<compile_context>
chip_gen: v7x
topology: tpu7x:2x2x1
jax: 0.10.0
libtpu: 0.0.40
codegen_flags: <defaults>
</compile_context>

<pallas_src>
import functools

import numpy as np

import jax
import jax.numpy as jnp
from jax.experimental import pallas as pl
from jax.experimental.pallas import tpu as pltpu


_VGG19_18_CFG = (
    ("conv1_1", 3, 64), ("conv1_2", 64, 64),
    ("conv2_1", 64, 128), ("conv2_2", 128, 128),
    ("conv3_1", 128, 256), ("conv3_2", 256, 256),
    ("conv3_3", 256, 256), ("conv3_4", 256, 256),
)


# --------------------------------------------------------------------------
# Host-side constant builders (tiny, computed once at trace time)
# --------------------------------------------------------------------------
def _halo(W):
    """Leading/trailing halo rows of a flattened buffer: >= W+1, multiple of 8."""
    return ((W + 1 + 7) // 8) * 8


def _pool_select_tl(H, W):
    """(Ho*Wo, H*W) one-hot compaction matrix: picks the 2x2-window max that the
    in-kernel shifted maxima leave at the top-left corner of each pooling window."""
    Ho, Wo = H // 2, W // 2
    S = np.zeros((Ho * Wo, H * W), np.float32)
    for yo in range(Ho):
        for xo in range(Wo):
            S[yo * Wo + xo, 2 * yo * W + 2 * xo] = 1.0
    return S


def _edge_masks(H, W):
    """(H*W, 2): col 0 = 1.0 where x != 0 (left tap valid), col 1 = 1.0 where x != W-1."""
    col = np.arange(H * W) % W
    return np.stack([(col != 0), (col != W - 1)], axis=1).astype(np.float32)


# --------------------------------------------------------------------------
# Fused VGG19[:18] kernel
# --------------------------------------------------------------------------
def _build_kernel(H, W):
    H1, W1 = H, W
    H2, W2 = H // 2, W // 2
    H3, W3 = H // 4, W // 4
    P1, P2, P3 = _halo(W1), _halo(W2), _halo(W3)  # aligned leading halo per stage

    def conv3x3_flat(src, w_ref, b_ref, mask_ref, Hs, Ws, pad):
        """3x3 SAME conv + bias + ReLU on a zero-haloed flattened activation.

        src      : VMEM ref (Hs*Ws + 2*pad, Cin) f32; image rows flattened row-major
                   starting at offset `pad`; halo entries are zero.
        w_ref    : (9, Cin, Cout) bf16, taps (dy, dx) row-major.
        b_ref    : (1, Cout) f32.
        mask_ref : (Hs*Ws, 2) bf16 edge-validity masks for the dx=-1 / dx=+1 taps.
        returns  : (Hs*Ws, Cout) f32 (post bias + ReLU).
        """
        HW = Hs * Ws
        Cout = w_ref.shape[-1]
        left_ok = mask_ref[:, 0:1]
        right_ok = mask_ref[:, 1:2]
        acc = jnp.broadcast_to(b_ref[...], (HW, Cout)).astype(jnp.float32)
        for dy in range(3):
            for dx in range(3):
                s = pad + (dy - 1) * Ws + (dx - 1)
                patch = src[s:s + HW, :].astype(jnp.bfloat16)   # (HW, Cin)
                if dx == 0:
                    patch = patch * left_ok
                elif dx == 2:
                    patch = patch * right_ok
                acc = acc + jnp.dot(patch, w_ref[dy * 3 + dx],
                                    preferred_element_type=jnp.float32)
        return jnp.maximum(acc, 0.0)

    def maxpool2x2(src, sel_ref, Hs, Ws, pad):
        """2x2 max-pool of the activation stored in `src`'s interior.

        4 shifted reads + 3 VPU maxima put every window max at its top-left flat
        position; one one-hot matmul (Ho*Wo, HW) compacts it.  Reads that run into
        the trailing halo hit zeros and those positions are never selected.
        """
        HW = Hs * Ws
        tl = src[pad:pad + HW, :]
        tr = src[pad + 1:pad + 1 + HW, :]
        bl = src[pad + Ws:pad + Ws + HW, :]
        br = src[pad + Ws + 1:pad + Ws + 1 + HW, :]
        m = jnp.maximum(jnp.maximum(tl, tr), jnp.maximum(bl, br)).astype(jnp.bfloat16)
        return jnp.dot(sel_ref[...], m, preferred_element_type=jnp.float32)

    def kernel(xcol_ref,
               w1, b1, w2, b2, w3, b3, w4, b4,
               w5, b5, w6, b6, w7, b7, w8, b8,
               m1, m2, m3, s1, s2,
               o_ref,
               buf1, buf2, buf3, buf4, buf5, buf6):
        # Zero only the halo regions; interiors are fully overwritten below.
        def zero_halo(buf, pad, hw):
            c = buf.shape[1]
            buf[0:pad, :] = jnp.zeros((pad, c), buf.dtype)
            tail = buf.shape[0] - pad - hw
            buf[pad + hw:, :] = jnp.zeros((tail, c), buf.dtype)

        zero_halo(buf1, P1, H1 * W1)
        zero_halo(buf2, P2, H2 * W2)
        zero_halo(buf3, P2, H2 * W2)
        zero_halo(buf4, P3, H3 * W3)
        zero_halo(buf5, P3, H3 * W3)
        zero_halo(buf6, P3, H3 * W3)

        # conv1_1: im2col, single (H*W, 27) x (27, 64) matmul
        a = jnp.dot(xcol_ref[0], w1[...], preferred_element_type=jnp.float32)
        a = jnp.maximum(a + b1[...], 0.0)
        buf1[P1:P1 + H1 * W1, :] = a

        # conv1_2 (written back over conv1_1's dead activation) + pool1
        a = conv3x3_flat(buf1, w2, b2, m1, H1, W1, P1)
        buf1[P1:P1 + H1 * W1, :] = a
        buf2[P2:P2 + H2 * W2, :] = maxpool2x2(buf1, s1, H1, W1, P1)

        # conv2_1
        a = conv3x3_flat(buf2, w3, b3, m2, H2, W2, P2)
        buf3[P2:P2 + H2 * W2, :] = a

        # conv2_2 (written back over conv2_1's dead activation) + pool2
        a = conv3x3_flat(buf3, w4, b4, m2, H2, W2, P2)
        buf3[P2:P2 + H2 * W2, :] = a
        buf4[P3:P3 + H3 * W3, :] = maxpool2x2(buf3, s2, H2, W2, P2)

        # conv3_1 .. conv3_3 (ping-pong buf5 / buf6)
        a = conv3x3_flat(buf4, w5, b5, m3, H3, W3, P3)
        buf5[P3:P3 + H3 * W3, :] = a
        a = conv3x3_flat(buf5, w6, b6, m3, H3, W3, P3)
        buf6[P3:P3 + H3 * W3, :] = a
        a = conv3x3_flat(buf6, w7, b7, m3, H3, W3, P3)
        buf5[P3:P3 + H3 * W3, :] = a

        # conv3_4 -> output (lane-dense: 256 channels on the last axis)
        a = conv3x3_flat(buf5, w8, b8, m3, H3, W3, P3)
        o_ref[0, :, :] = a.astype(o_ref.dtype)

    return kernel


# --------------------------------------------------------------------------
# Parameters
# --------------------------------------------------------------------------
def init_params(key):
    params = {}
    for name, cin, cout in _VGG19_18_CFG:
        key, kw, kb = jax.random.split(key, 3)
        fan_in = 9 * cin
        w = jax.random.normal(kw, (3, 3, cin, cout), jnp.float32) * jnp.sqrt(2.0 / fan_in)
        b = jax.random.normal(kb, (cout,), jnp.float32) * 0.01
        params[name] = (w, b)
    return params


# --------------------------------------------------------------------------
# Forward wrapper (NCHW in / NCHW out, like the PyTorch module)
# --------------------------------------------------------------------------
def pretrained_backbone_forward(params, x_nchw):
    x = x_nchw
    if x.shape[1] == 1:                            # matches `x.repeat((1, 3, 1, 1))`
        x = jnp.tile(x, (1, 3, 1, 1))
    N, C, H, W = x.shape
    assert C == 3 and H % 4 == 0 and W % 4 == 0, (N, C, H, W)
    x = jnp.transpose(x, (0, 2, 3, 1))             # NCHW -> NHWC

    H2, W2 = H // 2, W // 2
    H3, W3 = H // 4, W // 4

    # --- im2col for conv1_1: (N, H*W, 27), last-axis order (dy, dx, cin) ---
    xp = jnp.pad(x, ((0, 0), (1, 1), (1, 1), (0, 0)))
    cols = [xp[:, dy:dy + H, dx:dx + W, :] for dy in range(3) for dx in range(3)]
    xcol = jnp.concatenate(cols, axis=-1).reshape(N, H * W, 27).astype(jnp.bfloat16)

    # --- weights -> bf16 tap-major matrices, biases -> (1, Cout) f32 ---
    ws, bs = [], []
    for i, (name, cin, cout) in enumerate(_VGG19_18_CFG):
        w, b = params[name]
        if i == 0:
            ws.append(w.reshape(27, cout).astype(jnp.bfloat16))
        else:
            ws.append(w.reshape(9, cin, cout).astype(jnp.bfloat16))
        bs.append(b.reshape(1, cout).astype(jnp.float32))

    # --- constant edge masks / pool compaction matrices ---
    m1 = jnp.asarray(_edge_masks(H, W), jnp.bfloat16)
    m2 = jnp.asarray(_edge_masks(H2, W2), jnp.bfloat16)
    m3 = jnp.asarray(_edge_masks(H3, W3), jnp.bfloat16)
    s1 = jnp.asarray(_pool_select_tl(H, W), jnp.bfloat16)
    s2 = jnp.asarray(_pool_select_tl(H2, W2), jnp.bfloat16)

    kernel = _build_kernel(H, W)

    def const_spec(arr):
        nd = arr.ndim
        return pl.BlockSpec(arr.shape, lambda n, nd=nd: (0,) * nd)

    operands = [xcol]
    in_specs = [pl.BlockSpec((1, H * W, 27), lambda n: (n, 0, 0))]
    for w_, b_ in zip(ws, bs):
        operands += [w_, b_]
        in_specs += [const_spec(w_), const_spec(b_)]
    for extra in (m1, m2, m3, s1, s2):
        operands.append(extra)
        in_specs.append(const_spec(extra))

    # zero-haloed flattened activation buffers (f32), VMEM resident,
    # interior start aligned to 8 sublanes
    def hbuf(Hs, Ws, Cs):
        pad = _halo(Ws)
        return pltpu.VMEM((Hs * Ws + 2 * pad, Cs), jnp.float32)

    scratch = [hbuf(H, W, 64), hbuf(H2, W2, 64), hbuf(H2, W2, 128),
               hbuf(H3, W3, 128), hbuf(H3, W3, 256), hbuf(H3, W3, 256)]

    # advisory cost estimate for the XLA scheduler
    spat = [H * W, H * W, H2 * W2, H2 * W2, H3 * W3, H3 * W3, H3 * W3, H3 * W3]
    flops = int(sum(2 * 9 * cin * cout * s
                    for (_, cin, cout), s in zip(_VGG19_18_CFG, spat)) * N)
    bytes_accessed = int(xcol.size * 2 + sum(w_.size * 2 for w_ in ws)
                         + sum(b_.size * 4 for b_ in bs) + N * H3 * W3 * 256 * 4)
    cost = pl.CostEstimate(flops=flops, transcendentals=0, bytes_accessed=bytes_accessed)

    out = pl.pallas_call(
        kernel,
        out_shape=jax.ShapeDtypeStruct((N, H3 * W3, 256), jnp.float32),
        grid=(N,),
        in_specs=in_specs,
        out_specs=pl.BlockSpec((1, H3 * W3, 256), lambda n: (n, 0, 0)),
        scratch_shapes=scratch,
        compiler_params=pltpu.CompilerParams(
            dimension_semantics=("parallel",)),
        cost_estimate=cost,
    )(*operands)

    out = out.reshape(N, H3, W3, 256)
    return jnp.transpose(out, (0, 3, 1, 2))        # NHWC -> NCHW


# --------------------------------------------------------------------------
# Pure-JAX reference (same bf16-input / f32-accumulate numerics, for a sanity check)
# --------------------------------------------------------------------------
def _ref_forward(params, x_nchw):
    x = x_nchw
    if x.shape[1] == 1:
        x = jnp.tile(x, (1, 3, 1, 1))
    x = jnp.transpose(x, (0, 2, 3, 1))

    def conv(x, name):
        w, b = params[name]
        y = jax.lax.conv_general_dilated(
            x.astype(jnp.bfloat16), w.astype(jnp.bfloat16),
            window_strides=(1, 1), padding="SAME",
            dimension_numbers=("NHWC", "HWIO", "NHWC"),
            preferred_element_type=jnp.float32)
        return jnp.maximum(y + b[None, None, None, :].astype(jnp.float32), 0.0)

    def pool(x):
        N, H, W, C = x.shape
        return x.reshape(N, H // 2, 2, W // 2, 2, C).max(axis=(2, 4))

    x = conv(x, "conv1_1"); x = conv(x, "conv1_2"); x = pool(x)
    x = conv(x, "conv2_1"); x = conv(x, "conv2_2"); x = pool(x)
    for nm in ("conv3_1", "conv3_2", "conv3_3", "conv3_4"):
        x = conv(x, nm)
    return jnp.transpose(x, (0, 3, 1, 2))


# --------------------------------------------------------------------------
if __name__ == "__main__":
    key = jax.random.PRNGKey(0)
    kp, kx = jax.random.split(key)
    params = init_params(kp)

    # Single-channel input to also exercise the 1->3 channel repeat branch.
    x = jax.random.normal(kx, (2, 1, 16, 16), jnp.float32)

    fwd = jax.jit(functools.partial(pretrained_backbone_forward, params))
    out = jax.block_until_ready(fwd(x))

    assert out.shape == (2, 256, 4, 4), out.shape
    assert out.dtype == jnp.float32

    ref = jax.block_until_ready(jax.jit(functools.partial(_ref_forward, params))(x))
    max_ref = float(jnp.max(jnp.abs(ref)))
    max_err = float(jnp.max(jnp.abs(out - ref)))
    assert max_err <= 1e-2 * (1.0 + max_ref), (max_err, max_ref)

    print("KERNEL_OK")
</pallas_src>

<mosaic_0001>
module attributes {stable_mosaic.version = 11 : i64} {
  func.func @kernel(%arg0: i32, %arg1: memref<1x256x27xbf16, #tpu.memory_space<vmem>>, %arg2: memref<27x64xbf16, #tpu.memory_space<vmem>>, %arg3: memref<1x64xf32, #tpu.memory_space<vmem>>, %arg4: memref<9x64x64xbf16, #tpu.memory_space<vmem>>, %arg5: memref<1x64xf32, #tpu.memory_space<vmem>>, %arg6: memref<9x64x128xbf16, #tpu.memory_space<vmem>>, %arg7: memref<1x128xf32, #tpu.memory_space<vmem>>, %arg8: memref<9x128x128xbf16, #tpu.memory_space<vmem>>, %arg9: memref<1x128xf32, #tpu.memory_space<vmem>>, %arg10: memref<9x128x256xbf16, #tpu.memory_space<vmem>>, %arg11: memref<1x256xf32, #tpu.memory_space<vmem>>, %arg12: memref<9x256x256xbf16, #tpu.memory_space<vmem>>, %arg13: memref<1x256xf32, #tpu.memory_space<vmem>>, %arg14: memref<9x256x256xbf16, #tpu.memory_space<vmem>>, %arg15: memref<1x256xf32, #tpu.memory_space<vmem>>, %arg16: memref<9x256x256xbf16, #tpu.memory_space<vmem>>, %arg17: memref<1x256xf32, #tpu.memory_space<vmem>>, %arg18: memref<256x2xbf16, #tpu.memory_space<vmem>>, %arg19: memref<64x2xbf16, #tpu.memory_space<vmem>>, %arg20: memref<16x2xbf16, #tpu.memory_space<vmem>>, %arg21: memref<64x256xbf16, #tpu.memory_space<vmem>>, %arg22: memref<16x64xbf16, #tpu.memory_space<vmem>>, %arg23: memref<1x16x256xf32, #tpu.memory_space<vmem>>, %arg24: memref<304x64xf32, #tpu.memory_space<vmem>>, %arg25: memref<96x64xf32, #tpu.memory_space<vmem>>, %arg26: memref<96x128xf32, #tpu.memory_space<vmem>>, %arg27: memref<32x128xf32, #tpu.memory_space<vmem>>, %arg28: memref<32x256xf32, #tpu.memory_space<vmem>>, %arg29: memref<32x256xf32, #tpu.memory_space<vmem>>) attributes {dimension_semantics = [#tpu.dimension_semantics<parallel>], iteration_bounds = array<i64: 2>, scalar_prefetch = 0 : i64, scratch_operands = 6 : i64, tpu.core_type = #tpu.core_type<tc>, window_params = [{transform_indices = @transform_0, window_bounds = array<i64: 1, 256, 27>}, {pipeline_mode = #tpu.pipeline_mode<synchronous>, transform_indices = @transform_1, window_bounds = array<i64: 27, 64>}, {pipeline_mode = #tpu.pipeline_mode<synchronous>, transform_indices = @transform_2, window_bounds = array<i64: 1, 64>}, {pipeline_mode = #tpu.pipeline_mode<synchronous>, transform_indices = @transform_3, window_bounds = array<i64: 9, 64, 64>}, {pipeline_mode = #tpu.pipeline_mode<synchronous>, transform_indices = @transform_4, window_bounds = array<i64: 1, 64>}, {pipeline_mode = #tpu.pipeline_mode<synchronous>, transform_indices = @transform_5, window_bounds = array<i64: 9, 64, 128>}, {pipeline_mode = #tpu.pipeline_mode<synchronous>, transform_indices = @transform_6, window_bounds = array<i64: 1, 128>}, {pipeline_mode = #tpu.pipeline_mode<synchronous>, transform_indices = @transform_7, window_bounds = array<i64: 9, 128, 128>}, {pipeline_mode = #tpu.pipeline_mode<synchronous>, transform_indices = @transform_8, window_bounds = array<i64: 1, 128>}, {pipeline_mode = #tpu.pipeline_mode<synchronous>, transform_indices = @transform_9, window_bounds = array<i64: 9, 128, 256>}, {pipeline_mode = #tpu.pipeline_mode<synchronous>, transform_indices = @transform_10, window_bounds = array<i64: 1, 256>}, {pipeline_mode = #tpu.pipeline_mode<synchronous>, transform_indices = @transform_11, window_bounds = array<i64: 9, 256, 256>}, {pipeline_mode = #tpu.pipeline_mode<synchronous>, transform_indices = @transform_12, window_bounds = array<i64: 1, 256>}, {pipeline_mode = #tpu.pipeline_mode<synchronous>, transform_indices = @transform_13, window_bounds = array<i64: 9, 256, 256>}, {pipeline_mode = #tpu.pipeline_mode<synchronous>, transform_indices = @transform_14, window_bounds = array<i64: 1, 256>}, {pipeline_mode = #tpu.pipeline_mode<synchronous>, transform_indices = @transform_15, window_bounds = array<i64: 9, 256, 256>}, {pipeline_mode = #tpu.pipeline_mode<synchronous>, transform_indices = @transform_16, window_bounds = array<i64: 1, 256>}, {pipeline_mode = #tpu.pipeline_mode<synchronous>, transform_indices = @transform_17, window_bounds = array<i64: 256, 2>}, {pipeline_mode = #tpu.pipeline_mode<synchronous>, transform_indices = @transform_18, window_bounds = array<i64: 64, 2>}, {pipeline_mode = #tpu.pipeline_mode<synchronous>, transform_indices = @transform_19, window_bounds = array<i64: 16, 2>}, {pipeline_mode = #tpu.pipeline_mode<synchronous>, transform_indices = @transform_20, window_bounds = array<i64: 64, 256>}, {pipeline_mode = #tpu.pipeline_mode<synchronous>, transform_indices = @transform_21, window_bounds = array<i64: 16, 64>}, {transform_indices = @transform_22, window_bounds = array<i64: 1, 16, 256>}]} {
    %cst = arith.constant 0.000000e+00 : f32
    %0 = vector.broadcast %cst : f32 to vector<24x64xf32>
    %c0 = arith.constant 0 : index
    %c0_0 = arith.constant 0 : index
    %1 = vector.load %arg24[%c0, %c0_0] : memref<304x64xf32, #tpu.memory_space<vmem>>, vector<24x64xf32>
    tpu.vector_store %arg24[%c0, %c0_0], %0 {strides = array<i32>} : memref<304x64xf32, #tpu.memory_space<vmem>>, vector<24x64xf32>,
    %cst_1 = arith.constant 0.000000e+00 : f32
    %2 = vector.broadcast %cst_1 : f32 to vector<24x64xf32>
    %c280 = arith.constant 280 : index
    %c0_2 = arith.constant 0 : index
    %3 = vector.load %arg24[%c280, %c0_2] : memref<304x64xf32, #tpu.memory_space<vmem>>, vector<24x64xf32>
    tpu.vector_store %arg24[%c280, %c0_2], %2 {strides = array<i32>} : memref<304x64xf32, #tpu.memory_space<vmem>>, vector<24x64xf32>,
    %cst_3 = arith.constant 0.000000e+00 : f32
    %4 = vector.broadcast %cst_3 : f32 to vector<16x64xf32>
    %c0_4 = arith.constant 0 : index
    %c0_5 = arith.constant 0 : index
    %5 = vector.load %arg25[%c0_4, %c0_5] : memref<96x64xf32, #tpu.memory_space<vmem>>, vector<16x64xf32>
    tpu.vector_store %arg25[%c0_4, %c0_5], %4 {strides = array<i32>} : memref<96x64xf32, #tpu.memory_space<vmem>>, vector<16x64xf32>,
    %cst_6 = arith.constant 0.000000e+00 : f32
    %6 = vector.broadcast %cst_6 : f32 to vector<16x64xf32>
    %c80 = arith.constant 80 : index
    %c0_7 = arith.constant 0 : index
    %7 = vector.load %arg25[%c80, %c0_7] : memref<96x64xf32, #tpu.memory_space<vmem>>, vector<16x64xf32>
    tpu.vector_store %arg25[%c80, %c0_7], %6 {strides = array<i32>} : memref<96x64xf32, #tpu.memory_space<vmem>>, vector<16x64xf32>,
    %cst_8 = arith.constant 0.000000e+00 : f32
    %8 = vector.broadcast %cst_8 : f32 to vector<16x128xf32>
    %c0_9 = arith.constant 0 : index
    %c0_10 = arith.constant 0 : index
    %9 = vector.load %arg26[%c0_9, %c0_10] : memref<96x128xf32, #tpu.memory_space<vmem>>, vector<16x128xf32>
    tpu.vector_store %arg26[%c0_9, %c0_10], %8 {strides = array<i32>} : memref<96x128xf32, #tpu.memory_space<vmem>>, vector<16x128xf32>,
    %cst_11 = arith.constant 0.000000e+00 : f32
    %10 = vector.broadcast %cst_11 : f32 to vector<16x128xf32>
    %c80_12 = arith.constant 80 : index
    %c0_13 = arith.constant 0 : index
    %11 = vector.load %arg26[%c80_12, %c0_13] : memref<96x128xf32, #tpu.memory_space<vmem>>, vector<16x128xf32>
    tpu.vector_store %arg26[%c80_12, %c0_13], %10 {strides = array<i32>} : memref<96x128xf32, #tpu.memory_space<vmem>>, vector<16x128xf32>,
    %cst_14 = arith.constant 0.000000e+00 : f32
    %12 = vector.broadcast %cst_14 : f32 to vector<8x128xf32>
    %c0_15 = arith.constant 0 : index
    %c0_16 = arith.constant 0 : index
    %13 = vector.load %arg27[%c0_15, %c0_16] : memref<32x128xf32, #tpu.memory_space<vmem>>, vector<8x128xf32>
    tpu.vector_store %arg27[%c0_15, %c0_16], %12 {strides = array<i32>} : memref<32x128xf32, #tpu.memory_space<vmem>>, vector<8x128xf32>,
    %cst_17 = arith.constant 0.000000e+00 : f32
    %14 = vector.broadcast %cst_17 : f32 to vector<8x128xf32>
    %c24 = arith.constant 24 : index
    %c0_18 = arith.constant 0 : index
    %15 = vector.load %arg27[%c24, %c0_18] : memref<32x128xf32, #tpu.memory_space<vmem>>, vector<8x128xf32>
    tpu.vector_store %arg27[%c24, %c0_18], %14 {strides = array<i32>} : memref<32x128xf32, #tpu.memory_space<vmem>>, vector<8x128xf32>,
    %cst_19 = arith.constant 0.000000e+00 : f32
    %16 = vector.broadcast %cst_19 : f32 to vector<8x256xf32>
    %c0_20 = arith.constant 0 : index
    %c0_21 = arith.constant 0 : index
    %17 = vector.load %arg28[%c0_20, %c0_21] : memref<32x256xf32, #tpu.memory_space<vmem>>, vector<8x256xf32>
    tpu.vector_store %arg28[%c0_20, %c0_21], %16 {strides = array<i32>} : memref<32x256xf32, #tpu.memory_space<vmem>>, vector<8x256xf32>,
    %cst_22 = arith.constant 0.000000e+00 : f32
    %18 = vector.broadcast %cst_22 : f32 to vector<8x256xf32>
    %c24_23 = arith.constant 24 : index
    %c0_24 = arith.constant 0 : index
    %19 = vector.load %arg28[%c24_23, %c0_24] : memref<32x256xf32, #tpu.memory_space<vmem>>, vector<8x256xf32>
    tpu.vector_store %arg28[%c24_23, %c0_24], %18 {strides = array<i32>} : memref<32x256xf32, #tpu.memory_space<vmem>>, vector<8x256xf32>,
    %cst_25 = arith.constant 0.000000e+00 : f32
    %20 = vector.broadcast %cst_25 : f32 to vector<8x256xf32>
    %c0_26 = arith.constant 0 : index
    %c0_27 = arith.constant 0 : index
    %21 = vector.load %arg29[%c0_26, %c0_27] : memref<32x256xf32, #tpu.memory_space<vmem>>, vector<8x256xf32>
    tpu.vector_store %arg29[%c0_26, %c0_27], %20 {strides = array<i32>} : memref<32x256xf32, #tpu.memory_space<vmem>>, vector<8x256xf32>,
    %cst_28 = arith.constant 0.000000e+00 : f32
    %22 = vector.broadcast %cst_28 : f32 to vector<8x256xf32>
    %c24_29 = arith.constant 24 : index
    %c0_30 = arith.constant 0 : index
    %23 = vector.load %arg29[%c24_29, %c0_30] : memref<32x256xf32, #tpu.memory_space<vmem>>, vector<8x256xf32>
    tpu.vector_store %arg29[%c24_29, %c0_30], %22 {strides = array<i32>} : memref<32x256xf32, #tpu.memory_space<vmem>>, vector<8x256xf32>,
    %c0_31 = arith.constant 0 : index
    %c0_32 = arith.constant 0 : index
    %c0_33 = arith.constant 0 : index
    %24 = vector.load %arg1[%c0_31, %c0_32, %c0_33] : memref<1x256x27xbf16, #tpu.memory_space<vmem>>, vector<1x256x27xbf16>
    %25 = vector.shape_cast %24 : vector<1x256x27xbf16> to vector<256x27xbf16>
    %c0_34 = arith.constant 0 : index
    %c0_35 = arith.constant 0 : index
    %26 = vector.load %arg2[%c0_34, %c0_35] : memref<27x64xbf16, #tpu.memory_space<vmem>>, vector<27x64xbf16>
    %cst_36 = arith.constant dense<0.000000e+00> : vector<256x64xf32>
    %27 = tpu.matmul %25, %26, %cst_36 {dimension_numbers = #tpu.dot_dimension_numbers<[1], [0], [0], [1], [0, 0, 1, 1], [], []>} : vector<256x27xbf16>, vector<27x64xbf16>, vector<256x64xf32> -> vector<256x64xf32>
    %c0_37 = arith.constant 0 : index
    %c0_38 = arith.constant 0 : index
    %28 = vector.load %arg3[%c0_37, %c0_38] : memref<1x64xf32, #tpu.memory_space<vmem>>, vector<1x64xf32>
    %29 = vector.broadcast %28 : vector<1x64xf32> to vector<256x64xf32>
    %30 = arith.addf %27, %29 : vector<256x64xf32>
    %cst_39 = arith.constant 0.000000e+00 : f32
    %31 = vector.broadcast %cst_39 : f32 to vector<256x64xf32>
    %32 = arith.maximumf %30, %31 : vector<256x64xf32>
    %c24_40 = arith.constant 24 : index
    %c0_41 = arith.constant 0 : index
    %33 = vector.load %arg24[%c24_40, %c0_41] : memref<304x64xf32, #tpu.memory_space<vmem>>, vector<256x64xf32>
    tpu.vector_store %arg24[%c24_40, %c0_41], %32 {strides = array<i32>} : memref<304x64xf32, #tpu.memory_space<vmem>>, vector<256x64xf32>,
    %c0_42 = arith.constant 0 : index
    %c0_43 = arith.constant 0 : index
    %34 = vector.load %arg18[%c0_42, %c0_43] : memref<256x2xbf16, #tpu.memory_space<vmem>>, vector<256x1xbf16>
    %c0_44 = arith.constant 0 : index
    %c1 = arith.constant 1 : index
    %35 = vector.load %arg18[%c0_44, %c1] : memref<256x2xbf16, #tpu.memory_space<vmem>>, vector<256x1xbf16>
    %c0_45 = arith.constant 0 : index
    %c0_46 = arith.constant 0 : index
    %36 = vector.load %arg5[%c0_45, %c0_46] : memref<1x64xf32, #tpu.memory_space<vmem>>, vector<1x64xf32>
    %37 = vector.shape_cast %36 : vector<1x64xf32> to vector<1x64xf32>
    %38 = vector.broadcast %37 : vector<1x64xf32> to vector<256x64xf32>
    %c7 = arith.constant 7 : index
    %c0_47 = arith.constant 0 : index
    %39 = vector.load %arg24[%c7, %c0_47] : memref<304x64xf32, #tpu.memory_space<vmem>>, vector<256x64xf32>
    %40 = arith.truncf %39 : vector<256x64xf32> to vector<256x64xbf16>
    %41 = vector.broadcast %34 : vector<256x1xbf16> to vector<256x64xbf16>
    %42 = arith.mulf %40, %41 : vector<256x64xbf16>
    %c0_48 = arith.constant 0 : index
    %c0_49 = arith.constant 0 : index
    %c0_50 = arith.constant 0 : index
    %43 = vector.load %arg4[%c0_48, %c0_49, %c0_50] : memref<9x64x64xbf16, #tpu.memory_space<vmem>>, vector<1x64x64xbf16>
    %44 = vector.shape_cast %43 : vector<1x64x64xbf16> to vector<64x64xbf16>
    %cst_51 = arith.constant dense<0.000000e+00> : vector<256x64xf32>
    %45 = tpu.matmul %42, %44, %cst_51 {dimension_numbers = #tpu.dot_dimension_numbers<[1], [0], [0], [1], [0, 0, 1, 1], [], []>} : vector<256x64xbf16>, vector<64x64xbf16>, vector<256x64xf32> -> vector<256x64xf32>
    %46 = arith.addf %38, %45 : vector<256x64xf32>
    %c8 = arith.constant 8 : index
    %c0_52 = arith.constant 0 : index
    %47 = vector.load %arg24[%c8, %c0_52] : memref<304x64xf32, #tpu.memory_space<vmem>>, vector<256x64xf32>
    %48 = arith.truncf %47 : vector<256x64xf32> to vector<256x64xbf16>
    %c1_53 = arith.constant 1 : index
    %c0_54 = arith.constant 0 : index
    %c0_55 = arith.constant 0 : index
    %49 = vector.load %arg4[%c1_53, %c0_54, %c0_55] : memref<9x64x64xbf16, #tpu.memory_space<vmem>>, vector<1x64x64xbf16>
    %50 = vector.shape_cast %49 : vector<1x64x64xbf16> to vector<64x64xbf16>
    %cst_56 = arith.constant dense<0.000000e+00> : vector<256x64xf32>
    %51 = tpu.matmul %48, %50, %cst_56 {dimension_numbers = #tpu.dot_dimension_numbers<[1], [0], [0], [1], [0, 0, 1, 1], [], []>} : vector<256x64xbf16>, vector<64x64xbf16>, vector<256x64xf32> -> vector<256x64xf32>
    %52 = arith.addf %46, %51 : vector<256x64xf32>
    %c9 = arith.constant 9 : index
    %c0_57 = arith.constant 0 : index
    %53 = vector.load %arg24[%c9, %c0_57] : memref<304x64xf32, #tpu.memory_space<vmem>>, vector<256x64xf32>
    %54 = arith.truncf %53 : vector<256x64xf32> to vector<256x64xbf16>
    %55 = vector.broadcast %35 : vector<256x1xbf16> to vector<256x64xbf16>
    %56 = arith.mulf %54, %55 : vector<256x64xbf16>
    %c2 = arith.constant 2 : index
    %c0_58 = arith.constant 0 : index
    %c0_59 = arith.constant 0 : index
    %57 = vector.load %arg4[%c2, %c0_58, %c0_59] : memref<9x64x64xbf16, #tpu.memory_space<vmem>>, vector<1x64x64xbf16>
    %58 = vector.shape_cast %57 : vector<1x64x64xbf16> to vector<64x64xbf16>
    %cst_60 = arith.constant dense<0.000000e+00> : vector<256x64xf32>
    %59 = tpu.matmul %56, %58, %cst_60 {dimension_numbers = #tpu.dot_dimension_numbers<[1], [0], [0], [1], [0, 0, 1, 1], [], []>} : vector<256x64xbf16>, vector<64x64xbf16>, vector<256x64xf32> -> vector<256x64xf32>
    %60 = arith.addf %52, %59 : vector<256x64xf32>
    %c23 = arith.constant 23 : index
    %c0_61 = arith.constant 0 : index
    %61 = vector.load %arg24[%c23, %c0_61] : memref<304x64xf32, #tpu.memory_space<vmem>>, vector<256x64xf32>
    %62 = arith.truncf %61 : vector<256x64xf32> to vector<256x64xbf16>
    %63 = vector.broadcast %34 : vector<256x1xbf16> to vector<256x64xbf16>
    %64 = arith.mulf %62, %63 : vector<256x64xbf16>
    %c3 = arith.constant 3 : index
    %c0_62 = arith.constant 0 : index
    %c0_63 = arith.constant 0 : index
    %65 = vector.load %arg4[%c3, %c0_62, %c0_63] : memref<9x64x64xbf16, #tpu.memory_space<vmem>>, vector<1x64x64xbf16>
    %66 = vector.shape_cast %65 : vector<1x64x64xbf16> to vector<64x64xbf16>
    %cst_64 = arith.constant dense<0.000000e+00> : vector<256x64xf32>
    %67 = tpu.matmul %64, %66, %cst_64 {dimension_numbers = #tpu.dot_dimension_numbers<[1], [0], [0], [1], [0, 0, 1, 1], [], []>} : vector<256x64xbf16>, vector<64x64xbf16>, vector<256x64xf32> -> vector<256x64xf32>
    %68 = arith.addf %60, %67 : vector<256x64xf32>
    %c24_65 = arith.constant 24 : index
    %c0_66 = arith.constant 0 : index
    %69 = vector.load %arg24[%c24_65, %c0_66] : memref<304x64xf32, #tpu.memory_space<vmem>>, vector<256x64xf32>
    %70 = arith.truncf %69 : vector<256x64xf32> to vector<256x64xbf16>
    %c4 = arith.constant 4 : index
    %c0_67 = arith.constant 0 : index
    %c0_68 = arith.constant 0 : index
    %71 = vector.load %arg4[%c4, %c0_67, %c0_68] : memref<9x64x64xbf16, #tpu.memory_space<vmem>>, vector<1x64x64xbf16>
    %72 = vector.shape_cast %71 : vector<1x64x64xbf16> to vector<64x64xbf16>
    %cst_69 = arith.constant dense<0.000000e+00> : vector<256x64xf32>
    %73 = tpu.matmul %70, %72, %cst_69 {dimension_numbers = #tpu.dot_dimension_numbers<[1], [0], [0], [1], [0, 0, 1, 1], [], []>} : vector<256x64xbf16>, vector<64x64xbf16>, vector<256x64xf32> -> vector<256x64xf32>
    %74 = arith.addf %68, %73 : vector<256x64xf32>
    %c25 = arith.constant 25 : index
    %c0_70 = arith.constant 0 : index
    %75 = vector.load %arg24[%c25, %c0_70] : memref<304x64xf32, #tpu.memory_space<vmem>>, vector<256x64xf32>
    %76 = arith.truncf %75 : vector<256x64xf32> to vector<256x64xbf16>
    %77 = vector.broadcast %35 : vector<256x1xbf16> to vector<256x64xbf16>
    %78 = arith.mulf %76, %77 : vector<256x64xbf16>
    %c5 = arith.constant 5 : index
    %c0_71 = arith.constant 0 : index
    %c0_72 = arith.constant 0 : index
    %79 = vector.load %arg4[%c5, %c0_71, %c0_72] : memref<9x64x64xbf16, #tpu.memory_space<vmem>>, vector<1x64x64xbf16>
    %80 = vector.shape_cast %79 : vector<1x64x64xbf16> to vector<64x64xbf16>
    %cst_73 = arith.constant dense<0.000000e+00> : vector<256x64xf32>
    %81 = tpu.matmul %78, %80, %cst_73 {dimension_numbers = #tpu.dot_dimension_numbers<[1], [0], [0], [1], [0, 0, 1, 1], [], []>} : vector<256x64xbf16>, vector<64x64xbf16>, vector<256x64xf32> -> vector<256x64xf32>
    %82 = arith.addf %74, %81 : vector<256x64xf32>
    %c39 = arith.constant 39 : index
    %c0_74 = arith.constant 0 : index
    %83 = vector.load %arg24[%c39, %c0_74] : memref<304x64xf32, #tpu.memory_space<vmem>>, vector<256x64xf32>
    %84 = arith.truncf %83 : vector<256x64xf32> to vector<256x64xbf16>
    %85 = vector.broadcast %34 : vector<256x1xbf16> to vector<256x64xbf16>
    %86 = arith.mulf %84, %85 : vector<256x64xbf16>
    %c6 = arith.constant 6 : index
    %c0_75 = arith.constant 0 : index
    %c0_76 = arith.constant 0 : index
    %87 = vector.load %arg4[%c6, %c0_75, %c0_76] : memref<9x64x64xbf16, #tpu.memory_space<vmem>>, vector<1x64x64xbf16>
    %88 = vector.shape_cast %87 : vector<1x64x64xbf16> to vector<64x64xbf16>
    %cst_77 = arith.constant dense<0.000000e+00> : vector<256x64xf32>
    %89 = tpu.matmul %86, %88, %cst_77 {dimension_numbers = #tpu.dot_dimension_numbers<[1], [0], [0], [1], [0, 0, 1, 1], [], []>} : vector<256x64xbf16>, vector<64x64xbf16>, vector<256x64xf32> -> vector<256x64xf32>
    %90 = arith.addf %82, %89 : vector<256x64xf32>
    %c40 = arith.constant 40 : index
    %c0_78 = arith.constant 0 : index
    %91 = vector.load %arg24[%c40, %c0_78] : memref<304x64xf32, #tpu.memory_space<vmem>>, vector<256x64xf32>
    %92 = arith.truncf %91 : vector<256x64xf32> to vector<256x64xbf16>
    %c7_79 = arith.constant 7 : index
    %c0_80 = arith.constant 0 : index
    %c0_81 = arith.constant 0 : index
    %93 = vector.load %arg4[%c7_79, %c0_80, %c0_81] : memref<9x64x64xbf16, #tpu.memory_space<vmem>>, vector<1x64x64xbf16>
    %94 = vector.shape_cast %93 : vector<1x64x64xbf16> to vector<64x64xbf16>
    %cst_82 = arith.constant dense<0.000000e+00> : vector<256x64xf32>
    %95 = tpu.matmul %92, %94, %cst_82 {dimension_numbers = #tpu.dot_dimension_numbers<[1], [0], [0], [1], [0, 0, 1, 1], [], []>} : vector<256x64xbf16>, vector<64x64xbf16>, vector<256x64xf32> -> vector<256x64xf32>
    %96 = arith.addf %90, %95 : vector<256x64xf32>
    %c41 = arith.constant 41 : index
    %c0_83 = arith.constant 0 : index
    %97 = vector.load %arg24[%c41, %c0_83] : memref<304x64xf32, #tpu.memory_space<vmem>>, vector<256x64xf32>
    %98 = arith.truncf %97 : vector<256x64xf32> to vector<256x64xbf16>
    %99 = vector.broadcast %35 : vector<256x1xbf16> to vector<256x64xbf16>
    %100 = arith.mulf %98, %99 : vector<256x64xbf16>
    %c8_84 = arith.constant 8 : index
    %c0_85 = arith.constant 0 : index
    %c0_86 = arith.constant 0 : index
    %101 = vector.load %arg4[%c8_84, %c0_85, %c0_86] : memref<9x64x64xbf16, #tpu.memory_space<vmem>>, vector<1x64x64xbf16>
    %102 = vector.shape_cast %101 : vector<1x64x64xbf16> to vector<64x64xbf16>
    %cst_87 = arith.constant dense<0.000000e+00> : vector<256x64xf32>
    %103 = tpu.matmul %100, %102, %cst_87 {dimension_numbers = #tpu.dot_dimension_numbers<[1], [0], [0], [1], [0, 0, 1, 1], [], []>} : vector<256x64xbf16>, vector<64x64xbf16>, vector<256x64xf32> -> vector<256x64xf32>
    %104 = arith.addf %96, %103 : vector<256x64xf32>
    %cst_88 = arith.constant 0.000000e+00 : f32
    %105 = vector.broadcast %cst_88 : f32 to vector<256x64xf32>
    %106 = arith.maximumf %104, %105 : vector<256x64xf32>
    %c24_89 = arith.constant 24 : index
    %c0_90 = arith.constant 0 : index
    %107 = vector.load %arg24[%c24_89, %c0_90] : memref<304x64xf32, #tpu.memory_space<vmem>>, vector<256x64xf32>
    tpu.vector_store %arg24[%c24_89, %c0_90], %106 {strides = array<i32>} : memref<304x64xf32, #tpu.memory_space<vmem>>, vector<256x64xf32>,
    %c24_91 = arith.constant 24 : index
    %c0_92 = arith.constant 0 : index
    %108 = vector.load %arg24[%c24_91, %c0_92] : memref<304x64xf32, #tpu.memory_space<vmem>>, vector<256x64xf32>
    %c25_93 = arith.constant 25 : index
    %c0_94 = arith.constant 0 : index
    %109 = vector.load %arg24[%c25_93, %c0_94] : memref<304x64xf32, #tpu.memory_space<vmem>>, vector<256x64xf32>
    %c40_95 = arith.constant 40 : index
    %c0_96 = arith.constant 0 : index
    %110 = vector.load %arg24[%c40_95, %c0_96] : memref<304x64xf32, #tpu.memory_space<vmem>>, vector<256x64xf32>
    %c41_97 = arith.constant 41 : index
    %c0_98 = arith.constant 0 : index
    %111 = vector.load %arg24[%c41_97, %c0_98] : memref<304x64xf32, #tpu.memory_space<vmem>>, vector<256x64xf32>
    %112 = arith.maximumf %108, %109 : vector<256x64xf32>
    %113 = arith.maximumf %110, %111 : vector<256x64xf32>
    %114 = arith.maximumf %112, %113 : vector<256x64xf32>
    %115 = arith.truncf %114 : vector<256x64xf32> to vector<256x64xbf16>
    %c0_99 = arith.constant 0 : index
    %c0_100 = arith.constant 0 : index
    %116 = vector.load %arg21[%c0_99, %c0_100] : memref<64x256xbf16, #tpu.memory_space<vmem>>, vector<64x256xbf16>
    %cst_101 = arith.constant dense<0.000000e+00> : vector<64x64xf32>
    %117 = tpu.matmul %116, %115, %cst_101 {dimension_numbers = #tpu.dot_dimension_numbers<[1], [0], [0], [1], [0, 0, 1, 1], [], []>} : vector<64x256xbf16>, vector<256x64xbf16>, vector<64x64xf32> -> vector<64x64xf32>
    %c16 = arith.constant 16 : index
    %c0_102 = arith.constant 0 : index
    %118 = vector.load %arg25[%c16, %c0_102] : memref<96x64xf32, #tpu.memory_space<vmem>>, vector<64x64xf32>
    tpu.vector_store %arg25[%c16, %c0_102], %117 {strides = array<i32>} : memref<96x64xf32, #tpu.memory_space<vmem>>, vector<64x64xf32>,
    %c0_103 = arith.constant 0 : index
    %c0_104 = arith.constant 0 : index
    %119 = vector.load %arg19[%c0_103, %c0_104] : memref<64x2xbf16, #tpu.memory_space<vmem>>, vector<64x1xbf16>
    %c0_105 = arith.constant 0 : index
    %c1_106 = arith.constant 1 : index
    %120 = vector.load %arg19[%c0_105, %c1_106] : memref<64x2xbf16, #tpu.memory_space<vmem>>, vector<64x1xbf16>
    %c0_107 = arith.constant 0 : index
    %c0_108 = arith.constant 0 : index
    %121 = vector.load %arg7[%c0_107, %c0_108] : memref<1x128xf32, #tpu.memory_space<vmem>>, vector<1x128xf32>
    %122 = vector.shape_cast %121 : vector<1x128xf32> to vector<1x128xf32>
    %123 = vector.broadcast %122 : vector<1x128xf32> to vector<64x128xf32>
    %c7_109 = arith.constant 7 : index
    %c0_110 = arith.constant 0 : index
    %124 = vector.load %arg25[%c7_109, %c0_110] : memref<96x64xf32, #tpu.memory_space<vmem>>, vector<64x64xf32>
    %125 = arith.truncf %124 : vector<64x64xf32> to vector<64x64xbf16>
    %126 = vector.broadcast %119 : vector<64x1xbf16> to vector<64x64xbf16>
    %127 = arith.mulf %125, %126 : vector<64x64xbf16>
    %c0_111 = arith.constant 0 : index
    %c0_112 = arith.constant 0 : index
    %c0_113 = arith.constant 0 : index
    %128 = vector.load %arg6[%c0_111, %c0_112, %c0_113] : memref<9x64x128xbf16, #tpu.memory_space<vmem>>, vector<1x64x128xbf16>
    %129 = vector.shape_cast %128 : vector<1x64x128xbf16> to vector<64x128xbf16>
    %cst_114 = arith.constant dense<0.000000e+00> : vector<64x128xf32>
    %130 = tpu.matmul %127, %129, %cst_114 {dimension_numbers = #tpu.dot_dimension_numbers<[1], [0], [0], [1], [0, 0, 1, 1], [], []>} : vector<64x64xbf16>, vector<64x128xbf16>, vector<64x128xf32> -> vector<64x128xf32>
    %131 = arith.addf %123, %130 : vector<64x128xf32>
    %c8_115 = arith.constant 8 : index
    %c0_116 = arith.constant 0 : index
    %132 = vector.load %arg25[%c8_115, %c0_116] : memref<96x64xf32, #tpu.memory_space<vmem>>, vector<64x64xf32>
    %133 = arith.truncf %132 : vector<64x64xf32> to vector<64x64xbf16>
    %c1_117 = arith.constant 1 : index
    %c0_118 = arith.constant 0 : index
    %c0_119 = arith.constant 0 : index
    %134 = vector.load %arg6[%c1_117, %c0_118, %c0_119] : memref<9x64x128xbf16, #tpu.memory_space<vmem>>, vector<1x64x128xbf16>
    %135 = vector.shape_cast %134 : vector<1x64x128xbf16> to vector<64x128xbf16>
    %cst_120 = arith.constant dense<0.000000e+00> : vector<64x128xf32>
    %136 = tpu.matmul %133, %135, %cst_120 {dimension_numbers = #tpu.dot_dimension_numbers<[1], [0], [0], [1], [0, 0, 1, 1], [], []>} : vector<64x64xbf16>, vector<64x128xbf16>, vector<64x128xf32> -> vector<64x128xf32>
    %137 = arith.addf %131, %136 : vector<64x128xf32>
    %c9_121 = arith.constant 9 : index
    %c0_122 = arith.constant 0 : index
    %138 = vector.load %arg25[%c9_121, %c0_122] : memref<96x64xf32, #tpu.memory_space<vmem>>, vector<64x64xf32>
    %139 = arith.truncf %138 : vector<64x64xf32> to vector<64x64xbf16>
    %140 = vector.broadcast %120 : vector<64x1xbf16> to vector<64x64xbf16>
    %141 = arith.mulf %139, %140 : vector<64x64xbf16>
    %c2_123 = arith.constant 2 : index
    %c0_124 = arith.constant 0 : index
    %c0_125 = arith.constant 0 : index
    %142 = vector.load %arg6[%c2_123, %c0_124, %c0_125] : memref<9x64x128xbf16, #tpu.memory_space<vmem>>, vector<1x64x128xbf16>
    %143 = vector.shape_cast %142 : vector<1x64x128xbf16> to vector<64x128xbf16>
    %cst_126 = arith.constant dense<0.000000e+00> : vector<64x128xf32>
    %144 = tpu.matmul %141, %143, %cst_126 {dimension_numbers = #tpu.dot_dimension_numbers<[1], [0], [0], [1], [0, 0, 1, 1], [], []>} : vector<64x64xbf16>, vector<64x128xbf16>, vector<64x128xf32> -> vector<64x128xf32>
    %145 = arith.addf %137, %144 : vector<64x128xf32>
    %c15 = arith.constant 15 : index
    %c0_127 = arith.constant 0 : index
    %146 = vector.load %arg25[%c15, %c0_127] : memref<96x64xf32, #tpu.memory_space<vmem>>, vector<64x64xf32>
    %147 = arith.truncf %146 : vector<64x64xf32> to vector<64x64xbf16>
    %148 = vector.broadcast %119 : vector<64x1xbf16> to vector<64x64xbf16>
    %149 = arith.mulf %147, %148 : vector<64x64xbf16>
    %c3_128 = arith.constant 3 : index
    %c0_129 = arith.constant 0 : index
    %c0_130 = arith.constant 0 : index
    %150 = vector.load %arg6[%c3_128, %c0_129, %c0_130] : memref<9x64x128xbf16, #tpu.memory_space<vmem>>, vector<1x64x128xbf16>
    %151 = vector.shape_cast %150 : vector<1x64x128xbf16> to vector<64x128xbf16>
    %cst_131 = arith.constant dense<0.000000e+00> : vector<64x128xf32>
    %152 = tpu.matmul %149, %151, %cst_131 {dimension_numbers = #tpu.dot_dimension_numbers<[1], [0], [0], [1], [0, 0, 1, 1], [], []>} : vector<64x64xbf16>, vector<64x128xbf16>, vector<64x128xf32> -> vector<64x128xf32>
    %153 = arith.addf %145, %152 : vector<64x128xf32>
    %c16_132 = arith.constant 16 : index
    %c0_133 = arith.constant 0 : index
    %154 = vector.load %arg25[%c16_132, %c0_133] : memref<96x64xf32, #tpu.memory_space<vmem>>, vector<64x64xf32>
    %155 = arith.truncf %154 : vector<64x64xf32> to vector<64x64xbf16>
    %c4_134 = arith.constant 4 : index
    %c0_135 = arith.constant 0 : index
    %c0_136 = arith.constant 0 : index
    %156 = vector.load %arg6[%c4_134, %c0_135, %c0_136] : memref<9x64x128xbf16, #tpu.memory_space<vmem>>, vector<1x64x128xbf16>
    %157 = vector.shape_cast %156 : vector<1x64x128xbf16> to vector<64x128xbf16>
    %cst_137 = arith.constant dense<0.000000e+00> : vector<64x128xf32>
    %158 = tpu.matmul %155, %157, %cst_137 {dimension_numbers = #tpu.dot_dimension_numbers<[1], [0], [0], [1], [0, 0, 1, 1], [], []>} : vector<64x64xbf16>, vector<64x128xbf16>, vector<64x128xf32> -> vector<64x128xf32>
    %159 = arith.addf %153, %158 : vector<64x128xf32>
    %c17 = arith.constant 17 : index
    %c0_138 = arith.constant 0 : index
    %160 = vector.load %arg25[%c17, %c0_138] : memref<96x64xf32, #tpu.memory_space<vmem>>, vector<64x64xf32>
    %161 = arith.truncf %160 : vector<64x64xf32> to vector<64x64xbf16>
    %162 = vector.broadcast %120 : vector<64x1xbf16> to vector<64x64xbf16>
    %163 = arith.mulf %161, %162 : vector<64x64xbf16>
    %c5_139 = arith.constant 5 : index
    %c0_140 = arith.constant 0 : index
    %c0_141 = arith.constant 0 : index
    %164 = vector.load %arg6[%c5_139, %c0_140, %c0_141] : memref<9x64x128xbf16, #tpu.memory_space<vmem>>, vector<1x64x128xbf16>
    %165 = vector.shape_cast %164 : vector<1x64x128xbf16> to vector<64x128xbf16>
    %cst_142 = arith.constant dense<0.000000e+00> : vector<64x128xf32>
    %166 = tpu.matmul %163, %165, %cst_142 {dimension_numbers = #tpu.dot_dimension_numbers<[1], [0], [0], [1], [0, 0, 1, 1], [], []>} : vector<64x64xbf16>, vector<64x128xbf16>, vector<64x128xf32> -> vector<64x128xf32>
    %167 = arith.addf %159, %166 : vector<64x128xf32>
    %c23_143 = arith.constant 23 : index
    %c0_144 = arith.constant 0 : index
    %168 = vector.load %arg25[%c23_143, %c0_144] : memref<96x64xf32, #tpu.memory_space<vmem>>, vector<64x64xf32>
    %169 = arith.truncf %168 : vector<64x64xf32> to vector<64x64xbf16>
    %170 = vector.broadcast %119 : vector<64x1xbf16> to vector<64x64xbf16>
    %171 = arith.mulf %169, %170 : vector<64x64xbf16>
    %c6_145 = arith.constant 6 : index
    %c0_146 = arith.constant 0 : index
    %c0_147 = arith.constant 0 : index
    %172 = vector.load %arg6[%c6_145, %c0_146, %c0_147] : memref<9x64x128xbf16, #tpu.memory_space<vmem>>, vector<1x64x128xbf16>
    %173 = vector.shape_cast %172 : vector<1x64x128xbf16> to vector<64x128xbf16>
    %cst_148 = arith.constant dense<0.000000e+00> : vector<64x128xf32>
    %174 = tpu.matmul %171, %173, %cst_148 {dimension_numbers = #tpu.dot_dimension_numbers<[1], [0], [0], [1], [0, 0, 1, 1], [], []>} : vector<64x64xbf16>, vector<64x128xbf16>, vector<64x128xf32> -> vector<64x128xf32>
    %175 = arith.addf %167, %174 : vector<64x128xf32>
    %c24_149 = arith.constant 24 : index
    %c0_150 = arith.constant 0 : index
    %176 = vector.load %arg25[%c24_149, %c0_150] : memref<96x64xf32, #tpu.memory_space<vmem>>, vector<64x64xf32>
    %177 = arith.truncf %176 : vector<64x64xf32> to vector<64x64xbf16>
    %c7_151 = arith.constant 7 : index
    %c0_152 = arith.constant 0 : index
    %c0_153 = arith.constant 0 : index
    %178 = vector.load %arg6[%c7_151, %c0_152, %c0_153] : memref<9x64x128xbf16, #tpu.memory_space<vmem>>, vector<1x64x128xbf16>
    %179 = vector.shape_cast %178 : vector<1x64x128xbf16> to vector<64x128xbf16>
    %cst_154 = arith.constant dense<0.000000e+00> : vector<64x128xf32>
    %180 = tpu.matmul %177, %179, %cst_154 {dimension_numbers = #tpu.dot_dimension_numbers<[1], [0], [0], [1], [0, 0, 1, 1], [], []>} : vector<64x64xbf16>, vector<64x128xbf16>, vector<64x128xf32> -> vector<64x128xf32>
    %181 = arith.addf %175, %180 : vector<64x128xf32>
    %c25_155 = arith.constant 25 : index
    %c0_156 = arith.constant 0 : index
    %182 = vector.load %arg25[%c25_155, %c0_156] : memref<96x64xf32, #tpu.memory_space<vmem>>, vector<64x64xf32>
    %183 = arith.truncf %182 : vector<64x64xf32> to vector<64x64xbf16>
    %184 = vector.broadcast %120 : vector<64x1xbf16> to vector<64x64xbf16>
    %185 = arith.mulf %183, %184 : vector<64x64xbf16>
    %c8_157 = arith.constant 8 : index
    %c0_158 = arith.constant 0 : index
    %c0_159 = arith.constant 0 : index
    %186 = vector.load %arg6[%c8_157, %c0_158, %c0_159] : memref<9x64x128xbf16, #tpu.memory_space<vmem>>, vector<1x64x128xbf16>
    %187 = vector.shape_cast %186 : vector<1x64x128xbf16> to vector<64x128xbf16>
    %cst_160 = arith.constant dense<0.000000e+00> : vector<64x128xf32>
    %188 = tpu.matmul %185, %187, %cst_160 {dimension_numbers = #tpu.dot_dimension_numbers<[1], [0], [0], [1], [0, 0, 1, 1], [], []>} : vector<64x64xbf16>, vector<64x128xbf16>, vector<64x128xf32> -> vector<64x128xf32>
    %189 = arith.addf %181, %188 : vector<64x128xf32>
    %cst_161 = arith.constant 0.000000e+00 : f32
    %190 = vector.broadcast %cst_161 : f32 to vector<64x128xf32>
    %191 = arith.maximumf %189, %190 : vector<64x128xf32>
    %c16_162 = arith.constant 16 : index
    %c0_163 = arith.constant 0 : index
    %192 = vector.load %arg26[%c16_162, %c0_163] : memref<96x128xf32, #tpu.memory_space<vmem>>, vector<64x128xf32>
    tpu.vector_store %arg26[%c16_162, %c0_163], %191 {strides = array<i32>} : memref<96x128xf32, #tpu.memory_space<vmem>>, vector<64x128xf32>,
    %c0_164 = arith.constant 0 : index
    %c0_165 = arith.constant 0 : index
    %193 = vector.load %arg19[%c0_164, %c0_165] : memref<64x2xbf16, #tpu.memory_space<vmem>>, vector<64x1xbf16>
    %c0_166 = arith.constant 0 : index
    %c1_167 = arith.constant 1 : index
    %194 = vector.load %arg19[%c0_166, %c1_167] : memref<64x2xbf16, #tpu.memory_space<vmem>>, vector<64x1xbf16>
    %c0_168 = arith.constant 0 : index
    %c0_169 = arith.constant 0 : index
    %195 = vector.load %arg9[%c0_168, %c0_169] : memref<1x128xf32, #tpu.memory_space<vmem>>, vector<1x128xf32>
    %196 = vector.shape_cast %195 : vector<1x128xf32> to vector<1x128xf32>
    %197 = vector.broadcast %196 : vector<1x128xf32> to vector<64x128xf32>
    %c7_170 = arith.constant 7 : index
    %c0_171 = arith.constant 0 : index
    %198 = vector.load %arg26[%c7_170, %c0_171] : memref<96x128xf32, #tpu.memory_space<vmem>>, vector<64x128xf32>
    %199 = arith.truncf %198 : vector<64x128xf32> to vector<64x128xbf16>
    %200 = vector.broadcast %193 : vector<64x1xbf16> to vector<64x128xbf16>
    %201 = arith.mulf %199, %200 : vector<64x128xbf16>
    %c0_172 = arith.constant 0 : index
    %c0_173 = arith.constant 0 : index
    %c0_174 = arith.constant 0 : index
    %202 = vector.load %arg8[%c0_172, %c0_173, %c0_174] : memref<9x128x128xbf16, #tpu.memory_space<vmem>>, vector<1x128x128xbf16>
    %203 = vector.shape_cast %202 : vector<1x128x128xbf16> to vector<128x128xbf16>
    %cst_175 = arith.constant dense<0.000000e+00> : vector<64x128xf32>
    %204 = tpu.matmul %201, %203, %cst_175 {dimension_numbers = #tpu.dot_dimension_numbers<[1], [0], [0], [1], [0, 0, 1, 1], [], []>} : vector<64x128xbf16>, vector<128x128xbf16>, vector<64x128xf32> -> vector<64x128xf32>
    %205 = arith.addf %197, %204 : vector<64x128xf32>
    %c8_176 = arith.constant 8 : index
    %c0_177 = arith.constant 0 : index
    %206 = vector.load %arg26[%c8_176, %c0_177] : memref<96x128xf32, #tpu.memory_space<vmem>>, vector<64x128xf32>
    %207 = arith.truncf %206 : vector<64x128xf32> to vector<64x128xbf16>
    %c1_178 = arith.constant 1 : index
    %c0_179 = arith.constant 0 : index
    %c0_180 = arith.constant 0 : index
    %208 = vector.load %arg8[%c1_178, %c0_179, %c0_180] : memref<9x128x128xbf16, #tpu.memory_space<vmem>>, vector<1x128x128xbf16>
    %209 = vector.shape_cast %208 : vector<1x128x128xbf16> to vector<128x128xbf16>
    %cst_181 = arith.constant dense<0.000000e+00> : vector<64x128xf32>
    %210 = tpu.matmul %207, %209, %cst_181 {dimension_numbers = #tpu.dot_dimension_numbers<[1], [0], [0], [1], [0, 0, 1, 1], [], []>} : vector<64x128xbf16>, vector<128x128xbf16>, vector<64x128xf32> -> vector<64x128xf32>
    %211 = arith.addf %205, %210 : vector<64x128xf32>
    %c9_182 = arith.constant 9 : index
    %c0_183 = arith.constant 0 : index
    %212 = vector.load %arg26[%c9_182, %c0_183] : memref<96x128xf32, #tpu.memory_space<vmem>>, vector<64x128xf32>
    %213 = arith.truncf %212 : vector<64x128xf32> to vector<64x128xbf16>
    %214 = vector.broadcast %194 : vector<64x1xbf16> to vector<64x128xbf16>
    %215 = arith.mulf %213, %214 : vector<64x128xbf16>
    %c2_184 = arith.constant 2 : index
    %c0_185 = arith.constant 0 : index
    %c0_186 = arith.constant 0 : index
    %216 = vector.load %arg8[%c2_184, %c0_185, %c0_186] : memref<9x128x128xbf16, #tpu.memory_space<vmem>>, vector<1x128x128xbf16>
    %217 = vector.shape_cast %216 : vector<1x128x128xbf16> to vector<128x128xbf16>
    %cst_187 = arith.constant dense<0.000000e+00> : vector<64x128xf32>
    %218 = tpu.matmul %215, %217, %cst_187 {dimension_numbers = #tpu.dot_dimension_numbers<[1], [0], [0], [1], [0, 0, 1, 1], [], []>} : vector<64x128xbf16>, vector<128x128xbf16>, vector<64x128xf32> -> vector<64x128xf32>
    %219 = arith.addf %211, %218 : vector<64x128xf32>
    %c15_188 = arith.constant 15 : index
    %c0_189 = arith.constant 0 : index
    %220 = vector.load %arg26[%c15_188, %c0_189] : memref<96x128xf32, #tpu.memory_space<vmem>>, vector<64x128xf32>
    %221 = arith.truncf %220 : vector<64x128xf32> to vector<64x128xbf16>
    %222 = vector.broadcast %193 : vector<64x1xbf16> to vector<64x128xbf16>
    %223 = arith.mulf %221, %222 : vector<64x128xbf16>
    %c3_190 = arith.constant 3 : index
    %c0_191 = arith.constant 0 : index
    %c0_192 = arith.constant 0 : index
    %224 = vector.load %arg8[%c3_190, %c0_191, %c0_192] : memref<9x128x128xbf16, #tpu.memory_space<vmem>>, vector<1x128x128xbf16>
    %225 = vector.shape_cast %224 : vector<1x128x128xbf16> to vector<128x128xbf16>
    %cst_193 = arith.constant dense<0.000000e+00> : vector<64x128xf32>
    %226 = tpu.matmul %223, %225, %cst_193 {dimension_numbers = #tpu.dot_dimension_numbers<[1], [0], [0], [1], [0, 0, 1, 1], [], []>} : vector<64x128xbf16>, vector<128x128xbf16>, vector<64x128xf32> -> vector<64x128xf32>
    %227 = arith.addf %219, %226 : vector<64x128xf32>
    %c16_194 = arith.constant 16 : index
    %c0_195 = arith.constant 0 : index
    %228 = vector.load %arg26[%c16_194, %c0_195] : memref<96x128xf32, #tpu.memory_space<vmem>>, vector<64x128xf32>
    %229 = arith.truncf %228 : vector<64x128xf32> to vector<64x128xbf16>
    %c4_196 = arith.constant 4 : index
    %c0_197 = arith.constant 0 : index
    %c0_198 = arith.constant 0 : index
    %230 = vector.load %arg8[%c4_196, %c0_197, %c0_198] : memref<9x128x128xbf16, #tpu.memory_space<vmem>>, vector<1x128x128xbf16>
    %231 = vector.shape_cast %230 : vector<1x128x128xbf16> to vector<128x128xbf16>
    %cst_199 = arith.constant dense<0.000000e+00> : vector<64x128xf32>
    %232 = tpu.matmul %229, %231, %cst_199 {dimension_numbers = #tpu.dot_dimension_numbers<[1], [0], [0], [1], [0, 0, 1, 1], [], []>} : vector<64x128xbf16>, vector<128x128xbf16>, vector<64x128xf32> -> vector<64x128xf32>
    %233 = arith.addf %227, %232 : vector<64x128xf32>
    %c17_200 = arith.constant 17 : index
    %c0_201 = arith.constant 0 : index
    %234 = vector.load %arg26[%c17_200, %c0_201] : memref<96x128xf32, #tpu.memory_space<vmem>>, vector<64x128xf32>
    %235 = arith.truncf %234 : vector<64x128xf32> to vector<64x128xbf16>
    %236 = vector.broadcast %194 : vector<64x1xbf16> to vector<64x128xbf16>
    %237 = arith.mulf %235, %236 : vector<64x128xbf16>
    %c5_202 = arith.constant 5 : index
    %c0_203 = arith.constant 0 : index
    %c0_204 = arith.constant 0 : index
    %238 = vector.load %arg8[%c5_202, %c0_203, %c0_204] : memref<9x128x128xbf16, #tpu.memory_space<vmem>>, vector<1x128x128xbf16>
    %239 = vector.shape_cast %238 : vector<1x128x128xbf16> to vector<128x128xbf16>
    %cst_205 = arith.constant dense<0.000000e+00> : vector<64x128xf32>
    %240 = tpu.matmul %237, %239, %cst_205 {dimension_numbers = #tpu.dot_dimension_numbers<[1], [0], [0], [1], [0, 0, 1, 1], [], []>} : vector<64x128xbf16>, vector<128x128xbf16>, vector<64x128xf32> -> vector<64x128xf32>
    %241 = arith.addf %233, %240 : vector<64x128xf32>
    %c23_206 = arith.constant 23 : index
    %c0_207 = arith.constant 0 : index
    %242 = vector.load %arg26[%c23_206, %c0_207] : memref<96x128xf32, #tpu.memory_space<vmem>>, vector<64x128xf32>
    %243 = arith.truncf %242 : vector<64x128xf32> to vector<64x128xbf16>
    %244 = vector.broadcast %193 : vector<64x1xbf16> to vector<64x128xbf16>
    %245 = arith.mulf %243, %244 : vector<64x128xbf16>
    %c6_208 = arith.constant 6 : index
    %c0_209 = arith.constant 0 : index
    %c0_210 = arith.constant 0 : index
    %246 = vector.load %arg8[%c6_208, %c0_209, %c0_210] : memref<9x128x128xbf16, #tpu.memory_space<vmem>>, vector<1x128x128xbf16>
    %247 = vector.shape_cast %246 : vector<1x128x128xbf16> to vector<128x128xbf16>
    %cst_211 = arith.constant dense<0.000000e+00> : vector<64x128xf32>
    %248 = tpu.matmul %245, %247, %cst_211 {dimension_numbers = #tpu.dot_dimension_numbers<[1], [0], [0], [1], [0, 0, 1, 1], [], []>} : vector<64x128xbf16>, vector<128x128xbf16>, vector<64x128xf32> -> vector<64x128xf32>
    %249 = arith.addf %241, %248 : vector<64x128xf32>
    %c24_212 = arith.constant 24 : index
    %c0_213 = arith.constant 0 : index
    %250 = vector.load %arg26[%c24_212, %c0_213] : memref<96x128xf32, #tpu.memory_space<vmem>>, vector<64x128xf32>
    %251 = arith.truncf %250 : vector<64x128xf32> to vector<64x128xbf16>
    %c7_214 = arith.constant 7 : index
    %c0_215 = arith.constant 0 : index
    %c0_216 = arith.constant 0 : index
    %252 = vector.load %arg8[%c7_214, %c0_215, %c0_216] : memref<9x128x128xbf16, #tpu.memory_space<vmem>>, vector<1x128x128xbf16>
    %253 = vector.shape_cast %252 : vector<1x128x128xbf16> to vector<128x128xbf16>
    %cst_217 = arith.constant dense<0.000000e+00> : vector<64x128xf32>
    %254 = tpu.matmul %251, %253, %cst_217 {dimension_numbers = #tpu.dot_dimension_numbers<[1], [0], [0], [1], [0, 0, 1, 1], [], []>} : vector<64x128xbf16>, vector<128x128xbf16>, vector<64x128xf32> -> vector<64x128xf32>
    %255 = arith.addf %249, %254 : vector<64x128xf32>
    %c25_218 = arith.constant 25 : index
    %c0_219 = arith.constant 0 : index
    %256 = vector.load %arg26[%c25_218, %c0_219] : memref<96x128xf32, #tpu.memory_space<vmem>>, vector<64x128xf32>
    %257 = arith.truncf %256 : vector<64x128xf32> to vector<64x128xbf16>
    %258 = vector.broadcast %194 : vector<64x1xbf16> to vector<64x128xbf16>
    %259 = arith.mulf %257, %258 : vector<64x128xbf16>
    %c8_220 = arith.constant 8 : index
    %c0_221 = arith.constant 0 : index
    %c0_222 = arith.constant 0 : index
    %260 = vector.load %arg8[%c8_220, %c0_221, %c0_222] : memref<9x128x128xbf16, #tpu.memory_space<vmem>>, vector<1x128x128xbf16>
    %261 = vector.shape_cast %260 : vector<1x128x128xbf16> to vector<128x128xbf16>
    %cst_223 = arith.constant dense<0.000000e+00> : vector<64x128xf32>
    %262 = tpu.matmul %259, %261, %cst_223 {dimension_numbers = #tpu.dot_dimension_numbers<[1], [0], [0], [1], [0, 0, 1, 1], [], []>} : vector<64x128xbf16>, vector<128x128xbf16>, vector<64x128xf32> -> vector<64x128xf32>
    %263 = arith.addf %255, %262 : vector<64x128xf32>
    %cst_224 = arith.constant 0.000000e+00 : f32
    %264 = vector.broadcast %cst_224 : f32 to vector<64x128xf32>
    %265 = arith.maximumf %263, %264 : vector<64x128xf32>
    %c16_225 = arith.constant 16 : index
    %c0_226 = arith.constant 0 : index
    %266 = vector.load %arg26[%c16_225, %c0_226] : memref<96x128xf32, #tpu.memory_space<vmem>>, vector<64x128xf32>
    tpu.vector_store %arg26[%c16_225, %c0_226], %265 {strides = array<i32>} : memref<96x128xf32, #tpu.memory_space<vmem>>, vector<64x128xf32>,
    %c16_227 = arith.constant 16 : index
    %c0_228 = arith.constant 0 : index
    %267 = vector.load %arg26[%c16_227, %c0_228] : memref<96x128xf32, #tpu.memory_space<vmem>>, vector<64x128xf32>
    %c17_229 = arith.constant 17 : index
    %c0_230 = arith.constant 0 : index
    %268 = vector.load %arg26[%c17_229, %c0_230] : memref<96x128xf32, #tpu.memory_space<vmem>>, vector<64x128xf32>
    %c24_231 = arith.constant 24 : index
    %c0_232 = arith.constant 0 : index
    %269 = vector.load %arg26[%c24_231, %c0_232] : memref<96x128xf32, #tpu.memory_space<vmem>>, vector<64x128xf32>
    %c25_233 = arith.constant 25 : index
    %c0_234 = arith.constant 0 : index
    %270 = vector.load %arg26[%c25_233, %c0_234] : memref<96x128xf32, #tpu.memory_space<vmem>>, vector<64x128xf32>
    %271 = arith.maximumf %267, %268 : vector<64x128xf32>
    %272 = arith.maximumf %269, %270 : vector<64x128xf32>
    %273 = arith.maximumf %271, %272 : vector<64x128xf32>
    %274 = arith.truncf %273 : vector<64x128xf32> to vector<64x128xbf16>
    %c0_235 = arith.constant 0 : index
    %c0_236 = arith.constant 0 : index
    %275 = vector.load %arg22[%c0_235, %c0_236] : memref<16x64xbf16, #tpu.memory_space<vmem>>, vector<16x64xbf16>
    %cst_237 = arith.constant dense<0.000000e+00> : vector<16x128xf32>
    %276 = tpu.matmul %275, %274, %cst_237 {dimension_numbers = #tpu.dot_dimension_numbers<[1], [0], [0], [1], [0, 0, 1, 1], [], []>} : vector<16x64xbf16>, vector<64x128xbf16>, vector<16x128xf32> -> vector<16x128xf32>
    %c8_238 = arith.constant 8 : index
    %c0_239 = arith.constant 0 : index
    %277 = vector.load %arg27[%c8_238, %c0_239] : memref<32x128xf32, #tpu.memory_space<vmem>>, vector<16x128xf32>
    tpu.vector_store %arg27[%c8_238, %c0_239], %276 {strides = array<i32>} : memref<32x128xf32, #tpu.memory_space<vmem>>, vector<16x128xf32>,
    %c0_240 = arith.constant 0 : index
    %c0_241 = arith.constant 0 : index
    %278 = vector.load %arg20[%c0_240, %c0_241] : memref<16x2xbf16, #tpu.memory_space<vmem>>, vector<16x1xbf16>
    %c0_242 = arith.constant 0 : index
    %c1_243 = arith.constant 1 : index
    %279 = vector.load %arg20[%c0_242, %c1_243] : memref<16x2xbf16, #tpu.memory_space<vmem>>, vector<16x1xbf16>
    %c0_244 = arith.constant 0 : index
    %c0_245 = arith.constant 0 : index
    %280 = vector.load %arg11[%c0_244, %c0_245] : memref<1x256xf32, #tpu.memory_space<vmem>>, vector<1x256xf32>
    %281 = vector.shape_cast %280 : vector<1x256xf32> to vector<1x256xf32>
    %282 = vector.broadcast %281 : vector<1x256xf32> to vector<16x256xf32>
    %c3_246 = arith.constant 3 : index
    %c0_247 = arith.constant 0 : index
    %283 = vector.load %arg27[%c3_246, %c0_247] : memref<32x128xf32, #tpu.memory_space<vmem>>, vector<16x128xf32>
    %284 = arith.truncf %283 : vector<16x128xf32> to vector<16x128xbf16>
    %285 = vector.broadcast %278 : vector<16x1xbf16> to vector<16x128xbf16>
    %286 = arith.mulf %284, %285 : vector<16x128xbf16>
    %c0_248 = arith.constant 0 : index
    %c0_249 = arith.constant 0 : index
    %c0_250 = arith.constant 0 : index
    %287 = vector.load %arg10[%c0_248, %c0_249, %c0_250] : memref<9x128x256xbf16, #tpu.memory_space<vmem>>, vector<1x128x256xbf16>
    %288 = vector.shape_cast %287 : vector<1x128x256xbf16> to vector<128x256xbf16>
    %cst_251 = arith.constant dense<0.000000e+00> : vector<16x256xf32>
    %289 = tpu.matmul %286, %288, %cst_251 {dimension_numbers = #tpu.dot_dimension_numbers<[1], [0], [0], [1], [0, 0, 1, 1], [], []>} : vector<16x128xbf16>, vector<128x256xbf16>, vector<16x256xf32> -> vector<16x256xf32>
    %290 = arith.addf %282, %289 : vector<16x256xf32>
    %c4_252 = arith.constant 4 : index
    %c0_253 = arith.constant 0 : index
    %291 = vector.load %arg27[%c4_252, %c0_253] : memref<32x128xf32, #tpu.memory_space<vmem>>, vector<16x128xf32>
    %292 = arith.truncf %291 : vector<16x128xf32> to vector<16x128xbf16>
    %c1_254 = arith.constant 1 : index
    %c0_255 = arith.constant 0 : index
    %c0_256 = arith.constant 0 : index
    %293 = vector.load %arg10[%c1_254, %c0_255, %c0_256] : memref<9x128x256xbf16, #tpu.memory_space<vmem>>, vector<1x128x256xbf16>
    %294 = vector.shape_cast %293 : vector<1x128x256xbf16> to vector<128x256xbf16>
    %cst_257 = arith.constant dense<0.000000e+00> : vector<16x256xf32>
    %295 = tpu.matmul %292, %294, %cst_257 {dimension_numbers = #tpu.dot_dimension_numbers<[1], [0], [0], [1], [0, 0, 1, 1], [], []>} : vector<16x128xbf16>, vector<128x256xbf16>, vector<16x256xf32> -> vector<16x256xf32>
    %296 = arith.addf %290, %295 : vector<16x256xf32>
    %c5_258 = arith.constant 5 : index
    %c0_259 = arith.constant 0 : index
    %297 = vector.load %arg27[%c5_258, %c0_259] : memref<32x128xf32, #tpu.memory_space<vmem>>, vector<16x128xf32>
    %298 = arith.truncf %297 : vector<16x128xf32> to vector<16x128xbf16>
    %299 = vector.broadcast %279 : vector<16x1xbf16> to vector<16x128xbf16>
    %300 = arith.mulf %298, %299 : vector<16x128xbf16>
    %c2_260 = arith.constant 2 : index
    %c0_261 = arith.constant 0 : index
    %c0_262 = arith.constant 0 : index
    %301 = vector.load %arg10[%c2_260, %c0_261, %c0_262] : memref<9x128x256xbf16, #tpu.memory_space<vmem>>, vector<1x128x256xbf16>
    %302 = vector.shape_cast %301 : vector<1x128x256xbf16> to vector<128x256xbf16>
    %cst_263 = arith.constant dense<0.000000e+00> : vector<16x256xf32>
    %303 = tpu.matmul %300, %302, %cst_263 {dimension_numbers = #tpu.dot_dimension_numbers<[1], [0], [0], [1], [0, 0, 1, 1], [], []>} : vector<16x128xbf16>, vector<128x256xbf16>, vector<16x256xf32> -> vector<16x256xf32>
    %304 = arith.addf %296, %303 : vector<16x256xf32>
    %c7_264 = arith.constant 7 : index
    %c0_265 = arith.constant 0 : index
    %305 = vector.load %arg27[%c7_264, %c0_265] : memref<32x128xf32, #tpu.memory_space<vmem>>, vector<16x128xf32>
    %306 = arith.truncf %305 : vector<16x128xf32> to vector<16x128xbf16>
    %307 = vector.broadcast %278 : vector<16x1xbf16> to vector<16x128xbf16>
    %308 = arith.mulf %306, %307 : vector<16x128xbf16>
    %c3_266 = arith.constant 3 : index
    %c0_267 = arith.constant 0 : index
    %c0_268 = arith.constant 0 : index
    %309 = vector.load %arg10[%c3_266, %c0_267, %c0_268] : memref<9x128x256xbf16, #tpu.memory_space<vmem>>, vector<1x128x256xbf16>
    %310 = vector.shape_cast %309 : vector<1x128x256xbf16> to vector<128x256xbf16>
    %cst_269 = arith.constant dense<0.000000e+00> : vector<16x256xf32>
    %311 = tpu.matmul %308, %310, %cst_269 {dimension_numbers = #tpu.dot_dimension_numbers<[1], [0], [0], [1], [0, 0, 1, 1], [], []>} : vector<16x128xbf16>, vector<128x256xbf16>, vector<16x256xf32> -> vector<16x256xf32>
    %312 = arith.addf %304, %311 : vector<16x256xf32>
    %c8_270 = arith.constant 8 : index
    %c0_271 = arith.constant 0 : index
    %313 = vector.load %arg27[%c8_270, %c0_271] : memref<32x128xf32, #tpu.memory_space<vmem>>, vector<16x128xf32>
    %314 = arith.truncf %313 : vector<16x128xf32> to vector<16x128xbf16>
    %c4_272 = arith.constant 4 : index
    %c0_273 = arith.constant 0 : index
    %c0_274 = arith.constant 0 : index
    %315 = vector.load %arg10[%c4_272, %c0_273, %c0_274] : memref<9x128x256xbf16, #tpu.memory_space<vmem>>, vector<1x128x256xbf16>
    %316 = vector.shape_cast %315 : vector<1x128x256xbf16> to vector<128x256xbf16>
    %cst_275 = arith.constant dense<0.000000e+00> : vector<16x256xf32>
    %317 = tpu.matmul %314, %316, %cst_275 {dimension_numbers = #tpu.dot_dimension_numbers<[1], [0], [0], [1], [0, 0, 1, 1], [], []>} : vector<16x128xbf16>, vector<128x256xbf16>, vector<16x256xf32> -> vector<16x256xf32>
    %318 = arith.addf %312, %317 : vector<16x256xf32>
    %c9_276 = arith.constant 9 : index
    %c0_277 = arith.constant 0 : index
    %319 = vector.load %arg27[%c9_276, %c0_277] : memref<32x128xf32, #tpu.memory_space<vmem>>, vector<16x128xf32>
    %320 = arith.truncf %319 : vector<16x128xf32> to vector<16x128xbf16>
    %321 = vector.broadcast %279 : vector<16x1xbf16> to vector<16x128xbf16>
    %322 = arith.mulf %320, %321 : vector<16x128xbf16>
    %c5_278 = arith.constant 5 : index
    %c0_279 = arith.constant 0 : index
    %c0_280 = arith.constant 0 : index
    %323 = vector.load %arg10[%c5_278, %c0_279, %c0_280] : memref<9x128x256xbf16, #tpu.memory_space<vmem>>, vector<1x128x256xbf16>
    %324 = vector.shape_cast %323 : vector<1x128x256xbf16> to vector<128x256xbf16>
    %cst_281 = arith.constant dense<0.000000e+00> : vector<16x256xf32>
    %325 = tpu.matmul %322, %324, %cst_281 {dimension_numbers = #tpu.dot_dimension_numbers<[1], [0], [0], [1], [0, 0, 1, 1], [], []>} : vector<16x128xbf16>, vector<128x256xbf16>, vector<16x256xf32> -> vector<16x256xf32>
    %326 = arith.addf %318, %325 : vector<16x256xf32>
    %c11 = arith.constant 11 : index
    %c0_282 = arith.constant 0 : index
    %327 = vector.load %arg27[%c11, %c0_282] : memref<32x128xf32, #tpu.memory_space<vmem>>, vector<16x128xf32>
    %328 = arith.truncf %327 : vector<16x128xf32> to vector<16x128xbf16>
    %329 = vector.broadcast %278 : vector<16x1xbf16> to vector<16x128xbf16>
    %330 = arith.mulf %328, %329 : vector<16x128xbf16>
    %c6_283 = arith.constant 6 : index
    %c0_284 = arith.constant 0 : index
    %c0_285 = arith.constant 0 : index
    %331 = vector.load %arg10[%c6_283, %c0_284, %c0_285] : memref<9x128x256xbf16, #tpu.memory_space<vmem>>, vector<1x128x256xbf16>
    %332 = vector.shape_cast %331 : vector<1x128x256xbf16> to vector<128x256xbf16>
    %cst_286 = arith.constant dense<0.000000e+00> : vector<16x256xf32>
    %333 = tpu.matmul %330, %332, %cst_286 {dimension_numbers = #tpu.dot_dimension_numbers<[1], [0], [0], [1], [0, 0, 1, 1], [], []>} : vector<16x128xbf16>, vector<128x256xbf16>, vector<16x256xf32> -> vector<16x256xf32>
    %334 = arith.addf %326, %333 : vector<16x256xf32>
    %c12 = arith.constant 12 : index
    %c0_287 = arith.constant 0 : index
    %335 = vector.load %arg27[%c12, %c0_287] : memref<32x128xf32, #tpu.memory_space<vmem>>, vector<16x128xf32>
    %336 = arith.truncf %335 : vector<16x128xf32> to vector<16x128xbf16>
    %c7_288 = arith.constant 7 : index
    %c0_289 = arith.constant 0 : index
    %c0_290 = arith.constant 0 : index
    %337 = vector.load %arg10[%c7_288, %c0_289, %c0_290] : memref<9x128x256xbf16, #tpu.memory_space<vmem>>, vector<1x128x256xbf16>
    %338 = vector.shape_cast %337 : vector<1x128x256xbf16> to vector<128x256xbf16>
    %cst_291 = arith.constant dense<0.000000e+00> : vector<16x256xf32>
    %339 = tpu.matmul %336, %338, %cst_291 {dimension_numbers = #tpu.dot_dimension_numbers<[1], [0], [0], [1], [0, 0, 1, 1], [], []>} : vector<16x128xbf16>, vector<128x256xbf16>, vector<16x256xf32> -> vector<16x256xf32>
    %340 = arith.addf %334, %339 : vector<16x256xf32>
    %c13 = arith.constant 13 : index
    %c0_292 = arith.constant 0 : index
    %341 = vector.load %arg27[%c13, %c0_292] : memref<32x128xf32, #tpu.memory_space<vmem>>, vector<16x128xf32>
    %342 = arith.truncf %341 : vector<16x128xf32> to vector<16x128xbf16>
    %343 = vector.broadcast %279 : vector<16x1xbf16> to vector<16x128xbf16>
    %344 = arith.mulf %342, %343 : vector<16x128xbf16>
    %c8_293 = arith.constant 8 : index
    %c0_294 = arith.constant 0 : index
    %c0_295 = arith.constant 0 : index
    %345 = vector.load %arg10[%c8_293, %c0_294, %c0_295] : memref<9x128x256xbf16, #tpu.memory_space<vmem>>, vector<1x128x256xbf16>
    %346 = vector.shape_cast %345 : vector<1x128x256xbf16> to vector<128x256xbf16>
    %cst_296 = arith.constant dense<0.000000e+00> : vector<16x256xf32>
    %347 = tpu.matmul %344, %346, %cst_296 {dimension_numbers = #tpu.dot_dimension_numbers<[1], [0], [0], [1], [0, 0, 1, 1], [], []>} : vector<16x128xbf16>, vector<128x256xbf16>, vector<16x256xf32> -> vector<16x256xf32>
    %348 = arith.addf %340, %347 : vector<16x256xf32>
    %cst_297 = arith.constant 0.000000e+00 : f32
    %349 = vector.broadcast %cst_297 : f32 to vector<16x256xf32>
    %350 = arith.maximumf %348, %349 : vector<16x256xf32>
    %c8_298 = arith.constant 8 : index
    %c0_299 = arith.constant 0 : index
    %351 = vector.load %arg28[%c8_298, %c0_299] : memref<32x256xf32, #tpu.memory_space<vmem>>, vector<16x256xf32>
    tpu.vector_store %arg28[%c8_298, %c0_299], %350 {strides = array<i32>} : memref<32x256xf32, #tpu.memory_space<vmem>>, vector<16x256xf32>,
    %c0_300 = arith.constant 0 : index
    %c0_301 = arith.constant 0 : index
    %352 = vector.load %arg20[%c0_300, %c0_301] : memref<16x2xbf16, #tpu.memory_space<vmem>>, vector<16x1xbf16>
    %c0_302 = arith.constant 0 : index
    %c1_303 = arith.constant 1 : index
    %353 = vector.load %arg20[%c0_302, %c1_303] : memref<16x2xbf16, #tpu.memory_space<vmem>>, vector<16x1xbf16>
    %c0_304 = arith.constant 0 : index
    %c0_305 = arith.constant 0 : index
    %354 = vector.load %arg13[%c0_304, %c0_305] : memref<1x256xf32, #tpu.memory_space<vmem>>, vector<1x256xf32>
    %355 = vector.shape_cast %354 : vector<1x256xf32> to vector<1x256xf32>
    %356 = vector.broadcast %355 : vector<1x256xf32> to vector<16x256xf32>
    %c3_306 = arith.constant 3 : index
    %c0_307 = arith.constant 0 : index
    %357 = vector.load %arg28[%c3_306, %c0_307] : memref<32x256xf32, #tpu.memory_space<vmem>>, vector<16x256xf32>
    %358 = arith.truncf %357 : vector<16x256xf32> to vector<16x256xbf16>
    %359 = vector.broadcast %352 : vector<16x1xbf16> to vector<16x256xbf16>
    %360 = arith.mulf %358, %359 : vector<16x256xbf16>
    %c0_308 = arith.constant 0 : index
    %c0_309 = arith.constant 0 : index
    %c0_310 = arith.constant 0 : index
    %361 = vector.load %arg12[%c0_308, %c0_309, %c0_310] : memref<9x256x256xbf16, #tpu.memory_space<vmem>>, vector<1x256x256xbf16>
    %362 = vector.shape_cast %361 : vector<1x256x256xbf16> to vector<256x256xbf16>
    %cst_311 = arith.constant dense<0.000000e+00> : vector<16x256xf32>
    %363 = tpu.matmul %360, %362, %cst_311 {dimension_numbers = #tpu.dot_dimension_numbers<[1], [0], [0], [1], [0, 0, 1, 1], [], []>} : vector<16x256xbf16>, vector<256x256xbf16>, vector<16x256xf32> -> vector<16x256xf32>
    %364 = arith.addf %356, %363 : vector<16x256xf32>
    %c4_312 = arith.constant 4 : index
    %c0_313 = arith.constant 0 : index
    %365 = vector.load %arg28[%c4_312, %c0_313] : memref<32x256xf32, #tpu.memory_space<vmem>>, vector<16x256xf32>
    %366 = arith.truncf %365 : vector<16x256xf32> to vector<16x256xbf16>
    %c1_314 = arith.constant 1 : index
    %c0_315 = arith.constant 0 : index
    %c0_316 = arith.constant 0 : index
    %367 = vector.load %arg12[%c1_314, %c0_315, %c0_316] : memref<9x256x256xbf16, #tpu.memory_space<vmem>>, vector<1x256x256xbf16>
    %368 = vector.shape_cast %367 : vector<1x256x256xbf16> to vector<256x256xbf16>
    %cst_317 = arith.constant dense<0.000000e+00> : vector<16x256xf32>
    %369 = tpu.matmul %366, %368, %cst_317 {dimension_numbers = #tpu.dot_dimension_numbers<[1], [0], [0], [1], [0, 0, 1, 1], [], []>} : vector<16x256xbf16>, vector<256x256xbf16>, vector<16x256xf32> -> vector<16x256xf32>
    %370 = arith.addf %364, %369 : vector<16x256xf32>
    %c5_318 = arith.constant 5 : index
    %c0_319 = arith.constant 0 : index
    %371 = vector.load %arg28[%c5_318, %c0_319] : memref<32x256xf32, #tpu.memory_space<vmem>>, vector<16x256xf32>
    %372 = arith.truncf %371 : vector<16x256xf32> to vector<16x256xbf16>
    %373 = vector.broadcast %353 : vector<16x1xbf16> to vector<16x256xbf16>
    %374 = arith.mulf %372, %373 : vector<16x256xbf16>
    %c2_320 = arith.constant 2 : index
    %c0_321 = arith.constant 0 : index
    %c0_322 = arith.constant 0 : index
    %375 = vector.load %arg12[%c2_320, %c0_321, %c0_322] : memref<9x256x256xbf16, #tpu.memory_space<vmem>>, vector<1x256x256xbf16>
    %376 = vector.shape_cast %375 : vector<1x256x256xbf16> to vector<256x256xbf16>
    %cst_323 = arith.constant dense<0.000000e+00> : vector<16x256xf32>
    %377 = tpu.matmul %374, %376, %cst_323 {dimension_numbers = #tpu.dot_dimension_numbers<[1], [0], [0], [1], [0, 0, 1, 1], [], []>} : vector<16x256xbf16>, vector<256x256xbf16>, vector<16x256xf32> -> vector<16x256xf32>
    %378 = arith.addf %370, %377 : vector<16x256xf32>
    %c7_324 = arith.constant 7 : index
    %c0_325 = arith.constant 0 : index
    %379 = vector.load %arg28[%c7_324, %c0_325] : memref<32x256xf32, #tpu.memory_space<vmem>>, vector<16x256xf32>
    %380 = arith.truncf %379 : vector<16x256xf32> to vector<16x256xbf16>
    %381 = vector.broadcast %352 : vector<16x1xbf16> to vector<16x256xbf16>
    %382 = arith.mulf %380, %381 : vector<16x256xbf16>
    %c3_326 = arith.constant 3 : index
    %c0_327 = arith.constant 0 : index
    %c0_328 = arith.constant 0 : index
    %383 = vector.load %arg12[%c3_326, %c0_327, %c0_328] : memref<9x256x256xbf16, #tpu.memory_space<vmem>>, vector<1x256x256xbf16>
    %384 = vector.shape_cast %383 : vector<1x256x256xbf16> to vector<256x256xbf16>
    %cst_329 = arith.constant dense<0.000000e+00> : vector<16x256xf32>
    %385 = tpu.matmul %382, %384, %cst_329 {dimension_numbers = #tpu.dot_dimension_numbers<[1], [0], [0], [1], [0, 0, 1, 1], [], []>} : vector<16x256xbf16>, vector<256x256xbf16>, vector<16x256xf32> -> vector<16x256xf32>
    %386 = arith.addf %378, %385 : vector<16x256xf32>
    %c8_330 = arith.constant 8 : index
    %c0_331 = arith.constant 0 : index
    %387 = vector.load %arg28[%c8_330, %c0_331] : memref<32x256xf32, #tpu.memory_space<vmem>>, vector<16x256xf32>
    %388 = arith.truncf %387 : vector<16x256xf32> to vector<16x256xbf16>
    %c4_332 = arith.constant 4 : index
    %c0_333 = arith.constant 0 : index
    %c0_334 = arith.constant 0 : index
    %389 = vector.load %arg12[%c4_332, %c0_333, %c0_334] : memref<9x256x256xbf16, #tpu.memory_space<vmem>>, vector<1x256x256xbf16>
    %390 = vector.shape_cast %389 : vector<1x256x256xbf16> to vector<256x256xbf16>
    %cst_335 = arith.constant dense<0.000000e+00> : vector<16x256xf32>
    %391 = tpu.matmul %388, %390, %cst_335 {dimension_numbers = #tpu.dot_dimension_numbers<[1], [0], [0], [1], [0, 0, 1, 1], [], []>} : vector<16x256xbf16>, vector<256x256xbf16>, vector<16x256xf32> -> vector<16x256xf32>
    %392 = arith.addf %386, %391 : vector<16x256xf32>
    %c9_336 = arith.constant 9 : index
    %c0_337 = arith.constant 0 : index
    %393 = vector.load %arg28[%c9_336, %c0_337] : memref<32x256xf32, #tpu.memory_space<vmem>>, vector<16x256xf32>
    %394 = arith.truncf %393 : vector<16x256xf32> to vector<16x256xbf16>
    %395 = vector.broadcast %353 : vector<16x1xbf16> to vector<16x256xbf16>
    %396 = arith.mulf %394, %395 : vector<16x256xbf16>
    %c5_338 = arith.constant 5 : index
    %c0_339 = arith.constant 0 : index
    %c0_340 = arith.constant 0 : index
    %397 = vector.load %arg12[%c5_338, %c0_339, %c0_340] : memref<9x256x256xbf16, #tpu.memory_space<vmem>>, vector<1x256x256xbf16>
    %398 = vector.shape_cast %397 : vector<1x256x256xbf16> to vector<256x256xbf16>
    %cst_341 = arith.constant dense<0.000000e+00> : vector<16x256xf32>
    %399 = tpu.matmul %396, %398, %cst_341 {dimension_numbers = #tpu.dot_dimension_numbers<[1], [0], [0], [1], [0, 0, 1, 1], [], []>} : vector<16x256xbf16>, vector<256x256xbf16>, vector<16x256xf32> -> vector<16x256xf32>
    %400 = arith.addf %392, %399 : vector<16x256xf32>
    %c11_342 = arith.constant 11 : index
    %c0_343 = arith.constant 0 : index
    %401 = vector.load %arg28[%c11_342, %c0_343] : memref<32x256xf32, #tpu.memory_space<vmem>>, vector<16x256xf32>
    %402 = arith.truncf %401 : vector<16x256xf32> to vector<16x256xbf16>
    %403 = vector.broadcast %352 : vector<16x1xbf16> to vector<16x256xbf16>
    %404 = arith.mulf %402, %403 : vector<16x256xbf16>
    %c6_344 = arith.constant 6 : index
    %c0_345 = arith.constant 0 : index
    %c0_346 = arith.constant 0 : index
    %405 = vector.load %arg12[%c6_344, %c0_345, %c0_346] : memref<9x256x256xbf16, #tpu.memory_space<vmem>>, vector<1x256x256xbf16>
    %406 = vector.shape_cast %405 : vector<1x256x256xbf16> to vector<256x256xbf16>
    %cst_347 = arith.constant dense<0.000000e+00> : vector<16x256xf32>
    %407 = tpu.matmul %404, %406, %cst_347 {dimension_numbers = #tpu.dot_dimension_numbers<[1], [0], [0], [1], [0, 0, 1, 1], [], []>} : vector<16x256xbf16>, vector<256x256xbf16>, vector<16x256xf32> -> vector<16x256xf32>
    %408 = arith.addf %400, %407 : vector<16x256xf32>
    %c12_348 = arith.constant 12 : index
    %c0_349 = arith.constant 0 : index
    %409 = vector.load %arg28[%c12_348, %c0_349] : memref<32x256xf32, #tpu.memory_space<vmem>>, vector<16x256xf32>
    %410 = arith.truncf %409 : vector<16x256xf32> to vector<16x256xbf16>
    %c7_350 = arith.constant 7 : index
    %c0_351 = arith.constant 0 : index
    %c0_352 = arith.constant 0 : index
    %411 = vector.load %arg12[%c7_350, %c0_351, %c0_352] : memref<9x256x256xbf16, #tpu.memory_space<vmem>>, vector<1x256x256xbf16>
    %412 = vector.shape_cast %411 : vector<1x256x256xbf16> to vector<256x256xbf16>
    %cst_353 = arith.constant dense<0.000000e+00> : vector<16x256xf32>
    %413 = tpu.matmul %410, %412, %cst_353 {dimension_numbers = #tpu.dot_dimension_numbers<[1], [0], [0], [1], [0, 0, 1, 1], [], []>} : vector<16x256xbf16>, vector<256x256xbf16>, vector<16x256xf32> -> vector<16x256xf32>
    %414 = arith.addf %408, %413 : vector<16x256xf32>
    %c13_354 = arith.constant 13 : index
    %c0_355 = arith.constant 0 : index
    %415 = vector.load %arg28[%c13_354, %c0_355] : memref<32x256xf32, #tpu.memory_space<vmem>>, vector<16x256xf32>
    %416 = arith.truncf %415 : vector<16x256xf32> to vector<16x256xbf16>
    %417 = vector.broadcast %353 : vector<16x1xbf16> to vector<16x256xbf16>
    %418 = arith.mulf %416, %417 : vector<16x256xbf16>
    %c8_356 = arith.constant 8 : index
    %c0_357 = arith.constant 0 : index
    %c0_358 = arith.constant 0 : index
    %419 = vector.load %arg12[%c8_356, %c0_357, %c0_358] : memref<9x256x256xbf16, #tpu.memory_space<vmem>>, vector<1x256x256xbf16>
    %420 = vector.shape_cast %419 : vector<1x256x256xbf16> to vector<256x256xbf16>
    %cst_359 = arith.constant dense<0.000000e+00> : vector<16x256xf32>
    %421 = tpu.matmul %418, %420, %cst_359 {dimension_numbers = #tpu.dot_dimension_numbers<[1], [0], [0], [1], [0, 0, 1, 1], [], []>} : vector<16x256xbf16>, vector<256x256xbf16>, vector<16x256xf32> -> vector<16x256xf32>
    %422 = arith.addf %414, %421 : vector<16x256xf32>
    %cst_360 = arith.constant 0.000000e+00 : f32
    %423 = vector.broadcast %cst_360 : f32 to vector<16x256xf32>
    %424 = arith.maximumf %422, %423 : vector<16x256xf32>
    %c8_361 = arith.constant 8 : index
    %c0_362 = arith.constant 0 : index
    %425 = vector.load %arg29[%c8_361, %c0_362] : memref<32x256xf32, #tpu.memory_space<vmem>>, vector<16x256xf32>
    tpu.vector_store %arg29[%c8_361, %c0_362], %424 {strides = array<i32>} : memref<32x256xf32, #tpu.memory_space<vmem>>, vector<16x256xf32>,
    %c0_363 = arith.constant 0 : index
    %c0_364 = arith.constant 0 : index
    %426 = vector.load %arg20[%c0_363, %c0_364] : memref<16x2xbf16, #tpu.memory_space<vmem>>, vector<16x1xbf16>
    %c0_365 = arith.constant 0 : index
    %c1_366 = arith.constant 1 : index
    %427 = vector.load %arg20[%c0_365, %c1_366] : memref<16x2xbf16, #tpu.memory_space<vmem>>, vector<16x1xbf16>
    %c0_367 = arith.constant 0 : index
    %c0_368 = arith.constant 0 : index
    %428 = vector.load %arg15[%c0_367, %c0_368] : memref<1x256xf32, #tpu.memory_space<vmem>>, vector<1x256xf32>
    %429 = vector.shape_cast %428 : vector<1x256xf32> to vector<1x256xf32>
    %430 = vector.broadcast %429 : vector<1x256xf32> to vector<16x256xf32>
    %c3_369 = arith.constant 3 : index
    %c0_370 = arith.constant 0 : index
    %431 = vector.load %arg29[%c3_369, %c0_370] : memref<32x256xf32, #tpu.memory_space<vmem>>, vector<16x256xf32>
    %432 = arith.truncf %431 : vector<16x256xf32> to vector<16x256xbf16>
    %433 = vector.broadcast %426 : vector<16x1xbf16> to vector<16x256xbf16>
    %434 = arith.mulf %432, %433 : vector<16x256xbf16>
    %c0_371 = arith.constant 0 : index
    %c0_372 = arith.constant 0 : index
    %c0_373 = arith.constant 0 : index
    %435 = vector.load %arg14[%c0_371, %c0_372, %c0_373] : memref<9x256x256xbf16, #tpu.memory_space<vmem>>, vector<1x256x256xbf16>
    %436 = vector.shape_cast %435 : vector<1x256x256xbf16> to vector<256x256xbf16>
    %cst_374 = arith.constant dense<0.000000e+00> : vector<16x256xf32>
    %437 = tpu.matmul %434, %436, %cst_374 {dimension_numbers = #tpu.dot_dimension_numbers<[1], [0], [0], [1], [0, 0, 1, 1], [], []>} : vector<16x256xbf16>, vector<256x256xbf16>, vector<16x256xf32> -> vector<16x256xf32>
    %438 = arith.addf %430, %437 : vector<16x256xf32>
    %c4_375 = arith.constant 4 : index
    %c0_376 = arith.constant 0 : index
    %439 = vector.load %arg29[%c4_375, %c0_376] : memref<32x256xf32, #tpu.memory_space<vmem>>, vector<16x256xf32>
    %440 = arith.truncf %439 : vector<16x256xf32> to vector<16x256xbf16>
    %c1_377 = arith.constant 1 : index
    %c0_378 = arith.constant 0 : index
    %c0_379 = arith.constant 0 : index
    %441 = vector.load %arg14[%c1_377, %c0_378, %c0_379] : memref<9x256x256xbf16, #tpu.memory_space<vmem>>, vector<1x256x256xbf16>
    %442 = vector.shape_cast %441 : vector<1x256x256xbf16> to vector<256x256xbf16>
    %cst_380 = arith.constant dense<0.000000e+00> : vector<16x256xf32>
    %443 = tpu.matmul %440, %442, %cst_380 {dimension_numbers = #tpu.dot_dimension_numbers<[1], [0], [0], [1], [0, 0, 1, 1], [], []>} : vector<16x256xbf16>, vector<256x256xbf16>, vector<16x256xf32> -> vector<16x256xf32>
    %444 = arith.addf %438, %443 : vector<16x256xf32>
    %c5_381 = arith.constant 5 : index
    %c0_382 = arith.constant 0 : index
    %445 = vector.load %arg29[%c5_381, %c0_382] : memref<32x256xf32, #tpu.memory_space<vmem>>, vector<16x256xf32>
    %446 = arith.truncf %445 : vector<16x256xf32> to vector<16x256xbf16>
    %447 = vector.broadcast %427 : vector<16x1xbf16> to vector<16x256xbf16>
    %448 = arith.mulf %446, %447 : vector<16x256xbf16>
    %c2_383 = arith.constant 2 : index
    %c0_384 = arith.constant 0 : index
    %c0_385 = arith.constant 0 : index
    %449 = vector.load %arg14[%c2_383, %c0_384, %c0_385] : memref<9x256x256xbf16, #tpu.memory_space<vmem>>, vector<1x256x256xbf16>
    %450 = vector.shape_cast %449 : vector<1x256x256xbf16> to vector<256x256xbf16>
    %cst_386 = arith.constant dense<0.000000e+00> : vector<16x256xf32>
    %451 = tpu.matmul %448, %450, %cst_386 {dimension_numbers = #tpu.dot_dimension_numbers<[1], [0], [0], [1], [0, 0, 1, 1], [], []>} : vector<16x256xbf16>, vector<256x256xbf16>, vector<16x256xf32> -> vector<16x256xf32>
    %452 = arith.addf %444, %451 : vector<16x256xf32>
    %c7_387 = arith.constant 7 : index
    %c0_388 = arith.constant 0 : index
    %453 = vector.load %arg29[%c7_387, %c0_388] : memref<32x256xf32, #tpu.memory_space<vmem>>, vector<16x256xf32>
    %454 = arith.truncf %453 : vector<16x256xf32> to vector<16x256xbf16>
    %455 = vector.broadcast %426 : vector<16x1xbf16> to vector<16x256xbf16>
    %456 = arith.mulf %454, %455 : vector<16x256xbf16>
    %c3_389 = arith.constant 3 : index
    %c0_390 = arith.constant 0 : index
    %c0_391 = arith.constant 0 : index
    %457 = vector.load %arg14[%c3_389, %c0_390, %c0_391] : memref<9x256x256xbf16, #tpu.memory_space<vmem>>, vector<1x256x256xbf16>
    %458 = vector.shape_cast %457 : vector<1x256x256xbf16> to vector<256x256xbf16>
    %cst_392 = arith.constant dense<0.000000e+00> : vector<16x256xf32>
    %459 = tpu.matmul %456, %458, %cst_392 {dimension_numbers = #tpu.dot_dimension_numbers<[1], [0], [0], [1], [0, 0, 1, 1], [], []>} : vector<16x256xbf16>, vector<256x256xbf16>, vector<16x256xf32> -> vector<16x256xf32>
    %460 = arith.addf %452, %459 : vector<16x256xf32>
    %c8_393 = arith.constant 8 : index
    %c0_394 = arith.constant 0 : index
    %461 = vector.load %arg29[%c8_393, %c0_394] : memref<32x256xf32, #tpu.memory_space<vmem>>, vector<16x256xf32>
    %462 = arith.truncf %461 : vector<16x256xf32> to vector<16x256xbf16>
    %c4_395 = arith.constant 4 : index
    %c0_396 = arith.constant 0 : index
    %c0_397 = arith.constant 0 : index
    %463 = vector.load %arg14[%c4_395, %c0_396, %c0_397] : memref<9x256x256xbf16, #tpu.memory_space<vmem>>, vector<1x256x256xbf16>
    %464 = vector.shape_cast %463 : vector<1x256x256xbf16> to vector<256x256xbf16>
    %cst_398 = arith.constant dense<0.000000e+00> : vector<16x256xf32>
    %465 = tpu.matmul %462, %464, %cst_398 {dimension_numbers = #tpu.dot_dimension_numbers<[1], [0], [0], [1], [0, 0, 1, 1], [], []>} : vector<16x256xbf16>, vector<256x256xbf16>, vector<16x256xf32> -> vector<16x256xf32>
    %466 = arith.addf %460, %465 : vector<16x256xf32>
    %c9_399 = arith.constant 9 : index
    %c0_400 = arith.constant 0 : index
    %467 = vector.load %arg29[%c9_399, %c0_400] : memref<32x256xf32, #tpu.memory_space<vmem>>, vector<16x256xf32>
    %468 = arith.truncf %467 : vector<16x256xf32> to vector<16x256xbf16>
    %469 = vector.broadcast %427 : vector<16x1xbf16> to vector<16x256xbf16>
    %470 = arith.mulf %468, %469 : vector<16x256xbf16>
    %c5_401 = arith.constant 5 : index
    %c0_402 = arith.constant 0 : index
    %c0_403 = arith.constant 0 : index
    %471 = vector.load %arg14[%c5_401, %c0_402, %c0_403] : memref<9x256x256xbf16, #tpu.memory_space<vmem>>, vector<1x256x256xbf16>
    %472 = vector.shape_cast %471 : vector<1x256x256xbf16> to vector<256x256xbf16>
    %cst_404 = arith.constant dense<0.000000e+00> : vector<16x256xf32>
    %473 = tpu.matmul %470, %472, %cst_404 {dimension_numbers = #tpu.dot_dimension_numbers<[1], [0], [0], [1], [0, 0, 1, 1], [], []>} : vector<16x256xbf16>, vector<256x256xbf16>, vector<16x256xf32> -> vector<16x256xf32>
    %474 = arith.addf %466, %473 : vector<16x256xf32>
    %c11_405 = arith.constant 11 : index
    %c0_406 = arith.constant 0 : index
    %475 = vector.load %arg29[%c11_405, %c0_406] : memref<32x256xf32, #tpu.memory_space<vmem>>, vector<16x256xf32>
    %476 = arith.truncf %475 : vector<16x256xf32> to vector<16x256xbf16>
    %477 = vector.broadcast %426 : vector<16x1xbf16> to vector<16x256xbf16>
    %478 = arith.mulf %476, %477 : vector<16x256xbf16>
    %c6_407 = arith.constant 6 : index
    %c0_408 = arith.constant 0 : index
    %c0_409 = arith.constant 0 : index
    %479 = vector.load %arg14[%c6_407, %c0_408, %c0_409] : memref<9x256x256xbf16, #tpu.memory_space<vmem>>, vector<1x256x256xbf16>
    %480 = vector.shape_cast %479 : vector<1x256x256xbf16> to vector<256x256xbf16>
    %cst_410 = arith.constant dense<0.000000e+00> : vector<16x256xf32>
    %481 = tpu.matmul %478, %480, %cst_410 {dimension_numbers = #tpu.dot_dimension_numbers<[1], [0], [0], [1], [0, 0, 1, 1], [], []>} : vector<16x256xbf16>, vector<256x256xbf16>, vector<16x256xf32> -> vector<16x256xf32>
    %482 = arith.addf %474, %481 : vector<16x256xf32>
    %c12_411 = arith.constant 12 : index
    %c0_412 = arith.constant 0 : index
    %483 = vector.load %arg29[%c12_411, %c0_412] : memref<32x256xf32, #tpu.memory_space<vmem>>, vector<16x256xf32>
    %484 = arith.truncf %483 : vector<16x256xf32> to vector<16x256xbf16>
    %c7_413 = arith.constant 7 : index
    %c0_414 = arith.constant 0 : index
    %c0_415 = arith.constant 0 : index
    %485 = vector.load %arg14[%c7_413, %c0_414, %c0_415] : memref<9x256x256xbf16, #tpu.memory_space<vmem>>, vector<1x256x256xbf16>
    %486 = vector.shape_cast %485 : vector<1x256x256xbf16> to vector<256x256xbf16>
    %cst_416 = arith.constant dense<0.000000e+00> : vector<16x256xf32>
    %487 = tpu.matmul %484, %486, %cst_416 {dimension_numbers = #tpu.dot_dimension_numbers<[1], [0], [0], [1], [0, 0, 1, 1], [], []>} : vector<16x256xbf16>, vector<256x256xbf16>, vector<16x256xf32> -> vector<16x256xf32>
    %488 = arith.addf %482, %487 : vector<16x256xf32>
    %c13_417 = arith.constant 13 : index
    %c0_418 = arith.constant 0 : index
    %489 = vector.load %arg29[%c13_417, %c0_418] : memref<32x256xf32, #tpu.memory_space<vmem>>, vector<16x256xf32>
    %490 = arith.truncf %489 : vector<16x256xf32> to vector<16x256xbf16>
    %491 = vector.broadcast %427 : vector<16x1xbf16> to vector<16x256xbf16>
    %492 = arith.mulf %490, %491 : vector<16x256xbf16>
    %c8_419 = arith.constant 8 : index
    %c0_420 = arith.constant 0 : index
    %c0_421 = arith.constant 0 : index
    %493 = vector.load %arg14[%c8_419, %c0_420, %c0_421] : memref<9x256x256xbf16, #tpu.memory_space<vmem>>, vector<1x256x256xbf16>
    %494 = vector.shape_cast %493 : vector<1x256x256xbf16> to vector<256x256xbf16>
    %cst_422 = arith.constant dense<0.000000e+00> : vector<16x256xf32>
    %495 = tpu.matmul %492, %494, %cst_422 {dimension_numbers = #tpu.dot_dimension_numbers<[1], [0], [0], [1], [0, 0, 1, 1], [], []>} : vector<16x256xbf16>, vector<256x256xbf16>, vector<16x256xf32> -> vector<16x256xf32>
    %496 = arith.addf %488, %495 : vector<16x256xf32>
    %cst_423 = arith.constant 0.000000e+00 : f32
    %497 = vector.broadcast %cst_423 : f32 to vector<16x256xf32>
    %498 = arith.maximumf %496, %497 : vector<16x256xf32>
    %c8_424 = arith.constant 8 : index
    %c0_425 = arith.constant 0 : index
    %499 = vector.load %arg28[%c8_424, %c0_425] : memref<32x256xf32, #tpu.memory_space<vmem>>, vector<16x256xf32>
    tpu.vector_store %arg28[%c8_424, %c0_425], %498 {strides = array<i32>} : memref<32x256xf32, #tpu.memory_space<vmem>>, vector<16x256xf32>,
    %c0_426 = arith.constant 0 : index
    %c0_427 = arith.constant 0 : index
    %500 = vector.load %arg20[%c0_426, %c0_427] : memref<16x2xbf16, #tpu.memory_space<vmem>>, vector<16x1xbf16>
    %c0_428 = arith.constant 0 : index
    %c1_429 = arith.constant 1 : index
    %501 = vector.load %arg20[%c0_428, %c1_429] : memref<16x2xbf16, #tpu.memory_space<vmem>>, vector<16x1xbf16>
    %c0_430 = arith.constant 0 : index
    %c0_431 = arith.constant 0 : index
    %502 = vector.load %arg17[%c0_430, %c0_431] : memref<1x256xf32, #tpu.memory_space<vmem>>, vector<1x256xf32>
    %503 = vector.shape_cast %502 : vector<1x256xf32> to vector<1x256xf32>
    %504 = vector.broadcast %503 : vector<1x256xf32> to vector<16x256xf32>
    %c3_432 = arith.constant 3 : index
    %c0_433 = arith.constant 0 : index
    %505 = vector.load %arg28[%c3_432, %c0_433] : memref<32x256xf32, #tpu.memory_space<vmem>>, vector<16x256xf32>
    %506 = arith.truncf %505 : vector<16x256xf32> to vector<16x256xbf16>
    %507 = vector.broadcast %500 : vector<16x1xbf16> to vector<16x256xbf16>
    %508 = arith.mulf %506, %507 : vector<16x256xbf16>
    %c0_434 = arith.constant 0 : index
    %c0_435 = arith.constant 0 : index
    %c0_436 = arith.constant 0 : index
    %509 = vector.load %arg16[%c0_434, %c0_435, %c0_436] : memref<9x256x256xbf16, #tpu.memory_space<vmem>>, vector<1x256x256xbf16>
    %510 = vector.shape_cast %509 : vector<1x256x256xbf16> to vector<256x256xbf16>
    %cst_437 = arith.constant dense<0.000000e+00> : vector<16x256xf32>
    %511 = tpu.matmul %508, %510, %cst_437 {dimension_numbers = #tpu.dot_dimension_numbers<[1], [0], [0], [1], [0, 0, 1, 1], [], []>} : vector<16x256xbf16>, vector<256x256xbf16>, vector<16x256xf32> -> vector<16x256xf32>
    %512 = arith.addf %504, %511 : vector<16x256xf32>
    %c4_438 = arith.constant 4 : index
    %c0_439 = arith.constant 0 : index
    %513 = vector.load %arg28[%c4_438, %c0_439] : memref<32x256xf32, #tpu.memory_space<vmem>>, vector<16x256xf32>
    %514 = arith.truncf %513 : vector<16x256xf32> to vector<16x256xbf16>
    %c1_440 = arith.constant 1 : index
    %c0_441 = arith.constant 0 : index
    %c0_442 = arith.constant 0 : index
    %515 = vector.load %arg16[%c1_440, %c0_441, %c0_442] : memref<9x256x256xbf16, #tpu.memory_space<vmem>>, vector<1x256x256xbf16>
    %516 = vector.shape_cast %515 : vector<1x256x256xbf16> to vector<256x256xbf16>
    %cst_443 = arith.constant dense<0.000000e+00> : vector<16x256xf32>
    %517 = tpu.matmul %514, %516, %cst_443 {dimension_numbers = #tpu.dot_dimension_numbers<[1], [0], [0], [1], [0, 0, 1, 1], [], []>} : vector<16x256xbf16>, vector<256x256xbf16>, vector<16x256xf32> -> vector<16x256xf32>
    %518 = arith.addf %512, %517 : vector<16x256xf32>
    %c5_444 = arith.constant 5 : index
    %c0_445 = arith.constant 0 : index
    %519 = vector.load %arg28[%c5_444, %c0_445] : memref<32x256xf32, #tpu.memory_space<vmem>>, vector<16x256xf32>
    %520 = arith.truncf %519 : vector<16x256xf32> to vector<16x256xbf16>
    %521 = vector.broadcast %501 : vector<16x1xbf16> to vector<16x256xbf16>
    %522 = arith.mulf %520, %521 : vector<16x256xbf16>
    %c2_446 = arith.constant 2 : index
    %c0_447 = arith.constant 0 : index
    %c0_448 = arith.constant 0 : index
    %523 = vector.load %arg16[%c2_446, %c0_447, %c0_448] : memref<9x256x256xbf16, #tpu.memory_space<vmem>>, vector<1x256x256xbf16>
    %524 = vector.shape_cast %523 : vector<1x256x256xbf16> to vector<256x256xbf16>
    %cst_449 = arith.constant dense<0.000000e+00> : vector<16x256xf32>
    %525 = tpu.matmul %522, %524, %cst_449 {dimension_numbers = #tpu.dot_dimension_numbers<[1], [0], [0], [1], [0, 0, 1, 1], [], []>} : vector<16x256xbf16>, vector<256x256xbf16>, vector<16x256xf32> -> vector<16x256xf32>
    %526 = arith.addf %518, %525 : vector<16x256xf32>
    %c7_450 = arith.constant 7 : index
    %c0_451 = arith.constant 0 : index
    %527 = vector.load %arg28[%c7_450, %c0_451] : memref<32x256xf32, #tpu.memory_space<vmem>>, vector<16x256xf32>
    %528 = arith.truncf %527 : vector<16x256xf32> to vector<16x256xbf16>
    %529 = vector.broadcast %500 : vector<16x1xbf16> to vector<16x256xbf16>
    %530 = arith.mulf %528, %529 : vector<16x256xbf16>
    %c3_452 = arith.constant 3 : index
    %c0_453 = arith.constant 0 : index
    %c0_454 = arith.constant 0 : index
    %531 = vector.load %arg16[%c3_452, %c0_453, %c0_454] : memref<9x256x256xbf16, #tpu.memory_space<vmem>>, vector<1x256x256xbf16>
    %532 = vector.shape_cast %531 : vector<1x256x256xbf16> to vector<256x256xbf16>
    %cst_455 = arith.constant dense<0.000000e+00> : vector<16x256xf32>
    %533 = tpu.matmul %530, %532, %cst_455 {dimension_numbers = #tpu.dot_dimension_numbers<[1], [0], [0], [1], [0, 0, 1, 1], [], []>} : vector<16x256xbf16>, vector<256x256xbf16>, vector<16x256xf32> -> vector<16x256xf32>
    %534 = arith.addf %526, %533 : vector<16x256xf32>
    %c8_456 = arith.constant 8 : index
    %c0_457 = arith.constant 0 : index
    %535 = vector.load %arg28[%c8_456, %c0_457] : memref<32x256xf32, #tpu.memory_space<vmem>>, vector<16x256xf32>
    %536 = arith.truncf %535 : vector<16x256xf32> to vector<16x256xbf16>
    %c4_458 = arith.constant 4 : index
    %c0_459 = arith.constant 0 : index
    %c0_460 = arith.constant 0 : index
    %537 = vector.load %arg16[%c4_458, %c0_459, %c0_460] : memref<9x256x256xbf16, #tpu.memory_space<vmem>>, vector<1x256x256xbf16>
    %538 = vector.shape_cast %537 : vector<1x256x256xbf16> to vector<256x256xbf16>
    %cst_461 = arith.constant dense<0.000000e+00> : vector<16x256xf32>
    %539 = tpu.matmul %536, %538, %cst_461 {dimension_numbers = #tpu.dot_dimension_numbers<[1], [0], [0], [1], [0, 0, 1, 1], [], []>} : vector<16x256xbf16>, vector<256x256xbf16>, vector<16x256xf32> -> vector<16x256xf32>
    %540 = arith.addf %534, %539 : vector<16x256xf32>
    %c9_462 = arith.constant 9 : index
    %c0_463 = arith.constant 0 : index
    %541 = vector.load %arg28[%c9_462, %c0_463] : memref<32x256xf32, #tpu.memory_space<vmem>>, vector<16x256xf32>
    %542 = arith.truncf %541 : vector<16x256xf32> to vector<16x256xbf16>
    %543 = vector.broadcast %501 : vector<16x1xbf16> to vector<16x256xbf16>
    %544 = arith.mulf %542, %543 : vector<16x256xbf16>
    %c5_464 = arith.constant 5 : index
    %c0_465 = arith.constant 0 : index
    %c0_466 = arith.constant 0 : index
    %545 = vector.load %arg16[%c5_464, %c0_465, %c0_466] : memref<9x256x256xbf16, #tpu.memory_space<vmem>>, vector<1x256x256xbf16>
    %546 = vector.shape_cast %545 : vector<1x256x256xbf16> to vector<256x256xbf16>
    %cst_467 = arith.constant dense<0.000000e+00> : vector<16x256xf32>
    %547 = tpu.matmul %544, %546, %cst_467 {dimension_numbers = #tpu.dot_dimension_numbers<[1], [0], [0], [1], [0, 0, 1, 1], [], []>} : vector<16x256xbf16>, vector<256x256xbf16>, vector<16x256xf32> -> vector<16x256xf32>
    %548 = arith.addf %540, %547 : vector<16x256xf32>
    %c11_468 = arith.constant 11 : index
    %c0_469 = arith.constant 0 : index
    %549 = vector.load %arg28[%c11_468, %c0_469] : memref<32x256xf32, #tpu.memory_space<vmem>>, vector<16x256xf32>
    %550 = arith.truncf %549 : vector<16x256xf32> to vector<16x256xbf16>
    %551 = vector.broadcast %500 : vector<16x1xbf16> to vector<16x256xbf16>
    %552 = arith.mulf %550, %551 : vector<16x256xbf16>
    %c6_470 = arith.constant 6 : index
    %c0_471 = arith.constant 0 : index
    %c0_472 = arith.constant 0 : index
    %553 = vector.load %arg16[%c6_470, %c0_471, %c0_472] : memref<9x256x256xbf16, #tpu.memory_space<vmem>>, vector<1x256x256xbf16>
    %554 = vector.shape_cast %553 : vector<1x256x256xbf16> to vector<256x256xbf16>
    %cst_473 = arith.constant dense<0.000000e+00> : vector<16x256xf32>
    %555 = tpu.matmul %552, %554, %cst_473 {dimension_numbers = #tpu.dot_dimension_numbers<[1], [0], [0], [1], [0, 0, 1, 1], [], []>} : vector<16x256xbf16>, vector<256x256xbf16>, vector<16x256xf32> -> vector<16x256xf32>
    %556 = arith.addf %548, %555 : vector<16x256xf32>
    %c12_474 = arith.constant 12 : index
    %c0_475 = arith.constant 0 : index
    %557 = vector.load %arg28[%c12_474, %c0_475] : memref<32x256xf32, #tpu.memory_space<vmem>>, vector<16x256xf32>
    %558 = arith.truncf %557 : vector<16x256xf32> to vector<16x256xbf16>
    %c7_476 = arith.constant 7 : index
    %c0_477 = arith.constant 0 : index
    %c0_478 = arith.constant 0 : index
    %559 = vector.load %arg16[%c7_476, %c0_477, %c0_478] : memref<9x256x256xbf16, #tpu.memory_space<vmem>>, vector<1x256x256xbf16>
    %560 = vector.shape_cast %559 : vector<1x256x256xbf16> to vector<256x256xbf16>
    %cst_479 = arith.constant dense<0.000000e+00> : vector<16x256xf32>
    %561 = tpu.matmul %558, %560, %cst_479 {dimension_numbers = #tpu.dot_dimension_numbers<[1], [0], [0], [1], [0, 0, 1, 1], [], []>} : vector<16x256xbf16>, vector<256x256xbf16>, vector<16x256xf32> -> vector<16x256xf32>
    %562 = arith.addf %556, %561 : vector<16x256xf32>
    %c13_480 = arith.constant 13 : index
    %c0_481 = arith.constant 0 : index
    %563 = vector.load %arg28[%c13_480, %c0_481] : memref<32x256xf32, #tpu.memory_space<vmem>>, vector<16x256xf32>
    %564 = arith.truncf %563 : vector<16x256xf32> to vector<16x256xbf16>
    %565 = vector.broadcast %501 : vector<16x1xbf16> to vector<16x256xbf16>
    %566 = arith.mulf %564, %565 : vector<16x256xbf16>
    %c8_482 = arith.constant 8 : index
    %c0_483 = arith.constant 0 : index
    %c0_484 = arith.constant 0 : index
    %567 = vector.load %arg16[%c8_482, %c0_483, %c0_484] : memref<9x256x256xbf16, #tpu.memory_space<vmem>>, vector<1x256x256xbf16>
    %568 = vector.shape_cast %567 : vector<1x256x256xbf16> to vector<256x256xbf16>
    %cst_485 = arith.constant dense<0.000000e+00> : vector<16x256xf32>
    %569 = tpu.matmul %566, %568, %cst_485 {dimension_numbers = #tpu.dot_dimension_numbers<[1], [0], [0], [1], [0, 0, 1, 1], [], []>} : vector<16x256xbf16>, vector<256x256xbf16>, vector<16x256xf32> -> vector<16x256xf32>
    %570 = arith.addf %562, %569 : vector<16x256xf32>
    %cst_486 = arith.constant 0.000000e+00 : f32
    %571 = vector.broadcast %cst_486 : f32 to vector<16x256xf32>
    %572 = arith.maximumf %570, %571 : vector<16x256xf32>
    %c0_487 = arith.constant 0 : index
    %c0_488 = arith.constant 0 : index
    %c0_489 = arith.constant 0 : index
    %573 = vector.load %arg23[%c0_487, %c0_488, %c0_489] : memref<1x16x256xf32, #tpu.memory_space<vmem>>, vector<1x16x256xf32>
    %574 = vector.shape_cast %573 : vector<1x16x256xf32> to vector<16x256xf32>
    %575 = vector.shape_cast %572 : vector<16x256xf32> to vector<1x16x256xf32>
    tpu.vector_store %arg23[%c0_487, %c0_488, %c0_489], %575 {strides = array<i32>} : memref<1x16x256xf32, #tpu.memory_space<vmem>>, vector<1x16x256xf32>,
    return
  }
  func.func @transform_0(%arg0: i32) -> (i32, i32, i32) {
    %c0_i32 = arith.constant 0 : i32
    %c0_i32_0 = arith.constant 0 : i32
    %c0_i32_1 = arith.constant 0 : i32
    return %arg0, %c0_i32, %c0_i32_0 : i32, i32, i32
  }
  func.func @transform_1(%arg0: i32) -> (i32, i32) {
    %c0_i32 = arith.constant 0 : i32
    %c0_i32_0 = arith.constant 0 : i32
    %c0_i32_1 = arith.constant 0 : i32
    return %c0_i32, %c0_i32_0 : i32, i32
  }
  func.func @transform_2(%arg0: i32) -> (i32, i32) {
    %c0_i32 = arith.constant 0 : i32
    %c0_i32_0 = arith.constant 0 : i32
    %c0_i32_1 = arith.constant 0 : i32
    return %c0_i32, %c0_i32_0 : i32, i32
  }
  func.func @transform_3(%arg0: i32) -> (i32, i32, i32) {
    %c0_i32 = arith.constant 0 : i32
    %c0_i32_0 = arith.constant 0 : i32
    %c0_i32_1 = arith.constant 0 : i32
    %c0_i32_2 = arith.constant 0 : i32
    return %c0_i32, %c0_i32_0, %c0_i32_1 : i32, i32, i32
  }
  func.func @transform_4(%arg0: i32) -> (i32, i32) {
    %c0_i32 = arith.constant 0 : i32
    %c0_i32_0 = arith.constant 0 : i32
    %c0_i32_1 = arith.constant 0 : i32
    return %c0_i32, %c0_i32_0 : i32, i32
  }
  func.func @transform_5(%arg0: i32) -> (i32, i32, i32) {
    %c0_i32 = arith.constant 0 : i32
    %c0_i32_0 = arith.constant 0 : i32
    %c0_i32_1 = arith.constant 0 : i32
    %c0_i32_2 = arith.constant 0 : i32
    return %c0_i32, %c0_i32_0, %c0_i32_1 : i32, i32, i32
  }
  func.func @transform_6(%arg0: i32) -> (i32, i32) {
    %c0_i32 = arith.constant 0 : i32
    %c0_i32_0 = arith.constant 0 : i32
    %c0_i32_1 = arith.constant 0 : i32
    return %c0_i32, %c0_i32_0 : i32, i32
  }
  func.func @transform_7(%arg0: i32) -> (i32, i32, i32) {
    %c0_i32 = arith.constant 0 : i32
    %c0_i32_0 = arith.constant 0 : i32
    %c0_i32_1 = arith.constant 0 : i32
    %c0_i32_2 = arith.constant 0 : i32
    return %c0_i32, %c0_i32_0, %c0_i32_1 : i32, i32, i32
  }
  func.func @transform_8(%arg0: i32) -> (i32, i32) {
    %c0_i32 = arith.constant 0 : i32
    %c0_i32_0 = arith.constant 0 : i32
    %c0_i32_1 = arith.constant 0 : i32
    return %c0_i32, %c0_i32_0 : i32, i32
  }
  func.func @transform_9(%arg0: i32) -> (i32, i32, i32) {
    %c0_i32 = arith.constant 0 : i32
    %c0_i32_0 = arith.constant 0 : i32
    %c0_i32_1 = arith.constant 0 : i32
    %c0_i32_2 = arith.constant 0 : i32
    return %c0_i32, %c0_i32_0, %c0_i32_1 : i32, i32, i32
  }
  func.func @transform_10(%arg0: i32) -> (i32, i32) {
    %c0_i32 = arith.constant 0 : i32
    %c0_i32_0 = arith.constant 0 : i32
    %c0_i32_1 = arith.constant 0 : i32
    return %c0_i32, %c0_i32_0 : i32, i32
  }
  func.func @transform_11(%arg0: i32) -> (i32, i32, i32) {
    %c0_i32 = arith.constant 0 : i32
    %c0_i32_0 = arith.constant 0 : i32
    %c0_i32_1 = arith.constant 0 : i32
    %c0_i32_2 = arith.constant 0 : i32
    return %c0_i32, %c0_i32_0, %c0_i32_1 : i32, i32, i32
  }
  func.func @transform_12(%arg0: i32) -> (i32, i32) {
    %c0_i32 = arith.constant 0 : i32
    %c0_i32_0 = arith.constant 0 : i32
    %c0_i32_1 = arith.constant 0 : i32
    return %c0_i32, %c0_i32_0 : i32, i32
  }
  func.func @transform_13(%arg0: i32) -> (i32, i32, i32) {
    %c0_i32 = arith.constant 0 : i32
    %c0_i32_0 = arith.constant 0 : i32
    %c0_i32_1 = arith.constant 0 : i32
    %c0_i32_2 = arith.constant 0 : i32
    return %c0_i32, %c0_i32_0, %c0_i32_1 : i32, i32, i32
  }
  func.func @transform_14(%arg0: i32) -> (i32, i32) {
    %c0_i32 = arith.constant 0 : i32
    %c0_i32_0 = arith.constant 0 : i32
    %c0_i32_1 = arith.constant 0 : i32
    return %c0_i32, %c0_i32_0 : i32, i32
  }
  func.func @transform_15(%arg0: i32) -> (i32, i32, i32) {
    %c0_i32 = arith.constant 0 : i32
    %c0_i32_0 = arith.constant 0 : i32
    %c0_i32_1 = arith.constant 0 : i32
    %c0_i32_2 = arith.constant 0 : i32
    return %c0_i32, %c0_i32_0, %c0_i32_1 : i32, i32, i32
  }
  func.func @transform_16(%arg0: i32) -> (i32, i32) {
    %c0_i32 = arith.constant 0 : i32
    %c0_i32_0 = arith.constant 0 : i32
    %c0_i32_1 = arith.constant 0 : i32
    return %c0_i32, %c0_i32_0 : i32, i32
  }
  func.func @transform_17(%arg0: i32) -> (i32, i32) {
    %c0_i32 = arith.constant 0 : i32
    %c0_i32_0 = arith.constant 0 : i32
    %c0_i32_1 = arith.constant 0 : i32
    return %c0_i32, %c0_i32_0 : i32, i32
  }
  func.func @transform_18(%arg0: i32) -> (i32, i32) {
    %c0_i32 = arith.constant 0 : i32
    %c0_i32_0 = arith.constant 0 : i32
    %c0_i32_1 = arith.constant 0 : i32
    return %c0_i32, %c0_i32_0 : i32, i32
  }
  func.func @transform_19(%arg0: i32) -> (i32, i32) {
    %c0_i32 = arith.constant 0 : i32
    %c0_i32_0 = arith.constant 0 : i32
    %c0_i32_1 = arith.constant 0 : i32
    return %c0_i32, %c0_i32_0 : i32, i32
  }
  func.func @transform_20(%arg0: i32) -> (i32, i32) {
    %c0_i32 = arith.constant 0 : i32
    %c0_i32_0 = arith.constant 0 : i32
    %c0_i32_1 = arith.constant 0 : i32
    return %c0_i32, %c0_i32_0 : i32, i32
  }
  func.func @transform_21(%arg0: i32) -> (i32, i32) {
    %c0_i32 = arith.constant 0 : i32
    %c0_i32_0 = arith.constant 0 : i32
    %c0_i32_1 = arith.constant 0 : i32
    return %c0_i32, %c0_i32_0 : i32, i32
  }
  func.func @transform_22(%arg0: i32) -> (i32, i32, i32) {
    %c0_i32 = arith.constant 0 : i32
    %c0_i32_0 = arith.constant 0 : i32
    %c0_i32_1 = arith.constant 0 : i32
    return %arg0, %c0_i32, %c0_i32_0 : i32, i32, i32
  }
}

</mosaic_0001>

<bundles_post_ra>
// kernel: pretrained_backbone_forward.1
= control target key start
LH: loop header
LB: loop body
LE: loop exit
PB: predicated region body
PF: predicated region fallthrough
CT: control target
= control target key end

     0   :  { %s30028_s0 = inlined_call_operand.vmem [shape: bf16[2,256,27], index: 0, kind: input, shape index: {}]   ;;  %s30029_s1 = inlined_call_operand.vmem [shape: bf16[27,64], index: 1, kind: input, shape index: {}]   ;;  %s30030_s2 = inlined_call_operand.vmem [shape: f32[1,64], index: 2, kind: input, shape index: {}]   ;;  %s30031_s3 = inlined_call_operand.vmem [shape: bf16[9,64,64], index: 3, kind: input, shape index: {}]   ;;  %s30032_s4 = inlined_call_operand.vmem [shape: f32[1,64], index: 4, kind: input, shape index: {}]   ;;  %s30033_s5 = inlined_call_operand.vmem [shape: bf16[9,64,128], index: 5, kind: input, shape index: {}]   ;;  %s30034_s6 = inlined_call_operand.vmem [shape: f32[1,128], index: 6, kind: input, shape index: {}]   ;;  %s30035_s7 = inlined_call_operand.vmem [shape: bf16[9,128,128], index: 7, kind: input, shape index: {}]   ;;  %s30036_s8 = inlined_call_operand.vmem [shape: f32[1,128], index: 8, kind: input, shape index: {}]   ;;  %s30037_s9 = inlined_call_operand.vmem [shape: bf16[9,128,256], index: 9, kind: input, shape index: {}]   ;;  %s30038_s10 = inlined_call_operand.vmem [shape: f32[1,256], index: 10, kind: input, shape index: {}]   ;;  %s30039_s11 = inlined_call_operand.vmem [shape: bf16[9,256,256], index: 11, kind: input, shape index: {}]   ;;  %s30040_s12 = inlined_call_operand.vmem [shape: f32[1,256], index: 12, kind: input, shape index: {}]   ;;  %s30041_s13 = inlined_call_operand.vmem [shape: bf16[9,256,256], index: 13, kind: input, shape index: {}]   ;;  %s30042_s14 = inlined_call_operand.vmem [shape: f32[1,256], index: 14, kind: input, shape index: {}]   ;;  %s30043_s15 = inlined_call_operand.vmem [shape: bf16[9,256,256], index: 15, kind: input, shape index: {}]   ;;  %s30044_s16 = inlined_call_operand.vmem [shape: f32[1,256], index: 16, kind: input, shape index: {}]   ;;  %s30045_s17 = inlined_call_operand.vmem [shape: bf16[256,2], index: 17, kind: input, shape index: {}]   ;;  %s30046_s18 = inlined_call_operand.vmem [shape: bf16[64,2], index: 18, kind: input, shape index: {}]   ;;  %s30047_s19 = inlined_call_operand.vmem [shape: bf16[16,2], index: 19, kind: input, shape index: {}]   ;;  %s30048_s20 = inlined_call_operand.vmem [shape: bf16[64,256], index: 20, kind: input, shape index: {}]   ;;  %s30049_s21 = inlined_call_operand.vmem [shape: bf16[16,64], index: 21, kind: input, shape index: {}]   ;;  %s30050_s22 = inlined_call_operand.vmem [shape: f32[2,16,256], index: 22, kind: output, shape index: {}]  }
   0x1   :  { %30085 = sst [smem:[#allocation28_spill]] %s30028_s0 }
   0x2   :  { %30086 = sst [smem:[#allocation29_spill]] %s30029_s1 }
   0x3   :  { %30087 = sst [smem:[#allocation30_spill]] %s30030_s2 }
   0x4   :  { %30088 = sst [smem:[#allocation31_spill]] %s30031_s3  ;;  %s24066_s3 = smov 0  }
   0x5   :  { %30089 = sst [smem:[#allocation32_spill]] %s30032_s4 }
   0x6   :  { %30090 = sst [smem:[#allocation33_spill]] %s30033_s5 }
   0x7   :  { %30091 = sst [smem:[#allocation34_spill]] %s30034_s6 }
   0x8 LB: > { %s17839_s28 = sadd.s32 4294967295, %s23943_s3   ;;  %p17843_p0 = scmp.ge.s32.totalorder %s23943_s3, 1  ;;  %s23943_s3 = sphi %s24066_s3, %s32_s3  }
   0x9   : > { %p612_p1 = scmp.lt.s32.totalorder %s23943_s3, 3 }
   0xb   : > { %p613_p2 = pnand %p17843_p0, %p612_p1 }
   0xd   : > { %616 = sbr.rel (%p613_p2) target bundleno = 5020 (0x139c), region = 108 }
  0x14   : > { %s30092_s4 = sld [smem:[#allocation29_spill]]  ;;  %vm893_vm0 = vcmask 1044480   ;;  %vm894_vm1 = vcmask 1045504   ;;  %p674_p3 = scmp.lt.s32.totalorder %s17839_s28, 1  ;;  %v23945_v2 = vmov 65535   ;;  %v30056_v4 = vmov 1  }
  0x15   : > { %v895_v3 = vsel %vm893_vm0, 4294967295, %v23945_v2  ;;  %22222 = vset.pattern.permute.xlu1 %v30056_v4  ;;  %v24084_v5 = vld [vmem:[%s30045_s17 + $0x8] sm:$0xf]  ;;  %v24089_v6 = vld [vmem:[%s30045_s17] sm:$0xf]  ;;  %22221 = vset.pattern.permute.xlu0 %v30056_v4  ;;  %s30093_s23 = sld [smem:[#allocation28_spill]] }
  0x16   : > { %v896_v7 = vsel %vm894_vm1, %v895_v3, 0  ;;  %s30169_s28 = smov (!%p674_p3, %s17839_s28), 1  ;;  %2374 = vperm.xlu1 %22222, %v24084_v5   ;;  %2352 = vperm.xlu0 %22221, %v24089_v6   ;;  %v24100_v9 = vld [vmem:[%s30045_s17 + $0xc] sm:$0xf]  ;;  %v24106_v10 = vld [vmem:[%s30045_s17 + $0x4] sm:$0xf] }
  0x17   : > { %s20438_s2 = sshll.u32 %s30169_s28, 7  ;;  %vm844_vm2 = vcmask 220160   ;;  %v24116_v11 = vld [vmem:[%s30045_s17 + $0x14] sm:$0xf]  ;;  %v24123_v13 = vld [vmem:[%s30045_s17 + $0x10] sm:$0xf] }
  0x18   : > { %v24136_v16 = vld [vmem:[%s30045_s17 + $0x1c] sm:$0xf]  ;;  %v24141_v17 = vld [vmem:[%s30045_s17 + $0x18] sm:$0xf]  ;;  %v24150_v20 = vld [vmem:[%s30045_s17 + $0x24] sm:$0xf] }
  0x19   : > { %v24155_v21 = vld [vmem:[%s30045_s17 + $0x20] sm:$0xf]  ;;  %v24164_v22 = vld [vmem:[%s30045_s17 + $0x2c] sm:$0xf]  ;;  %v24169_v23 = vld [vmem:[%s30045_s17 + $0x28] sm:$0xf] }
  0x1a   : > { %v22243_v0 = vld [vmem:[%s30092_s4] sm:$0xff]   ;;  %v22244_v1 = vld [vmem:[%s30092_s4 + $0x8] sm:$0x3f]   ;;  %2385 = vperm.xlu1 %22222, %v24100_v9   ;;  %2363 = vperm.xlu0 %22221, %v24106_v10   ;;  %v24178_v26 = vld [vmem:[%s30045_s17 + $0x34] sm:$0xf]  ;;  %vm685_vm3 = vcmask 523264  }
  0x1b   : > { %20863 = vmatprep.subr.bf16.mxu0 %v22243_v0  ;;  %v898_v8 = vand.u32 %v22244_v1, %v896_v7  ;;  %s24111_s1 = scalar_lea.vmem %s30093_s23, %s20438_s2  ;;  %v24183_v27 = vld [vmem:[%s30045_s17 + $0x30] sm:$0xf]  ;;  %v24192_v28 = vld [vmem:[%s30045_s17 + $0x3c] sm:$0xf]  ;;  %v24197_v29 = vld [vmem:[%s30045_s17 + $0x38] sm:$0xf] }
  0x1c   : > { %20864 = vmatpush3.bf16.msra.mxu0 %v22243_v0  ;;  %v22245_v12 = vld [vmem:[%s24111_s1] sm:$0xff]   ;;  %v22246_v14 = vld [vmem:[%s24111_s1 + $0x8] sm:$0xff]   ;;  %v22247_v15 = vld [vmem:[%s24111_s1 + $0x10] sm:$0xff]   ;;  %v23947_v55 = vmov 0.0   ;;  %v30054_v56 = vmov 0   ;;  %s30094_s6 = sld [smem:[#allocation31_spill]] }
  0x1d   : > { %20865 = vmatprep.subr.bf16.mxu0 %v898_v8  ;;  %20867 = vmatprep.mubr.msk.bf16.mxu0 %vm844_vm2, %v22245_v12  ;;  %v22248_v18 = vld [vmem:[%s24111_s1 + $0x18] sm:$0xff]   ;;  %v22249_v19 = vld [vmem:[%s24111_s1 + $0x20] sm:$0xff]   ;;  %v22250_v24 = vld [vmem:[%s24111_s1 + $0x28] sm:$0xff]   ;;  %689 = vst.msk [vmem:[#allocation2 + $0x118] sm:$0xff] %vm685_vm3, %v23947_v55  ;;  %s30101_s27 = sld [smem:[#allocation30_spill]]  ;;  %s30161_s30 = sld [smem:[#allocation32_spill]] }
  0x1e   : > { %2407 = vperm.xlu1 %22222, %v24116_v11   ;;  %2396 = vperm.xlu0 %22221, %v24123_v13   ;;  %v22251_v25 = vld [vmem:[%s24111_s1 + $0x30] sm:$0xff]   ;;  %v22252_v30 = vld [vmem:[%s24111_s1 + $0x38] sm:$0xff]   ;;  %v22253_v31 = vld [vmem:[%s24111_s1 + $0x40] sm:$0xff]   ;;  %690 = vst.msk [vmem:[#allocation2 + $0x120] sm:$0xff] %vm685_vm3, %v23947_v55  ;;  %s30162_s25 = sld [smem:[#allocation33_spill]]  ;;  %s30166_s23 = sld [smem:[#allocation34_spill]] }
  0x1f   : > { %v24206_v32 = vld [vmem:[%s30045_s17 + $0x44] sm:$0xf]  ;;  %v24211_v33 = vld [vmem:[%s30045_s17 + $0x40] sm:$0xf]  ;;  %v24217_v34 = vld [vmem:[%s30045_s17 + $0x4c] sm:$0xf] }
  0x20   : > { %20866 = vmatpush3.bf16.msra.mxu0 %v898_v8  ;;  %v24224_v35 = vld [vmem:[%s30045_s17 + $0x48] sm:$0xf]  ;;  %v22255_v37 = vld [vmem:[%s24111_s1 + $0x50] sm:$0xff]   ;;  %v24245_v40 = vld [vmem:[%s30045_s17 + $0x5c] sm:$0xf]  ;;  %691 = vst.msk [vmem:[#allocation2 + $0x128] sm:$0xff] %vm685_vm3, %v23947_v55 }
  0x21   : > { %v22254_v36 = vld [vmem:[%s24111_s1 + $0x48] sm:$0xff]   ;;  %v24232_v38 = vld [vmem:[%s30045_s17 + $0x54] sm:$0xf]  ;;  %v24238_v39 = vld [vmem:[%s30045_s17 + $0x50] sm:$0xf]  ;;  %686 = vst.msk [vmem:[#allocation2] sm:$0xff] %vm685_vm3, %v23947_v55 }
  0x22   : > { %2429 = vperm.xlu1 %22222, %v24136_v16   ;;  %2418 = vperm.xlu0 %22221, %v24141_v17   ;;  %v24252_v41 = vld [vmem:[%s30045_s17 + $0x58] sm:$0xf]  ;;  %v22257_v43 = vld [vmem:[%s24111_s1 + $0x60] sm:$0xff]   ;;  %v24273_v46 = vld [vmem:[%s30045_s17 + $0x6c] sm:$0xf]  ;;  %687 = vst.msk [vmem:[#allocation2 + $0x8] sm:$0xff] %vm685_vm3, %v23947_v55 }
  0x23   : > { %20868 = vmatmul.mubr.msk.bf16.vlgmr.msra.gmra.mrb[0].mxu0 %vm844_vm2, %v22246_v14  ;;  %v22256_v42 = vld [vmem:[%s24111_s1 + $0x58] sm:$0xff]   ;;  %v24260_v44 = vld [vmem:[%s30045_s17 + $0x64] sm:$0xf]  ;;  %v24266_v45 = vld [vmem:[%s30045_s17 + $0x60] sm:$0xf]  ;;  %688 = vst.msk [vmem:[#allocation2 + $0x10] sm:$0xff] %vm685_vm3, %v23947_v55 }
  0x24   : > { %20871 = vmatprep.mubr.msk.bf16.mxu0 %vm844_vm2, %v22247_v15  ;;  %v24280_v47 = vld [vmem:[%s30045_s17 + $0x68] sm:$0xf]  ;;  %v22259_v49 = vld [vmem:[%s24111_s1 + $0x70] sm:$0xff]   ;;  %v24301_v52 = vld [vmem:[%s30045_s17 + $0x7c] sm:$0xf]  ;;  %692 = vst.msk [vmem:[#allocation3] sm:$0xff] %vm685_vm3, %v23947_v55 }
  0x25   : > { %v22258_v48 = vld [vmem:[%s24111_s1 + $0x68] sm:$0xff]   ;;  %v24288_v50 = vld [vmem:[%s30045_s17 + $0x74] sm:$0xf]  ;;  %v24294_v51 = vld [vmem:[%s30045_s17 + $0x70] sm:$0xf]  ;;  %693 = vst.msk [vmem:[#allocation3 + $0x8] sm:$0xff] %vm685_vm3, %v23947_v55 }
  0x26   : > { %2451 = vperm.xlu1 %22222, %v24150_v20   ;;  %2440 = vperm.xlu0 %22221, %v24155_v21   ;;  %v24308_v53 = vld [vmem:[%s30045_s17 + $0x78] sm:$0xf]  ;;  %694 = vst.msk [vmem:[#allocation3 + $0x50] sm:$0xff] %vm685_vm3, %v23947_v55  ;;  %695 = vst.msk [vmem:[#allocation3 + $0x58] sm:$0xff] %vm685_vm3, %v23947_v55  ;;  %v22261_v57 = vld [vmem:[%s30094_s6] sm:$0xff]   ;;  %vm23950_vm4 = vmmov 0  }
  0x27   : > { %v22260_v54 = vld [vmem:[%s24111_s1 + $0x78] sm:$0xff]   ;;  %696 = vst [vmem:[#allocation4] sm:$0xff] %v23947_v55  ;;  %697 = vst [vmem:[#allocation4 + $0x8] sm:$0xff] %v23947_v55  ;;  %v22262_v58 = vld [vmem:[%s30094_s6 + $0x40] sm:$0xff]   ;;  %20899 = vmatprep.subr.bf16.mxu0 %v22261_v57  ;;  %vm10110_vm5 = vsmask.f32 6400 }
  0x28   : > { %698 = vst [vmem:[#allocation4 + $0x50] sm:$0xff] %v23947_v55  ;;  %699 = vst [vmem:[#allocation4 + $0x58] sm:$0xff] %v23947_v55  ;;  %20979 = vmatprep.subr.bf16.mxu1 %v22262_v58  ;;  %20900 = vmatpush3.bf16.msra.mxu0 %v22261_v57  ;;  %v22263_v59 = vld [vmem:[%s30094_s6 + $0x8] sm:$0xff]   ;;  %v22265_v61 = vld [vmem:[%s30094_s6 + $0x10] sm:$0xff]   ;;  %vm10989_vm6 = vsmask.f32 4352 }
  0x29   : > { %700 = vst [vmem:[#allocation5] sm:$0xff] %v23947_v55  ;;  %701 = vst [vmem:[#allocation5 + $0x18] sm:$0xff] %v23947_v55  ;;  %20980 = vmatpush3.bf16.msra.mxu1 %v22262_v58  ;;  %v22264_v60 = vld [vmem:[%s30094_s6 + $0x48] sm:$0xff]   ;;  %20901 = vmatprep.subr.bf16.mxu0 %v22263_v59  ;;  %v22266_v62 = vld [vmem:[%s30094_s6 + $0x50] sm:$0xff]   ;;  %vm11528_vm7 = vsmask.f32 7424 }
  0x2a   : > { %2473 = vperm.xlu1 %22222, %v24164_v22   ;;  %2462 = vperm.xlu0 %22221, %v24169_v23   ;;  %702 = vst [vmem:[#allocation6] sm:$0xff] %v23947_v55  ;;  %703 = vst [vmem:[#allocation6 + $0x8] sm:$0xff] %v23947_v55  ;;  %v22267_v63 = vld [vmem:[%s30094_s6 + $0x18] sm:$0xff]   ;;  %v5420_v1 = vld [vmem:[%s30046_s18] sm:$0xf]  ;;  %s20439_s5 = sshll.u32 %s30169_s28, 5 }
  0x2b   : > { %20872 = vmatmul.mubr.msk.bf16.gmra.mrb[4].mxu0 %vm844_vm2, %v22248_v18  ;;  %704 = vst [vmem:[#allocation6 + $0x30] sm:$0xff] %v23947_v55  ;;  %705 = vst [vmem:[#allocation6 + $0x38] sm:$0xff] %v23947_v55  ;;  %20981 = vmatprep.subr.bf16.mxu1 %v22264_v60  ;;  %v22268_v0 = vld [vmem:[%s30094_s6 + $0x58] sm:$0xff]   ;;  %v5421_v2 = vld [vmem:[%s30046_s18 + $0x4] sm:$0xf]  ;;  %s683_s26 = scalar_lea.vmem %s30050_s22, %s20439_s5 }
  0x2c   : > { %20875 = vmatprep.mubr.msk.bf16.mxu0 %vm844_vm2, %v22249_v19  ;;  %706 = vst [vmem:[#allocation7] sm:$0xff] %v23947_v55  ;;  %707 = vst [vmem:[#allocation7 + $0x8] sm:$0xff] %v23947_v55  ;;  %20902 = vmatpush3.bf16.msra.mxu0 %v22263_v59  ;;  %v5423_v7 = vld [vmem:[%s30046_s18 + $0xc] sm:$0xf]  ;;  %v5426_v14 = vld [vmem:[%s30046_s18 + $0x18] sm:$0xf] }
  0x2d   : > { %708 = vst [vmem:[#allocation7 + $0x30] sm:$0xff] %v23947_v55  ;;  %709 = vst [vmem:[#allocation7 + $0x38] sm:$0xff] %v23947_v55  ;;  %20982 = vmatpush3.bf16.msra.mxu1 %v22264_v60  ;;  %20903 = vmatprep.subr.bf16.mxu0 %v22265_v61  ;;  %v5427_v15 = vld [vmem:[%s30046_s18 + $0x1c] sm:$0xf]  ;;  %vm10696_vm8 = vsmask.f32 5376 }
  0x2e   : > { %2495 = vperm.xlu1 %22222, %v24178_v26   ;;  %2484 = vperm.xlu0 %22221, %v24183_v27  }
  0x2f   : > { %20983 = vmatprep.subr.bf16.mxu1 %v22266_v62 }
  0x30   : > { %20904 = vmatpush3.bf16.msra.mxu0 %v22265_v61 }
  0x31   : > { %20984 = vmatpush3.bf16.msra.mxu1 %v22266_v62  ;;  %20905 = vmatprep.subr.bf16.mxu0 %v22267_v63 }
  0x32   : > { %2517 = vperm.xlu1 %22222, %v24192_v28   ;;  %2506 = vperm.xlu0 %22221, %v24197_v29  }
  0x33   : > { %20876 = vmatmul.mubr.msk.bf16.gmra.mrb[8].mxu0 %vm844_vm2, %v22250_v24  ;;  %20985 = vmatprep.subr.bf16.mxu1 %v22268_v0 }
  0x34   : > { %20879 = vmatprep.mubr.msk.bf16.mxu0 %vm844_vm2, %v22251_v25  ;;  %20906 = vmatpush3.bf16.msra.mxu0 %v22267_v63 }
  0x35   : > { %20986 = vmatpush3.bf16.msra.mxu1 %v22268_v0 }
  0x36   : > { %2539 = vperm.xlu1 %22222, %v24206_v32   ;;  %2528 = vperm.xlu0 %22221, %v24211_v33  }
  0x3a   : > { %2561 = vperm.xlu1 %22222, %v24217_v34   ;;  %2550 = vperm.xlu0 %22221, %v24224_v35  }
  0x3b   : > { %20880 = vmatmul.mubr.msk.bf16.gmra.mrb[12].mxu0 %vm844_vm2, %v22252_v30 }
  0x3c   : > { %20883 = vmatprep.mubr.msk.bf16.mxu0 %vm844_vm2, %v22253_v31  ;;  %v1220_v31 = vlaneseq }
  0x3e   : > { %2583 = vperm.xlu1 %22222, %v24232_v38   ;;  %2572 = vperm.xlu0 %22221, %v24238_v39  }
  0x42   : > { %2605 = vperm.xlu1 %22222, %v24245_v40   ;;  %2594 = vperm.xlu0 %22221, %v24252_v41  }
  0x43   : > { %20884 = vmatmul.mubr.msk.bf16.gmra.mrb[16].mxu0 %vm844_vm2, %v22254_v36 }
  0x44   : > { %20887 = vmatprep.mubr.msk.bf16.mxu0 %vm844_vm2, %v22255_v37 }
  0x46   : > { %2627 = vperm.xlu1 %22222, %v24260_v44   ;;  %2616 = vperm.xlu0 %22221, %v24266_v45  }
  0x4a   : > { %2649 = vperm.xlu1 %22222, %v24273_v46   ;;  %2638 = vperm.xlu0 %22221, %v24280_v47  }
  0x4b   : > { %20888 = vmatmul.mubr.msk.bf16.gmra.mrb[20].mxu0 %vm844_vm2, %v22256_v42 }
  0x4c   : > { %20891 = vmatprep.mubr.msk.bf16.mxu0 %vm844_vm2, %v22257_v43 }
  0x4e   : > { %2671 = vperm.xlu1 %22222, %v24288_v50   ;;  %2660 = vperm.xlu0 %22221, %v24294_v51  }
  0x52   : > { %2693 = vperm.xlu1 %22222, %v24301_v52   ;;  %2682 = vperm.xlu0 %22221, %v24308_v53  }
  0x53   : > { %20892 = vmatmul.mubr.msk.bf16.gmra.mrb[24].mxu0 %vm844_vm2, %v22258_v48 }
  0x54   : > { %20895 = vmatprep.mubr.msk.bf16.mxu0 %vm844_vm2, %v22259_v49 }
  0x56   : > { %22224 = vset.pattern.permute.xlu1 %v30054_v56  ;;  %22223 = vset.pattern.permute.xlu0 %v30054_v56 }
  0x57   : > { %1226 = vperm.xlu1 %22224, %v24106_v10   ;;  %1214 = vperm.xlu0 %22223, %v24089_v6   ;;  %v5422_v6 = vld [vmem:[%s30046_s18 + $0x8] sm:$0xf]  ;;  %v5424_v10 = vld [vmem:[%s30046_s18 + $0x10] sm:$0xf] }
  0x5b   : > { %20896 = vmatmul.mubr.msk.bf16.gmra.mrb[28].mxu0 %vm844_vm2, %v22260_v54  ;;  %1238 = vperm.xlu1 %22224, %v24084_v5  }
  0x5c   : > { %1250 = vperm.xlu0 %22223, %v24100_v9  }
  0x5f   : > { %1262 = vperm.xlu1 %22224, %v24123_v13  }
  0x60   : > { %1274 = vperm.xlu0 %22223, %v24116_v11   ;;  %v5425_v11 = vld [vmem:[%s30046_s18 + $0x14] sm:$0xf] }
  0x63   : > { %1286 = vperm.xlu1 %22224, %v24141_v17  }
  0x64   : > { %1298 = vperm.xlu0 %22223, %v24136_v16  }
  0x67   : > { %1310 = vperm.xlu1 %22224, %v24155_v21  }
  0x68   : > { %1322 = vperm.xlu0 %22223, %v24150_v20  }
  0x6b   : > { %1334 = vperm.xlu1 %22224, %v24169_v23  }
  0x6c   : > { %1346 = vperm.xlu0 %22223, %v24164_v22   ;;  %v24436_v22 = vld [vmem:[%s30094_s6 + $0x60] sm:$0xff]  }
  0x6d   : > { %21019 = vmatprep.subr.bf16.mxu1 %v24436_v22 }
  0x6f   : > { %1358 = vperm.xlu1 %22224, %v24183_v27   ;;  %v24450_v27 = vld [vmem:[%s30094_s6 + $0x20] sm:$0xff]  }
  0x70   : > { %1370 = vperm.xlu0 %22223, %v24178_v26   ;;  %20939 = vmatprep.subr.bf16.mxu0 %v24450_v27 }
  0x73   : > { %1382 = vperm.xlu1 %22224, %v24197_v29   ;;  %v23949_v29 = vmov 839922192  }
  0x74   : > { %1394 = vperm.xlu0 %22223, %v24192_v28   ;;  %v1218_v30 = vunpack.c.l.s4 %v23949_v29 }
  0x77   : > { %1406 = vperm.xlu1 %22224, %v24211_v33  }
  0x78   : > { %1418 = vperm.xlu0 %22223, %v24206_v32  }
  0x7b   : > { %1430 = vperm.xlu1 %22224, %v24224_v35   ;;  %v24460_v35 = vshrl.u32 %v1220_v31, 7 }
  0x7c   : > { %1442 = vperm.xlu0 %22223, %v24217_v34   ;;  %v1219_v34 = vunpack.c.0.s8 %v1218_v30 }
  0x7d   : > { %30095 = vst [vmem:[#allocation8_spill] sm:$0xff] %v24460_v35 }
  0x7f   : > { %1454 = vperm.xlu1 %22224, %v24238_v39  }
  0x80   : > { %1466 = vperm.xlu0 %22223, %v24232_v38   ;;  %v24468_v38 = vsub.s32 %v1219_v34, %v24460_v35 }
  0x82   : > { %30096 = vst [vmem:[#allocation9_spill] sm:$0xff] %v24468_v38 }
  0x83   : > { %1478 = vperm.xlu1 %22224, %v24252_v41  }
  0x84   : > { %1490 = vperm.xlu0 %22223, %v24245_v40  }
  0x87   : > { %1502 = vperm.xlu1 %22224, %v24266_v45  }
  0x88   : > { %1514 = vperm.xlu0 %22223, %v24260_v44  }
  0x8b   : > { %1526 = vperm.xlu1 %22224, %v24280_v47  }
  0x8c   : > { %1538 = vperm.xlu0 %22223, %v24273_v46  }
  0x8f   : > { %1550 = vperm.xlu1 %22224, %v24294_v51  }
  0x90   : > { %1562 = vperm.xlu0 %22223, %v24288_v50  }
  0x93   : > { %1574 = vperm.xlu1 %22224, %v24308_v53  }
  0x94   : > { %1586 = vperm.xlu0 %22223, %v24301_v52  }
  0x95   : > { %v24389_v3 = vpop.permute.xlu1 %2374  ;;  %v24391_v5 = vpop.permute.xlu0 %2352 }
  0x97   : > { %5449 = vperm.xlu1 %22224, %v5420_v1  }
  0x98   : > { %5461 = vperm.xlu0 %22223, %v5421_v2  }
  0x99   : > { %v24399_v8 = vpop.permute.xlu1 %2385  ;;  %v24401_v9 = vpop.permute.xlu0 %2363 }
  0x9b   : > { %5473 = vperm.xlu1 %22224, %v5422_v6  }
  0x9c   : > { %5485 = vperm.xlu0 %22223, %v5423_v7  }
  0x9d   : > { %v24409_v12 = vpop.permute.xlu1 %2407  ;;  %v24411_v13 = vpop.permute.xlu0 %2396 }
  0x9f   : > { %5497 = vperm.xlu1 %22224, %v5424_v10  }
  0xa0   : > { %5509 = vperm.xlu0 %22223, %v5425_v11  }
  0xa1   : > { %v24419_v16 = vpop.permute.xlu1 %2429  ;;  %v24421_v17 = vpop.permute.xlu0 %2418 }
  0xa3   : > { %5521 = vperm.xlu1 %22224, %v5426_v14  }
  0xa4   : > { %5533 = vperm.xlu0 %22223, %v5427_v15  }
  0xa5   : > { %v24423_v18 = vpop.permute.xlu1 %2451  ;;  %v24425_v19 = vpop.permute.xlu0 %2440 }
  0xa7   : > { %22225 = vset.pattern.permute.xlu1 %v30056_v4 }
  0xa8   : > { %5831 = vperm.xlu1 %22225, %v5420_v1   ;;  %22226 = vset.pattern.permute.xlu0 %v30056_v4  ;;  %v1164_v1 = vld [vmem:[#allocation2 + $0x7] sm:$0xff] }
  0xa9   : > { %v24429_v20 = vpop.permute.xlu1 %2473  ;;  %5842 = vperm.xlu0 %22226, %v5421_v2   ;;  %v24431_v21 = vpop.permute.xlu0 %2462  ;;  %v1165_v2 = vld [vmem:[#allocation2 + $0xf] sm:$0xff] }
  0xac   : > { %5853 = vperm.xlu1 %22225, %v5422_v6  }
  0xad   : > { %v24439_v23 = vpop.permute.xlu1 %2495  ;;  %5875 = vperm.xlu0 %22226, %v5424_v10   ;;  %v24441_v24 = vpop.permute.xlu0 %2484 }
  0xb0   : > { %5864 = vperm.xlu1 %22225, %v5423_v7  }
  0xb1   : > { %v24443_v25 = vpop.permute.xlu1 %2517  ;;  %5897 = vperm.xlu0 %22226, %v5426_v14   ;;  %v24445_v26 = vpop.permute.xlu0 %2506  ;;  %v1196_v14 = vpack.c.bf16 %v1165_v2, %v1164_v1 }
  0xb4   : > { %5886 = vperm.xlu1 %22225, %v5425_v11  }
  0xb5   : > { %v24452_v28 = vpop.permute.xlu1 %2539  ;;  %22227 = vset.pattern.permute.xlu0 %v30054_v56  ;;  %v24456_v32 = vpop.permute.xlu0 %2528 }
  0xb8   : > { %5908 = vperm.xlu1 %22225, %v5427_v15  }
  0xb9   : > { %v24458_v33 = vpop.permute.xlu1 %2561  ;;  %v24462_v36 = vpop.permute.xlu0 %2550 }
  0xbc   : > { %22228 = vset.pattern.permute.xlu1 %v30054_v56 }
  0xbd   : > { %v24465_v37 = vpop.permute.xlu1 %2583  ;;  %v24470_v39 = vpop.permute.xlu0 %2572 }
  0xc1   : > { %v2606_v40 = vpop.permute.xlu1 %2605  ;;  %v2595_v42 = vpop.permute.xlu0 %2594 }
  0xc2   : > { %v2614_v41 = vrot.slane %v2606_v40, %v24468_v38  ;;  %v2603_v43 = vrot.slane %v2595_v42, %v24468_v38 }
  0xc4   : > { %v24474_v44 = vcombine.low %v2603_v43, %v2614_v41 }
  0xc5   : > { %v2628_v45 = vpop.permute.xlu1 %2627  ;;  %v2617_v47 = vpop.permute.xlu0 %2616 }
  0xc6   : > { %30097 = vst [vmem:[#allocation10_spill] sm:$0xff] %v24474_v44  ;;  %v2636_v46 = vrot.slane %v2628_v45, %v24468_v38  ;;  %v2625_v48 = vrot.slane %v2617_v47, %v24468_v38 }
  0xc8   : > { %v24478_v49 = vcombine.low %v2625_v48, %v2636_v46  ;;  %v24507_v46 = vld [vmem:[%s30101_s27] ss:$0 sm:$0xff] }
  0xc9   : > { %v2650_v50 = vpop.permute.xlu1 %2649  ;;  %v2639_v52 = vpop.permute.xlu0 %2638 }
  0xca   : > { %30098 = vst [vmem:[#allocation11_spill] sm:$0xff] %v24478_v49  ;;  %v2658_v51 = vrot.slane %v2650_v50, %v24468_v38  ;;  %v2647_v53 = vrot.slane %v2639_v52, %v24468_v38 }
  0xcc   : > { %v24482_v54 = vcombine.low %v2647_v53, %v2658_v51 }
  0xcd   : > { %v2672_v55 = vpop.permute.xlu1 %2671  ;;  %v2661_v58 = vpop.permute.xlu0 %2660 }
  0xce   : > { %30099 = vst [vmem:[#allocation12_spill] sm:$0xff] %v24482_v54  ;;  %v2680_v57 = vrot.slane %v2672_v55, %v24468_v38  ;;  %v2669_v59 = vrot.slane %v2661_v58, %v24468_v38 }
  0xd0   : > { %v24486_v60 = vcombine.low %v2669_v59, %v2680_v57 }
  0xd1   : > { %v2694_v61 = vpop.permute.xlu1 %2693  ;;  %v2683_v63 = vpop.permute.xlu0 %2682 }
  0xd2   : > { %v2702_v62 = vrot.slane %v2694_v61, %v24468_v38  ;;  %v2691_v0 = vrot.slane %v2683_v63, %v24468_v38 }
  0xd4   : > { %v24490_v6 = vcombine.low %v2691_v0, %v2702_v62 }
  0xd6   : > { %30100 = vst [vmem:[#allocation13_spill] sm:$0xff] %v24490_v6  ;;  %v1227_v7 = vpop.permute.xlu1 %1226  ;;  %v1215_v11 = vpop.permute.xlu0 %1214 }
  0xd7   : > { %v1235_v10 = vrot.slane %v1227_v7, %v24468_v38  ;;  %v1223_v15 = vrot.slane %v1215_v11, %v24468_v38  ;;  %v2383_v7 = vrot.slane %v24389_v3, %v24468_v38  ;;  %v2303_v3 = vld [vmem:[#allocation2 + $0x9] sm:$0xff] }
  0xd9   : > { %v24494_v29 = vcombine.low %v1223_v15, %v1235_v10  ;;  %v2361_v10 = vrot.slane %v24391_v5, %v24468_v38  ;;  %v2394_v15 = vrot.slane %v24399_v8, %v24468_v38 }
  0xda   : > { %v1239_v30 = vpop.permute.xlu1 %1238 }
  0xdb   : > { %v1251_v31 = vpop.permute.xlu0 %1250  ;;  %v1692_v34 = vmul.bf16 %v24494_v29, %v1196_v14 }
  0xdd   : > { %20907 = vmatprep.mubr.msk.bf16.mxu0 %vm685_vm3, %v1692_v34  ;;  %v2372_v34 = vrot.slane %v24401_v9, %v24468_v38 }
  0xde   : > { %v1263_v40 = vpop.permute.xlu1 %1262 }
  0xdf   : > { %v1275_v41 = vpop.permute.xlu0 %1274  ;;  %v1271_v5 = vrot.slane %v1263_v40, %v24468_v38 }
  0xe2   : > { %v24498_v42 = vpop.permute.xlu1 %1286 }
  0xe3   : > { %v24500_v43 = vpop.permute.xlu0 %1298 }
  0xe6   : > { %v24502_v45 = vpop.permute.xlu1 %1310 }
  0xe7   : > { %v24509_v47 = vpop.permute.xlu0 %1322 }
  0xea   : > { %v24512_v52 = vpop.permute.xlu1 %1334 }
  0xeb   : > { %v24515_v57 = vpop.permute.xlu0 %1346 }
  0xee   : > { %v24522_v2 = vpop.permute.xlu1 %1358 }
  0xef   : > { %v24529_v14 = vpop.permute.xlu0 %1370 }
  0xf6   : > { %v20869_v48 = vpop.f32.mrb[0].mxu0 }
  0xf7   : > { %v943_v50 = vadd.f32 %v20869_v48, %v24507_v46  ;;  %v934_v51 = vpop.f32.mrb[1].mxu0  ;;  %v1247_v48 = vrot.slane %v1239_v30, %v24468_v38 }
  0xf8   : > { %v935_v53 = vadd.f32 %v24507_v46, %v934_v51  ;;  %v20870_v55 = vpop.f32.mrb[2].mxu0 }
  0xf9   : > { %v1063_v58 = vmax.f32 %v943_v50, 0.0  ;;  %v946_v59 = vadd.f32 %v20870_v55, %v24507_v46  ;;  %v937_v61 = vpop.f32.mrb[3].mxu0  ;;  %v1283_v55 = vrot.slane %v1275_v41, %v24468_v38 }
  0xfa   : > { %v1061_v62 = vmax.f32 %v935_v53, 0.0  ;;  %v938_v63 = vadd.f32 %v24507_v46, %v937_v61  ;;  %v1259_v53 = vrot.slane %v1251_v31, %v24468_v38 }
  0xfb   : > { %1095 = vst.msk [vmem:[#allocation2 + $0x28] sm:$0xff] %vm685_vm3, %v1063_v58  ;;  %v1064_v0 = vmax.f32 %v946_v59, 0.0 }
  0xfc   : > { %1093 = vst.msk [vmem:[#allocation2 + $0x18] sm:$0xff] %vm685_vm3, %v1061_v62  ;;  %v1062_v1 = vmax.f32 %v938_v63, 0.0  ;;  %v24543_v63 = vcombine.low %v2383_v7, %v2394_v15  ;;  %v24550_v41 = vcombine.low %v1247_v48, %v1259_v53  ;;  %v24555_v7 = vpop.permute.xlu0 %1394  ;;  %v2405_v15 = vrot.slane %v24411_v13, %v24468_v38 }
  0xfd   : > { %1096 = vst.msk [vmem:[#allocation2 + $0x30] sm:$0xff] %vm685_vm3, %v1064_v0  ;;  %v24545_v0 = vcombine.low %v2361_v10, %v2372_v34  ;;  %v2416_v10 = vrot.slane %v24409_v12, %v24468_v38  ;;  %v2438_v34 = vrot.slane %v24419_v16, %v24468_v38  ;;  %v2427_v48 = vrot.slane %v24421_v17, %v24468_v38 }
  0xfe   : > { %1094 = vst.msk [vmem:[#allocation2 + $0x20] sm:$0xff] %vm685_vm3, %v1062_v1  ;;  %v20873_v11 = vpop.f32.mrb[4].mxu0  ;;  %v24548_v1 = vpop.permute.xlu1 %1382  ;;  %v1307_v17 = vrot.slane %v24500_v43, %v24468_v38 }
  0xff   : > { %v959_v50 = vadd.f32 %v20873_v11, %v24507_v46  ;;  %v950_v51 = vpop.f32.mrb[5].mxu0  ;;  %v24607_v56 = vcombine.low %v2427_v48, %v2438_v34 }
 0x100   : > { %v951_v58 = vadd.f32 %v24507_v46, %v950_v51  ;;  %v20874_v59 = vpop.f32.mrb[6].mxu0 }
 0x101   : > { %v1067_v61 = vmax.f32 %v959_v50, 0.0  ;;  %v962_v8 = vadd.f32 %v20874_v59, %v24507_v46  ;;  %v953_v62 = vpop.f32.mrb[7].mxu0  ;;  %v24552_v50 = vcombine.low %v1271_v5, %v1283_v55  ;;  %30102 = vst [vmem:[#allocation14_spill] sm:$0xff] %v24607_v56 }
 0x102   : > { %v1065_v9 = vmax.f32 %v951_v58, 0.0  ;;  %v954_v30 = vadd.f32 %v24507_v46, %v953_v62  ;;  %v1319_v62 = vrot.slane %v24502_v45, %v24468_v38  ;;  %v24590_v45 = vld [vmem:[%s30094_s6 + $0x68] sm:$0xff]  }
 0x103   : > { %1099 = vst.msk [vmem:[#allocation2 + $0x48] sm:$0xff] %vm685_vm3, %v1067_v61  ;;  %v1068_v31 = vmax.f32 %v962_v8, 0.0  ;;  %v2304_v40 = vld [vmem:[#allocation2 + $0x11] sm:$0xff]  ;;  %v1295_v61 = vrot.slane %v24498_v42, %v24468_v38 }
 0x104   : > { %v1169_v11 = vld [vmem:[#allocation2 + $0x2f] sm:$0xff]  ;;  %1097 = vst.msk [vmem:[#allocation2 + $0x38] sm:$0xff] %vm685_vm3, %v1065_v9  ;;  %v1066_v51 = vmax.f32 %v954_v30, 0.0  ;;  %v2335_v58 = vpack.c.bf16 %v2304_v40, %v2303_v3  ;;  %v1166_v59 = vld [vmem:[#allocation2 + $0x17] sm:$0xff]  ;;  %v1331_v40 = vrot.slane %v24509_v47, %v24468_v38 }
 0x105   : > { %v1168_v53 = vld [vmem:[#allocation2 + $0x27] sm:$0xff]  ;;  %1100 = vst.msk [vmem:[#allocation2 + $0x50] sm:$0xff] %vm685_vm3, %v1068_v31  ;;  %v1167_v5 = vld [vmem:[#allocation2 + $0x1f] sm:$0xff] }
 0x106   : > { %v2305_v3 = vld [vmem:[#allocation2 + $0x19] sm:$0xff]  ;;  %v24566_v55 = vpack.c.bf16 %v1169_v11, %v1168_v53  ;;  %1098 = vst.msk [vmem:[#allocation2 + $0x40] sm:$0xff] %vm685_vm3, %v1066_v51  ;;  %v20877_v12 = vpop.f32.mrb[8].mxu0  ;;  %v2799_v13 = vmul.bf16 %v24545_v0, %v2335_v58  ;;  %v24572_v8 = vpack.c.bf16 %v1167_v5, %v1166_v59  ;;  %v2306_v16 = vld [vmem:[#allocation2 + $0x21] sm:$0xff]  ;;  %v24618_v34 = vcombine.low %v1319_v62, %v1331_v40 }
 0x107   : > { %v975_v9 = vadd.f32 %v20877_v12, %v24507_v46  ;;  %v966_v30 = vpop.f32.mrb[9].mxu0  ;;  %v2336_v31 = vpack.c.bf16 %v2306_v16, %v2305_v3  ;;  %v24595_v58 = vld [vmem:[%s30094_s6 + $0x28] sm:$0xff]   ;;  %v24599_v3 = vpop.permute.xlu1 %1406  ;;  %v24601_v12 = vcombine.low %v2405_v15, %v2416_v10 }
 0x108   : > { %v1694_v42 = vmul.bf16 %v24552_v50, %v24566_v55  ;;  %v967_v11 = vadd.f32 %v24507_v46, %v966_v30  ;;  %v20878_v51 = vpop.f32.mrb[10].mxu0  ;;  %20987 = vmatprep.mubr.msk.bf16.mxu1 %vm685_vm3, %v2799_v13  ;;  %v1693_v43 = vmul.bf16 %v24550_v41, %v24572_v8  ;;  %v24605_v30 = vpop.permute.xlu0 %1418  ;;  %v2307_v10 = vld [vmem:[#allocation2 + $0x29] sm:$0xff] }
 0x109   : > { %v1071_v59 = vmax.f32 %v975_v9, 0.0  ;;  %v978_v47 = vadd.f32 %v20878_v51, %v24507_v46  ;;  %v969_v53 = vpop.f32.mrb[11].mxu0  ;;  %v2800_v5 = vmul.bf16 %v24543_v63, %v2336_v31  ;;  %v2460_v9 = vrot.slane %v24423_v18, %v24468_v38 }
 0x10a   : > { %v1069_v13 = vmax.f32 %v967_v11, 0.0  ;;  %v970_v16 = vadd.f32 %v24507_v46, %v969_v53  ;;  %20908 = vmatmul.mubr.msk.bf16.vlgmr.msra.gmra.mrb[32].mxu0 %vm685_vm3, %v1693_v43  ;;  %v24616_v11 = vcombine.low %v1295_v61, %v1307_v17  ;;  %v2471_v61 = vrot.slane %v24431_v21, %v24468_v38 }
 0x10b   : > { %1103 = vst.msk [vmem:[#allocation2 + $0x68] sm:$0xff] %vm685_vm3, %v1071_v59  ;;  %v1072_v51 = vmax.f32 %v978_v47, 0.0  ;;  %20988 = vmatmul.mubr.msk.bf16.vlgmr.msra.gmra.mrb[0].mxu1 %vm685_vm3, %v2800_v5  ;;  %20911 = vmatprep.mubr.msk.bf16.mxu0 %vm685_vm3, %v1694_v42  ;;  %v2308_v15 = vld [vmem:[#allocation2 + $0x31] sm:$0xff]  ;;  %v2449_v42 = vrot.slane %v24425_v19, %v24468_v38  ;;  %v2482_v47 = vrot.slane %v24429_v20, %v24468_v38 }
 0x10c   : > { %v1173_v43 = vld [vmem:[#allocation2 + $0x4f] sm:$0xff]  ;;  %1101 = vst.msk [vmem:[#allocation2 + $0x58] sm:$0xff] %vm685_vm3, %v1069_v13  ;;  %v1070_v18 = vmax.f32 %v970_v16, 0.0  ;;  %v2337_v48 = vpack.c.bf16 %v2308_v15, %v2307_v10  ;;  %v1170_v59 = vld [vmem:[#allocation2 + $0x37] sm:$0xff]  ;;  %21020 = vmatpush3.bf16.msra.mxu1 %v24436_v22  ;;  %20940 = vmatpush3.bf16.msra.mxu0 %v24450_v27  ;;  %v1343_v19 = vrot.slane %v24512_v52, %v24468_v38  ;;  %v24648_v15 = vpop.permute.xlu1 %1430 }
 0x10d   : > { %v1172_v17 = vld [vmem:[#allocation2 + $0x47] sm:$0xff]  ;;  %1104 = vst.msk [vmem:[#allocation2 + $0x70] sm:$0xff] %vm685_vm3, %v1072_v51  ;;  %v1171_v62 = vld [vmem:[#allocation2 + $0x3f] sm:$0xff]  ;;  %21021 = vmatprep.subr.bf16.mxu1 %v24590_v45  ;;  %20941 = vmatprep.subr.bf16.mxu0 %v24595_v58  ;;  %v22273_v5 = vld [vmem:[%s30094_s6 + $0x30] sm:$0xff]   ;;  %v1355_v13 = vrot.slane %v24515_v57, %v24468_v38  ;;  %v1367_v16 = vrot.slane %v24522_v2, %v24468_v38  ;;  %v24658_v2 = vpop.permute.xlu0 %1442 }
 0x10e   : > { %v2309_v40 = vld [vmem:[#allocation2 + $0x39] sm:$0xff]  ;;  %v24632_v22 = vpack.c.bf16 %v1173_v43, %v1172_v17  ;;  %1102 = vst.msk [vmem:[#allocation2 + $0x60] sm:$0xff] %vm685_vm3, %v1070_v18  ;;  %v20881_v20 = vpop.f32.mrb[12].mxu0  ;;  %v2801_v27 = vmul.bf16 %v24601_v12, %v2337_v48  ;;  %v24638_v21 = vpack.c.bf16 %v1171_v62, %v1170_v59  ;;  %v2310_v53 = vld [vmem:[#allocation2 + $0x41] sm:$0xff]  ;;  %v1379_v18 = vrot.slane %v24529_v14, %v24468_v38  ;;  %v22274_v17 = vld [vmem:[%s30094_s6 + $0x70] sm:$0xff]  }
 0x10f   : > { %v991_v52 = vadd.f32 %v20881_v20, %v24507_v46  ;;  %v982_v51 = vpop.f32.mrb[13].mxu0  ;;  %v2338_v10 = vpack.c.bf16 %v2310_v53, %v2309_v40  ;;  %v24669_v53 = vcombine.low %v2471_v61, %v2482_v47  ;;  %v22276_v47 = vld [vmem:[%s30094_s6 + $0x78] sm:$0xff]  }
 0x110   : > { %v1696_v43 = vmul.bf16 %v24618_v34, %v24632_v22  ;;  %v983_v48 = vadd.f32 %v24507_v46, %v982_v51  ;;  %v20882_v59 = vpop.f32.mrb[14].mxu0  ;;  %20991 = vmatprep.mubr.msk.bf16.mxu1 %vm685_vm3, %v2801_v27  ;;  %v1695_v57 = vmul.bf16 %v24616_v11, %v24638_v21  ;;  %21022 = vmatpush3.bf16.msra.mxu1 %v24590_v45 }
 0x111   : > { %v1075_v62 = vmax.f32 %v991_v52, 0.0  ;;  %v994_v40 = vadd.f32 %v20882_v59, %v24507_v46  ;;  %v985_v20 = vpop.f32.mrb[15].mxu0  ;;  %v2802_v14 = vmul.bf16 %v24607_v56, %v2338_v10  ;;  %20942 = vmatpush3.bf16.msra.mxu0 %v24595_v58  ;;  %v24667_v27 = vcombine.low %v2449_v42, %v2460_v9  ;;  %30103 = vst [vmem:[#allocation15_spill] sm:$0xff] %v24669_v53  ;;  %v22275_v52 = vld [vmem:[%s30094_s6 + $0x38] sm:$0xff]   ;;  %v2311_v9 = vld [vmem:[#allocation2 + $0x49] sm:$0xff] }
 0x112   : > { %v1073_v51 = vmax.f32 %v983_v48, 0.0  ;;  %v986_v4 = vadd.f32 %v24507_v46, %v985_v20  ;;  %20912 = vmatmul.mubr.msk.bf16.gmra.mrb[36].mxu0 %vm685_vm3, %v1695_v57  ;;  %20943 = vmatprep.subr.bf16.mxu0 %v22273_v5  ;;  %v2504_v10 = vrot.slane %v24439_v23, %v24468_v38  ;;  %v2493_v45 = vrot.slane %v24441_v24, %v24468_v38 }
 0x113   : > { %1107 = vst.msk [vmem:[#allocation2 + $0x88] sm:$0xff] %vm685_vm3, %v1075_v62  ;;  %v1076_v58 = vmax.f32 %v994_v40, 0.0  ;;  %20992 = vmatmul.mubr.msk.bf16.gmra.mrb[4].mxu1 %vm685_vm3, %v2802_v14  ;;  %20915 = vmatprep.mubr.msk.bf16.mxu0 %vm685_vm3, %v1696_v43  ;;  %v2312_v42 = vld [vmem:[#allocation2 + $0x51] sm:$0xff]  ;;  %v24688_v23 = vcombine.low %v1343_v19, %v1355_v13  ;;  %v24690_v24 = vcombine.low %v1367_v16, %v1379_v18  ;;  %v24702_v18 = vpop.permute.xlu1 %1454 }
 0x114   : > { %v1177_v48 = vld [vmem:[#allocation2 + $0x6f] sm:$0xff]  ;;  %1105 = vst.msk [vmem:[#allocation2 + $0x78] sm:$0xff] %vm685_vm3, %v1073_v51  ;;  %v1074_v59 = vmax.f32 %v986_v4, 0.0  ;;  %v24693_v57 = vpack.c.bf16 %v2312_v42, %v2311_v9  ;;  %v1174_v43 = vld [vmem:[#allocation2 + $0x57] sm:$0xff]  ;;  %21023 = vmatprep.subr.bf16.mxu1 %v22274_v17  ;;  %v2526_v62 = vrot.slane %v24443_v25, %v24468_v38  ;;  %v2515_v40 = vrot.slane %v24445_v26, %v24468_v38 }
 0x115   : > { %v1176_v20 = vld [vmem:[#allocation2 + $0x67] sm:$0xff]  ;;  %v1391_v19 = vrot.slane %v24548_v1, %v24468_v38  ;;  %1108 = vst.msk [vmem:[#allocation2 + $0x90] sm:$0xff] %vm685_vm3, %v1076_v58  ;;  %v1175_v13 = vld [vmem:[#allocation2 + $0x5f] sm:$0xff]  ;;  %20944 = vmatpush3.bf16.msra.mxu0 %v22273_v5  ;;  %21024 = vmatpush3.bf16.msra.mxu1 %v22274_v17  ;;  %v1403_v25 = vrot.slane %v24555_v7, %v24468_v38  ;;  %v24713_v58 = vpop.permute.xlu0 %1466 }
 0x116   : > { %v2313_v16 = vld [vmem:[#allocation2 + $0x59] sm:$0xff]  ;;  %v24704_v4 = vpack.c.bf16 %v1177_v48, %v1176_v20  ;;  %1106 = vst.msk [vmem:[#allocation2 + $0x80] sm:$0xff] %vm685_vm3, %v1074_v59  ;;  %v20885_v26 = vpop.f32.mrb[16].mxu0  ;;  %v2803_v14 = vmul.bf16 %v24667_v27, %v24693_v57  ;;  %v24711_v1 = vpack.c.bf16 %v1175_v13, %v1174_v43  ;;  %v2314_v51 = vld [vmem:[#allocation2 + $0x61] sm:$0xff]  ;;  %20945 = vmatprep.subr.bf16.mxu0 %v22275_v52 }
 0x117   : > { %v24718_v5 = vld [vmem:[%s30094_s6 + $0x80] sm:$0xff]   ;;  %v1415_v7 = vrot.slane %v24599_v3, %v24468_v38  ;;  %v1007_v17 = vadd.f32 %v20885_v26, %v24507_v46  ;;  %v998_v9 = vpop.f32.mrb[17].mxu0  ;;  %v24723_v42 = vpack.c.bf16 %v2314_v51, %v2313_v16  ;;  %21025 = vmatprep.subr.bf16.mxu1 %v22276_v47  ;;  %v1427_v43 = vrot.slane %v24605_v30, %v24468_v38 }
 0x118   : > { %v1698_v59 = vmul.bf16 %v24690_v24, %v24704_v4  ;;  %v999_v20 = vadd.f32 %v24507_v46, %v998_v9  ;;  %v20886_v13 = vpop.f32.mrb[18].mxu0  ;;  %20995 = vmatprep.mubr.msk.bf16.mxu1 %vm685_vm3, %v2803_v14  ;;  %v1697_v3 = vmul.bf16 %v24688_v23, %v24711_v1  ;;  %v24738_v61 = vcombine.low %v2493_v45, %v2504_v10  ;;  %v2315_v10 = vld [vmem:[#allocation2 + $0x69] sm:$0xff] }
 0x119   : > { %30104 = vst [vmem:[#allocation16_spill] sm:$0xff] %v24723_v42  ;;  %v1079_v16 = vmax.f32 %v1007_v17, 0.0  ;;  %v1010_v26 = vadd.f32 %v20886_v13, %v24507_v46  ;;  %v1001_v51 = vpop.f32.mrb[19].mxu0  ;;  %v2804_v48 = vmul.bf16 %v24669_v53, %v24723_v42  ;;  %20946 = vmatpush3.bf16.msra.mxu0 %v22275_v52  ;;  %21026 = vmatpush3.bf16.msra.mxu1 %v22276_v47  ;;  %v24748_v52 = vpop.permute.xlu1 %1478 }
 0x11a   : > { %30105 = vst [vmem:[#allocation17_spill] sm:$0xff] %v24738_v61  ;;  %v1077_v30 = vmax.f32 %v999_v20, 0.0  ;;  %v1002_v9 = vadd.f32 %v24507_v46, %v1001_v51  ;;  %20916 = vmatmul.mubr.msk.bf16.gmra.mrb[40].mxu0 %vm685_vm3, %v1697_v3  ;;  %21059 = vmatprep.subr.bf16.mxu1 %v24718_v5  ;;  %v24743_v14 = vcombine.low %v2515_v40, %v2526_v62  ;;  %v24759_v3 = vpop.permute.xlu0 %1490 }
 0x11b   : > { %1111 = vst.msk [vmem:[#allocation2 + $0xa8] sm:$0xff] %vm685_vm3, %v1079_v16  ;;  %v1080_v17 = vmax.f32 %v1010_v26, 0.0  ;;  %20996 = vmatmul.mubr.msk.bf16.gmra.mrb[8].mxu1 %vm685_vm3, %v2804_v48  ;;  %20919 = vmatprep.mubr.msk.bf16.mxu0 %vm685_vm3, %v1698_v59  ;;  %v2316_v45 = vld [vmem:[#allocation2 + $0x71] sm:$0xff]  ;;  %v24754_v13 = vcombine.low %v1391_v19, %v1403_v25  ;;  %v24756_v40 = vcombine.low %v1415_v7, %v1427_v43 }
 0x11c   : > { %30106 = vst [vmem:[#allocation18_spill] sm:$0xff] %v24743_v14  ;;  %v1181_v62 = vld [vmem:[#allocation2 + $0x8f] sm:$0xff]  ;;  %1109 = vst.msk [vmem:[#allocation2 + $0x98] sm:$0xff] %vm685_vm3, %v1077_v30  ;;  %v1078_v48 = vmax.f32 %v1002_v9, 0.0  ;;  %v24761_v59 = vpack.c.bf16 %v2316_v45, %v2315_v10  ;;  %v1178_v16 = vld [vmem:[#allocation2 + $0x77] sm:$0xff]  ;;  %v2548_v26 = vrot.slane %v24452_v28, %v24468_v38  ;;  %v2537_v51 = vrot.slane %v24456_v32, %v24468_v38 }
 0x11d   : > { %v2570_v19 = vrot.slane %v24458_v33, %v24468_v38  ;;  %v1180_v25 = vld [vmem:[#allocation2 + $0x87] sm:$0xff]  ;;  %v1439_v7 = vrot.slane %v24648_v15, %v24468_v38  ;;  %1112 = vst.msk [vmem:[#allocation2 + $0xb0] sm:$0xff] %vm685_vm3, %v1080_v17  ;;  %v1179_v43 = vld [vmem:[#allocation2 + $0x7f] sm:$0xff]  ;;  %v1451_v10 = vrot.slane %v24658_v2, %v24468_v38  ;;  %v1463_v15 = vrot.slane %v24702_v18, %v24468_v38  ;;  %v24801_v31 = vpop.permute.xlu1 %1502 }
 0x11e   : > { %30107 = vst [vmem:[#allocation19_spill] sm:$0xff] %v24761_v59  ;;  %v2317_v30 = vld [vmem:[#allocation2 + $0x79] sm:$0xff]  ;;  %v24772_v9 = vpack.c.bf16 %v1181_v62, %v1180_v25  ;;  %1110 = vst.msk [vmem:[#allocation2 + $0xa0] sm:$0xff] %vm685_vm3, %v1078_v48  ;;  %v20889_v28 = vpop.f32.mrb[20].mxu0  ;;  %v2805_v32 = vmul.bf16 %v24738_v61, %v24761_v59  ;;  %v24779_v33 = vpack.c.bf16 %v1179_v43, %v1178_v16  ;;  %v2318_v45 = vld [vmem:[#allocation2 + $0x81] sm:$0xff] }
 0x11f   : > { %v1023_v17 = vadd.f32 %v20889_v28, %v24507_v46  ;;  %v1014_v20 = vpop.f32.mrb[21].mxu0  ;;  %v24784_v62 = vpack.c.bf16 %v2318_v45, %v2317_v30  ;;  %v1475_v25 = vrot.slane %v24713_v58, %v24468_v38  ;;  %v2559_v30 = vrot.slane %v24462_v36, %v24468_v38  ;;  %v3753_v61 = vld [vmem:[#allocation2 + $0x39] sm:$0xff] }
 0x120   : > { %v1700_v48 = vmul.bf16 %v24756_v40, %v24772_v9  ;;  %v1015_v16 = vadd.f32 %v24507_v46, %v1014_v20  ;;  %v20890_v43 = vpop.f32.mrb[22].mxu0  ;;  %20999 = vmatprep.mubr.msk.bf16.mxu1 %vm685_vm3, %v2805_v32  ;;  %v1699_v18 = vmul.bf16 %v24754_v13, %v24779_v33  ;;  %v24805_v32 = vpop.permute.xlu0 %1514  ;;  %v24807_v35 = vcombine.low %v2537_v51, %v2548_v26 }
 0x121   : > { %30108 = vst [vmem:[#allocation20_spill] sm:$0xff] %v24784_v62  ;;  %v1083_v28 = vmax.f32 %v1023_v17, 0.0  ;;  %v1026_v45 = vadd.f32 %v20890_v43, %v24507_v46  ;;  %v1017_v2 = vpop.f32.mrb[23].mxu0  ;;  %v2806_v47 = vmul.bf16 %v24743_v14, %v24784_v62  ;;  %v2319_v17 = vld [vmem:[#allocation2 + $0x89] sm:$0xff]  ;;  %v24818_v26 = vcombine.low %v1463_v15, %v1475_v25 }
 0x122   : > { %v1081_v58 = vmax.f32 %v1015_v16, 0.0  ;;  %v1018_v20 = vadd.f32 %v24507_v46, %v1017_v2  ;;  %20920 = vmatmul.mubr.msk.bf16.gmra.mrb[44].mxu0 %vm685_vm3, %v1699_v18  ;;  %v24816_v18 = vcombine.low %v1439_v7, %v1451_v10  ;;  %v2581_v16 = vrot.slane %v24470_v39, %v24468_v38  ;;  %v3751_v14 = vld [vmem:[#allocation2 + $0x29] sm:$0xff] }
 0x123   : > { %1115 = vst.msk [vmem:[#allocation2 + $0xc8] sm:$0xff] %vm685_vm3, %v1083_v28  ;;  %v1084_v36 = vmax.f32 %v1026_v45, 0.0  ;;  %21000 = vmatmul.mubr.msk.bf16.gmra.mrb[12].mxu1 %vm685_vm3, %v2806_v47  ;;  %20923 = vmatprep.mubr.msk.bf16.mxu0 %vm685_vm3, %v1700_v48  ;;  %v2320_v43 = vld [vmem:[#allocation2 + $0x91] sm:$0xff]  ;;  %v24823_v48 = vcombine.low %v2559_v30, %v2570_v19  ;;  %v2592_v45 = vrot.slane %v24465_v37, %v24468_v38 }
 0x124   : > { %v1185_v59 = vld [vmem:[#allocation2 + $0xaf] sm:$0xff]  ;;  %1113 = vst.msk [vmem:[#allocation2 + $0xb8] sm:$0xff] %vm685_vm3, %v1081_v58  ;;  %v1082_v51 = vmax.f32 %v1018_v20, 0.0  ;;  %v24821_v28 = vpack.c.bf16 %v2320_v43, %v2319_v17  ;;  %v1182_v47 = vld [vmem:[#allocation2 + $0x97] sm:$0xff]  ;;  %v1487_v7 = vrot.slane %v24748_v52, %v24468_v38  ;;  %v1499_v19 = vrot.slane %v24759_v3, %v24468_v38 }
 0x125   : > { %v1184_v2 = vld [vmem:[#allocation2 + $0xa7] sm:$0xff]  ;;  %1116 = vst.msk [vmem:[#allocation2 + $0xd0] sm:$0xff] %vm685_vm3, %v1084_v36  ;;  %v1183_v10 = vld [vmem:[#allocation2 + $0x9f] sm:$0xff]  ;;  %v1511_v52 = vrot.slane %v24801_v31, %v24468_v38  ;;  %v24844_v36 = vpop.permute.xlu1 %1526  ;;  %v24865_v62 = vcombine.low %v2581_v16, %v2592_v45 }
 0x126   : > { %30109 = vst [vmem:[#allocation21_spill] sm:$0xff] %v24821_v28  ;;  %v2321_v15 = vld [vmem:[#allocation2 + $0x99] sm:$0xff]  ;;  %v24832_v25 = vpack.c.bf16 %v1185_v59, %v1184_v2  ;;  %1114 = vst.msk [vmem:[#allocation2 + $0xc0] sm:$0xff] %vm685_vm3, %v1082_v51  ;;  %v20893_v30 = vpop.f32.mrb[24].mxu0  ;;  %v2807_v37 = vmul.bf16 %v24807_v35, %v24821_v28  ;;  %v24839_v39 = vpack.c.bf16 %v1183_v10, %v1182_v47  ;;  %v2322_v58 = vld [vmem:[#allocation2 + $0xa1] sm:$0xff]  ;;  %v24854_v51 = vpop.permute.xlu0 %1538 }
 0x127   : > { %v1039_v20 = vadd.f32 %v20893_v30, %v24507_v46  ;;  %v1030_v59 = vpop.f32.mrb[25].mxu0  ;;  %v24846_v17 = vpack.c.bf16 %v2322_v58, %v2321_v15  ;;  %v1523_v2 = vrot.slane %v24805_v32, %v24468_v38  ;;  %v1547_v42 = vrot.slane %v24854_v51, %v24468_v38 }
 0x128   : > { %v1702_v43 = vmul.bf16 %v24818_v26, %v24832_v25  ;;  %v1031_v31 = vadd.f32 %v24507_v46, %v1030_v59  ;;  %v20894_v47 = vpop.f32.mrb[26].mxu0  ;;  %21003 = vmatprep.mubr.msk.bf16.mxu1 %vm685_vm3, %v2807_v37  ;;  %v1701_v10 = vmul.bf16 %v24816_v18, %v24839_v39  ;;  %v3752_v59 = vld [vmem:[#allocation2 + $0x31] sm:$0xff] }
 0x129   : > { %30110 = vst [vmem:[#allocation22_spill] sm:$0xff] %v24846_v17  ;;  %v1087_v15 = vmax.f32 %v1039_v20, 0.0  ;;  %v1042_v30 = vadd.f32 %v20894_v47, %v24507_v46  ;;  %v1033_v58 = vpop.f32.mrb[27].mxu0  ;;  %v2808_v3 = vmul.bf16 %v24823_v48, %v24846_v17  ;;  %v2323_v20 = vld [vmem:[#allocation2 + $0xa9] sm:$0xff]  ;;  %v24876_v45 = vcombine.low %v1511_v52, %v1523_v2 }
 0x12a   : > { %v1085_v28 = vmax.f32 %v1031_v31, 0.0  ;;  %v1034_v32 = vadd.f32 %v24507_v46, %v1033_v58  ;;  %20924 = vmatmul.mubr.msk.bf16.gmra.mrb[48].mxu0 %vm685_vm3, %v1701_v10  ;;  %v24874_v58 = vcombine.low %v1487_v7, %v1499_v19  ;;  %v1535_v31 = vrot.slane %v24844_v36, %v24468_v38  ;;  %v1551_v7 = vpop.permute.xlu1 %1550 }
 0x12b   : > { %1119 = vst.msk [vmem:[#allocation2 + $0xe8] sm:$0xff] %vm685_vm3, %v1087_v15  ;;  %v1088_v37 = vmax.f32 %v1042_v30, 0.0  ;;  %21004 = vmatmul.mubr.msk.bf16.gmra.mrb[16].mxu1 %vm685_vm3, %v2808_v3  ;;  %20927 = vmatprep.mubr.msk.bf16.mxu0 %vm685_vm3, %v1702_v43  ;;  %v2324_v47 = vld [vmem:[#allocation2 + $0xb1] sm:$0xff]  ;;  %v3754_v30 = vld [vmem:[#allocation2 + $0x41] sm:$0xff]  ;;  %v24886_v2 = vpack.c.bf16 %v3752_v59, %v3751_v14 }
 0x12c   : > { %v1189_v16 = vld [vmem:[#allocation2 + $0xcf] sm:$0xff]  ;;  %1117 = vst.msk [vmem:[#allocation2 + $0xd8] sm:$0xff] %vm685_vm3, %v1085_v28  ;;  %v1086_v15 = vmax.f32 %v1034_v32, 0.0  ;;  %v24879_v3 = vpack.c.bf16 %v2324_v47, %v2323_v20  ;;  %v1186_v43 = vld [vmem:[#allocation2 + $0xb7] sm:$0xff]  ;;  %v1563_v32 = vpop.permute.xlu0 %1562  ;;  %v24908_v51 = vpack.c.bf16 %v3754_v30, %v3753_v61  ;;  %v24919_v61 = vcombine.low %v1535_v31, %v1547_v42 }
 0x12d   : > { %v1188_v53 = vld [vmem:[#allocation2 + $0xc7] sm:$0xff]  ;;  %1120 = vst.msk [vmem:[#allocation2 + $0xf0] sm:$0xff] %vm685_vm3, %v1088_v37  ;;  %v1187_v19 = vld [vmem:[#allocation2 + $0xbf] sm:$0xff]  ;;  %v1559_v37 = vrot.slane %v1551_v7, %v24468_v38  ;;  %v1571_v14 = vrot.slane %v1563_v32, %v24468_v38 }
 0x12e   : > { %30111 = vst [vmem:[#allocation23_spill] sm:$0xff] %v24879_v3  ;;  %v2325_v52 = vld [vmem:[#allocation2 + $0xb9] sm:$0xff]  ;;  %v24888_v28 = vpack.c.bf16 %v1189_v16, %v1188_v53  ;;  %1118 = vst.msk [vmem:[#allocation2 + $0xe0] sm:$0xff] %vm685_vm3, %v1086_v15  ;;  %v20897_v20 = vpop.f32.mrb[28].mxu0  ;;  %v2809_v47 = vmul.bf16 %v24865_v62, %v24879_v3  ;;  %v24893_v36 = vpack.c.bf16 %v1187_v19, %v1186_v43  ;;  %v2326_v10 = vld [vmem:[#allocation2 + $0xc1] sm:$0xff] }
 0x12f   : > { %v1055_v53 = vadd.f32 %v20897_v20, %v24507_v46  ;;  %v1046_v59 = vpop.f32.mrb[29].mxu0  ;;  %v24900_v16 = vpack.c.bf16 %v2326_v10, %v2325_v52  ;;  %30112 = vst [vmem:[#allocation24_spill] sm:$0xff] %v24908_v51  ;;  %v24921_v30 = vcombine.low %v1559_v37, %v1571_v14  ;;  %v1982_v52 = vld [vmem:[#allocation2 + $0x10] sm:$0xff] }
 0x130   : > { %v1704_v15 = vmul.bf16 %v24876_v45, %v24888_v28  ;;  %v1047_v17 = vadd.f32 %v24507_v46, %v1046_v59  ;;  %v20898_v43 = vpop.f32.mrb[30].mxu0  ;;  %21007 = vmatprep.mubr.msk.bf16.mxu1 %vm685_vm3, %v2809_v47  ;;  %v1703_v19 = vmul.bf16 %v24874_v58, %v24893_v36  ;;  %v1587_v37 = vpop.permute.xlu0 %1586 }
 0x131   : > { %v1091_v7 = vmax.f32 %v1055_v53, 0.0  ;;  %v1058_v32 = vadd.f32 %v20898_v43, %v24507_v46  ;;  %v1049_v20 = vpop.f32.mrb[31].mxu0  ;;  %v2810_v10 = vmul.bf16 %v24474_v44, %v24900_v16  ;;  %v2327_v43 = vld [vmem:[#allocation2 + $0xc9] sm:$0xff] }
 0x132   : > { %v1089_v3 = vmax.f32 %v1047_v17, 0.0  ;;  %v1050_v59 = vadd.f32 %v24507_v46, %v1049_v20  ;;  %20928 = vmatmul.mubr.msk.bf16.gmra.mrb[52].mxu0 %vm685_vm3, %v1703_v19  ;;  %v1575_v46 = vpop.permute.xlu1 %1574 }
 0x133   : > { %1123 = vst.msk [vmem:[#allocation2 + $0x108] sm:$0xff] %vm685_vm3, %v1091_v7  ;;  %v1092_v53 = vmax.f32 %v1058_v32, 0.0  ;;  %21008 = vmatmul.mubr.msk.bf16.gmra.mrb[20].mxu1 %vm685_vm3, %v2810_v10  ;;  %20931 = vmatprep.mubr.msk.bf16.mxu0 %vm685_vm3, %v1704_v15  ;;  %v2328_v17 = vld [vmem:[#allocation2 + $0xd1] sm:$0xff]  ;;  %v1583_v14 = vrot.slane %v1575_v46, %v24468_v38 }
 0x134   : > { %v1193_v19 = vld [vmem:[#allocation2 + $0xef] sm:$0xff]  ;;  %1121 = vst.msk [vmem:[#allocation2 + $0xf8] sm:$0xff] %vm685_vm3, %v1089_v3  ;;  %v1090_v20 = vmax.f32 %v1050_v59, 0.0  ;;  %v24929_v42 = vpack.c.bf16 %v2328_v17, %v2327_v43  ;;  %v1190_v31 = vld [vmem:[#allocation2 + $0xd7] sm:$0xff] }
 0x135   : > { %v1192_v7 = vld [vmem:[#allocation2 + $0xe7] sm:$0xff]  ;;  %1124 = vst.msk [vmem:[#allocation2 + $0x110] sm:$0xff] %vm685_vm3, %v1092_v53  ;;  %v1191_v15 = vld [vmem:[#allocation2 + $0xdf] sm:$0xff] }
 0x136   : > { %30113 = vst [vmem:[#allocation25_spill] sm:$0xff] %v24929_v42  ;;  %v2329_v32 = vld [vmem:[#allocation2 + $0xd9] sm:$0xff]  ;;  %v24936_v10 = vpack.c.bf16 %v1193_v19, %v1192_v7  ;;  %1122 = vst.msk [vmem:[#allocation2 + $0x100] sm:$0xff] %vm685_vm3, %v1090_v20  ;;  %v2811_v3 = vmul.bf16 %v24478_v49, %v24929_v42  ;;  %v24941_v59 = vpack.c.bf16 %v1191_v15, %v1190_v31  ;;  %v2330_v43 = vld [vmem:[#allocation2 + $0xe1] sm:$0xff] }
 0x137   : > { %v24946_v53 = vpack.c.bf16 %v2330_v43, %v2329_v32  ;;  %v1595_v7 = vrot.slane %v1587_v37, %v24468_v38  ;;  %v2331_v37 = vld [vmem:[#allocation2 + $0xe9] sm:$0xff] }
 0x138   : > { %v1706_v19 = vmul.bf16 %v24921_v30, %v24936_v10  ;;  %21011 = vmatprep.mubr.msk.bf16.mxu1 %vm685_vm3, %v2811_v3  ;;  %v1705_v20 = vmul.bf16 %v24919_v61, %v24941_v59  ;;  %v1981_v43 = vld [vmem:[#allocation2 + $0x8] sm:$0xff] }
 0x139   : > { %30114 = vst [vmem:[#allocation26_spill] sm:$0xff] %v24946_v53  ;;  %v2812_v15 = vmul.bf16 %v24482_v54, %v24946_v53  ;;  %v24965_v17 = vcombine.low %v1583_v14, %v1595_v7  ;;  %v30132_v14 = vld [vmem:[#allocation18_spill] sm:$0xff] }
 0x13a   : > { %20932 = vmatmul.mubr.msk.bf16.gmra.mrb[56].mxu0 %vm685_vm3, %v1705_v20 }
 0x13b   : > { %21012 = vmatmul.mubr.msk.bf16.gmra.mrb[24].mxu1 %vm685_vm3, %v2812_v15  ;;  %20935 = vmatprep.mubr.msk.bf16.mxu0 %vm685_vm3, %v1706_v19  ;;  %v2332_v3 = vld [vmem:[#allocation2 + $0xf1] sm:$0xff] }
 0x13c   : > { %v24967_v47 = vpack.c.bf16 %v2332_v3, %v2331_v37  ;;  %v1194_v31 = vld [vmem:[#allocation2 + $0xf7] sm:$0xff]  ;;  %v3120_v38 = vld [vmem:[#allocation2 + $0x10f] sm:$0xff]  ;;  %v2013_v37 = vpack.c.bf16 %v1982_v52, %v1981_v43  ;;  %v3137_v52 = vmul.bf16 %v24494_v29, %v24572_v8 }
 0x13d   : > { %v1195_v46 = vld [vmem:[#allocation2 + $0xff] sm:$0xff]  ;;  %v3119_v19 = vld [vmem:[#allocation2 + $0x107] sm:$0xff]  ;;  %v3780_v42 = vld [vmem:[#allocation2 + $0x111] sm:$0xff] }
 0x13e   : > { %v2333_v53 = vld [vmem:[#allocation2 + $0xf9] sm:$0xff]  ;;  %v2334_v49 = vld [vmem:[#allocation2 + $0x101] sm:$0xff]  ;;  %v2813_v20 = vmul.bf16 %v24486_v60, %v24967_v47  ;;  %v24971_v32 = vpack.c.bf16 %v1195_v46, %v1194_v31  ;;  %v3779_v7 = vld [vmem:[#allocation2 + $0x109] sm:$0xff]  ;;  %v24977_v3 = vpack.c.bf16 %v3120_v38, %v3119_v19  ;;  %v3798_v46 = vmul.bf16 %v24543_v63, %v24886_v2 }
 0x13f   : > { %v24973_v15 = vpack.c.bf16 %v2334_v49, %v2333_v53  ;;  %v24986_v53 = vpack.c.bf16 %v3780_v42, %v3779_v7  ;;  %v1984_v42 = vld [vmem:[#allocation2 + $0x20] sm:$0xff]  ;;  %v1983_v19 = vld [vmem:[#allocation2 + $0x18] sm:$0xff]  ;;  %v1985_v7 = vld [vmem:[#allocation2 + $0x28] sm:$0xff]  ;;  %v3799_v49 = vmul.bf16 %v24601_v12, %v24908_v51 }
 0x140   : > { %21015 = vmatprep.mubr.msk.bf16.mxu1 %vm685_vm3, %v2813_v20  ;;  %v1707_v44 = vmul.bf16 %v24965_v17, %v24971_v32  ;;  %v1986_v20 = vld [vmem:[#allocation2 + $0x30] sm:$0xff]  ;;  %v25003_v38 = vpack.c.bf16 %v1984_v42, %v1983_v19  ;;  %v1987_v19 = vld [vmem:[#allocation2 + $0x38] sm:$0xff] }
 0x141   : > { %v2814_v31 = vmul.bf16 %v24490_v6, %v24973_v15  ;;  %30115 = vst [vmem:[#allocation27_spill] sm:$0xff] %v24986_v53  ;;  %v25005_v8 = vpack.c.bf16 %v1986_v20, %v1985_v7  ;;  %v22279_v42 = vld [vmem:[%s30094_s6 + $0x90] sm:$0xff]  }
 0x142   : > { %20936 = vmatmul.mubr.msk.bf16.gmra.mrb[60].mxu0 %vm685_vm3, %v1707_v44  ;;  %v22278_v44 = vld [vmem:[%s30094_s6 + $0x88] sm:$0xff]   ;;  %v1990_v20 = vld [vmem:[#allocation2 + $0x50] sm:$0xff] }
 0x143   : > { %21016 = vmatmul.mubr.msk.bf16.gmra.mrb[28].mxu1 %vm685_vm3, %v2814_v31  ;;  %20947 = vmatprep.mubr.msk.bf16.mxu0 %vm685_vm3, %v2013_v37  ;;  %v3139_v37 = vmul.bf16 %v24552_v50, %v24638_v21  ;;  %v30116_v31 = vmul.bf16 %v24550_v41, %v24566_v55  ;;  %v1989_v21 = vld [vmem:[#allocation2 + $0x48] sm:$0xff]  ;;  %v22280_v55 = vld [vmem:[%s30094_s6 + $0x98] sm:$0xff]  }
 0x144   : > { %21027 = vmatprep.mubr.msk.bf16.mxu1 %vm685_vm3, %v3137_v52  ;;  %v1988_v52 = vld [vmem:[#allocation2 + $0x40] sm:$0xff] }
 0x145   : > { %v25025_v7 = vpack.c.bf16 %v1988_v52, %v1987_v19  ;;  %v1992_v52 = vld [vmem:[#allocation2 + $0x60] sm:$0xff]  ;;  %v1991_v19 = vld [vmem:[#allocation2 + $0x58] sm:$0xff] }
 0x14a   : > { %20948 = vmatmul.mubr.msk.bf16.vlgmr.msra.gmra.mrb[32].mxu0 %vm685_vm3, %v25003_v38 }
 0x14b   : > { %21028 = vmatmul.mubr.msk.bf16.vlgmr.msra.gmra.mrb[0].mxu1 %vm685_vm3, %v30116_v31  ;;  %20951 = vmatprep.mubr.msk.bf16.mxu0 %vm685_vm3, %v25005_v8  ;;  %v25027_v31 = vpack.c.bf16 %v1990_v20, %v1989_v21  ;;  %v1994_v20 = vld [vmem:[#allocation2 + $0x70] sm:$0xff]  ;;  %v25045_v21 = vpack.c.bf16 %v1992_v52, %v1991_v19  ;;  %v1995_v52 = vld [vmem:[#allocation2 + $0x78] sm:$0xff] }
 0x14c   : > { %21031 = vmatprep.mubr.msk.bf16.mxu1 %vm685_vm3, %v3139_v37  ;;  %21060 = vmatpush3.bf16.msra.mxu1 %v24718_v5  ;;  %v3141_v37 = vmul.bf16 %v24618_v34, %v24711_v1  ;;  %v30117_v5 = vmul.bf16 %v24616_v11, %v24632_v22  ;;  %v1993_v1 = vld [vmem:[#allocation2 + $0x68] sm:$0xff] }
 0x14d   : > { %21061 = vmatprep.subr.bf16.mxu1 %v22278_v44  ;;  %v25047_v22 = vpack.c.bf16 %v1994_v20, %v1993_v1  ;;  %v1997_v20 = vld [vmem:[#allocation2 + $0x88] sm:$0xff] }
 0x150   : > { %21062 = vmatpush3.bf16.msra.mxu1 %v22278_v44  ;;  %v25042_v44 = vld [vmem:[%s30094_s6 + $0xa0] sm:$0xff]  }
 0x151   : > { %21063 = vmatprep.subr.bf16.mxu1 %v22279_v42 }
 0x152   : > { %20952 = vmatmul.mubr.msk.bf16.gmra.mrb[36].mxu0 %vm685_vm3, %v25025_v7 }
 0x153   : > { %21032 = vmatmul.mubr.msk.bf16.gmra.mrb[4].mxu1 %vm685_vm3, %v30117_v5  ;;  %20955 = vmatprep.mubr.msk.bf16.mxu0 %vm685_vm3, %v25027_v31  ;;  %v3143_v5 = vmul.bf16 %v24690_v24, %v24779_v33  ;;  %v30119_v33 = vmul.bf16 %v24754_v13, %v24772_v9  ;;  %v3147_v9 = vmul.bf16 %v24818_v26, %v24893_v36 }
 0x154   : > { %21035 = vmatprep.mubr.msk.bf16.mxu1 %vm685_vm3, %v3141_v37  ;;  %21064 = vmatpush3.bf16.msra.mxu1 %v22279_v42  ;;  %v30118_v37 = vmul.bf16 %v24688_v23, %v24704_v4  ;;  %v1996_v42 = vld [vmem:[#allocation2 + $0x80] sm:$0xff]  ;;  %v3145_v4 = vmul.bf16 %v24756_v40, %v24839_v39  ;;  %v30120_v39 = vmul.bf16 %v24816_v18, %v24832_v25 }
 0x155   : > { %21065 = vmatprep.subr.bf16.mxu1 %v22280_v55  ;;  %v25061_v19 = vpack.c.bf16 %v1996_v42, %v1995_v52  ;;  %v1999_v42 = vld [vmem:[#allocation2 + $0x98] sm:$0xff]  ;;  %v3149_v25 = vmul.bf16 %v24876_v45, %v24941_v59 }
 0x158   : > { %21066 = vmatpush3.bf16.msra.mxu1 %v22280_v55  ;;  %v1998_v55 = vld [vmem:[#allocation2 + $0x90] sm:$0xff] }
 0x159   : > { %21099 = vmatprep.subr.bf16.mxu1 %v25042_v44  ;;  %v25063_v1 = vpack.c.bf16 %v1998_v55, %v1997_v20  ;;  %v2001_v55 = vld [vmem:[#allocation2 + $0xa8] sm:$0xff] }
 0x15a   : > { %20956 = vmatmul.mubr.msk.bf16.gmra.mrb[40].mxu0 %vm685_vm3, %v25045_v21 }
 0x15b   : > { %21036 = vmatmul.mubr.msk.bf16.gmra.mrb[8].mxu1 %vm685_vm3, %v30118_v37  ;;  %20959 = vmatprep.mubr.msk.bf16.mxu0 %vm685_vm3, %v25047_v22  ;;  %v2002_v37 = vld [vmem:[#allocation2 + $0xb0] sm:$0xff] }
 0x15c   : > { %21039 = vmatprep.mubr.msk.bf16.mxu1 %vm685_vm3, %v3143_v5  ;;  %v2000_v5 = vld [vmem:[#allocation2 + $0xa0] sm:$0xff]  ;;  %v25078_v20 = vpack.c.bf16 %v2002_v37, %v2001_v55  ;;  %v2005_v37 = vld [vmem:[#allocation2 + $0xc8] sm:$0xff] }
 0x15d   : > { %v25076_v52 = vpack.c.bf16 %v2000_v5, %v1999_v42  ;;  %v2003_v5 = vld [vmem:[#allocation2 + $0xb8] sm:$0xff] }
 0x162   : > { %20960 = vmatmul.mubr.msk.bf16.gmra.mrb[44].mxu0 %vm685_vm3, %v25061_v19 }
 0x163   : > { %21040 = vmatmul.mubr.msk.bf16.gmra.mrb[12].mxu1 %vm685_vm3, %v30119_v33  ;;  %20963 = vmatprep.mubr.msk.bf16.mxu0 %vm685_vm3, %v25063_v1  ;;  %v2006_v33 = vld [vmem:[#allocation2 + $0xd0] sm:$0xff] }
 0x164   : > { %21043 = vmatprep.mubr.msk.bf16.mxu1 %vm685_vm3, %v3145_v4  ;;  %v2004_v4 = vld [vmem:[#allocation2 + $0xc0] sm:$0xff]  ;;  %v25093_v55 = vpack.c.bf16 %v2006_v33, %v2005_v37  ;;  %v2007_v33 = vld [vmem:[#allocation2 + $0xd8] sm:$0xff] }
 0x165   : > { %v25091_v42 = vpack.c.bf16 %v2004_v4, %v2003_v5  ;;  %v2010_v4 = vld [vmem:[#allocation2 + $0xf0] sm:$0xff]  ;;  %v2009_v5 = vld [vmem:[#allocation2 + $0xe8] sm:$0xff] }
 0x166   : > { %v25108_v43 = vpack.c.bf16 %v2010_v4, %v2009_v5  ;;  %v22283_v5 = vld [vmem:[%s30094_s6 + $0xb0] sm:$0xff]  }
 0x16a   : > { %20964 = vmatmul.mubr.msk.bf16.gmra.mrb[48].mxu0 %vm685_vm3, %v25076_v52 }
 0x16b   : > { %21044 = vmatmul.mubr.msk.bf16.gmra.mrb[16].mxu1 %vm685_vm3, %v30120_v39  ;;  %20967 = vmatprep.mubr.msk.bf16.mxu0 %vm685_vm3, %v25078_v20  ;;  %v30121_v39 = vmul.bf16 %v24874_v58, %v24888_v28  ;;  %v3151_v28 = vmul.bf16 %v24921_v30, %v24971_v32 }
 0x16c   : > { %21047 = vmatprep.mubr.msk.bf16.mxu1 %vm685_vm3, %v3147_v9  ;;  %v2008_v9 = vld [vmem:[#allocation2 + $0xe0] sm:$0xff] }
 0x16d   : > { %v25106_v37 = vpack.c.bf16 %v2008_v9, %v2007_v33  ;;  %v2011_v9 = vld [vmem:[#allocation2 + $0xf8] sm:$0xff]  ;;  %v3152_v33 = vmul.bf16 %v24965_v17, %v24977_v3 }
 0x172   : > { %20968 = vmatmul.mubr.msk.bf16.gmra.mrb[52].mxu0 %vm685_vm3, %v25091_v42 }
 0x173   : > { %21048 = vmatmul.mubr.msk.bf16.gmra.mrb[20].mxu1 %vm685_vm3, %v30121_v39  ;;  %20971 = vmatprep.mubr.msk.bf16.mxu0 %vm685_vm3, %v25093_v55  ;;  %v30122_v39 = vmul.bf16 %v24919_v61, %v24936_v10  ;;  %v22282_v10 = vld [vmem:[%s30094_s6 + $0xa8] sm:$0xff]  }
 0x174   : > { %21051 = vmatprep.mubr.msk.bf16.mxu1 %vm685_vm3, %v3149_v25  ;;  %v2012_v25 = vld [vmem:[#allocation2 + $0x100] sm:$0xff] }
 0x175   : > { %v25121_v4 = vpack.c.bf16 %v2012_v25, %v2011_v9  ;;  %v3458_v25 = vld [vmem:[#allocation2 + $0x110] sm:$0xff]  ;;  %v3457_v9 = vld [vmem:[#allocation2 + $0x108] sm:$0xff] }
 0x17a   : > { %20972 = vmatmul.mubr.msk.bf16.gmra.mrb[56].mxu0 %vm685_vm3, %v25106_v37 }
 0x17b   : > { %21052 = vmatmul.mubr.msk.bf16.gmra.mrb[24].mxu1 %vm685_vm3, %v30122_v39  ;;  %20975 = vmatprep.mubr.msk.bf16.mxu0 %vm685_vm3, %v25108_v43  ;;  %v3750_v39 = vld [vmem:[#allocation2 + $0x21] sm:$0xff] }
 0x17c   : > { %21055 = vmatprep.mubr.msk.bf16.mxu1 %vm685_vm3, %v3151_v28  ;;  %v22285_v28 = vld [vmem:[%s30094_s6 + $0xc0] sm:$0xff]  }
 0x182   : > { %20976 = vmatmul.mubr.msk.bf16.gmra.mrb[60].mxu0 %vm685_vm3, %v25121_v4 }
 0x183   : > { %21056 = vmatmul.mubr.msk.bf16.gmra.mrb[28].mxu1 %vm685_vm3, %v3152_v33 }
 0x184   : > { %21067 = vmatprep.mubr.msk.bf16.mxu1 %vm685_vm3, %v25003_v38  ;;  %v22284_v38 = vld [vmem:[%s30094_s6 + $0xb8] sm:$0xff]  }
 0x18b   : > { %21068 = vmatmul.mubr.msk.bf16.vlgmr.msra.gmra.mrb[0].mxu1 %vm685_vm3, %v25005_v8 }
 0x18c   : > { %21071 = vmatprep.mubr.msk.bf16.mxu1 %vm685_vm3, %v25025_v7  ;;  %21100 = vmatpush3.bf16.msra.mxu1 %v25042_v44  ;;  %v3749_v44 = vld [vmem:[#allocation2 + $0x19] sm:$0xff] }
 0x18d   : > { %21101 = vmatprep.subr.bf16.mxu1 %v22282_v10  ;;  %v3781_v33 = vpack.c.bf16 %v3750_v39, %v3749_v44  ;;  %v22287_v44 = vld [vmem:[%s30094_s6 + $0xd0] sm:$0xff]   ;;  %v22288_v39 = vld [vmem:[%s30094_s6 + $0xd8] sm:$0xff]  }
 0x190   : > { %21102 = vmatpush3.bf16.msra.mxu1 %v22282_v10  ;;  %v25171_v10 = vpack.c.bf16 %v3458_v25, %v3457_v9  ;;  %v30123_v25 = vmul.bf16 %v24607_v56, %v24693_v57  ;;  %v30124_v9 = vld [vmem:[#allocation16_spill] sm:$0xff]  ;;  %v30129_v57 = vld [vmem:[#allocation17_spill] sm:$0xff] }
 0x191   : > { %21103 = vmatprep.subr.bf16.mxu1 %v22283_v5  ;;  %v30133_v56 = vld [vmem:[#allocation21_spill] sm:$0xff] }
 0x192   : > { %v30134_v51 = vmul.bf16 %v30132_v14, %v30133_v56 }
 0x193   : > { %21072 = vmatmul.mubr.msk.bf16.gmra.mrb[4].mxu1 %vm685_vm3, %v25027_v31 }
 0x194   : > { %21075 = vmatprep.mubr.msk.bf16.mxu1 %vm685_vm3, %v25045_v21  ;;  %21104 = vmatpush3.bf16.msra.mxu1 %v22283_v5  ;;  %v3797_v5 = vmul.bf16 %v24545_v0, %v3781_v33  ;;  %v30127_v33 = vld [vmem:[#allocation19_spill] sm:$0xff] }
 0x195   : > { %21105 = vmatprep.subr.bf16.mxu1 %v22284_v38 }
 0x198   : > { %21106 = vmatpush3.bf16.msra.mxu1 %v22284_v38  ;;  %v22286_v38 = vld [vmem:[%s30094_s6 + $0xc8] sm:$0xff]  }
 0x199   : > { %21139 = vmatprep.subr.bf16.mxu1 %v22285_v28 }
 0x19b   : > { %21076 = vmatmul.mubr.msk.bf16.gmra.mrb[8].mxu1 %vm685_vm3, %v25047_v22 }
 0x19c   : > { %21079 = vmatprep.mubr.msk.bf16.mxu1 %vm685_vm3, %v25061_v19 }
 0x1a3   : > { %21080 = vmatmul.mubr.msk.bf16.gmra.mrb[12].mxu1 %vm685_vm3, %v25063_v1 }
 0x1a4   : > { %21083 = vmatprep.mubr.msk.bf16.mxu1 %vm685_vm3, %v25076_v52 }
 0x1ab   : > { %21084 = vmatmul.mubr.msk.bf16.gmra.mrb[16].mxu1 %vm685_vm3, %v25078_v20 }
 0x1ac   : > { %21087 = vmatprep.mubr.msk.bf16.mxu1 %vm685_vm3, %v25091_v42 }
 0x1b3   : > { %21088 = vmatmul.mubr.msk.bf16.gmra.mrb[20].mxu1 %vm685_vm3, %v25093_v55 }
 0x1b4   : > { %21091 = vmatprep.mubr.msk.bf16.mxu1 %vm685_vm3, %v25106_v37 }
 0x1bb   : > { %21092 = vmatmul.mubr.msk.bf16.gmra.mrb[24].mxu1 %vm685_vm3, %v25108_v43 }
 0x1bc   : > { %21095 = vmatprep.mubr.msk.bf16.mxu1 %vm685_vm3, %v25121_v4 }
 0x1c3   : > { %21096 = vmatmul.mubr.msk.bf16.gmra.mrb[28].mxu1 %vm685_vm3, %v25171_v10 }
 0x1c4   : > { %21107 = vmatprep.mubr.msk.bf16.mxu1 %vm685_vm3, %v3797_v5 }
 0x1cb   : > { %21108 = vmatmul.mubr.msk.bf16.vlgmr.msra.gmra.mrb[0].mxu1 %vm685_vm3, %v3798_v46  ;;  %v22289_v46 = vld [vmem:[%s30094_s6 + $0xe0] sm:$0xff]  }
 0x1cc   : > { %21111 = vmatprep.mubr.msk.bf16.mxu1 %vm685_vm3, %v3799_v49  ;;  %21140 = vmatpush3.bf16.msra.mxu1 %v22285_v28  ;;  %v30125_v49 = vmul.bf16 %v24667_v27, %v30124_v9  ;;  %v30126_v28 = vld [vmem:[#allocation15_spill] sm:$0xff] }
 0x1cd   : > { %21141 = vmatprep.subr.bf16.mxu1 %v22286_v38  ;;  %v30128_v5 = vmul.bf16 %v30126_v28, %v30127_v33  ;;  %v30139_v33 = vmul.bf16 %v24865_v62, %v24900_v16  ;;  %v30147_v16 = vmul.bf16 %v24486_v60, %v24973_v15  ;;  %v22290_v15 = vld [vmem:[%s30094_s6 + $0xe8] sm:$0xff]  }
 0x1d0   : > { %21142 = vmatpush3.bf16.msra.mxu1 %v22286_v38  ;;  %v30130_v38 = vld [vmem:[#allocation20_spill] sm:$0xff] }
 0x1d1   : > { %21143 = vmatprep.subr.bf16.mxu1 %v22287_v44 }
 0x1d3   : > { %21112 = vmatmul.mubr.msk.bf16.gmra.mrb[4].mxu1 %vm685_vm3, %v30123_v25  ;;  %v30131_v25 = vmul.bf16 %v30129_v57, %v30130_v38  ;;  %v30141_v38 = vld [vmem:[#allocation25_spill] sm:$0xff] }
 0x1d4   : > { %21115 = vmatprep.mubr.msk.bf16.mxu1 %vm685_vm3, %v30125_v49  ;;  %21144 = vmatpush3.bf16.msra.mxu1 %v22287_v44  ;;  %v30135_v44 = vld [vmem:[#allocation22_spill] sm:$0xff] }
 0x1d5   : > { %21145 = vmatprep.subr.bf16.mxu1 %v22288_v39  ;;  %v30136_v9 = vmul.bf16 %v24807_v35, %v30135_v44 }
 0x1d8   : > { %21146 = vmatpush3.bf16.msra.mxu1 %v22288_v39  ;;  %v30137_v39 = vld [vmem:[#allocation23_spill] sm:$0xff] }
 0x1d9   : > { %21179 = vmatprep.subr.bf16.mxu1 %v22289_v46  ;;  %v30138_v49 = vmul.bf16 %v24823_v48, %v30137_v39  ;;  %v30146_v39 = vmul.bf16 %v24482_v54, %v24967_v47  ;;  %v4089_v47 = vld [vmem:[#allocation2 + $0x37] sm:$0xff] }
 0x1db   : > { %21116 = vmatmul.mubr.msk.bf16.gmra.mrb[8].mxu1 %vm685_vm3, %v30128_v5  ;;  %v30140_v5 = vld [vmem:[#allocation10_spill] sm:$0xff] }
 0x1dc   : > { %21119 = vmatprep.mubr.msk.bf16.mxu1 %vm685_vm3, %v30131_v25  ;;  %v30142_v56 = vmul.bf16 %v30140_v5, %v30141_v38  ;;  %v30144_v25 = vld [vmem:[#allocation26_spill] sm:$0xff] }
 0x1dd   : > { %v4090_v38 = vld [vmem:[#allocation2 + $0x3f] sm:$0xff] }
 0x1e3   : > { %21120 = vmatmul.mubr.msk.bf16.gmra.mrb[12].mxu1 %vm685_vm3, %v30134_v51  ;;  %v30143_v51 = vld [vmem:[#allocation11_spill] sm:$0xff] }
 0x1e4   : > { %21123 = vmatprep.mubr.msk.bf16.mxu1 %vm685_vm3, %v30136_v9  ;;  %v30145_v44 = vmul.bf16 %v30143_v51, %v30144_v25  ;;  %v4087_v9 = vld [vmem:[#allocation2 + $0x27] sm:$0xff]  ;;  %v4092_v51 = vld [vmem:[#allocation2 + $0x4f] sm:$0xff] }
 0x1e5   : > { %v4091_v25 = vld [vmem:[#allocation2 + $0x47] sm:$0xff] }
 0x1e6   : > { %v4121_v54 = vpack.c.bf16 %v4092_v51, %v4091_v25  ;;  %v4100_v25 = vld [vmem:[#allocation2 + $0x8f] sm:$0xff] }
 0x1eb   : > { %21124 = vmatmul.mubr.msk.bf16.gmra.mrb[16].mxu1 %vm685_vm3, %v30138_v49  ;;  %v4088_v49 = vld [vmem:[#allocation2 + $0x2f] sm:$0xff] }
 0x1ec   : > { %21127 = vmatprep.mubr.msk.bf16.mxu1 %vm685_vm3, %v30139_v33  ;;  %v4119_v33 = vpack.c.bf16 %v4088_v49, %v4087_v9  ;;  %v4094_v9 = vld [vmem:[#allocation2 + $0x5f] sm:$0xff] }
 0x1f3   : > { %21128 = vmatmul.mubr.msk.bf16.gmra.mrb[20].mxu1 %vm685_vm3, %v30142_v56  ;;  %v3812_v56 = vmul.bf16 %v24490_v6, %v24986_v53  ;;  %v4096_v6 = vld [vmem:[#allocation2 + $0x6f] sm:$0xff]  ;;  %v4137_v53 = vmul.bf16 %v24552_v50, %v4121_v54  ;;  %v4099_v50 = vld [vmem:[#allocation2 + $0x87] sm:$0xff] }
 0x1f4   : > { %21131 = vmatprep.mubr.msk.bf16.mxu1 %vm685_vm3, %v30145_v44  ;;  %v4135_v44 = vmul.bf16 %v24494_v29, %v4119_v33  ;;  %v4093_v29 = vld [vmem:[#allocation2 + $0x57] sm:$0xff] }
 0x1f5   : > { %v22291_v33 = vld [vmem:[%s30094_s6 + $0xf0] sm:$0xff]   ;;  %v4122_v51 = vpack.c.bf16 %v4094_v9, %v4093_v29 }
 0x1f7   : > { %v4138_v54 = vmul.bf16 %v24616_v11, %v4122_v51  ;;  %v4102_v11 = vld [vmem:[#allocation2 + $0x9f] sm:$0xff] }
 0x1fb   : > { %21132 = vmatmul.mubr.msk.bf16.gmra.mrb[24].mxu1 %vm685_vm3, %v30146_v39  ;;  %v4120_v39 = vpack.c.bf16 %v4090_v38, %v4089_v47  ;;  %v4097_v47 = vld [vmem:[#allocation2 + $0x77] sm:$0xff] }
 0x1fc   : > { %21135 = vmatprep.mubr.msk.bf16.mxu1 %vm685_vm3, %v30147_v16  ;;  %v4095_v16 = vld [vmem:[#allocation2 + $0x67] sm:$0xff] }
 0x1fd   : > { %v4136_v49 = vmul.bf16 %v24550_v41, %v4120_v39  ;;  %v4123_v38 = vpack.c.bf16 %v4096_v6, %v4095_v16  ;;  %v22292_v41 = vld [vmem:[%s30094_s6 + $0xf8] sm:$0xff]   ;;  %v25267_v6 = vld [vmem:[%s30094_s6 + $0x100] sm:$0xff]  }
 0x203   : > { %21136 = vmatmul.mubr.msk.bf16.gmra.mrb[28].mxu1 %vm685_vm3, %v3812_v56  ;;  %v4098_v56 = vld [vmem:[#allocation2 + $0x7f] sm:$0xff] }
 0x204   : > { %21147 = vmatprep.mubr.msk.bf16.mxu1 %vm685_vm3, %v4135_v44  ;;  %v4139_v44 = vmul.bf16 %v24618_v34, %v4123_v38  ;;  %v4104_v34 = vld [vmem:[#allocation2 + $0xaf] sm:$0xff] }
 0x20b   : > { %21148 = vmatmul.mubr.msk.bf16.vlgmr.msra.gmra.mrb[0].mxu1 %vm685_vm3, %v4136_v49  ;;  %v4101_v49 = vld [vmem:[#allocation2 + $0x97] sm:$0xff] }
 0x20c   : > { %21151 = vmatprep.mubr.msk.bf16.mxu1 %vm685_vm3, %v4137_v53  ;;  %21180 = vmatpush3.bf16.msra.mxu1 %v22289_v46  ;;  %v4124_v53 = vpack.c.bf16 %v4098_v56, %v4097_v47  ;;  %v4125_v46 = vpack.c.bf16 %v4100_v25, %v4099_v50  ;;  %v4126_v29 = vpack.c.bf16 %v4102_v11, %v4101_v49  ;;  %v4107_v56 = vld [vmem:[#allocation2 + $0xc7] sm:$0xff]  ;;  %v4112_v11 = vld [vmem:[#allocation2 + $0xef] sm:$0xff] }
 0x20d   : > { %21181 = vmatprep.subr.bf16.mxu1 %v22290_v15 }
 0x20e   : > { %v4140_v39 = vmul.bf16 %v24688_v23, %v4124_v53  ;;  %v4141_v9 = vmul.bf16 %v24690_v24, %v4125_v46  ;;  %v4111_v46 = vld [vmem:[#allocation2 + $0xe7] sm:$0xff] }
 0x210   : > { %21182 = vmatpush3.bf16.msra.mxu1 %v22290_v15  ;;  %v4103_v15 = vld [vmem:[#allocation2 + $0xa7] sm:$0xff] }
 0x211   : > { %21183 = vmatprep.subr.bf16.mxu1 %v22291_v33  ;;  %v4127_v51 = vpack.c.bf16 %v4104_v34, %v4103_v15  ;;  %v4131_v34 = vpack.c.bf16 %v4112_v11, %v4111_v46 }
 0x213   : > { %21152 = vmatmul.mubr.msk.bf16.gmra.mrb[4].mxu1 %vm685_vm3, %v4138_v54  ;;  %v4108_v54 = vld [vmem:[#allocation2 + $0xcf] sm:$0xff]  ;;  %v4143_v24 = vmul.bf16 %v24756_v40, %v4127_v51  ;;  %v30148_v40 = vmul.bf16 %v24816_v18, %v24893_v36 }
 0x214   : > { %21155 = vmatprep.mubr.msk.bf16.mxu1 %vm685_vm3, %v4139_v44  ;;  %21184 = vmatpush3.bf16.msra.mxu1 %v22291_v33  ;;  %v4129_v44 = vpack.c.bf16 %v4108_v54, %v4107_v56  ;;  %v4117_v56 = vld [vmem:[#allocation2 + $0x117] sm:$0xff]  ;;  %v4118_v54 = vld [vmem:[#allocation2 + $0x11f] sm:$0xff] }
 0x215   : > { %21185 = vmatprep.subr.bf16.mxu1 %v22292_v41 }
 0x218   : > { %21186 = vmatpush3.bf16.msra.mxu1 %v22292_v41  ;;  %v4142_v41 = vmul.bf16 %v24754_v13, %v4126_v29  ;;  %v4145_v13 = vmul.bf16 %v24818_v26, %v4129_v44  ;;  %v4147_v29 = vmul.bf16 %v24876_v45, %v4131_v34  ;;  %v30149_v26 = vmul.bf16 %v24874_v58, %v24941_v59 }
 0x219   : > { %21219 = vmatprep.subr.bf16.mxu1 %v25267_v6  ;;  %v30150_v45 = vmul.bf16 %v24919_v61, %v24971_v32  ;;  %v30151_v58 = vmul.bf16 %v24921_v30, %v24977_v3 }
 0x21b   : > { %21156 = vmatmul.mubr.msk.bf16.gmra.mrb[8].mxu1 %vm685_vm3, %v4140_v39 }
 0x21c   : > { %21159 = vmatprep.mubr.msk.bf16.mxu1 %vm685_vm3, %v4141_v9 }
 0x21d   : > { %v25275_v16 = vpop.f32.mrb[32].mxu0 }
 0x21e   : > { %v25277_v33 = vpop.f32.mrb[33].mxu0 }
 0x21f   : > { %v25279_v38 = vpop.f32.mrb[34].mxu0 }
 0x220   : > { %v25281_v23 = vpop.f32.mrb[35].mxu0 }
 0x223   : > { %21160 = vmatmul.mubr.msk.bf16.gmra.mrb[12].mxu1 %vm685_vm3, %v4142_v41 }
 0x224   : > { %21163 = vmatprep.mubr.msk.bf16.mxu1 %vm685_vm3, %v4143_v24  ;;  %v4134_v24 = vpack.c.bf16 %v4118_v54, %v4117_v56 }
 0x225   : > { %v25287_v50 = vpop.f32.mrb[36].mxu0 }
 0x226   : > { %v25289_v25 = vpop.f32.mrb[37].mxu0 }
 0x227   : > { %v25291_v47 = vpop.f32.mrb[38].mxu0 }
 0x228   : > { %v25293_v53 = vpop.f32.mrb[39].mxu0 }
 0x22b   : > { %21164 = vmatmul.mubr.msk.bf16.gmra.mrb[16].mxu1 %vm685_vm3, %v30148_v40  ;;  %v22294_v40 = vld [vmem:[%s30094_s6 + $0x108] sm:$0xff]  }
 0x22c   : > { %21167 = vmatprep.mubr.msk.bf16.mxu1 %vm685_vm3, %v4145_v13  ;;  %v4150_v13 = vmul.bf16 %v24965_v17, %v4134_v24  ;;  %v4755_v24 = vld [vmem:[#allocation2 + $0x69] sm:$0xff] }
 0x22d   : > { %v25301_v39 = vpop.f32.mrb[40].mxu0 }
 0x22e   : > { %v25303_v15 = vpop.f32.mrb[41].mxu0 }
 0x22f   : > { %v25305_v9 = vpop.f32.mrb[42].mxu0 }
 0x230   : > { %v25307_v49 = vpop.f32.mrb[43].mxu0 }
 0x233   : > { %21168 = vmatmul.mubr.msk.bf16.gmra.mrb[20].mxu1 %vm685_vm3, %v30149_v26 }
 0x234   : > { %21171 = vmatprep.mubr.msk.bf16.mxu1 %vm685_vm3, %v4147_v29 }
 0x235   : > { %v25315_v18 = vpop.f32.mrb[44].mxu0 }
 0x236   : > { %v25317_v36 = vpop.f32.mrb[45].mxu0 }
 0x237   : > { %v25319_v51 = vpop.f32.mrb[46].mxu0 }
 0x238   : > { %v25321_v41 = vpop.f32.mrb[47].mxu0 }
 0x23b   : > { %21172 = vmatmul.mubr.msk.bf16.gmra.mrb[24].mxu1 %vm685_vm3, %v30150_v45  ;;  %v4756_v45 = vld [vmem:[#allocation2 + $0x71] sm:$0xff] }
 0x23c   : > { %21175 = vmatprep.mubr.msk.bf16.mxu1 %vm685_vm3, %v30151_v58 }
 0x23d   : > { %v25331_v59 = vpop.f32.mrb[48].mxu0 }
 0x23e   : > { %v25333_v44 = vpop.f32.mrb[49].mxu0 }
 0x23f   : > { %v25335_v46 = vpop.f32.mrb[50].mxu0 }
 0x240   : > { %v25337_v11 = vpop.f32.mrb[51].mxu0 }
 0x243   : > { %21176 = vmatmul.mubr.msk.bf16.gmra.mrb[28].mxu1 %vm685_vm3, %v4150_v13  ;;  %v4783_v13 = vpack.c.bf16 %v4756_v45, %v4755_v24  ;;  %v4766_v24 = vld [vmem:[#allocation2 + $0xc1] sm:$0xff] }
 0x244   : > { %21187 = vmatprep.mubr.msk.bf16.mxu1 %vm685_vm3, %v25005_v8  ;;  %v22295_v8 = vld [vmem:[%s30094_s6 + $0x110] sm:$0xff]  }
 0x245   : > { %v25343_v61 = vpop.f32.mrb[52].mxu0 }
 0x246   : > { %v25345_v30 = vpop.f32.mrb[53].mxu0 }
 0x247   : > { %v25347_v32 = vpop.f32.mrb[54].mxu0 }
 0x248   : > { %v25349_v3 = vpop.f32.mrb[55].mxu0 }
 0x24b   : > { %21188 = vmatmul.mubr.msk.bf16.vlgmr.msra.gmra.mrb[0].mxu1 %vm685_vm3, %v25025_v7  ;;  %v22296_v7 = vld [vmem:[%s30094_s6 + $0x118] sm:$0xff]  }
 0x24c   : > { %21191 = vmatprep.mubr.msk.bf16.mxu1 %vm685_vm3, %v25027_v31  ;;  %21220 = vmatpush3.bf16.msra.mxu1 %v25267_v6 }
 0x24d   : > { %v25359_v17 = vpop.f32.mrb[56].mxu0  ;;  %21221 = vmatprep.subr.bf16.mxu1 %v22294_v40 }
 0x24e   : > { %v25364_v34 = vpop.f32.mrb[57].mxu0 }
 0x24f   : > { %v25366_v29 = vpop.f32.mrb[58].mxu0 }
 0x250   : > { %v25368_v26 = vpop.f32.mrb[59].mxu0  ;;  %21222 = vmatpush3.bf16.msra.mxu1 %v22294_v40  ;;  %v4799_v40 = vmul.bf16 %v24667_v27, %v4783_v13  ;;  %v4767_v13 = vld [vmem:[#allocation2 + $0xc9] sm:$0xff] }
 0x251   : > { %21223 = vmatprep.subr.bf16.mxu1 %v22295_v8 }
 0x253   : > { %21192 = vmatmul.mubr.msk.bf16.gmra.mrb[4].mxu1 %vm685_vm3, %v25045_v21  ;;  %v25405_v21 = vld [vmem:[#allocation2 + $0x118] sm:$0xff] }
 0x254   : > { %21195 = vmatprep.mubr.msk.bf16.mxu1 %vm685_vm3, %v25047_v22  ;;  %21224 = vmatpush3.bf16.msra.mxu1 %v22295_v8  ;;  %v25407_v22 = vld [vmem:[#allocation2 + $0x120] sm:$0xff] }
 0x255   : > { %v25377_v31 = vpop.f32.mrb[60].mxu0  ;;  %21225 = vmatprep.subr.bf16.mxu1 %v22296_v7  ;;  %v4757_v8 = vld [vmem:[#allocation2 + $0x79] sm:$0xff] }
 0x256   : > { %v25379_v6 = vpop.f32.mrb[61].mxu0 }
 0x257   : > { %v25381_v56 = vpop.f32.mrb[62].mxu0 }
 0x258   : > { %v25383_v54 = vpop.f32.mrb[63].mxu0  ;;  %21226 = vmatpush3.bf16.msra.mxu1 %v22296_v7  ;;  %v4758_v7 = vld [vmem:[#allocation2 + $0x81] sm:$0xff] }
 0x25b   : > { %21196 = vmatmul.mubr.msk.bf16.gmra.mrb[8].mxu1 %vm685_vm3, %v25061_v19  ;;  %v4472_v19 = vpack.c.bf16 %v25407_v22, %v25405_v21 }
 0x25c   : > { %21199 = vmatprep.mubr.msk.bf16.mxu1 %vm685_vm3, %v25063_v1  ;;  %v4752_v1 = vld [vmem:[#allocation2 + $0x51] sm:$0xff] }
 0x263   : > { %21200 = vmatmul.mubr.msk.bf16.gmra.mrb[12].mxu1 %vm685_vm3, %v25076_v52  ;;  %v30152_v52 = vmul.bf16 %v24545_v0, %v24886_v2  ;;  %v30155_v0 = vld [vmem:[#allocation14_spill] sm:$0xff] }
 0x264   : > { %21203 = vmatprep.mubr.msk.bf16.mxu1 %vm685_vm3, %v25078_v20 }
 0x26b   : > { %21204 = vmatmul.mubr.msk.bf16.gmra.mrb[16].mxu1 %vm685_vm3, %v25091_v42 }
 0x26c   : > { %21207 = vmatprep.mubr.msk.bf16.mxu1 %vm685_vm3, %v25093_v55  ;;  %v4753_v55 = vld [vmem:[#allocation2 + $0x59] sm:$0xff] }
 0x273   : > { %21208 = vmatmul.mubr.msk.bf16.gmra.mrb[20].mxu1 %vm685_vm3, %v25106_v37  ;;  %v4754_v37 = vld [vmem:[#allocation2 + $0x61] sm:$0xff] }
 0x274   : > { %21211 = vmatprep.mubr.msk.bf16.mxu1 %vm685_vm3, %v25108_v43  ;;  %v4751_v43 = vld [vmem:[#allocation2 + $0x49] sm:$0xff]  ;;  %v4782_v58 = vpack.c.bf16 %v4754_v37, %v4753_v55  ;;  %v4764_v55 = vld [vmem:[#allocation2 + $0xb1] sm:$0xff] }
 0x275   : > { %v4781_v20 = vpack.c.bf16 %v4752_v1, %v4751_v43  ;;  %v4763_v37 = vld [vmem:[#allocation2 + $0xa9] sm:$0xff] }
 0x276   : > { %v4798_v2 = vmul.bf16 %v30155_v0, %v4782_v58  ;;  %v4765_v58 = vld [vmem:[#allocation2 + $0xb9] sm:$0xff] }
 0x277   : > { %v4797_v42 = vmul.bf16 %v24601_v12, %v4781_v20  ;;  %v4760_v12 = vld [vmem:[#allocation2 + $0x91] sm:$0xff]  ;;  %v4761_v20 = vld [vmem:[#allocation2 + $0x99] sm:$0xff] }
 0x27b   : > { %21212 = vmatmul.mubr.msk.bf16.gmra.mrb[24].mxu1 %vm685_vm3, %v25121_v4  ;;  %v30153_v4 = vld [vmem:[#allocation24_spill] sm:$0xff] }
 0x27c   : > { %21215 = vmatprep.mubr.msk.bf16.mxu1 %vm685_vm3, %v25171_v10  ;;  %v30154_v10 = vmul.bf16 %v24543_v63, %v30153_v4  ;;  %v4784_v63 = vpack.c.bf16 %v4758_v7, %v4757_v8  ;;  %v4787_v4 = vpack.c.bf16 %v4764_v55, %v4763_v37  ;;  %v4769_v8 = vld [vmem:[#allocation2 + $0xd9] sm:$0xff]  ;;  %v4770_v7 = vld [vmem:[#allocation2 + $0xe1] sm:$0xff] }
 0x27d   : > { %v4777_v55 = vld [vmem:[#allocation2 + $0x119] sm:$0xff]  ;;  %v30158_v37 = vld [vmem:[#allocation27_spill] sm:$0xff] }
 0x27e   : > { %v4803_v45 = vmul.bf16 %v24807_v35, %v4787_v4  ;;  %v4790_v35 = vpack.c.bf16 %v4770_v7, %v4769_v8  ;;  %v30159_v4 = vmul.bf16 %v24486_v60, %v30158_v37 }
 0x283   : > { %21216 = vmatmul.mubr.msk.bf16.gmra.mrb[28].mxu1 %vm685_vm3, %v4472_v19  ;;  %v4759_v19 = vld [vmem:[#allocation2 + $0x89] sm:$0xff] }
 0x284   : > { %21227 = vmatprep.mubr.msk.bf16.mxu1 %vm685_vm3, %v30152_v52  ;;  %v4785_v1 = vpack.c.bf16 %v4760_v12, %v4759_v19  ;;  %v4800_v52 = vmul.bf16 %v30126_v28, %v4784_v63  ;;  %v4768_v28 = vld [vmem:[#allocation2 + $0xd1] sm:$0xff]  ;;  %v4771_v12 = vld [vmem:[#allocation2 + $0xe9] sm:$0xff]  ;;  %v4806_v19 = vmul.bf16 %v30140_v5, %v4790_v35 }
 0x285   : > { %v4789_v0 = vpack.c.bf16 %v4768_v28, %v4767_v13 }
 0x286   : > { %v4801_v43 = vmul.bf16 %v30129_v57, %v4785_v1  ;;  %v4788_v57 = vpack.c.bf16 %v4766_v24, %v4765_v58  ;;  %v30156_v1 = vld [vmem:[#allocation11_spill] sm:$0xff]  ;;  %v25456_v24 = vld [vmem:[%s30161_s30] ss:$0 sm:$0xff] }
 0x287   : > { %v22299_v58 = vld [vmem:[%s30048_s20 + $0x4] ss:$8 sps:$4 sm:$0xff]   ;;  %v21631_v60 = vadd.f32 %v25275_v16, %v25456_v24  ;;  %v21633_v28 = vadd.f32 %v25456_v24, %v25277_v33  ;;  %v21635_v13 = vadd.f32 %v25279_v38, %v25456_v24  ;;  %v21639_v38 = vadd.f32 %v25287_v50, %v25456_v24 }
 0x288   : > { %5379 = vmatprep.mubr.bf16.mxu0 %v22299_v58 }
 0x28b   : > { %21228 = vmatmul.mubr.msk.bf16.vlgmr.msra.gmra.mrb[0].mxu1 %vm685_vm3, %v30154_v10 }
 0x28c   : > { %21231 = vmatprep.mubr.msk.bf16.mxu1 %vm685_vm3, %v4797_v42  ;;  %v4762_v42 = vld [vmem:[#allocation2 + $0xa1] sm:$0xff] }
 0x28d   : > { %v4786_v27 = vpack.c.bf16 %v4762_v42, %v4761_v20  ;;  %v4774_v20 = vld [vmem:[#allocation2 + $0x101] sm:$0xff] }
 0x28f   : > { %v4802_v10 = vmul.bf16 %v30132_v14, %v4786_v27  ;;  %v4772_v14 = vld [vmem:[#allocation2 + $0xf1] sm:$0xff]  ;;  %v4778_v27 = vld [vmem:[#allocation2 + $0x121] sm:$0xff] }
 0x290   : > { %v4791_v63 = vpack.c.bf16 %v4772_v14, %v4771_v12  ;;  %v4794_v5 = vpack.c.bf16 %v4778_v27, %v4777_v55 }
 0x293   : > { %21232 = vmatmul.mubr.msk.bf16.gmra.mrb[4].mxu1 %vm685_vm3, %v4798_v2  ;;  %v4804_v2 = vmul.bf16 %v24823_v48, %v4788_v57  ;;  %v30157_v48 = vld [vmem:[#allocation12_spill] sm:$0xff] }
 0x294   : > { %21235 = vmatprep.mubr.msk.bf16.mxu1 %vm685_vm3, %v4799_v40  ;;  %v4805_v40 = vmul.bf16 %v24865_v62, %v4789_v0 }
 0x29b   : > { %21236 = vmatmul.mubr.msk.bf16.gmra.mrb[8].mxu1 %vm685_vm3, %v4800_v52  ;;  %v4807_v52 = vmul.bf16 %v30156_v1, %v4791_v63 }
 0x29c   : > { %21239 = vmatprep.mubr.msk.bf16.mxu1 %vm685_vm3, %v4801_v43  ;;  %v4773_v43 = vld [vmem:[#allocation2 + $0xf9] sm:$0xff] }
 0x29d   : > { %v4792_v62 = vpack.c.bf16 %v4774_v20, %v4773_v43 }
 0x29f   : > { %v4808_v42 = vmul.bf16 %v30157_v48, %v4792_v62  ;;  %v21645_v62 = vadd.f32 %v25456_v24, %v25293_v53  ;;  %v21649_v53 = vadd.f32 %v25456_v24, %v25303_v15 }
 0x2a3   : > { %21240 = vmatmul.mubr.msk.bf16.gmra.mrb[12].mxu1 %vm685_vm3, %v4802_v10  ;;  %v30160_v10 = vld [vmem:[#allocation13_spill] sm:$0xff] }
 0x2a4   : > { %21243 = vmatprep.mubr.msk.bf16.mxu1 %vm685_vm3, %v4803_v45  ;;  %v4810_v45 = vmul.bf16 %v30160_v10, %v4794_v5 }
 0x2ab   : > { %21244 = vmatmul.mubr.msk.bf16.gmra.mrb[16].mxu1 %vm685_vm3, %v4804_v2 }
 0x2ac   : > { %21247 = vmatprep.mubr.msk.bf16.mxu1 %vm685_vm3, %v4805_v40  ;;  %v21637_v40 = vadd.f32 %v25456_v24, %v25281_v23  ;;  %v21641_v23 = vadd.f32 %v25456_v24, %v25289_v25 }
 0x2b3   : > { %21248 = vmatmul.mubr.msk.bf16.gmra.mrb[20].mxu1 %vm685_vm3, %v4806_v19 }
 0x2b4   : > { %21251 = vmatprep.mubr.msk.bf16.mxu1 %vm685_vm3, %v4807_v52  ;;  %v21643_v52 = vadd.f32 %v25291_v47, %v25456_v24  ;;  %v21647_v47 = vadd.f32 %v25301_v39, %v25456_v24 }
 0x2bb   : > { %21252 = vmatmul.mubr.msk.bf16.gmra.mrb[24].mxu1 %vm685_vm3, %v4808_v42 }
 0x2bc   : > { %21255 = vmatprep.mubr.msk.bf16.mxu1 %vm685_vm3, %v30159_v4 }
 0x2c3   : > { %21256 = vmatmul.mubr.msk.bf16.gmra.mrb[28].mxu1 %vm685_vm3, %v4810_v45  ;;  %v21651_v45 = vadd.f32 %v25305_v9, %v25456_v24  ;;  %v21655_v9 = vadd.f32 %v25315_v18, %v25456_v24 }
 0x35e   : > { %v21229_v57 = vpop.f32.mrb[0].mxu1 }
 0x35f   : > { %v21632_v0 = vadd.f32 %v21631_v60, %v21229_v57  ;;  %v4926_v2 = vpop.f32.mrb[1].mxu1 }
 0x360   : > { %v21634_v8 = vadd.f32 %v21633_v28, %v4926_v2  ;;  %v21230_v7 = vpop.f32.mrb[2].mxu1  ;;  %v21653_v28 = vadd.f32 %v25456_v24, %v25307_v49  ;;  %v21657_v49 = vadd.f32 %v25456_v24, %v25317_v36 }
 0x361   : > { %v5087_v14 = vmax.f32 %v21632_v0, 0.0  ;;  %v21636_v35 = vadd.f32 %v21635_v13, %v21230_v7  ;;  %v4929_v12 = vpop.f32.mrb[3].mxu1 }
 0x362   : > { %v5085_v63 = vmax.f32 %v21634_v8, 0.0  ;;  %v21638_v19 = vadd.f32 %v21637_v40, %v4929_v12 }
 0x363   : > { %5119 = vst.msk [vmem:[#allocation2 + $0x28] sm:$0xff] %vm685_vm3, %v5087_v14  ;;  %v5088_v16 = vmax.f32 %v21636_v35, 0.0  ;;  %v21659_v35 = vadd.f32 %v25319_v51, %v25456_v24  ;;  %v21663_v51 = vadd.f32 %v25331_v59, %v25456_v24 }
 0x364   : > { %5117 = vst.msk [vmem:[#allocation2 + $0x18] sm:$0xff] %vm685_vm3, %v5085_v63  ;;  %v5086_v33 = vmax.f32 %v21638_v19, 0.0  ;;  %v21661_v19 = vadd.f32 %v25456_v24, %v25321_v41  ;;  %v21665_v41 = vadd.f32 %v25456_v24, %v25333_v44 }
 0x365   : > { %5120 = vst.msk [vmem:[#allocation2 + $0x30] sm:$0xff] %vm685_vm3, %v5088_v16 }
 0x366   : > { %5118 = vst.msk [vmem:[#allocation2 + $0x20] sm:$0xff] %vm685_vm3, %v5086_v33  ;;  %v21233_v1 = vpop.f32.mrb[4].mxu1 }
 0x367   : > { %v21640_v43 = vadd.f32 %v21639_v38, %v21233_v1  ;;  %v4942_v20 = vpop.f32.mrb[5].mxu1 }
 0x368   : > { %v21642_v48 = vadd.f32 %v21641_v23, %v4942_v20  ;;  %v21234_v42 = vpop.f32.mrb[6].mxu1 }
 0x369   : > { %v5091_v55 = vmax.f32 %v21640_v43, 0.0  ;;  %v21644_v50 = vadd.f32 %v21643_v52, %v21234_v42  ;;  %v4945_v27 = vpop.f32.mrb[7].mxu1 }
 0x36a   : > { %v5089_v37 = vmax.f32 %v21642_v48, 0.0  ;;  %v21646_v4 = vadd.f32 %v21645_v62, %v4945_v27  ;;  %v21667_v62 = vadd.f32 %v25335_v46, %v25456_v24  ;;  %v21671_v46 = vadd.f32 %v25343_v61, %v25456_v24 }
 0x36b   : > { %5123 = vst.msk [vmem:[#allocation2 + $0x48] sm:$0xff] %vm685_vm3, %v5091_v55  ;;  %v5092_v25 = vmax.f32 %v21644_v50, 0.0  ;;  %v21669_v55 = vadd.f32 %v25456_v24, %v25337_v11  ;;  %v21673_v11 = vadd.f32 %v25456_v24, %v25345_v30 }
 0x36c   : > { %5121 = vst.msk [vmem:[#allocation2 + $0x38] sm:$0xff] %vm685_vm3, %v5089_v37  ;;  %v5090_v5 = vmax.f32 %v21646_v4, 0.0 }
 0x36d   : > { %5124 = vst.msk [vmem:[#allocation2 + $0x50] sm:$0xff] %vm685_vm3, %v5092_v25 }
 0x36e   : > { %5122 = vst.msk [vmem:[#allocation2 + $0x40] sm:$0xff] %vm685_vm3, %v5090_v5  ;;  %v21237_v10 = vpop.f32.mrb[8].mxu1 }
 0x36f   : > { %v21648_v58 = vadd.f32 %v21647_v47, %v21237_v10  ;;  %v4958_v60 = vpop.f32.mrb[9].mxu1  ;;  %v21675_v10 = vadd.f32 %v25347_v32, %v25456_v24  ;;  %v21679_v32 = vadd.f32 %v25359_v17, %v25456_v24 }
 0x370   : > { %v21650_v57 = vadd.f32 %v21649_v53, %v4958_v60  ;;  %v21238_v13 = vpop.f32.mrb[10].mxu1  ;;  %v21677_v60 = vadd.f32 %v25456_v24, %v25349_v3  ;;  %v5152_v3 = vld [vmem:[#allocation2 + $0x30] sm:$0xff] }
 0x371   : > { %v5095_v0 = vmax.f32 %v21648_v58, 0.0  ;;  %v21652_v39 = vadd.f32 %v21651_v45, %v21238_v13  ;;  %v4961_v2 = vpop.f32.mrb[11].mxu1 }
 0x372   : > { %v5093_v40 = vmax.f32 %v21650_v57, 0.0  ;;  %v21654_v8 = vadd.f32 %v21653_v28, %v4961_v2 }
 0x373   : > { %5127 = vst.msk [vmem:[#allocation2 + $0x68] sm:$0xff] %vm685_vm3, %v5095_v0  ;;  %v5096_v15 = vmax.f32 %v21652_v39, 0.0 }
 0x374   : > { %5125 = vst.msk [vmem:[#allocation2 + $0x58] sm:$0xff] %vm685_vm3, %v5093_v40  ;;  %v5094_v7 = vmax.f32 %v21654_v8, 0.0  ;;  %v5184_v8 = vld [vmem:[#allocation2 + $0x31] sm:$0xff] }
 0x375   : > { %5128 = vst.msk [vmem:[#allocation2 + $0x70] sm:$0xff] %vm685_vm3, %v5096_v15  ;;  %v5183_v15 = vld [vmem:[#allocation2 + $0x29] sm:$0xff] }
 0x376   : > { %5126 = vst.msk [vmem:[#allocation2 + $0x60] sm:$0xff] %vm685_vm3, %v5094_v7  ;;  %v21241_v14 = vpop.f32.mrb[12].mxu1  ;;  %v21681_v7 = vadd.f32 %v25456_v24, %v25364_v34 }
 0x377   : > { %v21656_v12 = vadd.f32 %v21655_v9, %v21241_v14  ;;  %v4974_v63 = vpop.f32.mrb[13].mxu1  ;;  %v5181_v14 = vld [vmem:[#allocation2 + $0x19] sm:$0xff] }
 0x378   : > { %v21658_v16 = vadd.f32 %v21657_v49, %v4974_v63  ;;  %v21242_v33 = vpop.f32.mrb[14].mxu1  ;;  %v5150_v49 = vld [vmem:[#allocation2 + $0x20] sm:$0xff] }
 0x379   : > { %v5099_v38 = vmax.f32 %v21656_v12, 0.0  ;;  %v21660_v18 = vadd.f32 %v21659_v35, %v21242_v33  ;;  %v4977_v23 = vpop.f32.mrb[15].mxu1  ;;  %v5182_v35 = vld [vmem:[#allocation2 + $0x21] sm:$0xff]  ;;  %v21683_v12 = vadd.f32 %v25366_v29, %v25456_v24 }
 0x37a   : > { %v5097_v1 = vmax.f32 %v21658_v16, 0.0  ;;  %v21662_v52 = vadd.f32 %v21661_v19, %v4977_v23  ;;  %v5151_v33 = vld [vmem:[#allocation2 + $0x28] sm:$0xff] }
 0x37b   : > { %5131 = vst.msk [vmem:[#allocation2 + $0x88] sm:$0xff] %vm685_vm3, %v5099_v38  ;;  %v5100_v36 = vmax.f32 %v21660_v18, 0.0  ;;  %v25536_v38 = vmax.f32 %v5152_v3, %v5184_v8  ;;  %v21685_v18 = vadd.f32 %v25456_v24, %v25368_v26 }
 0x37c   : > { %5129 = vst.msk [vmem:[#allocation2 + $0x78] sm:$0xff] %vm685_vm3, %v5097_v1  ;;  %v5098_v43 = vmax.f32 %v21662_v52, 0.0  ;;  %v5149_v52 = vld [vmem:[#allocation2 + $0x18] sm:$0xff] }
 0x37d   : > { %5132 = vst.msk [vmem:[#allocation2 + $0x90] sm:$0xff] %vm685_vm3, %v5100_v36  ;;  %v25540_v36 = vmax.f32 %v5151_v33, %v5183_v15  ;;  %v5158_v33 = vld [vmem:[#allocation2 + $0x60] sm:$0xff] }
 0x37e   : > { %5130 = vst.msk [vmem:[#allocation2 + $0x80] sm:$0xff] %vm685_vm3, %v5098_v43  ;;  %v21245_v20 = vpop.f32.mrb[16].mxu1  ;;  %v5185_v43 = vld [vmem:[#allocation2 + $0x39] sm:$0xff] }
 0x37f   : > { %v21664_v48 = vadd.f32 %v21663_v51, %v21245_v20  ;;  %v4990_v42 = vpop.f32.mrb[17].mxu1 }
 0x380   : > { %v21666_v50 = vadd.f32 %v21665_v41, %v4990_v42  ;;  %v21246_v27 = vpop.f32.mrb[18].mxu1  ;;  %v5217_v42 = vmax.f32 %v5149_v52, %v5181_v14  ;;  %v5156_v14 = vld [vmem:[#allocation2 + $0x50] sm:$0xff] }
 0x381   : > { %v5103_v37 = vmax.f32 %v21664_v48, 0.0  ;;  %v21668_v59 = vadd.f32 %v21667_v62, %v21246_v27  ;;  %v4993_v4 = vpop.f32.mrb[19].mxu1 }
 0x382   : > { %v5101_v25 = vmax.f32 %v21666_v50, 0.0  ;;  %v21670_v5 = vadd.f32 %v21669_v55, %v4993_v4  ;;  %v5218_v55 = vmax.f32 %v5150_v49, %v5182_v35  ;;  %v5154_v4 = vld [vmem:[#allocation2 + $0x40] sm:$0xff]  ;;  %v5187_v35 = vld [vmem:[#allocation2 + $0x49] sm:$0xff] }
 0x383   : > { %5135 = vst.msk [vmem:[#allocation2 + $0xa8] sm:$0xff] %vm685_vm3, %v5103_v37  ;;  %v5104_v44 = vmax.f32 %v21668_v59, 0.0  ;;  %v5153_v59 = vld [vmem:[#allocation2 + $0x38] sm:$0xff] }
 0x384   : > { %5133 = vst.msk [vmem:[#allocation2 + $0x98] sm:$0xff] %vm685_vm3, %v5101_v25  ;;  %v5102_v47 = vmax.f32 %v21670_v5, 0.0  ;;  %v5186_v25 = vld [vmem:[#allocation2 + $0x41] sm:$0xff] }
 0x385   : > { %5136 = vst.msk [vmem:[#allocation2 + $0xb0] sm:$0xff] %vm685_vm3, %v5104_v44 }
 0x386   : > { %5134 = vst.msk [vmem:[#allocation2 + $0xa0] sm:$0xff] %vm685_vm3, %v5102_v47  ;;  %v21249_v53 = vpop.f32.mrb[20].mxu1 }
 0x387   : > { %v21672_v45 = vadd.f32 %v21671_v46, %v21249_v53  ;;  %v5006_v58 = vpop.f32.mrb[21].mxu1  ;;  %v5252_v46 = vmax.f32 %v5218_v55, %v25536_v38  ;;  %v21687_v53 = vadd.f32 %v25377_v31, %v25456_v24 }
 0x388   : > { %v21674_v28 = vadd.f32 %v21673_v11, %v5006_v58  ;;  %v21250_v57 = vpop.f32.mrb[22].mxu1  ;;  %v25546_v11 = vmax.f32 %v5153_v59, %v5185_v43 }
 0x389   : > { %v5107_v13 = vmax.f32 %v21672_v45, 0.0  ;;  %v21676_v61 = vadd.f32 %v21675_v10, %v21250_v57  ;;  %v5009_v0 = vpop.f32.mrb[23].mxu1  ;;  %v21691_v57 = vadd.f32 %v25381_v56, %v25456_v24  ;;  %v5188_v56 = vld [vmem:[#allocation2 + $0x51] sm:$0xff] }
 0x38a   : > { %v5105_v39 = vmax.f32 %v21674_v28, 0.0  ;;  %v21678_v2 = vadd.f32 %v21677_v60, %v5009_v0  ;;  %v5167_v1 = vld [vmem:[#allocation2 + $0xa8] sm:$0xff]  ;;  %v21689_v28 = vadd.f32 %v25456_v24, %v25379_v6 }
 0x38b   : > { %5139 = vst.msk [vmem:[#allocation2 + $0xc8] sm:$0xff] %vm685_vm3, %v5107_v13  ;;  %v5108_v30 = vmax.f32 %v21676_v61, 0.0  ;;  %v5165_v20 = vld [vmem:[#allocation2 + $0x98] sm:$0xff]  ;;  %v5251_v13 = vmax.f32 %v5217_v42, %v25540_v36 }
 0x38c   : > { %5137 = vst.msk [vmem:[#allocation2 + $0xb8] sm:$0xff] %vm685_vm3, %v5105_v39  ;;  %v5106_v40 = vmax.f32 %v21678_v2, 0.0  ;;  %v5199_v17 = vld [vmem:[#allocation2 + $0xa9] sm:$0xff]  ;;  %v25559_v39 = vmax.f32 %v5154_v4, %v5186_v25  ;;  %v5192_v25 = vld [vmem:[#allocation2 + $0x71] sm:$0xff] }
 0x38d   : > { %5140 = vst.msk [vmem:[#allocation2 + $0xd0] sm:$0xff] %vm685_vm3, %v5108_v30  ;;  %v5197_v16 = vld [vmem:[#allocation2 + $0x99] sm:$0xff]  ;;  %v5198_v48 = vld [vmem:[#allocation2 + $0xa1] sm:$0xff]  ;;  %v5235_v26 = vmax.f32 %v5167_v1, %v5199_v17  ;;  %v5168_v44 = vld [vmem:[#allocation2 + $0xb0] sm:$0xff] }
 0x38e   : > { %5138 = vst.msk [vmem:[#allocation2 + $0xc0] sm:$0xff] %vm685_vm3, %v5106_v40  ;;  %v21253_v9 = vpop.f32.mrb[24].mxu1  ;;  %v5166_v62 = vld [vmem:[#allocation2 + $0xa0] sm:$0xff]  ;;  %v25542_v37 = vmax.f32 %v5165_v20, %v5197_v16  ;;  %v5254_v1 = vmax.f32 %v25536_v38, %v25559_v39  ;;  %v5155_v20 = vld [vmem:[#allocation2 + $0x48] sm:$0xff] }
 0x38f   : > { %v21680_v63 = vadd.f32 %v21679_v32, %v21253_v9  ;;  %v5022_v19 = vpop.f32.mrb[25].mxu1  ;;  %v25551_v45 = vmax.f32 %v5166_v62, %v5198_v48  ;;  %v21693_v32 = vadd.f32 %v25456_v24, %v25383_v54  ;;  %v5253_v9 = vmax.f32 %v25540_v36, %v25546_v11  ;;  %v5157_v62 = vld [vmem:[#allocation2 + $0x58] sm:$0xff] }
 0x390   : > { %v21682_v34 = vadd.f32 %v21681_v7, %v5022_v19  ;;  %v21254_v23 = vpop.f32.mrb[26].mxu1  ;;  %v5267_v30 = vmax.f32 %v25542_v37, %v5235_v26  ;;  %v5283_v7 = vpack.c.bf16 %v5252_v46, %v5251_v13  ;;  %v25576_v36 = vmax.f32 %v5156_v14, %v5188_v56  ;;  %v5191_v56 = vld [vmem:[#allocation2 + $0x69] sm:$0xff]  ;;  %v5194_v14 = vld [vmem:[#allocation2 + $0x81] sm:$0xff] }
 0x391   : > { %v5111_v51 = vmax.f32 %v21680_v63, 0.0  ;;  %v21684_v41 = vadd.f32 %v21683_v12, %v21254_v23  ;;  %v5025_v29 = vpop.f32.mrb[27].mxu1 }
 0x392   : > { %v5109_v50 = vmax.f32 %v21682_v34, 0.0  ;;  %v21686_v27 = vadd.f32 %v21685_v18, %v5025_v29  ;;  %v5189_v18 = vld [vmem:[#allocation2 + $0x59] sm:$0xff]  ;;  %v5190_v34 = vld [vmem:[#allocation2 + $0x61] sm:$0xff] }
 0x393   : > { %5143 = vst.msk [vmem:[#allocation2 + $0xe8] sm:$0xff] %vm685_vm3, %v5111_v51  ;;  %v5112_v5 = vmax.f32 %v21684_v41, 0.0  ;;  %v5200_v47 = vld [vmem:[#allocation2 + $0xb1] sm:$0xff]  ;;  %v5171_v52 = vld [vmem:[#allocation2 + $0xc8] sm:$0xff]  ;;  %v25581_v38 = vmax.f32 %v5158_v33, %v5190_v34 }
 0x394   : > { %5141 = vst.msk [vmem:[#allocation2 + $0xd8] sm:$0xff] %vm685_vm3, %v5109_v50  ;;  %v5110_v10 = vmax.f32 %v21686_v27, 0.0  ;;  %v5236_v58 = vmax.f32 %v5168_v44, %v5200_v47  ;;  %v5169_v60 = vld [vmem:[#allocation2 + $0xb8] sm:$0xff]  ;;  %v5203_v49 = vld [vmem:[#allocation2 + $0xc9] sm:$0xff]  ;;  %v5223_v50 = vmax.f32 %v5155_v20, %v5187_v35  ;;  %v25579_v27 = vmax.f32 %v5157_v62, %v5189_v18 }
 0x395   : > { %5144 = vst.msk [vmem:[#allocation2 + $0xf0] sm:$0xff] %vm685_vm3, %v5112_v5  ;;  %v5170_v61 = vld [vmem:[#allocation2 + $0xc0] sm:$0xff]  ;;  %v5239_v29 = vmax.f32 %v5171_v52, %v5203_v49  ;;  %v5172_v42 = vld [vmem:[#allocation2 + $0xd0] sm:$0xff]  ;;  %v5284_v5 = vpack.c.bf16 %v5254_v1, %v5253_v9  ;;  %v5256_v44 = vmax.f32 %v25559_v39, %v25576_v36 }
 0x396   : > { %v5201_v0 = vld [vmem:[#allocation2 + $0xb9] sm:$0xff]  ;;  %v5202_v31 = vld [vmem:[#allocation2 + $0xc1] sm:$0xff]  ;;  %5142 = vst.msk [vmem:[#allocation2 + $0xe0] sm:$0xff] %vm685_vm3, %v5110_v10  ;;  %v21257_v2 = vpop.f32.mrb[28].mxu1  ;;  %v5268_v40 = vmax.f32 %v25551_v45, %v5236_v58  ;;  %v5255_v13 = vmax.f32 %v25546_v11, %v5223_v50 }
 0x397   : > { %v25564_v6 = vmax.f32 %v5169_v60, %v5201_v0  ;;  %v25566_v8 = vmax.f32 %v5170_v61, %v5202_v31  ;;  %v21688_v3 = vadd.f32 %v21687_v53, %v21257_v2  ;;  %v5038_v15 = vpop.f32.mrb[29].mxu1  ;;  %v5257_v61 = vmax.f32 %v5223_v50, %v25579_v27  ;;  %v5160_v31 = vld [vmem:[#allocation2 + $0x70] sm:$0xff]  ;;  %v5161_v11 = vld [vmem:[#allocation2 + $0x78] sm:$0xff]  ;;  %v5216_v50 = vld [vmem:[#allocation2 + $0x121] sm:$0xff] }
 0x398   : > { %v21690_v12 = vadd.f32 %v21689_v28, %v5038_v15  ;;  %v21258_v63 = vpop.f32.mrb[30].mxu1  ;;  %v5291_v19 = vpack.c.bf16 %v5268_v40, %v5267_v30  ;;  %v5258_v0 = vmax.f32 %v25576_v36, %v25581_v38  ;;  %v5162_v15 = vld [vmem:[#allocation2 + $0x80] sm:$0xff] }
 0x399   : > { %v5269_v16 = vmax.f32 %v5235_v26, %v25564_v6  ;;  %v5270_v17 = vmax.f32 %v5236_v58, %v25566_v8  ;;  %v5115_v54 = vmax.f32 %v21688_v3, 0.0  ;;  %v21692_v24 = vadd.f32 %v21691_v57, %v21258_v63  ;;  %v5041_v23 = vpop.f32.mrb[31].mxu1  ;;  %v5159_v3 = vld [vmem:[#allocation2 + $0x68] sm:$0xff]  ;;  %v5193_v49 = vld [vmem:[#allocation2 + $0x79] sm:$0xff] }
 0x39a   : > { %v5113_v43 = vmax.f32 %v21690_v12, 0.0  ;;  %v21694_v51 = vadd.f32 %v21693_v32, %v5041_v23  ;;  %20638 = vmatprep.subr.bf16.mxu0 %v5291_v19  ;;  %v5271_v10 = vmax.f32 %v25564_v6, %v5239_v29  ;;  %v5175_v40 = vld [vmem:[#allocation2 + $0xe8] sm:$0xff]  ;;  %v5228_v6 = vmax.f32 %v5160_v31, %v5192_v25 }
 0x39b   : > { %v5292_v41 = vpack.c.bf16 %v5270_v17, %v5269_v16  ;;  %5147 = vst.msk [vmem:[#allocation2 + $0x108] sm:$0xff] %vm685_vm3, %v5115_v54  ;;  %v5116_v48 = vmax.f32 %v21692_v24, 0.0  ;;  %20639 = vmatpush3.bf16.msra.mxu0 %v5283_v7  ;;  %v5204_v55 = vld [vmem:[#allocation2 + $0xd1] sm:$0xff]  ;;  %v5285_v32 = vpack.c.bf16 %v5256_v44, %v5255_v13  ;;  %v5227_v12 = vmax.f32 %v5159_v3, %v5191_v56  ;;  %v5215_v16 = vld [vmem:[#allocation2 + $0x119] sm:$0xff]  ;;  %v5195_v25 = vld [vmem:[#allocation2 + $0x89] sm:$0xff] }
 0x39c   : > { %5145 = vst.msk [vmem:[#allocation2 + $0xf8] sm:$0xff] %vm685_vm3, %v5113_v43  ;;  %v5114_v26 = vmax.f32 %v21694_v51, 0.0  ;;  %v5240_v59 = vmax.f32 %v5172_v42, %v5204_v55  ;;  %v5173_v4 = vld [vmem:[#allocation2 + $0xd8] sm:$0xff]  ;;  %v5207_v57 = vld [vmem:[#allocation2 + $0xe9] sm:$0xff]  ;;  %v5286_v17 = vpack.c.bf16 %v5258_v0, %v5257_v61  ;;  %v5260_v18 = vmax.f32 %v25581_v38, %v5228_v6 }
 0x39d   : > { %20640 = vmatprep.subr.bf16.mxu0 %v5292_v41  ;;  %5148 = vst.msk [vmem:[#allocation2 + $0x110] sm:$0xff] %vm685_vm3, %v5116_v48  ;;  %v5174_v47 = vld [vmem:[#allocation2 + $0xe0] sm:$0xff]  ;;  %v5176_v9 = vld [vmem:[#allocation2 + $0xf0] sm:$0xff]  ;;  %v5229_v43 = vmax.f32 %v5161_v11, %v5193_v49  ;;  %v5230_v51 = vmax.f32 %v5162_v15, %v5194_v14  ;;  %v5259_v55 = vmax.f32 %v25579_v27, %v5227_v12  ;;  %v22312_v49 = vld [vmem:[%s30162_s25 + $0x18] sm:$0xff]  }
 0x39e   : > { %v5205_v46 = vld [vmem:[#allocation2 + $0xd9] sm:$0xff]  ;;  %v5206_v53 = vld [vmem:[#allocation2 + $0xe1] sm:$0xff]  ;;  %5146 = vst.msk [vmem:[#allocation2 + $0x100] sm:$0xff] %vm685_vm3, %v5114_v26  ;;  %v5272_v58 = vmax.f32 %v25566_v8, %v5240_v59  ;;  %v5243_v8 = vmax.f32 %v5175_v40, %v5207_v57  ;;  %v5196_v42 = vld [vmem:[#allocation2 + $0x91] sm:$0xff]  ;;  %v5250_v57 = vmax.f32 %v25407_v22, %v5216_v50 }
 0x39f   : > { %v5241_v60 = vmax.f32 %v5173_v4, %v5205_v46  ;;  %v5242_v28 = vmax.f32 %v5174_v47, %v5206_v53  ;;  %20641 = vmatpush3.bf16.msra.mxu0 %v5284_v5  ;;  %v5164_v4 = vld [vmem:[#allocation2 + $0x90] sm:$0xff]  ;;  %v5249_v5 = vmax.f32 %v25405_v21, %v5215_v16  ;;  %v5287_v44 = vpack.c.bf16 %v5260_v18, %v5259_v55  ;;  %v25636_v14 = vld [vmem:[%s30162_s25 + $0x20] sm:$0xff]  }
 0x3a0   : > { %v5293_v39 = vpack.c.bf16 %v5272_v58, %v5271_v10  ;;  %v5261_v47 = vmax.f32 %v5227_v12, %v5229_v43  ;;  %v5262_v46 = vmax.f32 %v5228_v6, %v5230_v51  ;;  %v5232_v53 = vmax.f32 %v5164_v4, %v5196_v42  ;;  %v22297_v6 = vld [vmem:[%s30048_s20] ss:$8 sps:$4 sm:$0xff]   ;;  %v22306_v3 = vld [vmem:[%s30048_s20 + $0x34] ss:$8 sps:$4 sm:$0xff]   ;;  %v22308_v15 = vld [vmem:[%s30048_s20 + $0x30] ss:$8 sps:$4 sm:$0xff]   ;;  %v5462_v12 = vpop.permute.xlu0 %5461 }
 0x3a1   : > { %v5273_v2 = vmax.f32 %v5239_v29, %v5241_v60  ;;  %v5274_v30 = vmax.f32 %v5240_v59, %v5242_v28  ;;  %v5275_v23 = vmax.f32 %v5241_v60, %v5243_v8  ;;  %v22311_v11 = vld [vmem:[%s30162_s25 + $0x10] sm:$0xff]  }
 0x3a2   : > { %20642 = vmatprep.subr.bf16.mxu0 %v5293_v39  ;;  %v5179_v19 = vld [vmem:[#allocation2 + $0x108] sm:$0xff]  ;;  %v5288_v13 = vpack.c.bf16 %v5262_v46, %v5261_v47  ;;  %v5264_v61 = vmax.f32 %v5230_v51, %v5232_v53  ;;  %v5266_v40 = vmax.f32 %v5232_v53, %v25551_v45 }
 0x3a3   : > { %v5294_v7 = vpack.c.bf16 %v5274_v30, %v5273_v2  ;;  %20643 = vmatpush3.bf16.msra.mxu0 %v5285_v32  ;;  %v5208_v35 = vld [vmem:[#allocation2 + $0xf1] sm:$0xff]  ;;  %v22303_v45 = vld [vmem:[%s30048_s20 + $0x24] ss:$8 sps:$4 sm:$0xff]  }
 0x3a4   : > { %v5177_v63 = vld [vmem:[#allocation2 + $0xf8] sm:$0xff]  ;;  %v5244_v33 = vmax.f32 %v5176_v9, %v5208_v35  ;;  %v5180_v34 = vld [vmem:[#allocation2 + $0x110] sm:$0xff]  ;;  %v22310_v9 = vld [vmem:[%s30162_s25 + $0x8] sm:$0xff]   ;;  %v5450_v35 = vpop.permute.xlu1 %5449 }
 0x3a5   : > { %20644 = vmatprep.subr.bf16.mxu0 %v5294_v7  ;;  %v5211_v54 = vld [vmem:[#allocation2 + $0x109] sm:$0xff]  ;;  %v5212_v24 = vld [vmem:[#allocation2 + $0x111] sm:$0xff]  ;;  %v5178_v1 = vld [vmem:[#allocation2 + $0x100] sm:$0xff] }
 0x3a6   : > { %v5209_v52 = vld [vmem:[#allocation2 + $0xf9] sm:$0xff]  ;;  %v5210_v36 = vld [vmem:[#allocation2 + $0x101] sm:$0xff]  ;;  %v5247_v41 = vmax.f32 %v5179_v19, %v5211_v54  ;;  %v5276_v29 = vmax.f32 %v5242_v28, %v5244_v33  ;;  %v5248_v48 = vmax.f32 %v5180_v34, %v5212_v24  ;;  %v5486_v19 = vpop.permute.xlu0 %5485 }
 0x3a7   : > { %v5245_v20 = vmax.f32 %v5177_v63, %v5209_v52  ;;  %v5246_v62 = vmax.f32 %v5178_v1, %v5210_v36  ;;  %20645 = vmatpush3.bf16.msra.mxu0 %v5286_v17  ;;  %v5163_v28 = vld [vmem:[#allocation2 + $0x88] sm:$0xff]  ;;  %v22300_v32 = vld [vmem:[%s30048_s20 + $0x14] ss:$8 sps:$4 sm:$0xff]   ;;  %v22309_v7 = vld [vmem:[%s30162_s25] sm:$0xff]  }
 0x3a8   : > { %v5295_v38 = vpack.c.bf16 %v5276_v29, %v5275_v23  ;;  %v5231_v27 = vmax.f32 %v5163_v28, %v5195_v25  ;;  %v5281_v31 = vmax.f32 %v5247_v41, %v5249_v5  ;;  %v5282_v39 = vmax.f32 %v5248_v48, %v5250_v57  ;;  %v5474_v63 = vpop.permute.xlu1 %5473  ;;  %v30163_v52 = vld [vmem:[#allocation9_spill] sm:$0xff] }
 0x3a9   : > { %v5277_v26 = vmax.f32 %v5243_v8, %v5245_v20  ;;  %v5278_v59 = vmax.f32 %v5244_v33, %v5246_v62  ;;  %v5279_v58 = vmax.f32 %v5245_v20, %v5247_v41  ;;  %v5280_v60 = vmax.f32 %v5246_v62, %v5248_v48  ;;  %v22305_v8 = vld [vmem:[%s30048_s20 + $0x20] ss:$8 sps:$4 sm:$0xff]   ;;  %v5435_v29 = vld [vmem:[#allocation3 + $0x7] sm:$0xff] }
 0x3aa   : > { %20646 = vmatprep.subr.bf16.mxu0 %v5295_v38  ;;  %v5263_v21 = vmax.f32 %v5229_v43, %v5231_v27  ;;  %v5265_v30 = vmax.f32 %v5231_v27, %v25542_v37  ;;  %v5298_v56 = vpack.c.bf16 %v5282_v39, %v5281_v31  ;;  %v22302_v37 = vld [vmem:[%s30048_s20 + $0x10] ss:$8 sps:$4 sm:$0xff]   ;;  %v25641_v24 = vpop.permute.xlu0 %5509  ;;  %v5458_v36 = vrot.slane %v5450_v35, %v30163_v52 }
 0x3ab   : > { %v5296_v10 = vpack.c.bf16 %v5278_v59, %v5277_v26  ;;  %20647 = vmatpush3.bf16.msra.mxu0 %v5287_v44  ;;  %v5297_v0 = vpack.c.bf16 %v5280_v60, %v5279_v58  ;;  %v5470_v43 = vrot.slane %v5462_v12, %v30163_v52  ;;  %v5482_v5 = vrot.slane %v5474_v63, %v30163_v52 }
 0x3ac   : > { %v5289_v2 = vpack.c.bf16 %v5264_v61, %v5263_v21  ;;  %v5290_v22 = vpack.c.bf16 %v5266_v40, %v5265_v30  ;;  %v25639_v17 = vpop.permute.xlu1 %5497  ;;  %v5494_v44 = vrot.slane %v5486_v19, %v30163_v52  ;;  %v22314_v30 = vld [vmem:[%s30162_s25 + $0x28] sm:$0xff]  }
 0x3ad   : > { %20648 = vmatprep.subr.bf16.mxu0 %v5296_v10  ;;  %v25653_v38 = vcombine.low %v5458_v36, %v5470_v43 }
 0x3ae   : > { %v25649_v20 = vpop.permute.xlu0 %5533  ;;  %v25668_v61 = vcombine.low %v5482_v5, %v5494_v44 }
 0x3af   : > { %20649 = vmatpush3.bf16.msra.mxu0 %v5288_v13 }
 0x3b0   : > { %20650 = vmatprep.subr.bf16.mxu0 %v5297_v0  ;;  %v25645_v1 = vpop.permute.xlu1 %5521 }
 0x3b2   : > { %v5843_v25 = vpop.permute.xlu0 %5842 }
 0x3b3   : > { %20651 = vmatpush3.bf16.msra.mxu0 %v5289_v2  ;;  %v5851_v28 = vrot.slane %v5843_v25, %v30163_v52 }
 0x3b4   : > { %20652 = vmatprep.subr.bf16.mxu0 %v5298_v56  ;;  %v5832_v50 = vpop.permute.xlu1 %5831 }
 0x3b5   : > { %v5840_v60 = vrot.slane %v5832_v50, %v30163_v52 }
 0x3b6   : > { %v5876_v36 = vpop.permute.xlu0 %5875 }
 0x3b7   : > { %20653 = vmatpush3.bf16.msra.mxu0 %v5290_v22  ;;  %v25689_v56 = vcombine.low %v5840_v60, %v5851_v28  ;;  %v6877_v60 = vld [vmem:[%s30046_s18 + $0x4] sm:$0xf]  ;;  %v6876_v28 = vld [vmem:[%s30046_s18] sm:$0xf] }
 0x3b8   : > { %21259 = vmatprep.subr.bf16.mxu0 %v22309_v7  ;;  %v5854_v53 = vpop.permute.xlu1 %5853  ;;  %6917 = vperm.xlu1 %22228, %v6877_v60  }
 0x3b9   : > { %6905 = vperm.xlu0 %22227, %v6876_v28  }
 0x3ba   : > { %5380 = vmatmul.mubr.bf16.vlgmr.msra.gmra.mrb[64].mxu0 %v22297_v6 }
 0x3bb   : > { %5387 = vmatprep.mubr.bf16.mxu0 %v22300_v32  ;;  %21260 = vmatpush3.bf16.msra.mxu0 %v22309_v7  ;;  %v5506_v32 = vrot.slane %v25639_v17, %v30163_v52 }
 0x3bc   : > { %21261 = vmatprep.subr.bf16.mxu0 %v22310_v9  ;;  %v5865_v22 = vpop.permute.xlu1 %5864 }
 0x3bf   : > { %21262 = vmatpush3.bf16.msra.mxu0 %v22310_v9  ;;  %v5862_v9 = vrot.slane %v5854_v53, %v30163_v52 }
 0x3c0   : > { %21263 = vmatprep.subr.bf16.mxu0 %v22311_v11 }
 0x3c2   : > { %5388 = vmatmul.mubr.bf16.gmra.mrb[68].mxu0 %v22302_v37  ;;  %v5518_v37 = vrot.slane %v25641_v24, %v30163_v52  ;;  %v22316_v24 = vld [vmem:[%s30162_s25 + $0x38] sm:$0xff]  }
 0x3c3   : > { %5395 = vmatprep.mubr.bf16.mxu0 %v22303_v45  ;;  %21264 = vmatpush3.bf16.msra.mxu0 %v22311_v11  ;;  %v5873_v11 = vrot.slane %v5865_v22, %v30163_v52 }
 0x3c4   : > { %21265 = vmatprep.subr.bf16.mxu0 %v22312_v49  ;;  %v25710_v19 = vcombine.low %v5506_v32, %v5518_v37  ;;  %v22318_v37 = vld [vmem:[%s30162_s25 + $0x48] sm:$0xff]  }
 0x3c7   : > { %21266 = vmatpush3.bf16.msra.mxu0 %v22312_v49  ;;  %v22315_v49 = vld [vmem:[%s30162_s25 + $0x30] sm:$0xff]  }
 0x3c8   : > { %21275 = vmatprep.subr.bf16.mxu0 %v25636_v14 }
 0x3ca   : > { %5396 = vmatmul.mubr.bf16.gmra.mrb[72].mxu0 %v22305_v8 }
 0x3cb   : > { %5403 = vmatprep.mubr.bf16.mxu0 %v22306_v3 }
 0x3d2   : > { %5404 = vmatmul.mubr.bf16.gmra.mrb[76].mxu0 %v22308_v15 }
 0x48d   : > { %v20654_v16 = vpop.f32.mrb[64].mxu0 }
 0x48e   : > { %v20655_v33 = vpop.f32.mrb[65].mxu0 }
 0x48f   : > { %v20656_v18 = vadd.f32 %v20655_v33, %v20654_v16  ;;  %v20657_v34 = vpop.f32.mrb[66].mxu0 }
 0x490   : > { %v20658_v54 = vpop.f32.mrb[67].mxu0 }
 0x491   : > { %5412 = vst.msk [vmem:[#allocation3 + $0x10] sm:$0xff] %vm685_vm3, %v20656_v18  ;;  %v20659_v23 = vadd.f32 %v20658_v54, %v20657_v34  ;;  %v25724_v34 = vcombine.low %v5862_v9, %v5873_v11  ;;  %v6881_v9 = vld [vmem:[%s30046_s18 + $0x14] sm:$0xf] }
 0x493   : > { %5413 = vst.msk [vmem:[#allocation3 + $0x18] sm:$0xff] %vm685_vm3, %v20659_v23  ;;  %v5887_v23 = vpop.permute.xlu1 %5886 }
 0x495   : > { %v20660_v51 = vpop.f32.mrb[68].mxu0 }
 0x496   : > { %v20661_v41 = vpop.f32.mrb[69].mxu0 }
 0x497   : > { %v20662_v62 = vadd.f32 %v20661_v41, %v20660_v51  ;;  %v20663_v48 = vpop.f32.mrb[70].mxu0  ;;  %v5530_v51 = vrot.slane %v25645_v1, %v30163_v52  ;;  %v5542_v41 = vrot.slane %v25649_v20, %v30163_v52 }
 0x498   : > { %v20664_v42 = vpop.f32.mrb[71].mxu0  ;;  %v25651_v55 = vld [vmem:[#allocation3 + $0xf] sm:$0xff] }
 0x499   : > { %5414 = vst.msk [vmem:[#allocation3 + $0x20] sm:$0xff] %vm685_vm3, %v20662_v62  ;;  %v20665_v26 = vadd.f32 %v20664_v42, %v20663_v48  ;;  %v5443_v59 = vpack.c.bf16 %v25651_v55, %v5435_v29  ;;  %v5895_v62 = vrot.slane %v5887_v23, %v30163_v52  ;;  %v5884_v48 = vrot.slane %v5876_v36, %v30163_v52  ;;  %v22317_v42 = vld [vmem:[%s30162_s25 + $0x40] sm:$0xff]  }
 0x49a   : > { %v25664_v27 = vld [vmem:[#allocation3 + $0x17] sm:$0xff]  ;;  %v25751_v20 = vcombine.low %v5530_v51, %v5542_v41  ;;  %v5818_v11 = vld [vmem:[#allocation3 + $0x9] sm:$0xff] }
 0x49b   : > { %5415 = vst.msk [vmem:[#allocation3 + $0x28] sm:$0xff] %vm685_vm3, %v20665_v26  ;;  %v5567_v4 = vmul.bf16 %v25653_v38, %v5443_v59  ;;  %v5688_v59 = vld [vmem:[#allocation3 + $0x8] sm:$0xff]  ;;  %v25794_v22 = vld [vmem:[#allocation3 + $0x18] sm:$0xff] }
 0x49c   : > { %v22320_v51 = vld [vmem:[%s30162_s25 + $0x58] sm:$0xff]  }
 0x49d   : > { %v20666_v47 = vpop.f32.mrb[72].mxu0  ;;  %21267 = vmatprep.mubr.msk.bf16.mxu0 %vm685_vm3, %v5567_v4  ;;  %v25757_v4 = vld [vmem:[#allocation3 + $0x10] sm:$0xff] }
 0x49e   : > { %v20667_v46 = vpop.f32.mrb[73].mxu0  ;;  %v5696_v53 = vpack.c.bf16 %v25757_v4, %v5688_v59  ;;  %v5898_v59 = vpop.permute.xlu0 %5897 }
 0x49f   : > { %v20668_v10 = vadd.f32 %v20667_v46, %v20666_v47  ;;  %v20669_v58 = vpop.f32.mrb[74].mxu0  ;;  %v25765_v47 = vcombine.low %v5884_v48, %v5895_v62  ;;  %v22321_v62 = vld [vmem:[%s30162_s25 + $0x60] sm:$0xff]   ;;  %v30164_v48 = vmov 1  }
 0x4a0   : > { %v20670_v57 = vpop.f32.mrb[75].mxu0  ;;  %v25666_v13 = vld [vmem:[#allocation3 + $0x1f] sm:$0xff] }
 0x4a1   : > { %5416 = vst.msk [vmem:[#allocation3 + $0x30] sm:$0xff] %vm685_vm3, %v20668_v10  ;;  %v20671_v0 = vadd.f32 %v20670_v57, %v20669_v58  ;;  %v25673_v31 = vpack.c.bf16 %v25666_v13, %v25664_v27  ;;  %v25675_v39 = vld [vmem:[#allocation3 + $0x19] sm:$0xff] }
 0x4a2   : > { %v25677_v21 = vld [vmem:[#allocation3 + $0x21] sm:$0xff]  ;;  %v6878_v57 = vld [vmem:[%s30046_s18 + $0x8] sm:$0xf] }
 0x4a3   : > { %5417 = vst.msk [vmem:[#allocation3 + $0x38] sm:$0xff] %vm685_vm3, %v20671_v0  ;;  %v5568_v2 = vmul.bf16 %v25668_v61, %v25673_v31  ;;  %v25687_v40 = vpack.c.bf16 %v25677_v21, %v25675_v39  ;;  %v6474_v6 = vmul.bf16 %v25653_v38, %v25673_v31  ;;  %v25706_v12 = vld [vmem:[#allocation3 + $0x27] sm:$0xff]  ;;  %6929 = vperm.xlu1 %22228, %v6878_v57  }
 0x4a4   : > { %v25787_v0 = vld [vmem:[#allocation3 + $0x20] sm:$0xff] }
 0x4a5   : > { %v20672_v45 = vpop.f32.mrb[76].mxu0  ;;  %21268 = vmatmul.mubr.msk.bf16.vlgmr.msra.gmra.mrb[80].mxu0 %vm685_vm3, %v5568_v2  ;;  %v6738_v8 = vmul.bf16 %v25689_v56, %v25687_v40  ;;  %v6879_v2 = vld [vmem:[%s30046_s18 + $0xc] sm:$0xf]  ;;  %v25798_v32 = vpack.c.bf16 %v25787_v0, %v25794_v22  ;;  %v22339_v31 = vld [vmem:[%s30162_s25 + $0xf0] sm:$0xff]  }
 0x4a6   : > { %v20673_v3 = vpop.f32.mrb[77].mxu0  ;;  %21276 = vmatpush3.bf16.msra.mxu0 %v25636_v14  ;;  %6941 = vperm.xlu0 %22227, %v6879_v2  }
 0x4a7   : > { %v20674_v15 = vadd.f32 %v20673_v3, %v20672_v45  ;;  %v20675_v7 = vpop.f32.mrb[78].mxu0  ;;  %21277 = vmatprep.subr.bf16.mxu0 %v22314_v30  ;;  %v25803_v45 = vld [vmem:[#allocation3 + $0x28] sm:$0xff] }
 0x4a8   : > { %v20676_v35 = vpop.f32.mrb[79].mxu0  ;;  %v25708_v63 = vld [vmem:[#allocation3 + $0x2f] sm:$0xff] }
 0x4a9   : > { %5418 = vst.msk [vmem:[#allocation3 + $0x40] sm:$0xff] %vm685_vm3, %v20674_v15  ;;  %v20677_v14 = vadd.f32 %v20676_v35, %v20675_v7  ;;  %v25715_v16 = vpack.c.bf16 %v25708_v63, %v25706_v12  ;;  %v25717_v17 = vld [vmem:[#allocation3 + $0x29] sm:$0xff]  ;;  %v6880_v15 = vld [vmem:[%s30046_s18 + $0x10] sm:$0xf]  ;;  %v25812_v7 = vld [vmem:[#allocation3 + $0x11] sm:$0xff] }
 0x4aa   : > { %21278 = vmatpush3.bf16.msra.mxu0 %v22314_v30  ;;  %v25719_v33 = vld [vmem:[#allocation3 + $0x31] sm:$0xff]  ;;  %6953 = vperm.xlu1 %22228, %v6880_v15   ;;  %v5826_v35 = vpack.c.bf16 %v25812_v7, %v5818_v11 }
 0x4ab   : > { %5419 = vst.msk [vmem:[#allocation3 + $0x48] sm:$0xff] %vm685_vm3, %v20677_v14  ;;  %v5569_v18 = vmul.bf16 %v25710_v19, %v25715_v16  ;;  %v25728_v54 = vpack.c.bf16 %v25719_v33, %v25717_v17  ;;  %21279 = vmatprep.subr.bf16.mxu0 %v22315_v49  ;;  %v6475_v43 = vmul.bf16 %v25668_v61, %v25715_v16  ;;  %v25747_v50 = vld [vmem:[#allocation3 + $0x37] sm:$0xff] }
 0x4ac   : > { %v25792_v30 = vld [vmem:[#allocation3 + $0x30] sm:$0xff]  ;;  %6965 = vperm.xlu0 %22227, %v6881_v9   ;;  %v25833_v23 = vld [vmem:[#allocation3 + $0x38] sm:$0xff]  ;;  %v5942_v41 = vmul.bf16 %v25689_v56, %v5826_v35  ;;  %v6072_v35 = vpack.c.bf16 %v25664_v27, %v25651_v55  ;;  %v6073_v55 = vpack.c.bf16 %v25706_v12, %v25666_v13  ;;  %v22327_v12 = vld [vmem:[%s30162_s25 + $0x90] sm:$0xff]  }
 0x4ad   : > { %21271 = vmatprep.mubr.msk.bf16.mxu0 %vm685_vm3, %v5569_v18  ;;  %v6739_v29 = vmul.bf16 %v25724_v34, %v25728_v54  ;;  %v25807_v3 = vpack.c.bf16 %v25792_v30, %v25803_v45  ;;  %v6882_v18 = vld [vmem:[%s30046_s18 + $0x18] sm:$0xf]  ;;  %v22322_v11 = vld [vmem:[%s30162_s25 + $0x68] sm:$0xff]   ;;  %v22325_v27 = vld [vmem:[%s30162_s25 + $0x80] sm:$0xff]  }
 0x4ae   : > { %21280 = vmatpush3.bf16.msra.mxu0 %v22315_v49  ;;  %v22319_v49 = vld [vmem:[%s30162_s25 + $0x50] sm:$0xff]   ;;  %6977 = vperm.xlu1 %22228, %v6882_v18   ;;  %v22342_v16 = vld [vmem:[%s30162_s25 + $0x108] sm:$0xff]  }
 0x4af   : > { %21281 = vmatprep.subr.bf16.mxu0 %v22316_v24 }
 0x4b0   : > { %v25749_v1 = vld [vmem:[#allocation3 + $0x3f] sm:$0xff] }
 0x4b1   : > { %v25755_v26 = vpack.c.bf16 %v25749_v1, %v25747_v50  ;;  %v25759_v25 = vld [vmem:[#allocation3 + $0x39] sm:$0xff] }
 0x4b2   : > { %21282 = vmatpush3.bf16.msra.mxu0 %v22316_v24  ;;  %v25761_v5 = vld [vmem:[#allocation3 + $0x41] sm:$0xff]  ;;  %v6883_v24 = vld [vmem:[%s30046_s18 + $0x1c] sm:$0xf]  ;;  %22229 = vset.pattern.permute.xlu1 %v30164_v48 }
 0x4b3   : > { %v5570_v44 = vmul.bf16 %v25751_v20, %v25755_v26  ;;  %v25769_v46 = vpack.c.bf16 %v25761_v5, %v25759_v25  ;;  %21291 = vmatprep.subr.bf16.mxu0 %v22317_v42  ;;  %v6476_v10 = vmul.bf16 %v25710_v19, %v25755_v26  ;;  %v25825_v14 = vld [vmem:[#allocation3 + $0x40] sm:$0xff]  ;;  %6989 = vperm.xlu0 %22227, %v6883_v24  }
 0x4b4   : > { %v25837_v36 = vpack.c.bf16 %v25825_v14, %v25833_v23  ;;  %7327 = vperm.xlu1 %22229, %v6876_v28   ;;  %v22323_v28 = vld [vmem:[%s30162_s25 + $0x70] sm:$0xff]  }
 0x4b5   : > { %21272 = vmatmul.mubr.msk.bf16.gmra.mrb[84].mxu0 %vm685_vm3, %v5570_v44  ;;  %v6740_v58 = vmul.bf16 %v25765_v47, %v25769_v46  ;;  %v5943_v44 = vmul.bf16 %v25724_v34, %v25687_v40 }
 0x4b6   : > { %21283 = vmatprep.mubr.msk.bf16.mxu0 %vm685_vm3, %v5696_v53 }
 0x4b7   : > { %22230 = vset.pattern.permute.xlu0 %v30164_v48 }
 0x4b8   : > { %7338 = vperm.xlu0 %22230, %v6877_v60   ;;  %7349 = vperm.xlu1 %22229, %v6878_v57  }
 0x4bc   : > { %7371 = vperm.xlu0 %22230, %v6880_v15   ;;  %7360 = vperm.xlu1 %22229, %v6879_v2   ;;  %v22324_v15 = vld [vmem:[%s30162_s25 + $0x78] sm:$0xff]   ;;  %v6074_v2 = vpack.c.bf16 %v25747_v50, %v25708_v63 }
 0x4bd   : > { %21284 = vmatmul.mubr.msk.bf16.vlgmr.msra.gmra.mrb[80].mxu0 %vm685_vm3, %v25798_v32  ;;  %v22328_v50 = vld [vmem:[%s30162_s25 + $0x98] sm:$0xff]  }
 0x4be   : > { %21292 = vmatpush3.bf16.msra.mxu0 %v22317_v42  ;;  %21287 = vmatprep.mubr.msk.bf16.mxu0 %vm685_vm3, %v25807_v3  ;;  %v5909_v42 = vpop.permute.xlu1 %5908 }
 0x4bf   : > { %21293 = vmatprep.subr.bf16.mxu0 %v22318_v37  ;;  %v5917_v53 = vrot.slane %v5909_v42, %v30163_v52  ;;  %v25890_v42 = vld [vmem:[#allocation3 + $0x47] sm:$0xff] }
 0x4c0   : > { %7393 = vperm.xlu0 %22230, %v6882_v18   ;;  %7382 = vperm.xlu1 %22229, %v6881_v9   ;;  %v6077_v9 = vmul.bf16 %v25668_v61, %v6073_v55  ;;  %v22326_v18 = vld [vmem:[%s30162_s25 + $0x88] sm:$0xff]   ;;  %v6075_v13 = vpack.c.bf16 %v25890_v42, %v25749_v1  ;;  %v22329_v1 = vld [vmem:[%s30162_s25 + $0xa0] sm:$0xff]   ;;  %v22340_v61 = vld [vmem:[%s30162_s25 + $0xf8] sm:$0xff]  }
 0x4c2   : > { %21294 = vmatpush3.bf16.msra.mxu0 %v22318_v37  ;;  %v5906_v37 = vrot.slane %v5898_v59, %v30163_v52  ;;  %v6079_v63 = vmul.bf16 %v25751_v20, %v6075_v13  ;;  %v6207_v59 = vpack.c.bf16 %v25803_v45, %v25787_v0  ;;  %v6336_v0 = vpack.c.bf16 %v25675_v39, %v25812_v7  ;;  %v25925_v45 = vld [vmem:[#allocation3 + $0x48] sm:$0xff]  ;;  %v22333_v7 = vld [vmem:[%s30162_s25 + $0xc0] sm:$0xff]  }
 0x4c3   : > { %21295 = vmatprep.subr.bf16.mxu0 %v22319_v49  ;;  %v6337_v39 = vpack.c.bf16 %v25717_v17, %v25677_v21  ;;  %v22335_v17 = vld [vmem:[%s30162_s25 + $0xd0] sm:$0xff]  }
 0x4c4   : > { %v25862_v60 = vcombine.low %v5906_v37, %v5917_v53  ;;  %7404 = vperm.xlu1 %22229, %v6883_v24   ;;  %v6206_v24 = vpack.c.bf16 %v25794_v22, %v25757_v4  ;;  %v6208_v4 = vpack.c.bf16 %v25833_v23, %v25792_v30  ;;  %v22331_v22 = vld [vmem:[%s30162_s25 + $0xb0] sm:$0xff]   ;;  %v6209_v53 = vpack.c.bf16 %v25925_v45, %v25825_v14  ;;  %v22332_v30 = vld [vmem:[%s30162_s25 + $0xb8] sm:$0xff]  }
 0x4c5   : > { %21288 = vmatmul.mubr.msk.bf16.gmra.mrb[84].mxu0 %vm685_vm3, %v25837_v36  ;;  %v6340_v23 = vmul.bf16 %v25689_v56, %v6336_v0  ;;  %v6338_v14 = vpack.c.bf16 %v25759_v25, %v25719_v33  ;;  %v6341_v37 = vmul.bf16 %v25724_v34, %v6337_v39  ;;  %v22336_v25 = vld [vmem:[%s30162_s25 + $0xd8] sm:$0xff]   ;;  %v22347_v56 = vld [vmem:[%s30035_s7 + $0x10] sm:$0xff]  }
 0x4c6   : > { %21296 = vmatpush3.bf16.msra.mxu0 %v22319_v49  ;;  %21299 = vmatprep.mubr.msk.bf16.mxu0 %vm685_vm3, %v5942_v41  ;;  %v5944_v49 = vmul.bf16 %v25765_v47, %v25728_v54  ;;  %v5945_v57 = vmul.bf16 %v25862_v60, %v25769_v46  ;;  %v30165_v41 = vmov 0   ;;  %v22348_v34 = vld [vmem:[%s30035_s7 + $0x18] sm:$0xff]   ;;  %v22349_v54 = vld [vmem:[%s30035_s7 + $0x20] sm:$0xff]  }
 0x4c7   : > { %21297 = vmatprep.subr.bf16.mxu0 %v22320_v51  ;;  %22231 = vset.pattern.permute.xlu0 %v30165_v41  ;;  %v22352_v46 = vld [vmem:[%s30035_s7 + $0x38] sm:$0xff]  }
 0x4c8   : > { %22232 = vset.pattern.permute.xlu1 %v30165_v41 }
 0x4ca   : > { %21298 = vmatpush3.bf16.msra.mxu0 %v22320_v51  ;;  %v6076_v51 = vmul.bf16 %v25653_v38, %v6072_v35  ;;  %v22338_v35 = vld [vmem:[%s30162_s25 + $0xe8] sm:$0xff]  }
 0x4cb   : > { %21307 = vmatprep.subr.bf16.mxu0 %v22321_v62 }
 0x4cd   : > { %21300 = vmatmul.mubr.msk.bf16.vlgmr.msra.gmra.mrb[80].mxu0 %vm685_vm3, %v5943_v44  ;;  %v22330_v44 = vld [vmem:[%s30162_s25 + $0xa8] sm:$0xff]  }
 0x4ce   : > { %21303 = vmatprep.mubr.msk.bf16.mxu0 %vm685_vm3, %v5944_v49  ;;  %21308 = vmatpush3.bf16.msra.mxu0 %v22321_v62  ;;  %v6078_v62 = vmul.bf16 %v25710_v19, %v6074_v2  ;;  %v6342_v49 = vmul.bf16 %v25765_v47, %v6338_v14  ;;  %v22341_v19 = vld [vmem:[%s30162_s25 + $0x100] sm:$0xff]   ;;  %v22351_v47 = vld [vmem:[%s30035_s7 + $0x30] sm:$0xff]  }
 0x4cf   : > { %21309 = vmatprep.subr.bf16.mxu0 %v22322_v11 }
 0x4d2   : > { %21310 = vmatpush3.bf16.msra.mxu0 %v22322_v11  ;;  %v22334_v11 = vld [vmem:[%s30162_s25 + $0xc8] sm:$0xff]  }
 0x4d3   : > { %21311 = vmatprep.subr.bf16.mxu0 %v22323_v28 }
 0x4d5   : > { %21304 = vmatmul.mubr.msk.bf16.gmra.mrb[84].mxu0 %vm685_vm3, %v5945_v57  ;;  %v6469_v57 = vld [vmem:[#allocation3 + $0x4f] sm:$0xff] }
 0x4d6   : > { %21312 = vmatpush3.bf16.msra.mxu0 %v22323_v28  ;;  %21315 = vmatprep.mubr.msk.bf16.mxu0 %vm685_vm3, %v6076_v51  ;;  %v25947_v28 = vld [vmem:[#allocation3 + $0x49] sm:$0xff]  ;;  %v6473_v38 = vpack.c.bf16 %v6469_v57, %v25890_v42  ;;  %v6906_v51 = vpop.permute.xlu0 %6905 }
 0x4d7   : > { %21313 = vmatprep.subr.bf16.mxu0 %v22324_v15  ;;  %v6339_v21 = vpack.c.bf16 %v25947_v28, %v25761_v5  ;;  %v22337_v5 = vld [vmem:[%s30162_s25 + $0xe0] sm:$0xff]  }
 0x4d9   : > { %v6343_v33 = vmul.bf16 %v25862_v60, %v6339_v21  ;;  %v6914_v21 = vrot.slane %v6906_v51, %v30163_v52 }
 0x4da   : > { %21314 = vmatpush3.bf16.msra.mxu0 %v22324_v15 }
 0x4db   : > { %21323 = vmatprep.subr.bf16.mxu0 %v22325_v27 }
 0x4dd   : > { %21316 = vmatmul.mubr.msk.bf16.vlgmr.msra.gmra.mrb[80].mxu0 %vm685_vm3, %v6077_v9 }
 0x4de   : > { %21319 = vmatprep.mubr.msk.bf16.mxu0 %vm685_vm3, %v6078_v62  ;;  %21324 = vmatpush3.bf16.msra.mxu0 %v22325_v27 }
 0x4df   : > { %21325 = vmatprep.subr.bf16.mxu0 %v22326_v18 }
 0x4e2   : > { %21326 = vmatpush3.bf16.msra.mxu0 %v22326_v18  ;;  %v18168_v18 = vld [vmem:[%s30166_s23] ss:$0 sm:$0xff] }
 0x4e3   : > { %21327 = vmatprep.subr.bf16.mxu0 %v22327_v12 }
 0x4e5   : > { %21320 = vmatmul.mubr.msk.bf16.gmra.mrb[84].mxu0 %vm685_vm3, %v6079_v63 }
 0x4e6   : > { %21328 = vmatpush3.bf16.msra.mxu0 %v22327_v12  ;;  %21331 = vmatprep.mubr.msk.bf16.mxu0 %vm685_vm3, %v6206_v24 }
 0x4e7   : > { %21329 = vmatprep.subr.bf16.mxu0 %v22328_v50 }
 0x4ea   : > { %21330 = vmatpush3.bf16.msra.mxu0 %v22328_v50 }
 0x4eb   : > { %21339 = vmatprep.subr.bf16.mxu0 %v22329_v1 }
 0x4ed   : > { %21332 = vmatmul.mubr.msk.bf16.vlgmr.msra.gmra.mrb[80].mxu0 %vm685_vm3, %v6207_v59 }
 0x4ee   : > { %21335 = vmatprep.mubr.msk.bf16.mxu0 %vm685_vm3, %v6208_v4  ;;  %21340 = vmatpush3.bf16.msra.mxu0 %v22329_v1 }
 0x4ef   : > { %21341 = vmatprep.subr.bf16.mxu0 %v22330_v44 }
 0x4f2   : > { %21342 = vmatpush3.bf16.msra.mxu0 %v22330_v44 }
 0x4f3   : > { %21343 = vmatprep.subr.bf16.mxu0 %v22331_v22 }
 0x4f5   : > { %21336 = vmatmul.mubr.msk.bf16.gmra.mrb[84].mxu0 %vm685_vm3, %v6209_v53 }
 0x4f6   : > { %21344 = vmatpush3.bf16.msra.mxu0 %v22331_v22  ;;  %21347 = vmatprep.mubr.msk.bf16.mxu0 %vm685_vm3, %v6340_v23 }
 0x4f7   : > { %21345 = vmatprep.subr.bf16.mxu0 %v22332_v30 }
 0x4fa   : > { %21346 = vmatpush3.bf16.msra.mxu0 %v22332_v30 }
 0x4fb   : > { %21355 = vmatprep.subr.bf16.mxu0 %v22333_v7 }
 0x4fd   : > { %21348 = vmatmul.mubr.msk.bf16.vlgmr.msra.gmra.mrb[80].mxu0 %vm685_vm3, %v6341_v37 }
 0x4fe   : > { %21351 = vmatprep.mubr.msk.bf16.mxu0 %vm685_vm3, %v6342_v49  ;;  %21356 = vmatpush3.bf16.msra.mxu0 %v22333_v7 }
 0x4ff   : > { %21357 = vmatprep.subr.bf16.mxu0 %v22334_v11 }
 0x502   : > { %21358 = vmatpush3.bf16.msra.mxu0 %v22334_v11 }
 0x503   : > { %21359 = vmatprep.subr.bf16.mxu0 %v22335_v17 }
 0x505   : > { %21352 = vmatmul.mubr.msk.bf16.gmra.mrb[84].mxu0 %vm685_vm3, %v6343_v33 }
 0x506   : > { %21360 = vmatpush3.bf16.msra.mxu0 %v22335_v17  ;;  %21363 = vmatprep.mubr.msk.bf16.mxu0 %vm685_vm3, %v6474_v6  ;;  %v6477_v6 = vmul.bf16 %v25751_v20, %v6473_v38  ;;  %v6603_v20 = vld [vmem:[#allocation3 + $0x50] sm:$0xff] }
 0x507   : > { %21361 = vmatprep.subr.bf16.mxu0 %v22336_v25  ;;  %v6607_v26 = vpack.c.bf16 %v6603_v20, %v25925_v45 }
 0x50a   : > { %21362 = vmatpush3.bf16.msra.mxu0 %v22336_v25 }
 0x50b   : > { %21371 = vmatprep.subr.bf16.mxu0 %v22337_v5 }
 0x50d   : > { %21364 = vmatmul.mubr.msk.bf16.vlgmr.msra.gmra.mrb[80].mxu0 %vm685_vm3, %v6475_v43  ;;  %v22343_v43 = vld [vmem:[%s30162_s25 + $0x110] sm:$0xff]  }
 0x50e   : > { %21367 = vmatprep.mubr.msk.bf16.mxu0 %vm685_vm3, %v6476_v10  ;;  %21372 = vmatpush3.bf16.msra.mxu0 %v22337_v5  ;;  %v22344_v10 = vld [vmem:[%s30162_s25 + $0x118] sm:$0xff]  }
 0x50f   : > { %21373 = vmatprep.subr.bf16.mxu0 %v22338_v35 }
 0x512   : > { %21374 = vmatpush3.bf16.msra.mxu0 %v22338_v35 }
 0x513   : > { %21375 = vmatprep.subr.bf16.mxu0 %v22339_v31 }
 0x515   : > { %21368 = vmatmul.mubr.msk.bf16.gmra.mrb[84].mxu0 %vm685_vm3, %v6477_v6  ;;  %v6891_v6 = vld [vmem:[#allocation4 + $0x7] sm:$0xff] }
 0x516   : > { %21376 = vmatpush3.bf16.msra.mxu0 %v22339_v31  ;;  %21379 = vmatprep.mubr.msk.bf16.mxu0 %vm685_vm3, %v25798_v32  ;;  %v22345_v32 = vld [vmem:[%s30035_s7] sm:$0xff]  }
 0x517   : > { %21377 = vmatprep.subr.bf16.mxu0 %v22340_v61 }
 0x51a   : > { %21378 = vmatpush3.bf16.msra.mxu0 %v22340_v61 }
 0x51b   : > { %21387 = vmatprep.subr.bf16.mxu0 %v22341_v19 }
 0x51d   : > { %21380 = vmatmul.mubr.msk.bf16.vlgmr.msra.gmra.mrb[80].mxu0 %vm685_vm3, %v25807_v3  ;;  %v22346_v3 = vld [vmem:[%s30035_s7 + $0x8] sm:$0xff]  }
 0x51e   : > { %21383 = vmatprep.mubr.msk.bf16.mxu0 %vm685_vm3, %v25837_v36  ;;  %21388 = vmatpush3.bf16.msra.mxu0 %v22341_v19  ;;  %v6733_v36 = vld [vmem:[#allocation3 + $0x51] sm:$0xff] }
 0x51f   : > { %21389 = vmatprep.subr.bf16.mxu0 %v22342_v16  ;;  %v6737_v40 = vpack.c.bf16 %v6733_v36, %v25947_v28 }
 0x522   : > { %21390 = vmatpush3.bf16.msra.mxu0 %v22342_v16 }
 0x523   : > { %21391 = vmatprep.subr.bf16.mxu0 %v22343_v43 }
 0x525   : > { %21384 = vmatmul.mubr.msk.bf16.gmra.mrb[84].mxu0 %vm685_vm3, %v6607_v26  ;;  %v6942_v27 = vpop.permute.xlu0 %6941 }
 0x526   : > { %21392 = vmatpush3.bf16.msra.mxu0 %v22343_v43  ;;  %21395 = vmatprep.mubr.msk.bf16.mxu0 %vm685_vm3, %v6738_v8  ;;  %v6741_v8 = vmul.bf16 %v25862_v60, %v6737_v40  ;;  %v6918_v60 = vpop.permute.xlu1 %6917  ;;  %v6950_v17 = vrot.slane %v6942_v27, %v30163_v52 }
 0x527   : > { %21393 = vmatprep.subr.bf16.mxu0 %v22344_v10  ;;  %v6926_v37 = vrot.slane %v6918_v60, %v30163_v52 }
 0x529   : > { %v26101_v20 = vcombine.low %v6914_v21, %v6926_v37 }
 0x52a   : > { %21394 = vmatpush3.bf16.msra.mxu0 %v22344_v10  ;;  %v6930_v15 = vpop.permute.xlu1 %6929 }
 0x52b   : > { %21403 = vmatprep.subr.bf16.mxu0 %v22345_v32  ;;  %v26057_v9 = vpop.permute.xlu0 %6965  ;;  %v6938_v28 = vrot.slane %v6930_v15, %v30163_v52 }
 0x52d   : > { %21396 = vmatmul.mubr.msk.bf16.vlgmr.msra.gmra.mrb[80].mxu0 %vm685_vm3, %v6739_v29  ;;  %v22350_v29 = vld [vmem:[%s30035_s7 + $0x28] sm:$0xff]   ;;  %v26113_v40 = vcombine.low %v6938_v28, %v6950_v17 }
 0x52e   : > { %21399 = vmatprep.mubr.msk.bf16.mxu0 %vm685_vm3, %v6740_v58  ;;  %21404 = vmatpush3.bf16.msra.mxu0 %v22345_v32  ;;  %v26050_v58 = vld [vmem:[%s30035_s7 + $0x40] sm:$0xff]   ;;  %v26053_v55 = vpop.permute.xlu1 %6953 }
 0x52f   : > { %21405 = vmatprep.subr.bf16.mxu0 %v22346_v3  ;;  %v6962_v27 = vrot.slane %v26053_v55, %v30163_v52 }
 0x532   : > { %21406 = vmatpush3.bf16.msra.mxu0 %v22346_v3  ;;  %v26055_v2 = vpop.permute.xlu1 %6977  ;;  %v26062_v24 = vpop.permute.xlu0 %6989 }
 0x533   : > { %21407 = vmatprep.subr.bf16.mxu0 %v22347_v56  ;;  %v6998_v55 = vrot.slane %v26062_v24, %v30163_v52 }
 0x535   : > { %21400 = vmatmul.mubr.msk.bf16.gmra.mrb[84].mxu0 %vm685_vm3, %v6741_v8 }
 0x536   : > { %21408 = vmatpush3.bf16.msra.mxu0 %v22347_v56  ;;  %v7328_v12 = vpop.permute.xlu1 %7327 }
 0x537   : > { %21409 = vmatprep.subr.bf16.mxu0 %v22348_v34  ;;  %v7339_v39 = vpop.permute.xlu0 %7338  ;;  %v7336_v5 = vrot.slane %v7328_v12, %v30163_v52  ;;  %v6986_v12 = vrot.slane %v26055_v2, %v30163_v52 }
 0x538   : > { %v7347_v31 = vrot.slane %v7339_v39, %v30163_v52 }
 0x53a   : > { %21410 = vmatpush3.bf16.msra.mxu0 %v22348_v34  ;;  %v26075_v53 = vpop.permute.xlu1 %7349  ;;  %v26118_v8 = vcombine.low %v7336_v5, %v7347_v31 }
 0x53b   : > { %21411 = vmatprep.subr.bf16.mxu0 %v22349_v54 }
 0x53e   : > { %21412 = vmatpush3.bf16.msra.mxu0 %v22349_v54  ;;  %v7361_v10 = vpop.permute.xlu1 %7360 }
 0x53f   : > { %21413 = vmatprep.subr.bf16.mxu0 %v22350_v29 }
 0x542   : > { %21414 = vmatpush3.bf16.msra.mxu0 %v22350_v29 }
 0x543   : > { %21415 = vmatprep.subr.bf16.mxu0 %v22351_v47 }
 0x546   : > { %21416 = vmatpush3.bf16.msra.mxu0 %v22351_v47 }
 0x547   : > { %21417 = vmatprep.subr.bf16.mxu0 %v22352_v46 }
 0x54a   : > { %21418 = vmatpush3.bf16.msra.mxu0 %v22352_v46 }
 0x54b   : > { %21427 = vmatprep.subr.bf16.mxu0 %v26050_v58 }
 0x600   : > { %v21397_v62 = vpop.f32.mrb[80].mxu0 }
 0x601   : > { %v21695_v42 = vadd.f32 %v21397_v62, %v18168_v18  ;;  %v6821_v13 = vpop.f32.mrb[81].mxu0 }
 0x602   : > { %v21696_v63 = vadd.f32 %v18168_v18, %v6821_v13  ;;  %v21398_v50 = vpop.f32.mrb[82].mxu0 }
 0x603   : > { %v26064_v1 = vmax.f32 %v21695_v42, 0.0  ;;  %v21697_v59 = vadd.f32 %v21398_v50, %v18168_v18  ;;  %v6824_v44 = vpop.f32.mrb[83].mxu0  ;;  %v22354_v42 = vld [vmem:[%s30035_s7 + $0x48] sm:$0xff]   ;;  %v7369_v50 = vrot.slane %v7361_v10, %v30163_v52 }
 0x604   : > { %v26066_v4 = vmax.f32 %v21696_v63, 0.0  ;;  %v21698_v22 = vadd.f32 %v18168_v18, %v6824_v44  ;;  %v7358_v63 = vrot.slane %v26075_v53, %v30163_v52  ;;  %v7372_v44 = vpop.permute.xlu0 %7371 }
 0x605   : > { %6870 = vst [vmem:[#allocation4 + $0x20] sm:$0xff] %v26064_v1  ;;  %v26069_v0 = vmax.f32 %v21697_v59, 0.0  ;;  %v7383_v59 = vpop.permute.xlu1 %7382 }
 0x606   : > { %6868 = vst [vmem:[#allocation4 + $0x10] sm:$0xff] %v26066_v4  ;;  %v26072_v45 = vmax.f32 %v21698_v22, 0.0  ;;  %v7391_v22 = vrot.slane %v7383_v59, %v30163_v52  ;;  %v22361_v59 = vld [vmem:[%s30035_s7 + $0x80] sm:$0xff]  }
 0x607   : > { %6871 = vst [vmem:[#allocation4 + $0x28] sm:$0xff] %v26069_v0  ;;  %v7743_v30 = vpack.c.bf16 %v26069_v0, %v26064_v1 }
 0x608   : > { %6869 = vst [vmem:[#allocation4 + $0x18] sm:$0xff] %v26072_v45  ;;  %v21401_v23 = vpop.f32.mrb[84].mxu0  ;;  %v26082_v7 = vpack.c.bf16 %v26064_v1, %v26072_v45  ;;  %v7742_v14 = vpack.c.bf16 %v26072_v45, %v26066_v4  ;;  %v22385_v45 = vld [vmem:[%s30035_s7 + $0x140] sm:$0xff]   ;;  %v22388_v1 = vld [vmem:[%s30035_s7 + $0x158] sm:$0xff]  }
 0x609   : > { %v21699_v11 = vadd.f32 %v21401_v23, %v18168_v18  ;;  %v6837_v49 = vpop.f32.mrb[85].mxu0  ;;  %v7380_v23 = vrot.slane %v7372_v44, %v30163_v52  ;;  %v22362_v44 = vld [vmem:[%s30035_s7 + $0x88] sm:$0xff]  }
 0x60a   : > { %v21700_v33 = vadd.f32 %v18168_v18, %v6837_v49  ;;  %v21402_v25 = vpop.f32.mrb[86].mxu0 }
 0x60b   : > { %v26091_v35 = vmax.f32 %v21699_v11, 0.0  ;;  %v21701_v57 = vadd.f32 %v21402_v25, %v18168_v18  ;;  %v6840_v38 = vpop.f32.mrb[87].mxu0  ;;  %v22355_v11 = vld [vmem:[%s30035_s7 + $0x50] sm:$0xff]   ;;  %v26204_v31 = vcombine.low %v7380_v23, %v7391_v22 }
 0x60c   : > { %v26094_v61 = vmax.f32 %v21700_v33, 0.0  ;;  %v21702_v19 = vadd.f32 %v18168_v18, %v6840_v38  ;;  %v6974_v18 = vrot.slane %v26057_v9, %v30163_v52  ;;  %v26190_v33 = vcombine.low %v7358_v63, %v7369_v50  ;;  %v22359_v63 = vld [vmem:[%s30035_s7 + $0x70] sm:$0xff]   ;;  %v22360_v50 = vld [vmem:[%s30035_s7 + $0x78] sm:$0xff]  }
 0x60d   : > { %6874 = vst [vmem:[#allocation4 + $0x40] sm:$0xff] %v26091_v35  ;;  %v26097_v16 = vmax.f32 %v21701_v57, 0.0  ;;  %v26099_v43 = vld [vmem:[#allocation4 + $0xf] sm:$0xff]  ;;  %v22363_v23 = vld [vmem:[%s30035_s7 + $0x90] sm:$0xff]  }
 0x60e   : > { %6872 = vst [vmem:[#allocation4 + $0x30] sm:$0xff] %v26094_v61  ;;  %v26104_v26 = vmax.f32 %v21702_v19, 0.0  ;;  %v26106_v32 = vld [vmem:[#allocation4 + $0x21] sm:$0xff]  ;;  %v6899_v3 = vpack.c.bf16 %v26099_v43, %v6891_v6  ;;  %v26111_v36 = vpack.c.bf16 %v26094_v61, %v26069_v0  ;;  %v26169_v39 = vcombine.low %v6962_v27, %v6974_v18 }
 0x60f   : > { %6875 = vst [vmem:[#allocation4 + $0x48] sm:$0xff] %v26097_v16  ;;  %v26116_v56 = vld [vmem:[#allocation4 + $0x19] sm:$0xff]  ;;  %v7745_v29 = vpack.c.bf16 %v26097_v16, %v26091_v35  ;;  %v26165_v2 = vld [vmem:[#allocation4 + $0x27] sm:$0xff]  ;;  %v26246_v22 = vld [vmem:[#allocation4 + $0x11] sm:$0xff] }
 0x610   : > { %v26120_v34 = vld [vmem:[#allocation4 + $0x17] sm:$0xff]  ;;  %v26122_v54 = vld [vmem:[#allocation4 + $0x1f] sm:$0xff]  ;;  %6873 = vst [vmem:[#allocation4 + $0x38] sm:$0xff] %v26104_v26  ;;  %v26129_v47 = vpack.c.bf16 %v26106_v32, %v26116_v56  ;;  %v7023_v46 = vmul.bf16 %v26101_v20, %v6899_v3  ;;  %v26138_v15 = vpack.c.bf16 %v26091_v35, %v26104_v26  ;;  %v7744_v51 = vpack.c.bf16 %v26104_v26, %v26094_v61  ;;  %v22356_v3 = vld [vmem:[%s30035_s7 + $0x58] sm:$0xff]  }
 0x611   : > { %v26134_v60 = vpack.c.bf16 %v26122_v54, %v26120_v34  ;;  %v22390_v61 = vld [vmem:[%s30035_s7 + $0x168] sm:$0xff]   ;;  %v22391_v35 = vld [vmem:[%s30035_s7 + $0x170] sm:$0xff]   ;;  %v22392_v26 = vld [vmem:[%s30035_s7 + $0x178] sm:$0xff]  }
 0x612   : > { %21419 = vmatprep.mubr.bf16.mxu0 %v7023_v46  ;;  %v8354_v9 = vmul.bf16 %v26118_v8, %v26129_v47  ;;  %v26217_v46 = vld [vmem:[#allocation4] sm:$0xff] }
 0x613   : > { %v7024_v62 = vmul.bf16 %v26113_v40, %v26134_v60  ;;  %v8050_v13 = vmul.bf16 %v26101_v20, %v26134_v60  ;;  %v7172_v27 = vpack.c.bf16 %v26066_v4, %v26217_v46  ;;  %v22384_v4 = vld [vmem:[%s30035_s7 + $0x138] sm:$0xff]   ;;  %v22401_v60 = vld [vmem:[%s30035_s7 + $0x1c0] sm:$0xff]  }
 0x615   : > { %21420 = vmatmul.mubr.bf16.vlgmr.msra.gmra.mrb[88].mxu0 %v7024_v62  ;;  %v26167_v24 = vld [vmem:[#allocation4 + $0x2f] sm:$0xff] }
 0x616   : > { %21428 = vmatpush3.bf16.msra.mxu0 %v26050_v58  ;;  %v26171_v37 = vld [vmem:[#allocation4 + $0x29] sm:$0xff]  ;;  %v26175_v53 = vpack.c.bf16 %v26167_v24, %v26165_v2  ;;  %v26180_v49 = vld [vmem:[#allocation4 + $0x41] sm:$0xff]  ;;  %v26182_v58 = vcombine.low %v6986_v12, %v6998_v55  ;;  %v22358_v55 = vld [vmem:[%s30035_s7 + $0x68] sm:$0xff]  }
 0x617   : > { %21429 = vmatprep.subr.bf16.mxu0 %v22354_v42  ;;  %v26184_v28 = vld [vmem:[#allocation4 + $0x31] sm:$0xff]  ;;  %v26188_v17 = vld [vmem:[#allocation4 + $0x3f] sm:$0xff] }
 0x618   : > { %v26186_v21 = vld [vmem:[#allocation4 + $0x37] sm:$0xff]  ;;  %v26194_v25 = vpack.c.bf16 %v26184_v28, %v26171_v37  ;;  %v7025_v5 = vmul.bf16 %v26169_v39, %v26175_v53  ;;  %v8051_v18 = vmul.bf16 %v26113_v40, %v26175_v53 }
 0x619   : > { %v26200_v57 = vpack.c.bf16 %v26188_v17, %v26186_v21  ;;  %v26202_v38 = vld [vmem:[#allocation4 + $0x39] sm:$0xff]  ;;  %v22357_v12 = vld [vmem:[%s30035_s7 + $0x60] sm:$0xff]  }
 0x61a   : > { %21430 = vmatpush3.bf16.msra.mxu0 %v22354_v42  ;;  %v26208_v6 = vpack.c.bf16 %v26180_v49, %v26202_v38  ;;  %v8355_v19 = vmul.bf16 %v26190_v33, %v26194_v25  ;;  %21423 = vmatprep.mubr.bf16.mxu0 %v7025_v5  ;;  %v22406_v53 = vld [vmem:[%s30035_s7 + $0x1e8] sm:$0xff]  }
 0x61b   : > { %21431 = vmatprep.subr.bf16.mxu0 %v22355_v11  ;;  %v7026_v10 = vmul.bf16 %v26182_v58, %v26200_v57  ;;  %v8052_v62 = vmul.bf16 %v26169_v39, %v26200_v57  ;;  %v22409_v57 = vld [vmem:[%s30035_s7 + $0x200] sm:$0xff]  }
 0x61c   : > { %v8356_v42 = vmul.bf16 %v26204_v31, %v26208_v6 }
 0x61d   : > { %21424 = vmatmul.mubr.bf16.gmra.mrb[92].mxu0 %v7026_v10  ;;  %v22364_v10 = vld [vmem:[%s30035_s7 + $0x98] sm:$0xff]  }
 0x61e   : > { %21432 = vmatpush3.bf16.msra.mxu0 %v22355_v11  ;;  %21443 = vmatprep.mubr.bf16.mxu0 %v7172_v27  ;;  %v7314_v11 = vld [vmem:[#allocation4 + $0x9] sm:$0xff] }
 0x61f   : > { %21433 = vmatprep.subr.bf16.mxu0 %v22356_v3  ;;  %v7322_v5 = vpack.c.bf16 %v26246_v22, %v7314_v11  ;;  %v22365_v27 = vld [vmem:[%s30035_s7 + $0xa0] sm:$0xff]  }
 0x622   : > { %21434 = vmatpush3.bf16.msra.mxu0 %v22356_v3  ;;  %v7438_v3 = vmul.bf16 %v26118_v8, %v7322_v5 }
 0x623   : > { %21435 = vmatprep.subr.bf16.mxu0 %v22357_v12 }
 0x626   : > { %21436 = vmatpush3.bf16.msra.mxu0 %v22357_v12  ;;  %v22366_v12 = vld [vmem:[%s30035_s7 + $0xa8] sm:$0xff]  }
 0x627   : > { %21437 = vmatprep.subr.bf16.mxu0 %v22358_v55 }
 0x62a   : > { %21438 = vmatpush3.bf16.msra.mxu0 %v22358_v55  ;;  %v22367_v55 = vld [vmem:[%s30035_s7 + $0xb0] sm:$0xff]  }
 0x62b   : > { %21439 = vmatprep.subr.bf16.mxu0 %v22359_v63 }
 0x62e   : > { %21440 = vmatpush3.bf16.msra.mxu0 %v22359_v63  ;;  %v22368_v63 = vld [vmem:[%s30035_s7 + $0xb8] sm:$0xff]  }
 0x62f   : > { %21441 = vmatprep.subr.bf16.mxu0 %v22360_v50 }
 0x632   : > { %21442 = vmatpush3.bf16.msra.mxu0 %v22360_v50  ;;  %v22369_v50 = vld [vmem:[%s30035_s7 + $0xc0] sm:$0xff]  }
 0x633   : > { %21451 = vmatprep.subr.bf16.mxu0 %v22361_v59 }
 0x635   : > { %21444 = vmatmul.mubr.bf16.vlgmr.msra.gmra.mrb[88].mxu0 %v26082_v7 }
 0x636   : > { %21447 = vmatprep.mubr.bf16.mxu0 %v26111_v36  ;;  %21452 = vmatpush3.bf16.msra.mxu0 %v22361_v59  ;;  %v7405_v59 = vpop.permute.xlu1 %7404 }
 0x637   : > { %21453 = vmatprep.subr.bf16.mxu0 %v22362_v44  ;;  %v7413_v11 = vrot.slane %v7405_v59, %v30163_v52  ;;  %v22372_v59 = vld [vmem:[%s30035_s7 + $0xd8] sm:$0xff]  }
 0x63a   : > { %21454 = vmatpush3.bf16.msra.mxu0 %v22362_v44  ;;  %v7394_v44 = vpop.permute.xlu0 %7393 }
 0x63b   : > { %21455 = vmatprep.subr.bf16.mxu0 %v22363_v23  ;;  %v7402_v5 = vrot.slane %v7394_v44, %v30163_v52  ;;  %v22373_v44 = vld [vmem:[%s30035_s7 + $0xe0] sm:$0xff]  }
 0x63d   : > { %21448 = vmatmul.mubr.bf16.gmra.mrb[92].mxu0 %v26138_v15 }
 0x63e   : > { %21456 = vmatpush3.bf16.msra.mxu0 %v22363_v23  ;;  %21467 = vmatprep.mubr.bf16.mxu0 %v7438_v3  ;;  %v7439_v23 = vmul.bf16 %v26190_v33, %v26129_v47  ;;  %v7440_v3 = vmul.bf16 %v26204_v31, %v26194_v25  ;;  %v26484_v47 = vld [vmem:[#allocation4 + $0x51] sm:$0xff] }
 0x63f   : > { %21457 = vmatprep.subr.bf16.mxu0 %v22364_v10  ;;  %v10012_v25 = vld [vmem:[%s30047_s19] sm:$0xf] }
 0x642   : > { %21458 = vmatpush3.bf16.msra.mxu0 %v22364_v10  ;;  %v22370_v10 = vld [vmem:[%s30035_s7 + $0xc8] sm:$0xff]  }
 0x643   : > { %21459 = vmatprep.subr.bf16.mxu0 %v22365_v27 }
 0x646   : > { %21460 = vmatpush3.bf16.msra.mxu0 %v22365_v27  ;;  %v26282_v27 = vcombine.low %v7402_v5, %v7413_v11  ;;  %v7589_v11 = vpack.c.bf16 %v26165_v2, %v26122_v54  ;;  %v22377_v5 = vld [vmem:[%s30035_s7 + $0x100] sm:$0xff]   ;;  %v22379_v2 = vld [vmem:[%s30035_s7 + $0x110] sm:$0xff]  }
 0x647   : > { %21461 = vmatprep.subr.bf16.mxu0 %v22366_v12 }
 0x64a   : > { %21462 = vmatpush3.bf16.msra.mxu0 %v22366_v12  ;;  %v22371_v12 = vld [vmem:[%s30035_s7 + $0xd0] sm:$0xff]  }
 0x64b   : > { %21463 = vmatprep.subr.bf16.mxu0 %v22367_v55 }
 0x64e   : > { %21464 = vmatpush3.bf16.msra.mxu0 %v22367_v55  ;;  %v7588_v55 = vpack.c.bf16 %v26120_v34, %v26099_v43  ;;  %v22374_v43 = vld [vmem:[%s30035_s7 + $0xe8] sm:$0xff]   ;;  %v22375_v34 = vld [vmem:[%s30035_s7 + $0xf0] sm:$0xff]  }
 0x64f   : > { %21465 = vmatprep.subr.bf16.mxu0 %v22368_v63 }
 0x652   : > { %21466 = vmatpush3.bf16.msra.mxu0 %v22368_v63  ;;  %v7441_v63 = vmul.bf16 %v26282_v27, %v26208_v6  ;;  %v18313_v6 = vld [vmem:[%s30036_s8] ss:$0 sm:$0xff] }
 0x653   : > { %21475 = vmatprep.subr.bf16.mxu0 %v22369_v50 }
 0x655   : > { %21468 = vmatmul.mubr.bf16.vlgmr.msra.gmra.mrb[88].mxu0 %v7439_v23  ;;  %v22376_v23 = vld [vmem:[%s30035_s7 + $0xf8] sm:$0xff]  }
 0x656   : > { %21471 = vmatprep.mubr.bf16.mxu0 %v7440_v3  ;;  %21476 = vmatpush3.bf16.msra.mxu0 %v22369_v50  ;;  %v7592_v50 = vmul.bf16 %v26101_v20, %v7588_v55  ;;  %v7593_v3 = vmul.bf16 %v26113_v40, %v7589_v11  ;;  %v26393_v11 = vld [vmem:[#allocation4 + $0x49] sm:$0xff] }
 0x657   : > { %21477 = vmatprep.subr.bf16.mxu0 %v22370_v10  ;;  %v22400_v20 = vld [vmem:[%s30035_s7 + $0x1b8] sm:$0xff]  }
 0x658   : > { %v22404_v40 = vld [vmem:[%s30035_s7 + $0x1d8] sm:$0xff]  }
 0x65a   : > { %21478 = vmatpush3.bf16.msra.mxu0 %v22370_v10  ;;  %v7590_v10 = vpack.c.bf16 %v26186_v21, %v26167_v24  ;;  %v22380_v21 = vld [vmem:[%s30035_s7 + $0x118] sm:$0xff]  }
 0x65b   : > { %21479 = vmatprep.subr.bf16.mxu0 %v22371_v12 }
 0x65c   : > { %v7594_v55 = vmul.bf16 %v26169_v39, %v7590_v10  ;;  %v22399_v10 = vld [vmem:[%s30035_s7 + $0x1b0] sm:$0xff]   ;;  %v22405_v39 = vld [vmem:[%s30035_s7 + $0x1e0] sm:$0xff]  }
 0x65d   : > { %21472 = vmatmul.mubr.bf16.gmra.mrb[92].mxu0 %v7441_v63  ;;  %v26319_v63 = vld [vmem:[#allocation4 + $0x47] sm:$0xff] }
 0x65e   : > { %21480 = vmatpush3.bf16.msra.mxu0 %v22371_v12  ;;  %21491 = vmatprep.mubr.bf16.mxu0 %v7592_v50  ;;  %v22378_v12 = vld [vmem:[%s30035_s7 + $0x108] sm:$0xff]   ;;  %v7591_v54 = vpack.c.bf16 %v26319_v63, %v26188_v17  ;;  %v22381_v17 = vld [vmem:[%s30035_s7 + $0x120] sm:$0xff]   ;;  %v22383_v50 = vld [vmem:[%s30035_s7 + $0x130] sm:$0xff]  }
 0x65f   : > { %21481 = vmatprep.subr.bf16.mxu0 %v22372_v59 }
 0x660   : > { %v7595_v24 = vmul.bf16 %v26182_v58, %v7591_v54 }
 0x662   : > { %21482 = vmatpush3.bf16.msra.mxu0 %v22372_v59  ;;  %v22382_v59 = vld [vmem:[%s30035_s7 + $0x128] sm:$0xff]  }
 0x663   : > { %21483 = vmatprep.subr.bf16.mxu0 %v22373_v44 }
 0x666   : > { %21484 = vmatpush3.bf16.msra.mxu0 %v22373_v44  ;;  %v22387_v44 = vld [vmem:[%s30035_s7 + $0x150] sm:$0xff]  }
 0x667   : > { %21485 = vmatprep.subr.bf16.mxu0 %v22374_v43 }
 0x66a   : > { %21486 = vmatpush3.bf16.msra.mxu0 %v22374_v43  ;;  %v7892_v43 = vpack.c.bf16 %v26116_v56, %v26246_v22  ;;  %v7893_v56 = vpack.c.bf16 %v26171_v37, %v26106_v32  ;;  %v7895_v32 = vpack.c.bf16 %v26393_v11, %v26180_v49  ;;  %v22395_v37 = vld [vmem:[%s30035_s7 + $0x190] sm:$0xff]   ;;  %v22397_v49 = vld [vmem:[%s30035_s7 + $0x1a0] sm:$0xff]  }
 0x66b   : > { %21487 = vmatprep.subr.bf16.mxu0 %v22375_v34 }
 0x66c   : > { %v7896_v0 = vmul.bf16 %v26118_v8, %v7892_v43  ;;  %v7897_v22 = vmul.bf16 %v26190_v33, %v7893_v56  ;;  %v22416_v8 = vld [vmem:[%s30035_s7 + $0x238] sm:$0xff]   ;;  %v8604_v33 = vld [vmem:[%s30047_s19] sm:$0xf] }
 0x66d   : > { %8623 = vperm.xlu0 %22231, %v8604_v33  }
 0x66e   : > { %21488 = vmatpush3.bf16.msra.mxu0 %v22375_v34  ;;  %v22394_v34 = vld [vmem:[%s30035_s7 + $0x188] sm:$0xff]  }
 0x66f   : > { %21489 = vmatprep.subr.bf16.mxu0 %v22376_v23 }
 0x671   : > { %22234 = vset.pattern.permute.xlu0 %v30164_v48 }
 0x672   : > { %21490 = vmatpush3.bf16.msra.mxu0 %v22376_v23 }
 0x673   : > { %21499 = vmatprep.subr.bf16.mxu0 %v22377_v5 }
 0x675   : > { %21492 = vmatmul.mubr.bf16.vlgmr.msra.gmra.mrb[88].mxu0 %v7593_v3  ;;  %v8045_v3 = vld [vmem:[#allocation4 + $0x4f] sm:$0xff] }
 0x676   : > { %21495 = vmatprep.mubr.bf16.mxu0 %v7594_v55  ;;  %21500 = vmatpush3.bf16.msra.mxu0 %v22377_v5  ;;  %v22398_v5 = vld [vmem:[%s30035_s7 + $0x1a8] sm:$0xff]   ;;  %v22403_v55 = vld [vmem:[%s30035_s7 + $0x1d0] sm:$0xff]  }
 0x677   : > { %21501 = vmatprep.subr.bf16.mxu0 %v22378_v12 }
 0x67a   : > { %21502 = vmatpush3.bf16.msra.mxu0 %v22378_v12  ;;  %v8049_v12 = vpack.c.bf16 %v8045_v3, %v26319_v63  ;;  %v8203_v63 = vpack.c.bf16 %v26217_v46, %v26097_v16  ;;  %v22414_v16 = vld [vmem:[%s30035_s7 + $0x228] sm:$0xff]   ;;  %v8538_v3 = vmax.f32 %v26217_v46, %v26484_v47 }
 0x67b   : > { %21503 = vmatprep.subr.bf16.mxu0 %v22379_v2 }
 0x67c   : > { %v8053_v54 = vmul.bf16 %v26182_v58, %v8049_v12  ;;  %v22407_v58 = vld [vmem:[%s30035_s7 + $0x1f0] sm:$0xff]  }
 0x67d   : > { %21496 = vmatmul.mubr.bf16.gmra.mrb[92].mxu0 %v7595_v24 }
 0x67e   : > { %21504 = vmatpush3.bf16.msra.mxu0 %v22379_v2  ;;  %21515 = vmatprep.mubr.bf16.mxu0 %v7742_v14  ;;  %v22386_v14 = vld [vmem:[%s30035_s7 + $0x148] sm:$0xff]   ;;  %v22412_v2 = vld [vmem:[%s30035_s7 + $0x218] sm:$0xff]  }
 0x67f   : > { %21505 = vmatprep.subr.bf16.mxu0 %v22380_v21 }
 0x682   : > { %21506 = vmatpush3.bf16.msra.mxu0 %v22380_v21  ;;  %v8605_v21 = vld [vmem:[%s30047_s19 + $0x4] sm:$0xf] }
 0x683   : > { %21507 = vmatprep.subr.bf16.mxu0 %v22381_v17  ;;  %8635 = vperm.xlu1 %22232, %v8605_v21  }
 0x684   : > { %8957 = vperm.xlu0 %22234, %v8605_v21   ;;  %v22418_v21 = vld [vmem:[%s30037_s9] ss:$8 sps:$4 sm:$0xff]  }
 0x686   : > { %21508 = vmatpush3.bf16.msra.mxu0 %v22381_v17 }
 0x687   : > { %21509 = vmatprep.subr.bf16.mxu0 %v22382_v59  ;;  %22233 = vset.pattern.permute.xlu1 %v30164_v48 }
 0x688   : > { %8946 = vperm.xlu1 %22233, %v8604_v33   ;;  %10624 = vperm.xlu0 %22234, %v10012_v25   ;;  %v22423_v33 = vld [vmem:[%s30037_s9 + $0x14] ss:$8 sps:$4 sm:$0xff]  }
 0x68a   : > { %21510 = vmatpush3.bf16.msra.mxu0 %v22382_v59 }
 0x68b   : > { %21511 = vmatprep.subr.bf16.mxu0 %v22383_v50 }
 0x68c   : > { %22235 = vset.pattern.permute.xlu1 %v30165_v41  ;;  %22237 = vset.pattern.permute.xlu0 %v30165_v41 }
 0x68d   : > { %10038 = vperm.xlu1 %22235, %v10012_v25   ;;  %v22426_v25 = vld [vmem:[%s30037_s9 + $0x24] ss:$8 sps:$4 sm:$0xff]  }
 0x68e   : > { %21512 = vmatpush3.bf16.msra.mxu0 %v22383_v50 }
 0x68f   : > { %21513 = vmatprep.subr.bf16.mxu0 %v22384_v4 }
 0x692   : > { %21514 = vmatpush3.bf16.msra.mxu0 %v22384_v4 }
 0x693   : > { %21523 = vmatprep.subr.bf16.mxu0 %v22385_v45 }
 0x695   : > { %21516 = vmatmul.mubr.bf16.vlgmr.msra.gmra.mrb[88].mxu0 %v7743_v30  ;;  %v22389_v30 = vld [vmem:[%s30035_s7 + $0x160] sm:$0xff]  }
 0x696   : > { %21519 = vmatprep.mubr.bf16.mxu0 %v7744_v51  ;;  %21524 = vmatpush3.bf16.msra.mxu0 %v22385_v45  ;;  %v7894_v51 = vpack.c.bf16 %v26202_v38, %v26184_v28  ;;  %v7899_v28 = vmul.bf16 %v26282_v27, %v7895_v32  ;;  %v22396_v38 = vld [vmem:[%s30035_s7 + $0x198] sm:$0xff]  }
 0x697   : > { %21525 = vmatprep.subr.bf16.mxu0 %v22386_v14 }
 0x698   : > { %v7898_v23 = vmul.bf16 %v26204_v31, %v7894_v51  ;;  %v10013_v31 = vld [vmem:[%s30047_s19 + $0x4] sm:$0xf] }
 0x699   : > { %10050 = vperm.xlu1 %22235, %v10013_v31  }
 0x69a   : > { %21526 = vmatpush3.bf16.msra.mxu0 %v22386_v14 }
 0x69b   : > { %21527 = vmatprep.subr.bf16.mxu0 %v22387_v44 }
 0x69d   : > { %21520 = vmatmul.mubr.bf16.gmra.mrb[92].mxu0 %v7745_v29  ;;  %v22393_v29 = vld [vmem:[%s30035_s7 + $0x180] sm:$0xff]   ;;  %22236 = vset.pattern.permute.xlu1 %v30164_v48 }
 0x69e   : > { %21528 = vmatpush3.bf16.msra.mxu0 %v22387_v44  ;;  %21539 = vmatprep.mubr.bf16.mxu0 %v7896_v0 }
 0x69f   : > { %21529 = vmatprep.subr.bf16.mxu0 %v22388_v1  ;;  %10635 = vperm.xlu1 %22236, %v10013_v31   ;;  %v22424_v31 = vld [vmem:[%s30037_s9 + $0x20] ss:$8 sps:$4 sm:$0xff]  }
 0x6a2   : > { %21530 = vmatpush3.bf16.msra.mxu0 %v22388_v1 }
 0x6a3   : > { %21531 = vmatprep.subr.bf16.mxu0 %v22389_v30  ;;  %22238 = vset.pattern.permute.xlu1 %v30165_v41 }
 0x6a6   : > { %21532 = vmatpush3.bf16.msra.mxu0 %v22389_v30 }
 0x6a7   : > { %21533 = vmatprep.subr.bf16.mxu0 %v22390_v61 }
 0x6aa   : > { %21534 = vmatpush3.bf16.msra.mxu0 %v22390_v61 }
 0x6ab   : > { %21535 = vmatprep.subr.bf16.mxu0 %v22391_v35 }
 0x6ae   : > { %21536 = vmatpush3.bf16.msra.mxu0 %v22391_v35 }
 0x6af   : > { %21537 = vmatprep.subr.bf16.mxu0 %v22392_v26 }
 0x6b2   : > { %21538 = vmatpush3.bf16.msra.mxu0 %v22392_v26 }
 0x6b3   : > { %21547 = vmatprep.subr.bf16.mxu0 %v22393_v29 }
 0x6b5   : > { %21540 = vmatmul.mubr.bf16.vlgmr.msra.gmra.mrb[88].mxu0 %v7897_v22 }
 0x6b6   : > { %21543 = vmatprep.mubr.bf16.mxu0 %v7898_v23  ;;  %21548 = vmatpush3.bf16.msra.mxu0 %v22393_v29 }
 0x6b7   : > { %21549 = vmatprep.subr.bf16.mxu0 %v22394_v34 }
 0x6ba   : > { %21550 = vmatpush3.bf16.msra.mxu0 %v22394_v34 }
 0x6bb   : > { %21551 = vmatprep.subr.bf16.mxu0 %v22395_v37 }
 0x6bd   : > { %21544 = vmatmul.mubr.bf16.gmra.mrb[92].mxu0 %v7899_v28 }
 0x6be   : > { %21552 = vmatpush3.bf16.msra.mxu0 %v22395_v37  ;;  %21563 = vmatprep.mubr.bf16.mxu0 %v8050_v13  ;;  %v22402_v13 = vld [vmem:[%s30035_s7 + $0x1c8] sm:$0xff]  }
 0x6bf   : > { %21553 = vmatprep.subr.bf16.mxu0 %v22396_v38 }
 0x6c2   : > { %21554 = vmatpush3.bf16.msra.mxu0 %v22396_v38 }
 0x6c3   : > { %21555 = vmatprep.subr.bf16.mxu0 %v22397_v49 }
 0x6c6   : > { %21556 = vmatpush3.bf16.msra.mxu0 %v22397_v49 }
 0x6c7   : > { %21557 = vmatprep.subr.bf16.mxu0 %v22398_v5 }
 0x6ca   : > { %21558 = vmatpush3.bf16.msra.mxu0 %v22398_v5 }
 0x6cb   : > { %21559 = vmatprep.subr.bf16.mxu0 %v22399_v10 }
 0x6ce   : > { %21560 = vmatpush3.bf16.msra.mxu0 %v22399_v10 }
 0x6cf   : > { %21561 = vmatprep.subr.bf16.mxu0 %v22400_v20 }
 0x6d2   : > { %21562 = vmatpush3.bf16.msra.mxu0 %v22400_v20 }
 0x6d3   : > { %21571 = vmatprep.subr.bf16.mxu0 %v22401_v60 }
 0x6d5   : > { %21564 = vmatmul.mubr.bf16.vlgmr.msra.gmra.mrb[88].mxu0 %v8051_v18  ;;  %v22410_v18 = vld [vmem:[%s30035_s7 + $0x208] sm:$0xff]  }
 0x6d6   : > { %21567 = vmatprep.mubr.bf16.mxu0 %v8052_v62  ;;  %21572 = vmatpush3.bf16.msra.mxu0 %v22401_v60  ;;  %v22411_v62 = vld [vmem:[%s30035_s7 + $0x210] sm:$0xff]  }
 0x6d7   : > { %21573 = vmatprep.subr.bf16.mxu0 %v22402_v13 }
 0x6da   : > { %21574 = vmatpush3.bf16.msra.mxu0 %v22402_v13 }
 0x6db   : > { %21575 = vmatprep.subr.bf16.mxu0 %v22403_v55 }
 0x6dd   : > { %21568 = vmatmul.mubr.bf16.gmra.mrb[92].mxu0 %v8053_v54 }
 0x6de   : > { %21576 = vmatpush3.bf16.msra.mxu0 %v22403_v55  ;;  %21587 = vmatprep.mubr.bf16.mxu0 %v26082_v7  ;;  %v22408_v7 = vld [vmem:[%s30035_s7 + $0x1f8] sm:$0xff]  }
 0x6df   : > { %21577 = vmatprep.subr.bf16.mxu0 %v22404_v40 }
 0x6e2   : > { %21578 = vmatpush3.bf16.msra.mxu0 %v22404_v40 }
 0x6e3   : > { %21579 = vmatprep.subr.bf16.mxu0 %v22405_v39 }
 0x6e6   : > { %21580 = vmatpush3.bf16.msra.mxu0 %v22405_v39 }
 0x6e7   : > { %21581 = vmatprep.subr.bf16.mxu0 %v22406_v53 }
 0x6ea   : > { %21582 = vmatpush3.bf16.msra.mxu0 %v22406_v53 }
 0x6eb   : > { %21583 = vmatprep.subr.bf16.mxu0 %v22407_v58 }
 0x6ee   : > { %21584 = vmatpush3.bf16.msra.mxu0 %v22407_v58 }
 0x6ef   : > { %21585 = vmatprep.subr.bf16.mxu0 %v22408_v7 }
 0x6f2   : > { %21586 = vmatpush3.bf16.msra.mxu0 %v22408_v7 }
 0x6f3   : > { %21595 = vmatprep.subr.bf16.mxu0 %v22409_v57 }
 0x6f5   : > { %21588 = vmatmul.mubr.bf16.vlgmr.msra.gmra.mrb[88].mxu0 %v26111_v36  ;;  %v22413_v36 = vld [vmem:[%s30035_s7 + $0x220] sm:$0xff]  }
 0x6f6   : > { %21591 = vmatprep.mubr.bf16.mxu0 %v26138_v15  ;;  %21596 = vmatpush3.bf16.msra.mxu0 %v22409_v57  ;;  %v22415_v15 = vld [vmem:[%s30035_s7 + $0x230] sm:$0xff]  }
 0x6f7   : > { %21597 = vmatprep.subr.bf16.mxu0 %v22410_v18 }
 0x6fa   : > { %21598 = vmatpush3.bf16.msra.mxu0 %v22410_v18 }
 0x6fb   : > { %21599 = vmatprep.subr.bf16.mxu0 %v22411_v62 }
 0x6fd   : > { %21592 = vmatmul.mubr.bf16.gmra.mrb[92].mxu0 %v8203_v63 }
 0x6fe   : > { %21600 = vmatpush3.bf16.msra.mxu0 %v22411_v62  ;;  %21611 = vmatprep.mubr.bf16.mxu0 %v8354_v9  ;;  %v8353_v9 = vpack.c.bf16 %v26484_v47, %v26393_v11 }
 0x6ff   : > { %21601 = vmatprep.subr.bf16.mxu0 %v22412_v2 }
 0x700   : > { %v8357_v24 = vmul.bf16 %v26282_v27, %v8353_v9  ;;  %v22420_v9 = vld [vmem:[%s30037_s9 + $0x4] ss:$8 sps:$4 sm:$0xff]  }
 0x702   : > { %21602 = vmatpush3.bf16.msra.mxu0 %v22412_v2 }
 0x703   : > { %21603 = vmatprep.subr.bf16.mxu0 %v22413_v36 }
 0x706   : > { %21604 = vmatpush3.bf16.msra.mxu0 %v22413_v36 }
 0x707   : > { %21605 = vmatprep.subr.bf16.mxu0 %v22414_v16 }
 0x70a   : > { %21606 = vmatpush3.bf16.msra.mxu0 %v22414_v16 }
 0x70b   : > { %21607 = vmatprep.subr.bf16.mxu0 %v22415_v15 }
 0x70e   : > { %21608 = vmatpush3.bf16.msra.mxu0 %v22415_v15 }
 0x70f   : > { %21609 = vmatprep.subr.bf16.mxu0 %v22416_v8 }
 0x712   : > { %21610 = vmatpush3.bf16.msra.mxu0 %v22416_v8 }
 0x713   : > { %21619 = vmatprep.subr.bf16.mxu0 %v26217_v46 }
 0x715   : > { %21612 = vmatmul.mubr.bf16.vlgmr.msra.gmra.mrb[88].mxu0 %v8355_v19 }
 0x716   : > { %21615 = vmatprep.mubr.bf16.mxu0 %v8356_v42 }
 0x71d   : > { %21616 = vmatmul.mubr.bf16.gmra.mrb[92].mxu0 %v8357_v24  ;;  %v22417_v24 = vld [vmem:[%s30049_s21] sm:$0xff]  }
 0x71e   : > { %21627 = vmatprep.mubr.msk.bf16.mxu0 %vm23950_vm4, %v26217_v46 }
 0x7e8   : > { %v21613_v19 = vpop.f32.mrb[88].mxu0 }
 0x7e9   : > { %v21703_v42 = vadd.f32 %v21613_v19, %v18313_v6  ;;  %v8457_v27 = vpop.f32.mrb[89].mxu0  ;;  %v22427_v19 = vld [vmem:[%s30037_s9 + $0x30] ss:$8 sps:$4 sm:$0xff]  }
 0x7ea   : > { %v21704_v17 = vadd.f32 %v18313_v6, %v8457_v27  ;;  %v21614_v59 = vpop.f32.mrb[90].mxu0  ;;  %v22430_v27 = vld [vmem:[%s30037_s9 + $0x40] ss:$8 sps:$4 sm:$0xff]  }
 0x7eb   : > { %v8498_v50 = vmax.f32 %v21703_v42, 0.0  ;;  %v21705_v4 = vadd.f32 %v21614_v59, %v18313_v6  ;;  %v8460_v45 = vpop.f32.mrb[91].mxu0  ;;  %v22432_v42 = vld [vmem:[%s30037_s9 + $0x44] ss:$8 sps:$4 sm:$0xff]   ;;  %v22435_v59 = vld [vmem:[%s30037_s9 + $0x54] ss:$8 sps:$4 sm:$0xff]  }
 0x7ec   : > { %v8496_v14 = vmax.f32 %v21704_v17, 0.0  ;;  %v21706_v44 = vadd.f32 %v18313_v6, %v8460_v45  ;;  %v22433_v17 = vld [vmem:[%s30037_s9 + $0x50] ss:$8 sps:$4 sm:$0xff]  }
 0x7ed   : > { %8506 = vst [vmem:[#allocation4 + $0x20] sm:$0xff] %v8498_v50  ;;  %v8499_v43 = vmax.f32 %v21705_v4, 0.0  ;;  %v22436_v4 = vld [vmem:[%s30037_s9 + $0x60] ss:$8 sps:$4 sm:$0xff]   ;;  %v22439_v45 = vld [vmem:[%s30037_s9 + $0x70] ss:$8 sps:$4 sm:$0xff]  }
 0x7ee   : > { %8504 = vst [vmem:[#allocation4 + $0x10] sm:$0xff] %v8496_v14  ;;  %v8497_v1 = vmax.f32 %v21706_v44, 0.0  ;;  %v22444_v44 = vld [vmem:[%s30037_s9 + $0x84] ss:$8 sps:$4 sm:$0xff]  }
 0x7ef   : > { %8507 = vst [vmem:[#allocation4 + $0x28] sm:$0xff] %v8499_v43 }
 0x7f0   : > { %8505 = vst [vmem:[#allocation4 + $0x18] sm:$0xff] %v8497_v1  ;;  %v21617_v0 = vpop.f32.mrb[92].mxu0 }
 0x7f1   : > { %v21707_v30 = vadd.f32 %v21617_v0, %v18313_v6  ;;  %v8473_v61 = vpop.f32.mrb[93].mxu0  ;;  %v8624_v0 = vpop.permute.xlu0 %8623 }
 0x7f2   : > { %v21708_v35 = vadd.f32 %v18313_v6, %v8473_v61  ;;  %v21618_v26 = vpop.f32.mrb[94].mxu0 }
 0x7f3   : > { %v8502_v56 = vmax.f32 %v21707_v30, 0.0  ;;  %v21709_v29 = vadd.f32 %v21618_v26, %v18313_v6  ;;  %v8476_v51 = vpop.f32.mrb[95].mxu0 }
 0x7f4   : > { %v8500_v22 = vmax.f32 %v21708_v35, 0.0  ;;  %v21710_v34 = vadd.f32 %v18313_v6, %v8476_v51  ;;  %v22429_v6 = vld [vmem:[%s30037_s9 + $0x34] ss:$8 sps:$4 sm:$0xff]  }
 0x7f5   : > { %8510 = vst [vmem:[#allocation4 + $0x40] sm:$0xff] %v8502_v56  ;;  %v8503_v23 = vmax.f32 %v21709_v29, 0.0  ;;  %v8958_v35 = vpop.permute.xlu0 %8957 }
 0x7f6   : > { %8508 = vst [vmem:[#allocation4 + $0x30] sm:$0xff] %v8500_v22  ;;  %v8501_v11 = vmax.f32 %v21710_v34, 0.0  ;;  %v8522_v32 = vld [vmem:[#allocation4 + $0x21] sm:$0xff] }
 0x7f7   : > { %8511 = vst [vmem:[#allocation4 + $0x48] sm:$0xff] %v8503_v23  ;;  %v8520_v37 = vld [vmem:[#allocation4 + $0x11] sm:$0xff]  ;;  %v8521_v28 = vld [vmem:[#allocation4 + $0x19] sm:$0xff]  ;;  %v8532_v38 = vmax.f32 %v8498_v50, %v8522_v32 }
 0x7f8   : > { %8509 = vst [vmem:[#allocation4 + $0x38] sm:$0xff] %v8501_v11  ;;  %v8530_v49 = vmax.f32 %v8496_v14, %v8520_v37  ;;  %v8531_v5 = vmax.f32 %v8497_v1, %v8521_v28  ;;  %v22438_v50 = vld [vmem:[%s30037_s9 + $0x64] ss:$8 sps:$4 sm:$0xff]   ;;  %v22441_v14 = vld [vmem:[%s30037_s9 + $0x74] ss:$8 sps:$4 sm:$0xff]  }
 0x7fa   : > { %v8539_v10 = vmax.f32 %v8530_v49, %v8531_v5  ;;  %v8540_v20 = vmax.f32 %v8531_v5, %v8532_v38 }
 0x7fc   : > { %v8547_v60 = vpack.c.bf16 %v8540_v20, %v8539_v10 }
 0x7fd   : > { %v8523_v13 = vld [vmem:[#allocation4 + $0x29] sm:$0xff] }
 0x7fe   : > { %21620 = vmatpush3.bf16.msra.mxu0 %v8547_v60  ;;  %v8533_v12 = vmax.f32 %v8499_v43, %v8523_v13  ;;  %v8526_v55 = vld [vmem:[#allocation4 + $0x41] sm:$0xff]  ;;  %v8527_v54 = vld [vmem:[#allocation4 + $0x49] sm:$0xff]  ;;  %v8636_v43 = vpop.permute.xlu1 %8635 }
 0x7ff   : > { %21621 = vmatprep.subr.bf16.mxu0 %v26217_v46  ;;  %v8524_v40 = vld [vmem:[#allocation4 + $0x31] sm:$0xff]  ;;  %v8525_v39 = vld [vmem:[#allocation4 + $0x39] sm:$0xff]  ;;  %v8536_v53 = vmax.f32 %v8502_v56, %v8526_v55  ;;  %v8537_v58 = vmax.f32 %v8503_v23, %v8527_v54 }
 0x800   : > { %v8534_v7 = vmax.f32 %v8500_v22, %v8524_v40  ;;  %v8541_v57 = vmax.f32 %v8532_v38, %v8533_v12  ;;  %v8535_v18 = vmax.f32 %v8501_v11, %v8525_v39  ;;  %v10625_v22 = vpop.permute.xlu0 %10624  ;;  %v8644_v40 = vrot.slane %v8636_v43, %v30163_v52 }
 0x801   : > { %v8545_v62 = vmax.f32 %v8536_v53, %v8537_v58  ;;  %v8546_v63 = vmax.f32 %v8537_v58, %v8538_v3  ;;  %v10633_v32 = vrot.slane %v10625_v22, %v30163_v52  ;;  %v8632_v39 = vrot.slane %v8624_v0, %v30163_v52  ;;  %v22466_v0 = vld [vmem:[%s30037_s9 + $0x100] ss:$8 sps:$4 sm:$0xff]   ;;  %v22475_v22 = vld [vmem:[%s30037_s9 + $0x130] ss:$8 sps:$4 sm:$0xff]  }
 0x802   : > { %v8542_v2 = vmax.f32 %v8533_v12, %v8534_v7  ;;  %v8543_v36 = vmax.f32 %v8534_v7, %v8535_v18  ;;  %v8544_v16 = vmax.f32 %v8535_v18, %v8536_v53  ;;  %v8947_v1 = vpop.permute.xlu1 %8946  ;;  %v8966_v58 = vrot.slane %v8958_v35, %v30163_v52  ;;  %v22469_v35 = vld [vmem:[%s30037_s9 + $0x110] ss:$8 sps:$4 sm:$0xff]  }
 0x803   : > { %v8550_v15 = vpack.c.bf16 %v8546_v63, %v8545_v62  ;;  %v8955_v53 = vrot.slane %v8947_v1, %v30163_v52  ;;  %v26617_v7 = vcombine.low %v8632_v39, %v8644_v40  ;;  %v22489_v40 = vld [vmem:[%s30037_s9 + $0x174] ss:$8 sps:$4 sm:$0xff]  }
 0x804   : > { %v8548_v8 = vpack.c.bf16 %v8542_v2, %v8541_v57  ;;  %v8549_v47 = vpack.c.bf16 %v8544_v16, %v8543_v36 }
 0x805   : > { %v26621_v16 = vcombine.low %v8955_v53, %v8966_v58  ;;  %v22487_v53 = vld [vmem:[%s30037_s9 + $0x170] ss:$8 sps:$4 sm:$0xff]  }
 0x806   : > { %21622 = vmatpush3.bf16.msra.mxu0 %v8548_v8  ;;  %v10039_v30 = vpop.permute.xlu1 %10038 }
 0x807   : > { %21623 = vmatprep.subr.bf16.mxu0 %v26217_v46  ;;  %v10047_v61 = vrot.slane %v10039_v30, %v30163_v52 }
 0x80a   : > { %21624 = vmatpush3.bf16.msra.mxu0 %v8549_v47  ;;  %v10051_v26 = vpop.permute.xlu1 %10050 }
 0x80b   : > { %21625 = vmatprep.subr.bf16.mxu0 %v26217_v46  ;;  %v22421_v46 = vld [vmem:[%s30037_s9 + $0x10] ss:$8 sps:$4 sm:$0xff]   ;;  %v10059_v56 = vrot.slane %v10051_v26, %v30163_v52  ;;  %v22474_v26 = vld [vmem:[%s30037_s9 + $0x124] ss:$8 sps:$4 sm:$0xff]  }
 0x80d   : > { %v26580_v29 = vcombine.low %v10047_v61, %v10059_v56  ;;  %v22471_v61 = vld [vmem:[%s30037_s9 + $0x114] ss:$8 sps:$4 sm:$0xff]   ;;  %v22472_v56 = vld [vmem:[%s30037_s9 + $0x120] ss:$8 sps:$4 sm:$0xff]  }
 0x80e   : > { %21626 = vmatpush3.bf16.msra.mxu0 %v8550_v15  ;;  %v10636_v51 = vpop.permute.xlu1 %10635  ;;  %v22442_v15 = vld [vmem:[%s30037_s9 + $0x80] ss:$8 sps:$4 sm:$0xff]  }
 0x80f   : > { %8748 = vmatprep.subr.bf16.mxu0 %v22420_v9  ;;  %v10066_v34 = vshrl.u32 %v26580_v29, 16  ;;  %v10069_v23 = vshll.u32 %v26580_v29, 16  ;;  %v10644_v11 = vrot.slane %v10636_v51, %v30163_v52  ;;  %v22477_v51 = vld [vmem:[%s30037_s9 + $0x134] ss:$8 sps:$4 sm:$0xff]  }
 0x811   : > { %21628 = vmatmul.mubr.msk.bf16.vlgmr.msra.gmra.mrb[96].mxu0 %vm685_vm3, %v22417_v24  ;;  %v10948_v37 = vrot.slane %v10066_v34, 4  ;;  %v10949_v28 = vrot.slane %v10069_v23, 5  ;;  %v26590_v38 = vcombine.low %v10633_v32, %v10644_v11  ;;  %v22447_v24 = vld [vmem:[%s30037_s9 + $0x94] ss:$8 sps:$4 sm:$0xff]   ;;  %v22480_v11 = vld [vmem:[%s30037_s9 + $0x144] ss:$8 sps:$4 sm:$0xff]  }
 0x812   : > { %8749 = vmatpush1.bf16.msra.mxu0 %v22418_v21  ;;  %8780 = vmatprep.mubr.bf16.mxu0 %v30165_v41  ;;  %v22478_v32 = vld [vmem:[%s30037_s9 + $0x140] ss:$8 sps:$4 sm:$0xff]  }
 0x813   : > { %8750 = vmatprep.subr.bf16.mxu0 %v22423_v33  ;;  %v26592_v49 = vor.u32 %v10949_v28, %v10948_v37  ;;  %v10651_v5 = vshrl.u32 %v26590_v38, 16  ;;  %v10654_v10 = vshll.u32 %v26590_v38, 16  ;;  %v22483_v37 = vld [vmem:[%s30037_s9 + $0x154] ss:$8 sps:$4 sm:$0xff]   ;;  %v22481_v28 = vld [vmem:[%s30037_s9 + $0x150] ss:$8 sps:$4 sm:$0xff]  }
 0x814   : > { %v22723_v38 = vld [vmem:[%s30039_s11 + $0x1d4] ss:$8 sps:$4 sm:$0xff]  }
 0x815   : > { %v26598_v20 = vrot.slane %v10651_v5, 7 }
 0x816   : > { %8751 = vmatpush1.bf16.msra.mxu0 %v22421_v46  ;;  %v22445_v46 = vld [vmem:[%s30037_s9 + $0x90] ss:$8 sps:$4 sm:$0xff]  }
 0x817   : > { %8752 = vmatprep.subr.bf16.mxu0 %v22426_v25  ;;  %v26603_v60 = vor.u32 %v26598_v20, %v10654_v10  ;;  %v22450_v25 = vld [vmem:[%s30037_s9 + $0xa4] ss:$8 sps:$4 sm:$0xff]  }
 0x81a   : > { %8753 = vmatpush1.bf16.msra.mxu0 %v22424_v31  ;;  %v22448_v31 = vld [vmem:[%s30037_s9 + $0xa0] ss:$8 sps:$4 sm:$0xff]  }
 0x81b   : > { %8754 = vmatprep.subr.bf16.mxu0 %v22429_v6  ;;  %v22453_v6 = vld [vmem:[%s30037_s9 + $0xb4] ss:$8 sps:$4 sm:$0xff]  }
 0x81e   : > { %8755 = vmatpush1.bf16.msra.mxu0 %v22427_v19  ;;  %v22451_v19 = vld [vmem:[%s30037_s9 + $0xb0] ss:$8 sps:$4 sm:$0xff]  }
 0x81f   : > { %8756 = vmatprep.subr.bf16.mxu0 %v22432_v42  ;;  %v22456_v42 = vld [vmem:[%s30037_s9 + $0xc4] ss:$8 sps:$4 sm:$0xff]  }
 0x822   : > { %8757 = vmatpush1.bf16.msra.mxu0 %v22430_v27  ;;  %v22454_v27 = vld [vmem:[%s30037_s9 + $0xc0] ss:$8 sps:$4 sm:$0xff]  }
 0x823   : > { %8758 = vmatprep.subr.bf16.mxu0 %v22435_v59  ;;  %v22457_v59 = vld [vmem:[%s30037_s9 + $0xd0] ss:$8 sps:$4 sm:$0xff]  }
 0x826   : > { %8759 = vmatpush1.bf16.msra.mxu0 %v22433_v17  ;;  %v22459_v17 = vld [vmem:[%s30037_s9 + $0xd4] ss:$8 sps:$4 sm:$0xff]  }
 0x827   : > { %8760 = vmatprep.subr.bf16.mxu0 %v22438_v50  ;;  %v22462_v50 = vld [vmem:[%s30037_s9 + $0xe4] ss:$8 sps:$4 sm:$0xff]  }
 0x82a   : > { %8761 = vmatpush1.bf16.msra.mxu0 %v22436_v4  ;;  %v22460_v4 = vld [vmem:[%s30037_s9 + $0xe0] ss:$8 sps:$4 sm:$0xff]  }
 0x82b   : > { %8762 = vmatprep.subr.bf16.mxu0 %v22441_v14  ;;  %v22463_v14 = vld [vmem:[%s30037_s9 + $0xf0] ss:$8 sps:$4 sm:$0xff]  }
 0x82e   : > { %8763 = vmatpush1.bf16.msra.mxu0 %v22439_v45  ;;  %v22465_v45 = vld [vmem:[%s30037_s9 + $0xf4] ss:$8 sps:$4 sm:$0xff]  }
 0x82f   : > { %8895 = vmatprep.subr.bf16.mxu0 %v22444_v44  ;;  %v22468_v44 = vld [vmem:[%s30037_s9 + $0x104] ss:$8 sps:$4 sm:$0xff]  }
 0x8e4   : > { %v26605_v13 = vpop.f32.mrb[96].mxu0 }
 0x8e5   : > { %8602 = vst [vmem:[#allocation5 + $0x8] sm:$0xff] %v26605_v13  ;;  %v21629_v3 = vpop.f32.mrb[97].mxu0 }
 0x8e6   : > { %v26608_v12 = vpop.f32.mrb[98].mxu0  ;;  %v22486_v3 = vld [vmem:[%s30037_s9 + $0x164] ss:$8 sps:$4 sm:$0xff]  }
 0x8e7   : > { %8603 = vst [vmem:[#allocation5 + $0x10] sm:$0xff] %v26608_v12  ;;  %v21630_v55 = vpop.f32.mrb[99].mxu0  ;;  %v9268_v54 = vpack.c.bf16 %v26608_v12, %v26605_v13  ;;  %v22639_v13 = vld [vmem:[%s30039_s11 + $0x14] ss:$8 sps:$4 sm:$0xff]   ;;  %v22546_v12 = vld [vmem:[%s30037_s9 + $0x2a4] ss:$8 sps:$4 sm:$0xff]  }
 0x8e8   : > { %v22484_v55 = vld [vmem:[%s30037_s9 + $0x160] ss:$8 sps:$4 sm:$0xff]  }
 0x8ec   : > { %v8618_v57 = vld [vmem:[#allocation5 + $0x3] sm:$0xff] }
 0x8ed   : > { %v8795_v1 = vld [vmem:[#allocation5 + $0x4] sm:$0xff] }
 0x8ee   : > { %v8619_v18 = vld [vmem:[#allocation5 + $0xb] sm:$0xff]  ;;  %v9562_v62 = vld [vmem:[#allocation5 + $0x13] sm:$0xff] }
 0x8ef   : > { %v8620_v63 = vpack.c.bf16 %v8619_v18, %v8618_v57  ;;  %v9563_v2 = vpack.c.bf16 %v9562_v62, %v8619_v18  ;;  %v26619_v36 = vld [vmem:[#allocation5 + $0xd] sm:$0xff]  ;;  %v9857_v8 = vld [vmem:[#allocation5 + $0x15] sm:$0xff]  ;;  %v8942_v39 = vld [vmem:[#allocation5 + $0x5] sm:$0xff] }
 0x8f0   : > { %v9858_v21 = vpack.c.bf16 %v9857_v8, %v26619_v36  ;;  %v26680_v43 = vld [vmem:[#allocation5 + $0xc] sm:$0xff]  ;;  %v8944_v58 = vpack.c.bf16 %v26619_v36, %v8942_v39  ;;  %v22492_v57 = vld [vmem:[%s30037_s9 + $0x184] ss:$8 sps:$4 sm:$0xff]   ;;  %v22541_v39 = vld [vmem:[%s30037_s9 + $0x290] ss:$8 sps:$4 sm:$0xff]  }
 0x8f1   : > { %v8651_v47 = vmul.bf16 %v26617_v7, %v8620_v63  ;;  %v26628_v9 = vmul.bf16 %v26617_v7, %v9563_v2  ;;  %v8797_v30 = vpack.c.bf16 %v26680_v43, %v8795_v1  ;;  %v22490_v18 = vld [vmem:[%s30037_s9 + $0x180] ss:$8 sps:$4 sm:$0xff]   ;;  %v22495_v63 = vld [vmem:[%s30037_s9 + $0x194] ss:$8 sps:$4 sm:$0xff]   ;;  %v22493_v2 = vld [vmem:[%s30037_s9 + $0x190] ss:$8 sps:$4 sm:$0xff]  }
 0x8f2   : > { %v26635_v33 = vmul.bf16 %v26621_v16, %v9858_v21  ;;  %v8973_v62 = vmul.bf16 %v26621_v16, %v8944_v58  ;;  %v22498_v36 = vld [vmem:[%s30037_s9 + $0x1a4] ss:$8 sps:$4 sm:$0xff]   ;;  %v22501_v8 = vld [vmem:[%s30037_s9 + $0x1b4] ss:$8 sps:$4 sm:$0xff]   ;;  %v22502_v21 = vld [vmem:[%s30037_s9 + $0x1c0] ss:$8 sps:$4 sm:$0xff]  }
 0x8f3   : > { %8781 = vmatmul.mubr.bf16.vlgmr.msra.gmra.mrb[100].mxu0 %v8651_v47  ;;  %v22499_v47 = vld [vmem:[%s30037_s9 + $0x1b0] ss:$8 sps:$4 sm:$0xff]   ;;  %v22522_v1 = vld [vmem:[%s30037_s9 + $0x224] ss:$8 sps:$4 sm:$0xff]   ;;  %v22544_v58 = vld [vmem:[%s30037_s9 + $0x2a0] ss:$8 sps:$4 sm:$0xff]  }
 0x8f4   : > { %8896 = vmatpush1.bf16.msra.mxu0 %v22442_v15  ;;  %8927 = vmatprep.mubr.bf16.mxu0 %v30165_v41  ;;  %v22496_v15 = vld [vmem:[%s30037_s9 + $0x1a0] ss:$8 sps:$4 sm:$0xff]  }
 0x8f5   : > { %8897 = vmatprep.subr.bf16.mxu0 %v22447_v24  ;;  %v22504_v24 = vld [vmem:[%s30037_s9 + $0x1c4] ss:$8 sps:$4 sm:$0xff]  }
 0x8f8   : > { %8898 = vmatpush1.bf16.msra.mxu0 %v22445_v46  ;;  %v22507_v46 = vld [vmem:[%s30037_s9 + $0x1d4] ss:$8 sps:$4 sm:$0xff]  }
 0x8f9   : > { %8899 = vmatprep.subr.bf16.mxu0 %v22450_v25  ;;  %v22505_v25 = vld [vmem:[%s30037_s9 + $0x1d0] ss:$8 sps:$4 sm:$0xff]  }
 0x8fc   : > { %8900 = vmatpush1.bf16.msra.mxu0 %v22448_v31  ;;  %v22510_v31 = vld [vmem:[%s30037_s9 + $0x1e4] ss:$8 sps:$4 sm:$0xff]  }
 0x8fd   : > { %8901 = vmatprep.subr.bf16.mxu0 %v22453_v6  ;;  %v22508_v6 = vld [vmem:[%s30037_s9 + $0x1e0] ss:$8 sps:$4 sm:$0xff]  }
 0x900   : > { %8902 = vmatpush1.bf16.msra.mxu0 %v22451_v19  ;;  %v22513_v19 = vld [vmem:[%s30037_s9 + $0x1f4] ss:$8 sps:$4 sm:$0xff]  }
 0x901   : > { %8903 = vmatprep.subr.bf16.mxu0 %v22456_v42  ;;  %v9119_v42 = vld [vmem:[#allocation5 + $0xf] sm:$0xff] }
 0x904   : > { %8904 = vmatpush1.bf16.msra.mxu0 %v22454_v27  ;;  %v9118_v27 = vld [vmem:[#allocation5 + $0x7] sm:$0xff] }
 0x905   : > { %8905 = vmatprep.subr.bf16.mxu0 %v22459_v17  ;;  %v22511_v17 = vld [vmem:[%s30037_s9 + $0x1f0] ss:$8 sps:$4 sm:$0xff]  }
 0x908   : > { %8906 = vmatpush1.bf16.msra.mxu0 %v22457_v59  ;;  %v9120_v59 = vpack.c.bf16 %v9119_v42, %v9118_v27  ;;  %v22561_v42 = vld [vmem:[%s30037_s9 + $0x2f4] ss:$8 sps:$4 sm:$0xff]  }
 0x909   : > { %8907 = vmatprep.subr.bf16.mxu0 %v22462_v50  ;;  %v22516_v50 = vld [vmem:[%s30037_s9 + $0x204] ss:$8 sps:$4 sm:$0xff]   ;;  %v9413_v27 = vld [vmem:[#allocation5 + $0x9] sm:$0xff] }
 0x90c   : > { %8908 = vmatpush1.bf16.msra.mxu0 %v22460_v4  ;;  %v22514_v4 = vld [vmem:[%s30037_s9 + $0x200] ss:$8 sps:$4 sm:$0xff]  }
 0x90d   : > { %8909 = vmatprep.subr.bf16.mxu0 %v22465_v45  ;;  %v9121_v45 = vmul.bf16 %v26617_v7, %v9120_v59  ;;  %v22520_v7 = vld [vmem:[%s30037_s9 + $0x220] ss:$8 sps:$4 sm:$0xff]  }
 0x90e   : > { %v22652_v59 = vld [vmem:[%s30039_s11 + $0x60] ss:$8 sps:$4 sm:$0xff]  }
 0x910   : > { %8910 = vmatpush1.bf16.msra.mxu0 %v22463_v14  ;;  %v22519_v14 = vld [vmem:[%s30037_s9 + $0x214] ss:$8 sps:$4 sm:$0xff]  }
 0x911   : > { %9071 = vmatprep.subr.bf16.mxu0 %v22468_v44  ;;  %v22517_v44 = vld [vmem:[%s30037_s9 + $0x210] ss:$8 sps:$4 sm:$0xff]  }
 0x913   : > { %8928 = vmatmul.mubr.bf16.vlgmr.msra.gmra.mrb[100].mxu0 %v8797_v30  ;;  %v22523_v30 = vld [vmem:[%s30037_s9 + $0x230] ss:$8 sps:$4 sm:$0xff]  }
 0x914   : > { %9072 = vmatpush1.bf16.msra.mxu0 %v22466_v0  ;;  %9103 = vmatprep.mubr.bf16.mxu0 %v30165_v41  ;;  %v22525_v0 = vld [vmem:[%s30037_s9 + $0x234] ss:$8 sps:$4 sm:$0xff]  }
 0x915   : > { %9073 = vmatprep.subr.bf16.mxu0 %v22471_v61  ;;  %v22528_v61 = vld [vmem:[%s30037_s9 + $0x244] ss:$8 sps:$4 sm:$0xff]  }
 0x918   : > { %9074 = vmatpush1.bf16.msra.mxu0 %v22469_v35  ;;  %v22526_v35 = vld [vmem:[%s30037_s9 + $0x240] ss:$8 sps:$4 sm:$0xff]  }
 0x919   : > { %9075 = vmatprep.subr.bf16.mxu0 %v22474_v26  ;;  %v22531_v26 = vld [vmem:[%s30037_s9 + $0x254] ss:$8 sps:$4 sm:$0xff]  }
 0x91c   : > { %9076 = vmatpush1.bf16.msra.mxu0 %v22472_v56  ;;  %v22529_v56 = vld [vmem:[%s30037_s9 + $0x250] ss:$8 sps:$4 sm:$0xff]  }
 0x91d   : > { %9077 = vmatprep.subr.bf16.mxu0 %v22477_v51  ;;  %v22534_v51 = vld [vmem:[%s30037_s9 + $0x264] ss:$8 sps:$4 sm:$0xff]  }
 0x920   : > { %9078 = vmatpush1.bf16.msra.mxu0 %v22475_v22  ;;  %v22532_v22 = vld [vmem:[%s30037_s9 + $0x260] ss:$8 sps:$4 sm:$0xff]  }
 0x921   : > { %9079 = vmatprep.subr.bf16.mxu0 %v22480_v11  ;;  %v22537_v11 = vld [vmem:[%s30037_s9 + $0x274] ss:$8 sps:$4 sm:$0xff]  }
 0x924   : > { %9080 = vmatpush1.bf16.msra.mxu0 %v22478_v32  ;;  %v22535_v32 = vld [vmem:[%s30037_s9 + $0x270] ss:$8 sps:$4 sm:$0xff]  }
 0x925   : > { %9081 = vmatprep.subr.bf16.mxu0 %v22483_v37  ;;  %v22540_v37 = vld [vmem:[%s30037_s9 + $0x284] ss:$8 sps:$4 sm:$0xff]  }
 0x928   : > { %9082 = vmatpush1.bf16.msra.mxu0 %v22481_v28  ;;  %v22538_v28 = vld [vmem:[%s30037_s9 + $0x280] ss:$8 sps:$4 sm:$0xff]  }
 0x929   : > { %9083 = vmatprep.subr.bf16.mxu0 %v22486_v3  ;;  %v22543_v3 = vld [vmem:[%s30037_s9 + $0x294] ss:$8 sps:$4 sm:$0xff]  }
 0x92c   : > { %9084 = vmatpush1.bf16.msra.mxu0 %v22484_v55  ;;  %v22634_v55 = vld [vmem:[%s30039_s11] ss:$8 sps:$4 sm:$0xff]  }
 0x92d   : > { %9085 = vmatprep.subr.bf16.mxu0 %v22489_v40  ;;  %v22636_v40 = vld [vmem:[%s30039_s11 + $0x4] ss:$8 sps:$4 sm:$0xff]  }
 0x92e   : > { %10307 = vmatprep.subr.bf16.mxu1 %v22636_v40  ;;  %v22580_v40 = vld [vmem:[%s30037_s9 + $0x360] ss:$8 sps:$4 sm:$0xff]  }
 0x92f   : > { %10308 = vmatpush1.bf16.msra.mxu1 %v22634_v55  ;;  %v22582_v55 = vld [vmem:[%s30037_s9 + $0x364] ss:$8 sps:$4 sm:$0xff]  }
 0x930   : > { %9086 = vmatpush1.bf16.msra.mxu0 %v22487_v53  ;;  %10309 = vmatprep.subr.bf16.mxu1 %v22639_v13  ;;  %v22642_v53 = vld [vmem:[%s30039_s11 + $0x24] ss:$8 sps:$4 sm:$0xff]   ;;  %v22583_v13 = vld [vmem:[%s30037_s9 + $0x370] ss:$8 sps:$4 sm:$0xff]  }
 0x931   : > { %9219 = vmatprep.subr.bf16.mxu0 %v22492_v57  ;;  %v22549_v57 = vld [vmem:[%s30037_s9 + $0x2b4] ss:$8 sps:$4 sm:$0xff]  }
 0x933   : > { %9104 = vmatmul.mubr.bf16.vlgmr.msra.gmra.mrb[100].mxu0 %v8973_v62  ;;  %v22645_v62 = vld [vmem:[%s30039_s11 + $0x34] ss:$8 sps:$4 sm:$0xff]  }
 0x934   : > { %9220 = vmatpush1.bf16.msra.mxu0 %v22490_v18  ;;  %9251 = vmatprep.mubr.bf16.mxu0 %v30165_v41  ;;  %v22640_v18 = vld [vmem:[%s30039_s11 + $0x20] ss:$8 sps:$4 sm:$0xff]  }
 0x935   : > { %9221 = vmatprep.subr.bf16.mxu0 %v22495_v63  ;;  %v22547_v63 = vld [vmem:[%s30037_s9 + $0x2b0] ss:$8 sps:$4 sm:$0xff]  }
 0x938   : > { %9222 = vmatpush1.bf16.msra.mxu0 %v22493_v2  ;;  %v22552_v2 = vld [vmem:[%s30037_s9 + $0x2c4] ss:$8 sps:$4 sm:$0xff]  }
 0x939   : > { %9223 = vmatprep.subr.bf16.mxu0 %v22498_v36  ;;  %v22643_v36 = vld [vmem:[%s30039_s11 + $0x30] ss:$8 sps:$4 sm:$0xff]  }
 0x93c   : > { %9224 = vmatpush1.bf16.msra.mxu0 %v22496_v15  ;;  %v22648_v15 = vld [vmem:[%s30039_s11 + $0x44] ss:$8 sps:$4 sm:$0xff]  }
 0x93d   : > { %9225 = vmatprep.subr.bf16.mxu0 %v22501_v8  ;;  %v22550_v8 = vld [vmem:[%s30037_s9 + $0x2c0] ss:$8 sps:$4 sm:$0xff]  }
 0x940   : > { %9226 = vmatpush1.bf16.msra.mxu0 %v22499_v47  ;;  %v22555_v47 = vld [vmem:[%s30037_s9 + $0x2d4] ss:$8 sps:$4 sm:$0xff]  }
 0x941   : > { %9227 = vmatprep.subr.bf16.mxu0 %v22504_v24  ;;  %v22646_v24 = vld [vmem:[%s30039_s11 + $0x40] ss:$8 sps:$4 sm:$0xff]  }
 0x944   : > { %9228 = vmatpush1.bf16.msra.mxu0 %v22502_v21  ;;  %v22651_v21 = vld [vmem:[%s30039_s11 + $0x54] ss:$8 sps:$4 sm:$0xff]  }
 0x945   : > { %9229 = vmatprep.subr.bf16.mxu0 %v22507_v46  ;;  %v22553_v46 = vld [vmem:[%s30037_s9 + $0x2d0] ss:$8 sps:$4 sm:$0xff]  }
 0x948   : > { %9230 = vmatpush1.bf16.msra.mxu0 %v22505_v25  ;;  %v22558_v25 = vld [vmem:[%s30037_s9 + $0x2e4] ss:$8 sps:$4 sm:$0xff]  }
 0x949   : > { %9231 = vmatprep.subr.bf16.mxu0 %v22510_v31  ;;  %v22649_v31 = vld [vmem:[%s30039_s11 + $0x50] ss:$8 sps:$4 sm:$0xff]  }
 0x94c   : > { %9232 = vmatpush1.bf16.msra.mxu0 %v22508_v6  ;;  %v22654_v6 = vld [vmem:[%s30039_s11 + $0x64] ss:$8 sps:$4 sm:$0xff]  }
 0x94d   : > { %9233 = vmatprep.subr.bf16.mxu0 %v22513_v19  ;;  %v22556_v19 = vld [vmem:[%s30037_s9 + $0x2e0] ss:$8 sps:$4 sm:$0xff]  }
 0x950   : > { %9234 = vmatpush1.bf16.msra.mxu0 %v22511_v17  ;;  %v9414_v17 = vld [vmem:[#allocation5 + $0x11] sm:$0xff] }
 0x951   : > { %9366 = vmatprep.subr.bf16.mxu0 %v22516_v50  ;;  %v22657_v50 = vld [vmem:[%s30039_s11 + $0x74] ss:$8 sps:$4 sm:$0xff]  }
 0x953   : > { %9252 = vmatmul.mubr.bf16.vlgmr.msra.gmra.mrb[100].mxu0 %v9121_v45  ;;  %v9415_v45 = vpack.c.bf16 %v9414_v17, %v9413_v27  ;;  %v22618_v27 = vld [vmem:[%s30037_s9 + $0x424] ss:$8 sps:$4 sm:$0xff]   ;;  %v22621_v17 = vld [vmem:[%s30037_s9 + $0x434] ss:$8 sps:$4 sm:$0xff]  }
 0x954   : > { %9367 = vmatpush1.bf16.msra.mxu0 %v22514_v4  ;;  %9398 = vmatprep.mubr.bf16.mxu0 %v30165_v41  ;;  %v22559_v4 = vld [vmem:[%s30037_s9 + $0x2f0] ss:$8 sps:$4 sm:$0xff]  }
 0x955   : > { %9368 = vmatprep.subr.bf16.mxu0 %v22519_v14  ;;  %v22564_v14 = vld [vmem:[%s30037_s9 + $0x304] ss:$8 sps:$4 sm:$0xff]  }
 0x958   : > { %9369 = vmatpush1.bf16.msra.mxu0 %v22517_v44  ;;  %v22655_v44 = vld [vmem:[%s30039_s11 + $0x70] ss:$8 sps:$4 sm:$0xff]  }
 0x959   : > { %9370 = vmatprep.subr.bf16.mxu0 %v22522_v1  ;;  %v22660_v1 = vld [vmem:[%s30039_s11 + $0x84] ss:$8 sps:$4 sm:$0xff]  }
 0x95c   : > { %9371 = vmatpush1.bf16.msra.mxu0 %v22520_v7  ;;  %v22562_v7 = vld [vmem:[%s30037_s9 + $0x300] ss:$8 sps:$4 sm:$0xff]  }
 0x95d   : > { %9372 = vmatprep.subr.bf16.mxu0 %v22525_v0  ;;  %v9416_v0 = vmul.bf16 %v26621_v16, %v9415_v45  ;;  %v22565_v16 = vld [vmem:[%s30037_s9 + $0x310] ss:$8 sps:$4 sm:$0xff]   ;;  %v22627_v45 = vld [vmem:[%s30037_s9 + $0x454] ss:$8 sps:$4 sm:$0xff]  }
 0x960   : > { %9373 = vmatpush1.bf16.msra.mxu0 %v22523_v30  ;;  %v22567_v30 = vld [vmem:[%s30037_s9 + $0x314] ss:$8 sps:$4 sm:$0xff]  }
 0x961   : > { %9374 = vmatprep.subr.bf16.mxu0 %v22528_v61  ;;  %v22658_v61 = vld [vmem:[%s30039_s11 + $0x80] ss:$8 sps:$4 sm:$0xff]  }
 0x964   : > { %9375 = vmatpush1.bf16.msra.mxu0 %v22526_v35  ;;  %v22663_v35 = vld [vmem:[%s30039_s11 + $0x94] ss:$8 sps:$4 sm:$0xff]  }
 0x965   : > { %9376 = vmatprep.subr.bf16.mxu0 %v22531_v26  ;;  %v22570_v26 = vld [vmem:[%s30037_s9 + $0x324] ss:$8 sps:$4 sm:$0xff]  }
 0x968   : > { %9377 = vmatpush1.bf16.msra.mxu0 %v22529_v56  ;;  %v22661_v56 = vld [vmem:[%s30039_s11 + $0x90] ss:$8 sps:$4 sm:$0xff]  }
 0x969   : > { %9378 = vmatprep.subr.bf16.mxu0 %v22534_v51  ;;  %v22568_v51 = vld [vmem:[%s30037_s9 + $0x320] ss:$8 sps:$4 sm:$0xff]  }
 0x96c   : > { %9379 = vmatpush1.bf16.msra.mxu0 %v22532_v22  ;;  %v22573_v22 = vld [vmem:[%s30037_s9 + $0x334] ss:$8 sps:$4 sm:$0xff]  }
 0x96d   : > { %9380 = vmatprep.subr.bf16.mxu0 %v22537_v11  ;;  %v22571_v11 = vld [vmem:[%s30037_s9 + $0x330] ss:$8 sps:$4 sm:$0xff]  }
 0x970   : > { %9381 = vmatpush1.bf16.msra.mxu0 %v22535_v32  ;;  %v22576_v32 = vld [vmem:[%s30037_s9 + $0x344] ss:$8 sps:$4 sm:$0xff]  }
 0x971   : > { %9514 = vmatprep.subr.bf16.mxu0 %v22540_v37  ;;  %v22574_v37 = vld [vmem:[%s30037_s9 + $0x340] ss:$8 sps:$4 sm:$0xff]  }
 0x973   : > { %9399 = vmatmul.mubr.bf16.vlgmr.msra.gmra.mrb[100].mxu0 %v9268_v54  ;;  %v22637_v54 = vld [vmem:[%s30039_s11 + $0x10] ss:$8 sps:$4 sm:$0xff]  }
 0x974   : > { %9515 = vmatpush1.bf16.msra.mxu0 %v22538_v28  ;;  %9546 = vmatprep.mubr.bf16.mxu0 %v30165_v41  ;;  %v22579_v28 = vld [vmem:[%s30037_s9 + $0x354] ss:$8 sps:$4 sm:$0xff]  }
 0x975   : > { %9516 = vmatprep.subr.bf16.mxu0 %v22543_v3  ;;  %10310 = vmatpush1.bf16.msra.mxu1 %v22637_v54  ;;  %v22577_v3 = vld [vmem:[%s30037_s9 + $0x350] ss:$8 sps:$4 sm:$0xff]   ;;  %v22586_v54 = vld [vmem:[%s30037_s9 + $0x380] ss:$8 sps:$4 sm:$0xff]  }
 0x976   : > { %10311 = vmatprep.subr.bf16.mxu1 %v22642_v53  ;;  %v22591_v53 = vld [vmem:[%s30037_s9 + $0x394] ss:$8 sps:$4 sm:$0xff]  }
 0x978   : > { %9517 = vmatpush1.bf16.msra.mxu0 %v22541_v39  ;;  %v22585_v39 = vld [vmem:[%s30037_s9 + $0x374] ss:$8 sps:$4 sm:$0xff]  }
 0x979   : > { %9518 = vmatprep.subr.bf16.mxu0 %v22546_v12  ;;  %10312 = vmatpush1.bf16.msra.mxu1 %v22640_v18  ;;  %v22588_v12 = vld [vmem:[%s30037_s9 + $0x384] ss:$8 sps:$4 sm:$0xff]   ;;  %v22592_v18 = vld [vmem:[%s30037_s9 + $0x3a0] ss:$8 sps:$4 sm:$0xff]  }
 0x97a   : > { %10313 = vmatprep.subr.bf16.mxu1 %v22645_v62  ;;  %v22595_v62 = vld [vmem:[%s30037_s9 + $0x3b0] ss:$8 sps:$4 sm:$0xff]  }
 0x97c   : > { %9519 = vmatpush1.bf16.msra.mxu0 %v22544_v58  ;;  %v22589_v58 = vld [vmem:[%s30037_s9 + $0x390] ss:$8 sps:$4 sm:$0xff]  }
 0x97d   : > { %9520 = vmatprep.subr.bf16.mxu0 %v22549_v57  ;;  %10314 = vmatpush1.bf16.msra.mxu1 %v22643_v36  ;;  %v22594_v57 = vld [vmem:[%s30037_s9 + $0x3a4] ss:$8 sps:$4 sm:$0xff]   ;;  %v22603_v36 = vld [vmem:[%s30037_s9 + $0x3d4] ss:$8 sps:$4 sm:$0xff]  }
 0x97e   : > { %10315 = vmatprep.subr.bf16.mxu1 %v22648_v15  ;;  %v22601_v15 = vld [vmem:[%s30037_s9 + $0x3d0] ss:$8 sps:$4 sm:$0xff]  }
 0x980   : > { %9521 = vmatpush1.bf16.msra.mxu0 %v22547_v63  ;;  %v22600_v63 = vld [vmem:[%s30037_s9 + $0x3c4] ss:$8 sps:$4 sm:$0xff]  }
 0x981   : > { %9522 = vmatprep.subr.bf16.mxu0 %v22552_v2  ;;  %10316 = vmatpush1.bf16.msra.mxu1 %v22646_v24  ;;  %v22598_v2 = vld [vmem:[%s30037_s9 + $0x3c0] ss:$8 sps:$4 sm:$0xff]   ;;  %v22609_v24 = vld [vmem:[%s30037_s9 + $0x3f4] ss:$8 sps:$4 sm:$0xff]  }
 0x982   : > { %10317 = vmatprep.subr.bf16.mxu1 %v22651_v21  ;;  %v22607_v21 = vld [vmem:[%s30037_s9 + $0x3f0] ss:$8 sps:$4 sm:$0xff]  }
 0x984   : > { %9523 = vmatpush1.bf16.msra.mxu0 %v22550_v8  ;;  %v22606_v8 = vld [vmem:[%s30037_s9 + $0x3e4] ss:$8 sps:$4 sm:$0xff]  }
 0x985   : > { %9524 = vmatprep.subr.bf16.mxu0 %v22555_v47  ;;  %10318 = vmatpush1.bf16.msra.mxu1 %v22649_v31  ;;  %v22604_v47 = vld [vmem:[%s30037_s9 + $0x3e0] ss:$8 sps:$4 sm:$0xff]  }
 0x986   : > { %10319 = vmatprep.subr.bf16.mxu1 %v22654_v6  ;;  %v22610_v31 = vld [vmem:[%s30037_s9 + $0x400] ss:$8 sps:$4 sm:$0xff]  }
 0x988   : > { %9525 = vmatpush1.bf16.msra.mxu0 %v22553_v46  ;;  %v22612_v46 = vld [vmem:[%s30037_s9 + $0x404] ss:$8 sps:$4 sm:$0xff]  }
 0x989   : > { %9526 = vmatprep.subr.bf16.mxu0 %v22558_v25  ;;  %10320 = vmatpush1.bf16.msra.mxu1 %v22652_v59  ;;  %v9710_v25 = vld [vmem:[#allocation5 + $0x14] sm:$0xff]  ;;  %v22619_v59 = vld [vmem:[%s30037_s9 + $0x430] ss:$8 sps:$4 sm:$0xff]  }
 0x98a   : > { %10321 = vmatprep.subr.bf16.mxu1 %v22657_v50  ;;  %v9711_v6 = vpack.c.bf16 %v9710_v25, %v26680_v43  ;;  %v22616_v43 = vld [vmem:[%s30037_s9 + $0x420] ss:$8 sps:$4 sm:$0xff]   ;;  %v22624_v50 = vld [vmem:[%s30037_s9 + $0x444] ss:$8 sps:$4 sm:$0xff]  }
 0x98c   : > { %9527 = vmatpush1.bf16.msra.mxu0 %v22556_v19  ;;  %v22615_v19 = vld [vmem:[%s30037_s9 + $0x414] ss:$8 sps:$4 sm:$0xff]  }
 0x98d   : > { %9528 = vmatprep.subr.bf16.mxu0 %v22561_v42  ;;  %10322 = vmatpush1.bf16.msra.mxu1 %v22655_v44  ;;  %v22613_v42 = vld [vmem:[%s30037_s9 + $0x410] ss:$8 sps:$4 sm:$0xff]   ;;  %v22630_v44 = vld [vmem:[%s30037_s9 + $0x464] ss:$8 sps:$4 sm:$0xff]  }
 0x98e   : > { %10323 = vmatprep.subr.bf16.mxu1 %v22660_v1  ;;  %v22628_v1 = vld [vmem:[%s30037_s9 + $0x460] ss:$8 sps:$4 sm:$0xff]  }
 0x990   : > { %9529 = vmatpush1.bf16.msra.mxu0 %v22559_v4  ;;  %v22622_v4 = vld [vmem:[%s30037_s9 + $0x440] ss:$8 sps:$4 sm:$0xff]  }
 0x991   : > { %9662 = vmatprep.subr.bf16.mxu0 %v22564_v14  ;;  %10324 = vmatpush1.bf16.msra.mxu1 %v22658_v61  ;;  %v22625_v14 = vld [vmem:[%s30037_s9 + $0x450] ss:$8 sps:$4 sm:$0xff]   ;;  %v22666_v61 = vld [vmem:[%s30039_s11 + $0xa4] ss:$8 sps:$4 sm:$0xff]  }
 0x992   : > { %10325 = vmatprep.subr.bf16.mxu1 %v22663_v35  ;;  %v22669_v35 = vld [vmem:[%s30039_s11 + $0xb4] ss:$8 sps:$4 sm:$0xff]  }
 0x993   : > { %9547 = vmatmul.mubr.bf16.vlgmr.msra.gmra.mrb[100].mxu0 %v9416_v0  ;;  %v22631_v0 = vld [vmem:[%s30037_s9 + $0x470] ss:$8 sps:$4 sm:$0xff]  }
 0x994   : > { %9663 = vmatpush1.bf16.msra.mxu0 %v22562_v7  ;;  %9694 = vmatprep.mubr.bf16.mxu0 %v30165_v41  ;;  %v22633_v7 = vld [vmem:[%s30037_s9 + $0x474] ss:$8 sps:$4 sm:$0xff]  }
 0x995   : > { %9664 = vmatprep.subr.bf16.mxu0 %v22567_v30  ;;  %10326 = vmatpush1.bf16.msra.mxu1 %v22661_v56  ;;  %v22664_v30 = vld [vmem:[%s30039_s11 + $0xa0] ss:$8 sps:$4 sm:$0xff]   ;;  %v22675_v56 = vld [vmem:[%s30039_s11 + $0xd4] ss:$8 sps:$4 sm:$0xff]  }
 0x996   : > { %10327 = vmatprep.subr.bf16.mxu1 %v22666_v61 }
 0x998   : > { %9665 = vmatpush1.bf16.msra.mxu0 %v22565_v16  ;;  %v22667_v16 = vld [vmem:[%s30039_s11 + $0xb0] ss:$8 sps:$4 sm:$0xff]  }
 0x999   : > { %9666 = vmatprep.subr.bf16.mxu0 %v22570_v26  ;;  %10328 = vmatpush1.bf16.msra.mxu1 %v22664_v30  ;;  %v22670_v26 = vld [vmem:[%s30039_s11 + $0xc0] ss:$8 sps:$4 sm:$0xff]  }
 0x99a   : > { %10329 = vmatprep.subr.bf16.mxu1 %v22669_v35 }
 0x99c   : > { %9667 = vmatpush1.bf16.msra.mxu0 %v22568_v51  ;;  %v22673_v51 = vld [vmem:[%s30039_s11 + $0xd0] ss:$8 sps:$4 sm:$0xff]  }
 0x99d   : > { %9668 = vmatprep.subr.bf16.mxu0 %v22573_v22  ;;  %10330 = vmatpush1.bf16.msra.mxu1 %v22667_v16  ;;  %v22678_v22 = vld [vmem:[%s30039_s11 + $0xe4] ss:$8 sps:$4 sm:$0xff]  }
 0x9a0   : > { %9669 = vmatpush1.bf16.msra.mxu0 %v22571_v11  ;;  %v22676_v11 = vld [vmem:[%s30039_s11 + $0xe0] ss:$8 sps:$4 sm:$0xff]  }
 0x9a1   : > { %9670 = vmatprep.subr.bf16.mxu0 %v22576_v32  ;;  %v22681_v32 = vld [vmem:[%s30039_s11 + $0xf4] ss:$8 sps:$4 sm:$0xff]  }
 0x9a4   : > { %9671 = vmatpush1.bf16.msra.mxu0 %v22574_v37  ;;  %v22679_v37 = vld [vmem:[%s30039_s11 + $0xf0] ss:$8 sps:$4 sm:$0xff]  }
 0x9a5   : > { %9672 = vmatprep.subr.bf16.mxu0 %v22579_v28  ;;  %v22684_v28 = vld [vmem:[%s30039_s11 + $0x104] ss:$8 sps:$4 sm:$0xff]  }
 0x9a8   : > { %9673 = vmatpush1.bf16.msra.mxu0 %v22577_v3  ;;  %v30167_v3 = vld [vmem:[#allocation8_spill] sm:$0xff] }
 0x9a9   : > { %9674 = vmatprep.subr.bf16.mxu0 %v22582_v55  ;;  %v27133_v55 = vsub.s32 0, %v30167_v3 }
 0x9ac   : > { %9675 = vmatpush1.bf16.msra.mxu0 %v22580_v40  ;;  %v8606_v40 = vld [vmem:[%s30038_s10] sm:$0x3] }
 0x9ad   : > { %9676 = vmatprep.subr.bf16.mxu0 %v22585_v39  ;;  %v27139_v39 = vsub.s32 1, %v30167_v3  ;;  %v11481_v3 = vld [vmem:[#allocation6 + $0x30] sm:$0x1] }
 0x9b0   : > { %9677 = vmatpush1.bf16.msra.mxu0 %v22583_v13  ;;  %v8611_v13 = vrot.slane %v8606_v40, %v27133_v55 }
 0x9b1   : > { %9809 = vmatprep.subr.bf16.mxu0 %v22588_v12  ;;  %v8615_v12 = vrot.slane %v8606_v40, %v27139_v39 }
 0x9b3   : > { %9695 = vmatmul.mubr.bf16.vlgmr.msra.gmra.mrb[100].mxu0 %v26628_v9  ;;  %v22597_v9 = vld [vmem:[%s30037_s9 + $0x3b4] ss:$8 sps:$4 sm:$0xff]  }
 0x9b4   : > { %9810 = vmatpush1.bf16.msra.mxu0 %v22586_v54  ;;  %9841 = vmatprep.mubr.bf16.mxu0 %v30165_v41 }
 0x9b5   : > { %9811 = vmatprep.subr.bf16.mxu0 %v22591_v53 }
 0x9b8   : > { %9812 = vmatpush1.bf16.msra.mxu0 %v22589_v58 }
 0x9b9   : > { %9813 = vmatprep.subr.bf16.mxu0 %v22594_v57  ;;  %v10068_v57 = vrot.slane %v10066_v34, 6 }
 0x9bc   : > { %9814 = vmatpush1.bf16.msra.mxu0 %v22592_v18  ;;  %v10071_v18 = vrot.slane %v10069_v23, 7  ;;  %v10940_v23 = vld [vmem:[#allocation6] sm:$0x80] }
 0x9bd   : > { %9815 = vmatprep.subr.bf16.mxu0 %v22597_v9 }
 0x9be   : > { %v27152_v25 = vor.u32 %v10071_v18, %v10068_v57 }
 0x9c0   : > { %9816 = vmatpush1.bf16.msra.mxu0 %v22595_v62 }
 0x9c1   : > { %9817 = vmatprep.subr.bf16.mxu0 %v22600_v63 }
 0x9c4   : > { %9818 = vmatpush1.bf16.msra.mxu0 %v22598_v2 }
 0x9c5   : > { %9819 = vmatprep.subr.bf16.mxu0 %v22603_v36 }
 0x9c8   : > { %9820 = vmatpush1.bf16.msra.mxu0 %v22601_v15  ;;  %v10027_v15 = vld [vmem:[#allocation6 + $0x8] sm:$0xf8] }
 0x9c9   : > { %9821 = vmatprep.subr.bf16.mxu0 %v22606_v8 }
 0x9cc   : > { %9822 = vmatpush1.bf16.msra.mxu0 %v22604_v47 }
 0x9cd   : > { %9823 = vmatprep.subr.bf16.mxu0 %v22609_v24  ;;  %v10941_v24 = vld [vmem:[#allocation6 + $0x8] sm:$0x80] }
 0x9d0   : > { %9824 = vmatpush1.bf16.msra.mxu0 %v22607_v21 }
 0x9d1   : > { %9957 = vmatprep.subr.bf16.mxu0 %v22612_v46  ;;  %v10026_v46 = vld [vmem:[#allocation6] sm:$0xf8] }
 0x9d3   : > { %9842 = vmatmul.mubr.bf16.vlgmr.msra.gmra.mrb[100].mxu0 %v9711_v6 }
 0x9d4   : > { %9958 = vmatpush1.bf16.msra.mxu0 %v22610_v31  ;;  %9989 = vmatprep.mubr.bf16.mxu0 %v30165_v41 }
 0x9d5   : > { %9959 = vmatprep.subr.bf16.mxu0 %v22615_v19 }
 0x9d8   : > { %9960 = vmatpush1.bf16.msra.mxu0 %v22613_v42 }
 0x9d9   : > { %9961 = vmatprep.subr.bf16.mxu0 %v22618_v27 }
 0x9dc   : > { %9962 = vmatpush1.bf16.msra.mxu0 %v22616_v43 }
 0x9dd   : > { %9963 = vmatprep.subr.bf16.mxu0 %v22621_v17 }
 0x9e0   : > { %9964 = vmatpush1.bf16.msra.mxu0 %v22619_v59 }
 0x9e1   : > { %9965 = vmatprep.subr.bf16.mxu0 %v22624_v50 }
 0x9e4   : > { %9966 = vmatpush1.bf16.msra.mxu0 %v22622_v4 }
 0x9e5   : > { %9967 = vmatprep.subr.bf16.mxu0 %v22627_v45  ;;  %v11482_v45 = vld [vmem:[#allocation6 + $0x38] sm:$0x1] }
 0x9e8   : > { %9968 = vmatpush1.bf16.msra.mxu0 %v22625_v14 }
 0x9e9   : > { %9969 = vmatprep.subr.bf16.mxu0 %v22630_v44 }
 0x9ec   : > { %9970 = vmatpush1.bf16.msra.mxu0 %v22628_v1 }
 0x9ed   : > { %9971 = vmatprep.subr.bf16.mxu0 %v22633_v7  ;;  %v10355_v7 = vld [vmem:[#allocation6 + $0x8] sm:$0xf0] }
 0x9f0   : > { %9972 = vmatpush1.bf16.msra.mxu0 %v22631_v0 }
 0x9f3   : > { %9990 = vmatmul.mubr.bf16.vlgmr.msra.gmra.mrb[100].mxu0 %v26635_v33  ;;  %v22672_v33 = vld [vmem:[%s30039_s11 + $0xc4] ss:$8 sps:$4 sm:$0xff]  }
 0x9f4   : > { %10331 = vmatprep.subr.bf16.mxu1 %v22672_v33 }
 0x9f5   : > { %10332 = vmatpush1.bf16.msra.mxu1 %v22670_v26 }
 0x9f6   : > { %10333 = vmatprep.subr.bf16.mxu1 %v22675_v56 }
 0x9f9   : > { %10334 = vmatpush1.bf16.msra.mxu1 %v22673_v51 }
 0x9fa   : > { %10335 = vmatprep.subr.bf16.mxu1 %v22678_v22  ;;  %v11486_v22 = vpack.c.bf16 %v11482_v45, %v11482_v45 }
 0x9fd   : > { %10336 = vmatpush1.bf16.msra.mxu1 %v22676_v11 }
 0x9fe   : > { %10337 = vmatprep.subr.bf16.mxu1 %v22681_v32 }
 0xa01   : > { %10338 = vmatpush1.bf16.msra.mxu1 %v22679_v37 }
 0xa02   : > { %10568 = vmatprep.subr.bf16.mxu1 %v22684_v28 }
 0xac6   : > { %v9991_v54 = vpop.f32.mrb[100].mxu0 }
 0xac7   : > { %v21711_v53 = vadd.f32 %v9991_v54, %v8611_v13  ;;  %v9993_v58 = vpop.f32.mrb[101].mxu0 }
 0xac8   : > { %v21712_v9 = vadd.f32 %v9993_v58, %v8615_v12  ;;  %v9995_v62 = vpop.f32.mrb[102].mxu0 }
 0xac9   : > { %v27147_v63 = vmax.f32 %v21711_v53, 0.0  ;;  %v21713_v2 = vadd.f32 %v9995_v62, %v8611_v13  ;;  %v9997_v36 = vpop.f32.mrb[103].mxu0 }
 0xaca   : > { %v27149_v8 = vmax.f32 %v21712_v9, 0.0  ;;  %v21714_v47 = vadd.f32 %v9997_v36, %v8615_v12  ;;  %v11485_v36 = vpack.c.bf16 %v11481_v3, %v11481_v3 }
 0xacb   : > { %10008 = vst [vmem:[#allocation6 + $0x10] sm:$0xff] %v27147_v63  ;;  %v10006_v21 = vmax.f32 %v21713_v2, 0.0  ;;  %v10032_v6 = vpack.c.bf16 %v27147_v63, %v10026_v46  ;;  %v10944_v42 = vpack.c.bf16 %v27147_v63, %v10940_v23 }
 0xacc   : > { %10009 = vst [vmem:[#allocation6 + $0x18] sm:$0xff] %v27149_v8  ;;  %v10007_v29 = vmax.f32 %v21714_v47, 0.0  ;;  %v10033_v34 = vpack.c.bf16 %v27149_v8, %v10027_v15  ;;  %v10945_v31 = vpack.c.bf16 %v27149_v8, %v10941_v24  ;;  %v10359_v51 = vpack.c.bf16 %v27149_v8, %v10355_v7 }
 0xacd   : > { %10010 = vst [vmem:[#allocation6 + $0x20] sm:$0xff] %v10006_v21  ;;  %v10074_v17 = vmul.bf16 %v27152_v25, %v10032_v6  ;;  %v27166_v59 = vmul.bf16 %v26592_v49, %v10944_v42 }
 0xace   : > { %10011 = vst [vmem:[#allocation6 + $0x28] sm:$0xff] %v10007_v29  ;;  %v10953_v19 = vmul.bf16 %v26592_v49, %v10945_v31  ;;  %v27161_v27 = vpack.c.bf16 %v10007_v29, %v27149_v8  ;;  %v10075_v43 = vmul.bf16 %v27152_v25, %v10033_v34  ;;  %v22682_v31 = vld [vmem:[%s30039_s11 + $0x100] ss:$8 sps:$4 sm:$0xff]   ;;  %v10403_v42 = vrot.slane %v10359_v51, 2 }
 0xacf   : > { %v10112_v30 = vshrl.u32 %v10074_v17, 16  ;;  %v10115_v16 = vshll.u32 %v10074_v17, 16  ;;  %v10991_v23 = vshrl.u32 %v27166_v59, 16 }
 0xad0   : > { %v10129_v50 = vshrl.u32 %v10075_v43, 16  ;;  %v10132_v44 = vshll.u32 %v10075_v43, 16  ;;  %v11008_v18 = vshrl.u32 %v10953_v19, 16  ;;  %v11011_v21 = vshll.u32 %v10953_v19, 16 }
 0xad1   : > { %v10114_v12 = vrot.slane %v10112_v30, 1  ;;  %v10117_v53 = vrot.slane %v10115_v16, 2  ;;  %v11494_v30 = vmul.bf16 %v26598_v20, %v11486_v22 }
 0xad2   : > { %v10131_v56 = vrot.slane %v10129_v50, 1  ;;  %v10134_v11 = vrot.slane %v10132_v44, 2  ;;  %v11010_v43 = vrot.slane %v11008_v18, 3  ;;  %v11013_v19 = vrot.slane %v11011_v21, 4 }
 0xad3   : > { %v10118_v6 = vor.u32 %v10117_v53, %v10114_v12 }
 0xad4   : > { %v10030_v4 = vld [vmem:[#allocation6 + $0x20] sm:$0x7]  ;;  %v10135_v15 = vor.u32 %v10134_v11, %v10131_v56 }
 0xad5   : > { %v10031_v14 = vld [vmem:[#allocation6 + $0x28] sm:$0x7]  ;;  %v10034_v1 = vpack.c.bf16 %v10030_v4, %v10030_v4  ;;  %v10942_v9 = vld [vmem:[#allocation6 + $0x20] sm:$0x7f] }
 0xad6   : > { %v10035_v0 = vpack.c.bf16 %v10031_v14, %v10031_v14  ;;  %v10943_v61 = vld [vmem:[#allocation6 + $0x28] sm:$0x7f]  ;;  %v10946_v34 = vpack.c.bf16 %v10942_v9, %v10942_v9  ;;  %v27181_v44 = vld [vmem:[#allocation6 + $0x20] sm:$0xff] }
 0xad7   : > { %v10076_v35 = vmul.bf16 %v27152_v25, %v10034_v1  ;;  %v10357_v33 = vld [vmem:[#allocation6 + $0x28] sm:$0xf]  ;;  %v10947_v28 = vpack.c.bf16 %v10943_v61, %v10943_v61  ;;  %v22687_v4 = vld [vmem:[%s30039_s11 + $0x114] ss:$8 sps:$4 sm:$0xff]   ;;  %v11477_v61 = vld [vmem:[#allocation6 + $0x10] sm:$0xfe] }
 0xad8   : > { %v10077_v26 = vmul.bf16 %v27152_v25, %v10035_v0  ;;  %v10361_v54 = vpack.c.bf16 %v10357_v33, %v10357_v33  ;;  %v10954_v14 = vmul.bf16 %v26592_v49, %v10946_v34  ;;  %v27183_v1 = vld [vmem:[#allocation6 + $0x28] sm:$0xff]  ;;  %v10993_v33 = vrot.slane %v10991_v23, 3 }
 0xad9   : > { %v10120_v32 = vshrl.u32 %v10076_v35, 16  ;;  %v10123_v37 = vshll.u32 %v10076_v35, 16  ;;  %v10955_v24 = vmul.bf16 %v26592_v49, %v10947_v28  ;;  %v11478_v49 = vld [vmem:[#allocation6 + $0x18] sm:$0xfe]  ;;  %v22685_v56 = vld [vmem:[%s30039_s11 + $0x110] ss:$8 sps:$4 sm:$0xff]   ;;  %v11483_v22 = vpack.c.bf16 %v27181_v44, %v11477_v61 }
 0xada   : > { %v10137_v40 = vshrl.u32 %v10077_v26, 16  ;;  %v10140_v13 = vshll.u32 %v10077_v26, 16  ;;  %v10404_v29 = vrot.slane %v10361_v54, 2  ;;  %v10994_v26 = vshll.u32 %v27166_v59, 16  ;;  %v22706_v61 = vld [vmem:[%s30039_s11 + $0x180] ss:$8 sps:$4 sm:$0xff]  }
 0xadb   : > { %v10122_v58 = vrot.slane %v10120_v32, 1  ;;  %v10125_v57 = vrot.slane %v10123_v37, 2  ;;  %v11016_v17 = vshrl.u32 %v10955_v24, 16  ;;  %v11019_v45 = vshll.u32 %v10955_v24, 16  ;;  %v22690_v37 = vld [vmem:[%s30039_s11 + $0x124] ss:$8 sps:$4 sm:$0xff]  }
 0xadc   : > { %v10139_v62 = vrot.slane %v10137_v40, 1  ;;  %v10142_v2 = vrot.slane %v10140_v13, 2  ;;  %v10405_v35 = vsel %vm894_vm1, %v10403_v42, %v10404_v29  ;;  %v10999_v51 = vshrl.u32 %v10954_v14, 16  ;;  %v22691_v29 = vld [vmem:[%s30039_s11 + $0x130] ss:$8 sps:$4 sm:$0xff]  }
 0xadd   : > { %v10126_v47 = vor.u32 %v10125_v57, %v10122_v58  ;;  %v11018_v0 = vrot.slane %v11016_v17, 3  ;;  %v11021_v16 = vrot.slane %v11019_v45, 4  ;;  %v11002_v11 = vshll.u32 %v10954_v14, 16  ;;  %v22688_v57 = vld [vmem:[%s30039_s11 + $0x120] ss:$8 sps:$4 sm:$0xff]  }
 0xade   : > { %v10143_v46 = vor.u32 %v10142_v2, %v10139_v62  ;;  %v11484_v32 = vpack.c.bf16 %v27183_v1, %v11478_v49  ;;  %v11014_v28 = vor.u32 %v11013_v19, %v11010_v43  ;;  %v10996_v3 = vrot.slane %v10994_v26, 4  ;;  %v22697_v19 = vld [vmem:[%s30039_s11 + $0x150] ss:$8 sps:$4 sm:$0xff]   ;;  %v22702_v45 = vld [vmem:[%s30039_s11 + $0x164] ss:$8 sps:$4 sm:$0xff]  }
 0xadf   : > { %v10127_v7 = vsel %vm10110_vm5, %v10118_v6, %v10126_v47  ;;  %v11022_v59 = vor.u32 %v11021_v16, %v11018_v0  ;;  %v11493_v40 = vmul.bf16 %v26598_v20, %v11485_v36  ;;  %v11001_v13 = vrot.slane %v10999_v51, 3  ;;  %v22693_v20 = vld [vmem:[%s30039_s11 + $0x134] ss:$8 sps:$4 sm:$0xff]   ;;  %v22700_v14 = vld [vmem:[%s30039_s11 + $0x160] ss:$8 sps:$4 sm:$0xff]  }
 0xae0   : > { %v10144_v50 = vsel %vm10110_vm5, %v10135_v15, %v10143_v46  ;;  %v11004_v12 = vrot.slane %v11002_v11, 4  ;;  %v11492_v54 = vmul.bf16 %v26603_v60, %v11484_v32  ;;  %v11491_v53 = vmul.bf16 %v26603_v60, %v11483_v22  ;;  %v22703_v0 = vld [vmem:[%s30039_s11 + $0x170] ss:$8 sps:$4 sm:$0xff]   ;;  %v22712_v26 = vld [vmem:[%s30039_s11 + $0x1a0] ss:$8 sps:$4 sm:$0xff]  }
 0xae1   : > { %10339 = vmatprep.mubr.bf16.mxu1 %v10144_v50  ;;  %v27201_v58 = vsel %vm10989_vm6, %v11014_v28, %v11022_v59  ;;  %v10997_v18 = vor.u32 %v10996_v3, %v10993_v33  ;;  %v11549_v2 = vshll.u32 %v11494_v30, 16  ;;  %v11537_v15 = vshll.u32 %v11493_v40, 16  ;;  %v22694_v50 = vld [vmem:[%s30039_s11 + $0x140] ss:$8 sps:$4 sm:$0xff]   ;;  %v22708_v30 = vld [vmem:[%s30039_s11 + $0x184] ss:$8 sps:$4 sm:$0xff]  }
 0xae2   : > { %10340 = vmatmul.mubr.bf16.vlgmr.msra.gmra.mrb[32].mxu1 %v10127_v7  ;;  %v11005_v9 = vor.u32 %v11004_v12, %v11001_v13  ;;  %v11544_v62 = vshll.u32 %v11492_v54, 16  ;;  %v11532_v36 = vshll.u32 %v11491_v53, 16  ;;  %v11542_v47 = vshrl.u32 %v11492_v54, 16  ;;  %v22705_v7 = vld [vmem:[%s30039_s11 + $0x174] ss:$8 sps:$4 sm:$0xff]  }
 0xae3   : > { %10569 = vmatpush1.bf16.msra.mxu1 %v22682_v31  ;;  %10600 = vmatprep.mubr.bf16.mxu1 %v10405_v35  ;;  %v11530_v21 = vshrl.u32 %v11491_v53, 16  ;;  %v11551_v23 = vrot.slane %v11549_v2, 1  ;;  %v22696_v31 = vld [vmem:[%s30039_s11 + $0x144] ss:$8 sps:$4 sm:$0xff]   ;;  %v11539_v42 = vrot.slane %v11537_v15, 1  ;;  %v10653_v11 = vrot.slane %v10651_v5, 5 }
 0xae4   : > { %10570 = vmatprep.subr.bf16.mxu1 %v22687_v4  ;;  %v27210_v60 = vsel %vm10989_vm6, %v10997_v18, %v11005_v9  ;;  %v11546_v24 = vrot.slane %v11544_v62, 1  ;;  %v11534_v46 = vrot.slane %v11532_v36, 1  ;;  %v22699_v4 = vld [vmem:[%s30039_s11 + $0x154] ss:$8 sps:$4 sm:$0xff]   ;;  %v22709_v16 = vld [vmem:[%s30039_s11 + $0x190] ss:$8 sps:$4 sm:$0xff]  }
 0xae5   : > { %v22711_v35 = vld [vmem:[%s30039_s11 + $0x194] ss:$8 sps:$4 sm:$0xff]   ;;  %v22714_v33 = vld [vmem:[%s30039_s11 + $0x1a4] ss:$8 sps:$4 sm:$0xff]   ;;  %v10656_v32 = vrot.slane %v10654_v10, 6 }
 0xae6   : > { %v11547_v34 = vor.u32 %v11546_v24, %v11542_v47  ;;  %v11535_v6 = vor.u32 %v11534_v46, %v11530_v21  ;;  %v22717_v49 = vld [vmem:[%s30039_s11 + $0x1b4] ss:$8 sps:$4 sm:$0xff]   ;;  %v22720_v22 = vld [vmem:[%s30039_s11 + $0x1c4] ss:$8 sps:$4 sm:$0xff]   ;;  %v22718_v59 = vld [vmem:[%s30039_s11 + $0x1c0] ss:$8 sps:$4 sm:$0xff]  }
 0xae7   : > { %10571 = vmatpush1.bf16.msra.mxu1 %v22685_v56  ;;  %v22715_v56 = vld [vmem:[%s30039_s11 + $0x1b0] ss:$8 sps:$4 sm:$0xff]   ;;  %v27279_v3 = vor.u32 %v10656_v32, %v10653_v11  ;;  %v22726_v13 = vld [vmem:[%s30039_s11 + $0x1e4] ss:$8 sps:$4 sm:$0xff]   ;;  %v22729_v18 = vld [vmem:[%s30039_s11 + $0x1f4] ss:$8 sps:$4 sm:$0xff]  }
 0xae8   : > { %10572 = vmatprep.subr.bf16.mxu1 %v22690_v37  ;;  %v27219_v43 = vsel %vm11528_vm7, %v11547_v34, %v11551_v23  ;;  %v27222_v17 = vsel %vm11528_vm7, %v11535_v6, %v11539_v42  ;;  %v10618_v51 = vld [vmem:[#allocation6 + $0x28] sm:$0x1f]  ;;  %v10616_v37 = vld [vmem:[#allocation6 + $0x8] sm:$0xe0]  ;;  %v10356_v54 = vld [vmem:[#allocation6 + $0x20] sm:$0xf] }
 0xae9   : > { %v10622_v28 = vpack.c.bf16 %v10618_v51, %v10618_v51  ;;  %v10620_v5 = vpack.c.bf16 %v27149_v8, %v10616_v37  ;;  %v22721_v40 = vld [vmem:[%s30039_s11 + $0x1d0] ss:$8 sps:$4 sm:$0xff]   ;;  %v22724_v8 = vld [vmem:[%s30039_s11 + $0x1e0] ss:$8 sps:$4 sm:$0xff]   ;;  %v10354_v9 = vld [vmem:[#allocation6] sm:$0xf0] }
 0xaea   : > { %v22727_v47 = vld [vmem:[%s30039_s11 + $0x1f0] ss:$8 sps:$4 sm:$0xff]   ;;  %v10358_v24 = vpack.c.bf16 %v27147_v63, %v10354_v9  ;;  %v22732_v21 = vld [vmem:[%s30039_s11 + $0x204] ss:$8 sps:$4 sm:$0xff]   ;;  %v22730_v6 = vld [vmem:[%s30039_s11 + $0x200] ss:$8 sps:$4 sm:$0xff]  }
 0xaeb   : > { %10573 = vmatpush1.bf16.msra.mxu1 %v22688_v57  ;;  %v10662_v10 = vmul.bf16 %v27279_v3, %v10622_v28  ;;  %v10660_v12 = vmul.bf16 %v27279_v3, %v10620_v5  ;;  %v22751_v51 = vld [vmem:[%s30039_s11 + $0x270] ss:$8 sps:$4 sm:$0xff]   ;;  %v22756_v11 = vld [vmem:[%s30039_s11 + $0x284] ss:$8 sps:$4 sm:$0xff]   ;;  %v22754_v32 = vld [vmem:[%s30039_s11 + $0x280] ss:$8 sps:$4 sm:$0xff]  }
 0xaec   : > { %10574 = vmatprep.subr.bf16.mxu1 %v22693_v20  ;;  %v10360_v20 = vpack.c.bf16 %v10356_v54, %v10356_v54  ;;  %v22757_v37 = vld [vmem:[%s30039_s11 + $0x290] ss:$8 sps:$4 sm:$0xff]   ;;  %v22762_v28 = vld [vmem:[%s30039_s11 + $0x2a4] ss:$8 sps:$4 sm:$0xff]   ;;  %v22766_v54 = vld [vmem:[%s30039_s11 + $0x2c0] ss:$8 sps:$4 sm:$0xff]  }
 0xaed   : > { %v10723_v53 = vshrl.u32 %v10662_v10, 16  ;;  %v10726_v57 = vshll.u32 %v10662_v10, 16  ;;  %v10715_v62 = vshrl.u32 %v10660_v12, 16  ;;  %v10718_v2 = vshll.u32 %v10660_v12, 16  ;;  %v10617_v5 = vld [vmem:[#allocation6 + $0x20] sm:$0x1f] }
 0xaee   : > { %v10401_v34 = vrot.slane %v10360_v20, 2  ;;  %v22763_v10 = vld [vmem:[%s30039_s11 + $0x2b0] ss:$8 sps:$4 sm:$0xff]   ;;  %v10621_v12 = vpack.c.bf16 %v10617_v5, %v10617_v5  ;;  %v22816_v5 = vld [vmem:[%s30039_s11 + $0x3c4] ss:$8 sps:$4 sm:$0xff]  }
 0xaef   : > { %10575 = vmatpush1.bf16.msra.mxu1 %v22691_v29  ;;  %v10725_v36 = vrot.slane %v10723_v53, 2  ;;  %v10728_v15 = vrot.slane %v10726_v57, 3  ;;  %v10717_v46 = vrot.slane %v10715_v62, 2  ;;  %v10720_v29 = vrot.slane %v10718_v2, 3  ;;  %v22771_v57 = vld [vmem:[%s30039_s11 + $0x2d4] ss:$8 sps:$4 sm:$0xff]  }
 0xaf0   : > { %10576 = vmatprep.subr.bf16.mxu1 %v22696_v31  ;;  %v10400_v31 = vrot.slane %v10358_v24, 2  ;;  %v22774_v62 = vld [vmem:[%s30039_s11 + $0x2e4] ss:$8 sps:$4 sm:$0xff]   ;;  %v22777_v24 = vld [vmem:[%s30039_s11 + $0x2f4] ss:$8 sps:$4 sm:$0xff]  }
 0xaf1   : > { %v10729_v23 = vor.u32 %v10728_v15, %v10725_v36  ;;  %v10721_v42 = vor.u32 %v10720_v29, %v10717_v46  ;;  %v22772_v36 = vld [vmem:[%s30039_s11 + $0x2e0] ss:$8 sps:$4 sm:$0xff]   ;;  %v22775_v29 = vld [vmem:[%s30039_s11 + $0x2f0] ss:$8 sps:$4 sm:$0xff]  }
 0xaf3   : > { %10577 = vmatpush1.bf16.msra.mxu1 %v22694_v50  ;;  %v22735_v50 = vld [vmem:[%s30039_s11 + $0x214] ss:$8 sps:$4 sm:$0xff]  }
 0xaf4   : > { %10578 = vmatprep.subr.bf16.mxu1 %v22699_v4  ;;  %v10402_v4 = vsel %vm894_vm1, %v10400_v31, %v10401_v34  ;;  %v22780_v31 = vld [vmem:[%s30039_s11 + $0x304] ss:$8 sps:$4 sm:$0xff]  }
 0xaf7   : > { %10579 = vmatpush1.bf16.msra.mxu1 %v22697_v19  ;;  %v10730_v19 = vsel %vm10696_vm8, %v10721_v42, %v10729_v23 }
 0xaf8   : > { %10580 = vmatprep.subr.bf16.mxu1 %v22702_v45  ;;  %v22733_v45 = vld [vmem:[%s30039_s11 + $0x210] ss:$8 sps:$4 sm:$0xff]  }
 0xafb   : > { %10581 = vmatpush1.bf16.msra.mxu1 %v22700_v14  ;;  %v22738_v14 = vld [vmem:[%s30039_s11 + $0x224] ss:$8 sps:$4 sm:$0xff]  }
 0xafc   : > { %10582 = vmatprep.subr.bf16.mxu1 %v22705_v7  ;;  %v22736_v7 = vld [vmem:[%s30039_s11 + $0x220] ss:$8 sps:$4 sm:$0xff]  }
 0xaff   : > { %10583 = vmatpush1.bf16.msra.mxu1 %v22703_v0  ;;  %v22741_v0 = vld [vmem:[%s30039_s11 + $0x234] ss:$8 sps:$4 sm:$0xff]  }
 0xb00   : > { %10584 = vmatprep.subr.bf16.mxu1 %v22708_v30  ;;  %v22739_v30 = vld [vmem:[%s30039_s11 + $0x230] ss:$8 sps:$4 sm:$0xff]  }
 0xb03   : > { %10585 = vmatpush1.bf16.msra.mxu1 %v22706_v61  ;;  %v22744_v61 = vld [vmem:[%s30039_s11 + $0x244] ss:$8 sps:$4 sm:$0xff]  }
 0xb04   : > { %10586 = vmatprep.subr.bf16.mxu1 %v22711_v35  ;;  %v22742_v35 = vld [vmem:[%s30039_s11 + $0x240] ss:$8 sps:$4 sm:$0xff]  }
 0xb07   : > { %10587 = vmatpush1.bf16.msra.mxu1 %v22709_v16  ;;  %v22747_v16 = vld [vmem:[%s30039_s11 + $0x254] ss:$8 sps:$4 sm:$0xff]  }
 0xb08   : > { %10588 = vmatprep.subr.bf16.mxu1 %v22714_v33  ;;  %v22745_v33 = vld [vmem:[%s30039_s11 + $0x250] ss:$8 sps:$4 sm:$0xff]  }
 0xb0b   : > { %10589 = vmatpush1.bf16.msra.mxu1 %v22712_v26  ;;  %v22750_v26 = vld [vmem:[%s30039_s11 + $0x264] ss:$8 sps:$4 sm:$0xff]  }
 0xb0c   : > { %10590 = vmatprep.subr.bf16.mxu1 %v22717_v49  ;;  %v22748_v49 = vld [vmem:[%s30039_s11 + $0x260] ss:$8 sps:$4 sm:$0xff]  }
 0xb0f   : > { %10591 = vmatpush1.bf16.msra.mxu1 %v22715_v56  ;;  %v22753_v56 = vld [vmem:[%s30039_s11 + $0x274] ss:$8 sps:$4 sm:$0xff]  }
 0xb10   : > { %10592 = vmatprep.subr.bf16.mxu1 %v22720_v22  ;;  %v22759_v22 = vld [vmem:[%s30039_s11 + $0x294] ss:$8 sps:$4 sm:$0xff]  }
 0xb13   : > { %10593 = vmatpush1.bf16.msra.mxu1 %v22718_v59  ;;  %v22760_v59 = vld [vmem:[%s30039_s11 + $0x2a0] ss:$8 sps:$4 sm:$0xff]  }
 0xb14   : > { %10594 = vmatprep.subr.bf16.mxu1 %v22723_v38  ;;  %v22765_v38 = vld [vmem:[%s30039_s11 + $0x2b4] ss:$8 sps:$4 sm:$0xff]  }
 0xb17   : > { %10595 = vmatpush1.bf16.msra.mxu1 %v22721_v40  ;;  %v22768_v40 = vld [vmem:[%s30039_s11 + $0x2c4] ss:$8 sps:$4 sm:$0xff]  }
 0xb18   : > { %10596 = vmatprep.subr.bf16.mxu1 %v22726_v13  ;;  %v10615_v13 = vld [vmem:[#allocation6] sm:$0xe0] }
 0xb19   : > { %v10619_v53 = vpack.c.bf16 %v27147_v63, %v10615_v13  ;;  %v22817_v13 = vld [vmem:[%s30039_s11 + $0x3d0] ss:$8 sps:$4 sm:$0xff]  }
 0xb1b   : > { %10597 = vmatpush1.bf16.msra.mxu1 %v22724_v8  ;;  %v10661_v8 = vmul.bf16 %v27279_v3, %v10621_v12  ;;  %v10659_v9 = vmul.bf16 %v27279_v3, %v10619_v53  ;;  %v22822_v12 = vld [vmem:[%s30039_s11 + $0x3e4] ss:$8 sps:$4 sm:$0xff]   ;;  %v22825_v53 = vld [vmem:[%s30039_s11 + $0x3f4] ss:$8 sps:$4 sm:$0xff]  }
 0xb1c   : > { %10598 = vmatprep.subr.bf16.mxu1 %v22729_v18  ;;  %v22769_v18 = vld [vmem:[%s30039_s11 + $0x2d0] ss:$8 sps:$4 sm:$0xff]  }
 0xb1d   : > { %v10706_v2 = vshrl.u32 %v10661_v8, 16  ;;  %v10709_v20 = vshll.u32 %v10661_v8, 16  ;;  %v10698_v15 = vshrl.u32 %v10659_v9, 16  ;;  %v22828_v8 = vld [vmem:[%s30039_s11 + $0x404] ss:$8 sps:$4 sm:$0xff]  }
 0xb1f   : > { %10599 = vmatpush1.bf16.msra.mxu1 %v22727_v47  ;;  %v10701_v47 = vshll.u32 %v10659_v9, 16  ;;  %v10711_v46 = vrot.slane %v10709_v20, 3  ;;  %v10700_v34 = vrot.slane %v10698_v15, 2  ;;  %v22831_v9 = vld [vmem:[%s30039_s11 + $0x414] ss:$8 sps:$4 sm:$0xff]  }
 0xb20   : > { %10893 = vmatprep.subr.bf16.mxu1 %v22732_v21  ;;  %v10708_v21 = vrot.slane %v10706_v2, 2  ;;  %v22834_v2 = vld [vmem:[%s30039_s11 + $0x424] ss:$8 sps:$4 sm:$0xff]   ;;  %v22832_v20 = vld [vmem:[%s30039_s11 + $0x420] ss:$8 sps:$4 sm:$0xff]  }
 0xb21   : > { %v10703_v23 = vrot.slane %v10701_v47, 3  ;;  %v22838_v15 = vld [vmem:[%s30039_s11 + $0x440] ss:$8 sps:$4 sm:$0xff]   ;;  %v22843_v47 = vld [vmem:[%s30039_s11 + $0x454] ss:$8 sps:$4 sm:$0xff]  }
 0xb22   : > { %10601 = vmatmul.mubr.bf16.vlgmr.msra.gmra.mrb[32].mxu1 %v10402_v4  ;;  %v22783_v4 = vld [vmem:[%s30039_s11 + $0x314] ss:$8 sps:$4 sm:$0xff]  }
 0xb23   : > { %10894 = vmatpush1.bf16.msra.mxu1 %v22730_v6  ;;  %10925 = vmatprep.mubr.bf16.mxu1 %v10730_v19  ;;  %v10712_v6 = vor.u32 %v10711_v46, %v10708_v21  ;;  %v10704_v42 = vor.u32 %v10703_v23, %v10700_v34  ;;  %v22846_v21 = vld [vmem:[%s30039_s11 + $0x464] ss:$8 sps:$4 sm:$0xff]   ;;  %v22844_v46 = vld [vmem:[%s30039_s11 + $0x460] ss:$8 sps:$4 sm:$0xff]   ;;  %v22847_v34 = vld [vmem:[%s30039_s11 + $0x470] ss:$8 sps:$4 sm:$0xff]  }
 0xb24   : > { %10895 = vmatprep.subr.bf16.mxu1 %v22735_v50  ;;  %v22778_v50 = vld [vmem:[%s30039_s11 + $0x300] ss:$8 sps:$4 sm:$0xff]   ;;  %v22852_v23 = vld [vmem:[%s30039_s11 + $0x484] ss:$8 sps:$4 sm:$0xff]  }
 0xb25   : > { %v10713_v19 = vsel %vm10696_vm8, %v10704_v42, %v10712_v6  ;;  %v22855_v6 = vld [vmem:[%s30039_s11 + $0x494] ss:$8 sps:$4 sm:$0xff]   ;;  %v22853_v42 = vld [vmem:[%s30039_s11 + $0x490] ss:$8 sps:$4 sm:$0xff]  }
 0xb27   : > { %10896 = vmatpush1.bf16.msra.mxu1 %v22733_v45  ;;  %v22781_v45 = vld [vmem:[%s30039_s11 + $0x310] ss:$8 sps:$4 sm:$0xff]  }
 0xb28   : > { %10897 = vmatprep.subr.bf16.mxu1 %v22738_v14  ;;  %v22786_v14 = vld [vmem:[%s30039_s11 + $0x324] ss:$8 sps:$4 sm:$0xff]  }
 0xb2b   : > { %10898 = vmatpush1.bf16.msra.mxu1 %v22736_v7  ;;  %v22784_v7 = vld [vmem:[%s30039_s11 + $0x320] ss:$8 sps:$4 sm:$0xff]  }
 0xb2c   : > { %10899 = vmatprep.subr.bf16.mxu1 %v22741_v0  ;;  %v22789_v0 = vld [vmem:[%s30039_s11 + $0x334] ss:$8 sps:$4 sm:$0xff]  }
 0xb2f   : > { %10900 = vmatpush1.bf16.msra.mxu1 %v22739_v30  ;;  %v22792_v30 = vld [vmem:[%s30039_s11 + $0x344] ss:$8 sps:$4 sm:$0xff]  }
 0xb30   : > { %10901 = vmatprep.subr.bf16.mxu1 %v22744_v61  ;;  %v22790_v61 = vld [vmem:[%s30039_s11 + $0x340] ss:$8 sps:$4 sm:$0xff]  }
 0xb33   : > { %10902 = vmatpush1.bf16.msra.mxu1 %v22742_v35  ;;  %v22795_v35 = vld [vmem:[%s30039_s11 + $0x354] ss:$8 sps:$4 sm:$0xff]  }
 0xb34   : > { %10903 = vmatprep.subr.bf16.mxu1 %v22747_v16  ;;  %v22793_v16 = vld [vmem:[%s30039_s11 + $0x350] ss:$8 sps:$4 sm:$0xff]  }
 0xb37   : > { %10904 = vmatpush1.bf16.msra.mxu1 %v22745_v33  ;;  %v22798_v33 = vld [vmem:[%s30039_s11 + $0x364] ss:$8 sps:$4 sm:$0xff]  }
 0xb38   : > { %10905 = vmatprep.subr.bf16.mxu1 %v22750_v26  ;;  %v22796_v26 = vld [vmem:[%s30039_s11 + $0x360] ss:$8 sps:$4 sm:$0xff]  }
 0xb3b   : > { %10906 = vmatpush1.bf16.msra.mxu1 %v22748_v49  ;;  %v22801_v49 = vld [vmem:[%s30039_s11 + $0x374] ss:$8 sps:$4 sm:$0xff]  }
 0xb3c   : > { %10907 = vmatprep.subr.bf16.mxu1 %v22753_v56  ;;  %v22799_v56 = vld [vmem:[%s30039_s11 + $0x370] ss:$8 sps:$4 sm:$0xff]  }
 0xb3f   : > { %10908 = vmatpush1.bf16.msra.mxu1 %v22751_v51  ;;  %v22804_v51 = vld [vmem:[%s30039_s11 + $0x384] ss:$8 sps:$4 sm:$0xff]  }
 0xb40   : > { %10909 = vmatprep.subr.bf16.mxu1 %v22756_v11  ;;  %v22802_v11 = vld [vmem:[%s30039_s11 + $0x380] ss:$8 sps:$4 sm:$0xff]  }
 0xb43   : > { %10910 = vmatpush1.bf16.msra.mxu1 %v22754_v32  ;;  %v22807_v32 = vld [vmem:[%s30039_s11 + $0x394] ss:$8 sps:$4 sm:$0xff]  }
 0xb44   : > { %10911 = vmatprep.subr.bf16.mxu1 %v22759_v22  ;;  %v22805_v22 = vld [vmem:[%s30039_s11 + $0x390] ss:$8 sps:$4 sm:$0xff]  }
 0xb47   : > { %10912 = vmatpush1.bf16.msra.mxu1 %v22757_v37  ;;  %v22810_v37 = vld [vmem:[%s30039_s11 + $0x3a4] ss:$8 sps:$4 sm:$0xff]  }
 0xb48   : > { %10913 = vmatprep.subr.bf16.mxu1 %v22762_v28  ;;  %v22808_v28 = vld [vmem:[%s30039_s11 + $0x3a0] ss:$8 sps:$4 sm:$0xff]  }
 0xb4b   : > { %10914 = vmatpush1.bf16.msra.mxu1 %v22760_v59  ;;  %v22813_v59 = vld [vmem:[%s30039_s11 + $0x3b4] ss:$8 sps:$4 sm:$0xff]  }
 0xb4c   : > { %10915 = vmatprep.subr.bf16.mxu1 %v22765_v38  ;;  %v22811_v38 = vld [vmem:[%s30039_s11 + $0x3b0] ss:$8 sps:$4 sm:$0xff]  }
 0xb4f   : > { %10916 = vmatpush1.bf16.msra.mxu1 %v22763_v10  ;;  %v22814_v10 = vld [vmem:[%s30039_s11 + $0x3c0] ss:$8 sps:$4 sm:$0xff]  }
 0xb50   : > { %10917 = vmatprep.subr.bf16.mxu1 %v22768_v40  ;;  %v22819_v40 = vld [vmem:[%s30039_s11 + $0x3d4] ss:$8 sps:$4 sm:$0xff]  }
 0xb53   : > { %10918 = vmatpush1.bf16.msra.mxu1 %v22766_v54  ;;  %v22820_v54 = vld [vmem:[%s30039_s11 + $0x3e0] ss:$8 sps:$4 sm:$0xff]  }
 0xb54   : > { %10919 = vmatprep.subr.bf16.mxu1 %v22771_v57  ;;  %v22823_v57 = vld [vmem:[%s30039_s11 + $0x3f0] ss:$8 sps:$4 sm:$0xff]  }
 0xb57   : > { %10920 = vmatpush1.bf16.msra.mxu1 %v22769_v18  ;;  %v22826_v18 = vld [vmem:[%s30039_s11 + $0x400] ss:$8 sps:$4 sm:$0xff]  }
 0xb58   : > { %10921 = vmatprep.subr.bf16.mxu1 %v22774_v62  ;;  %v22829_v62 = vld [vmem:[%s30039_s11 + $0x410] ss:$8 sps:$4 sm:$0xff]  }
 0xb5b   : > { %10922 = vmatpush1.bf16.msra.mxu1 %v22772_v36  ;;  %v22840_v36 = vld [vmem:[%s30039_s11 + $0x444] ss:$8 sps:$4 sm:$0xff]  }
 0xb5c   : > { %10923 = vmatprep.subr.bf16.mxu1 %v22777_v24  ;;  %v22841_v24 = vld [vmem:[%s30039_s11 + $0x450] ss:$8 sps:$4 sm:$0xff]  }
 0xb5f   : > { %10924 = vmatpush1.bf16.msra.mxu1 %v22775_v29  ;;  %v22849_v29 = vld [vmem:[%s30039_s11 + $0x474] ss:$8 sps:$4 sm:$0xff]  }
 0xb60   : > { %11186 = vmatprep.subr.bf16.mxu1 %v22780_v31  ;;  %v22850_v31 = vld [vmem:[%s30039_s11 + $0x480] ss:$8 sps:$4 sm:$0xff]  }
 0xb62   : > { %10926 = vmatmul.mubr.bf16.vlgmr.msra.gmra.mrb[32].mxu1 %v10713_v19  ;;  %v22861_v19 = vld [vmem:[%s30039_s11 + $0x4b4] ss:$8 sps:$4 sm:$0xff]  }
 0xb63   : > { %11187 = vmatpush1.bf16.msra.mxu1 %v22778_v50  ;;  %11218 = vmatprep.mubr.bf16.mxu1 %v27201_v58  ;;  %v22787_v58 = vld [vmem:[%s30039_s11 + $0x330] ss:$8 sps:$4 sm:$0xff]   ;;  %v22858_v50 = vld [vmem:[%s30039_s11 + $0x4a4] ss:$8 sps:$4 sm:$0xff]  }
 0xb64   : > { %11188 = vmatprep.subr.bf16.mxu1 %v22783_v4  ;;  %v22856_v4 = vld [vmem:[%s30039_s11 + $0x4a0] ss:$8 sps:$4 sm:$0xff]  }
 0xb67   : > { %11189 = vmatpush1.bf16.msra.mxu1 %v22781_v45  ;;  %v22859_v45 = vld [vmem:[%s30039_s11 + $0x4b0] ss:$8 sps:$4 sm:$0xff]  }
 0xb68   : > { %11190 = vmatprep.subr.bf16.mxu1 %v22786_v14  ;;  %v22864_v14 = vld [vmem:[%s30039_s11 + $0x4c4] ss:$8 sps:$4 sm:$0xff]  }
 0xb6b   : > { %11191 = vmatpush1.bf16.msra.mxu1 %v22784_v7  ;;  %v22862_v7 = vld [vmem:[%s30039_s11 + $0x4c0] ss:$8 sps:$4 sm:$0xff]  }
 0xb6c   : > { %11192 = vmatprep.subr.bf16.mxu1 %v22789_v0  ;;  %v22867_v0 = vld [vmem:[%s30039_s11 + $0x4d4] ss:$8 sps:$4 sm:$0xff]  }
 0xb6f   : > { %11193 = vmatpush1.bf16.msra.mxu1 %v22787_v58  ;;  %v22865_v58 = vld [vmem:[%s30039_s11 + $0x4d0] ss:$8 sps:$4 sm:$0xff]  }
 0xb70   : > { %11194 = vmatprep.subr.bf16.mxu1 %v22792_v30  ;;  %v22870_v30 = vld [vmem:[%s30039_s11 + $0x4e4] ss:$8 sps:$4 sm:$0xff]  }
 0xb73   : > { %11195 = vmatpush1.bf16.msra.mxu1 %v22790_v61  ;;  %v22868_v61 = vld [vmem:[%s30039_s11 + $0x4e0] ss:$8 sps:$4 sm:$0xff]  }
 0xb74   : > { %11196 = vmatprep.subr.bf16.mxu1 %v22795_v35  ;;  %v22873_v35 = vld [vmem:[%s30039_s11 + $0x4f4] ss:$8 sps:$4 sm:$0xff]  }
 0xb77   : > { %11197 = vmatpush1.bf16.msra.mxu1 %v22793_v16  ;;  %v22871_v16 = vld [vmem:[%s30039_s11 + $0x4f0] ss:$8 sps:$4 sm:$0xff]  }
 0xb78   : > { %11198 = vmatprep.subr.bf16.mxu1 %v22798_v33  ;;  %v22876_v33 = vld [vmem:[%s30039_s11 + $0x504] ss:$8 sps:$4 sm:$0xff]  }
 0xb7b   : > { %11199 = vmatpush1.bf16.msra.mxu1 %v22796_v26  ;;  %v22874_v26 = vld [vmem:[%s30039_s11 + $0x500] ss:$8 sps:$4 sm:$0xff]  }
 0xb7c   : > { %11200 = vmatprep.subr.bf16.mxu1 %v22801_v49  ;;  %v11235_v49 = vpack.c.bf16 %v27181_v44, %v27147_v63  ;;  %v22880_v63 = vld [vmem:[%s30039_s11 + $0x520] ss:$8 sps:$4 sm:$0xff]  }
 0xb7f   : > { %11201 = vmatpush1.bf16.msra.mxu1 %v22799_v56  ;;  %v22879_v56 = vld [vmem:[%s30039_s11 + $0x514] ss:$8 sps:$4 sm:$0xff]  }
 0xb80   : > { %11202 = vmatprep.subr.bf16.mxu1 %v22804_v51  ;;  %v22877_v51 = vld [vmem:[%s30039_s11 + $0x510] ss:$8 sps:$4 sm:$0xff]  }
 0xb83   : > { %11203 = vmatpush1.bf16.msra.mxu1 %v22802_v11  ;;  %v22882_v11 = vld [vmem:[%s30039_s11 + $0x524] ss:$8 sps:$4 sm:$0xff]  }
 0xb84   : > { %11204 = vmatprep.subr.bf16.mxu1 %v22807_v32  ;;  %v22885_v32 = vld [vmem:[%s30039_s11 + $0x534] ss:$8 sps:$4 sm:$0xff]  }
 0xb87   : > { %11205 = vmatpush1.bf16.msra.mxu1 %v22805_v22  ;;  %v22888_v22 = vld [vmem:[%s30039_s11 + $0x544] ss:$8 sps:$4 sm:$0xff]  }
 0xb88   : > { %11206 = vmatprep.subr.bf16.mxu1 %v22810_v37  ;;  %v22886_v37 = vld [vmem:[%s30039_s11 + $0x540] ss:$8 sps:$4 sm:$0xff]  }
 0xb8b   : > { %11207 = vmatpush1.bf16.msra.mxu1 %v22808_v28  ;;  %v22891_v28 = vld [vmem:[%s30039_s11 + $0x554] ss:$8 sps:$4 sm:$0xff]  }
 0xb8c   : > { %11208 = vmatprep.subr.bf16.mxu1 %v22813_v59  ;;  %v22889_v59 = vld [vmem:[%s30039_s11 + $0x550] ss:$8 sps:$4 sm:$0xff]  }
 0xb8f   : > { %11209 = vmatpush1.bf16.msra.mxu1 %v22811_v38  ;;  %v22894_v38 = vld [vmem:[%s30039_s11 + $0x564] ss:$8 sps:$4 sm:$0xff]  }
 0xb90   : > { %11210 = vmatprep.subr.bf16.mxu1 %v22816_v5  ;;  %v22892_v5 = vld [vmem:[%s30039_s11 + $0x560] ss:$8 sps:$4 sm:$0xff]  }
 0xb93   : > { %11211 = vmatpush1.bf16.msra.mxu1 %v22814_v10  ;;  %v22897_v10 = vld [vmem:[%s30039_s11 + $0x574] ss:$8 sps:$4 sm:$0xff]  }
 0xb94   : > { %11212 = vmatprep.subr.bf16.mxu1 %v22819_v40  ;;  %v22895_v40 = vld [vmem:[%s30039_s11 + $0x570] ss:$8 sps:$4 sm:$0xff]  }
 0xb97   : > { %11213 = vmatpush1.bf16.msra.mxu1 %v22817_v13  ;;  %v22900_v13 = vld [vmem:[%s30039_s11 + $0x584] ss:$8 sps:$4 sm:$0xff]  }
 0xb98   : > { %11214 = vmatprep.subr.bf16.mxu1 %v22822_v12  ;;  %v22898_v12 = vld [vmem:[%s30039_s11 + $0x580] ss:$8 sps:$4 sm:$0xff]  }
 0xb9b   : > { %11215 = vmatpush1.bf16.msra.mxu1 %v22820_v54  ;;  %v22903_v54 = vld [vmem:[%s30039_s11 + $0x594] ss:$8 sps:$4 sm:$0xff]  }
 0xb9c   : > { %11216 = vmatprep.subr.bf16.mxu1 %v22825_v53  ;;  %v22901_v53 = vld [vmem:[%s30039_s11 + $0x590] ss:$8 sps:$4 sm:$0xff]  }
 0xb9f   : > { %11217 = vmatpush1.bf16.msra.mxu1 %v22823_v57  ;;  %v22906_v57 = vld [vmem:[%s30039_s11 + $0x5a4] ss:$8 sps:$4 sm:$0xff]  }
 0xba0   : > { %11430 = vmatprep.subr.bf16.mxu1 %v22828_v8  ;;  %v22904_v8 = vld [vmem:[%s30039_s11 + $0x5a0] ss:$8 sps:$4 sm:$0xff]  }
 0xba2   : > { %11219 = vmatmul.mubr.bf16.vlgmr.msra.gmra.mrb[32].mxu1 %v27210_v60  ;;  %v22837_v60 = vld [vmem:[%s30039_s11 + $0x434] ss:$8 sps:$4 sm:$0xff]  }
 0xba3   : > { %11431 = vmatpush1.bf16.msra.mxu1 %v22826_v18  ;;  %11462 = vmatprep.mubr.bf16.mxu1 %v27161_v27  ;;  %v22835_v27 = vld [vmem:[%s30039_s11 + $0x430] ss:$8 sps:$4 sm:$0xff]   ;;  %v22909_v18 = vld [vmem:[%s30039_s11 + $0x5b4] ss:$8 sps:$4 sm:$0xff]  }
 0xba4   : > { %11432 = vmatprep.subr.bf16.mxu1 %v22831_v9  ;;  %v22907_v9 = vld [vmem:[%s30039_s11 + $0x5b0] ss:$8 sps:$4 sm:$0xff]  }
 0xba7   : > { %11433 = vmatpush1.bf16.msra.mxu1 %v22829_v62  ;;  %v22912_v62 = vld [vmem:[%s30039_s11 + $0x5c4] ss:$8 sps:$4 sm:$0xff]  }
 0xba8   : > { %11434 = vmatprep.subr.bf16.mxu1 %v22834_v2  ;;  %v11763_v2 = vld [vmem:[#allocation6 + $0x18] sm:$0xf8] }
 0xbab   : > { %11435 = vmatpush1.bf16.msra.mxu1 %v22832_v20  ;;  %v11765_v20 = vld [vmem:[#allocation6 + $0x38] sm:$0x7] }
 0xbac   : > { %11436 = vmatprep.subr.bf16.mxu1 %v22837_v60  ;;  %v11767_v60 = vpack.c.bf16 %v27183_v1, %v11763_v2 }
 0xbaf   : > { %11437 = vmatpush1.bf16.msra.mxu1 %v22835_v27  ;;  %v22910_v27 = vld [vmem:[%s30039_s11 + $0x5c0] ss:$8 sps:$4 sm:$0xff]  }
 0xbb0   : > { %11438 = vmatprep.subr.bf16.mxu1 %v22840_v36  ;;  %v22915_v36 = vld [vmem:[%s30039_s11 + $0x5d4] ss:$8 sps:$4 sm:$0xff]  }
 0xbb3   : > { %11439 = vmatpush1.bf16.msra.mxu1 %v22838_v15  ;;  %v11769_v15 = vpack.c.bf16 %v11765_v20, %v11765_v20  ;;  %v22961_v20 = vld [vmem:[%s30039_s11 + $0x6d0] ss:$8 sps:$4 sm:$0xff]  }
 0xbb4   : > { %11440 = vmatprep.subr.bf16.mxu1 %v22843_v47  ;;  %v11771_v47 = vmul.bf16 %v11767_v60, %v27152_v25  ;;  %v22966_v60 = vld [vmem:[%s30039_s11 + $0x6e4] ss:$8 sps:$4 sm:$0xff]  }
 0xbb7   : > { %11441 = vmatpush1.bf16.msra.mxu1 %v22841_v24  ;;  %v22913_v24 = vld [vmem:[%s30039_s11 + $0x5d0] ss:$8 sps:$4 sm:$0xff]  }
 0xbb8   : > { %11442 = vmatprep.subr.bf16.mxu1 %v22846_v21  ;;  %v22918_v21 = vld [vmem:[%s30039_s11 + $0x5e4] ss:$8 sps:$4 sm:$0xff]  }
 0xbbb   : > { %11443 = vmatpush1.bf16.msra.mxu1 %v22844_v46  ;;  %v11773_v46 = vmul.bf16 %v11769_v15, %v27152_v25  ;;  %v22964_v15 = vld [vmem:[%s30039_s11 + $0x6e0] ss:$8 sps:$4 sm:$0xff]  }
 0xbbc   : > { %11444 = vmatprep.subr.bf16.mxu1 %v22849_v29  ;;  %v11825_v29 = vshrl.u32 %v11771_v47, 16 }
 0xbbf   : > { %11445 = vmatpush1.bf16.msra.mxu1 %v22847_v34  ;;  %v11828_v34 = vshll.u32 %v11771_v47, 16 }
 0xbc0   : > { %11446 = vmatprep.subr.bf16.mxu1 %v22852_v23  ;;  %v22916_v23 = vld [vmem:[%s30039_s11 + $0x5e0] ss:$8 sps:$4 sm:$0xff]  }
 0xbc3   : > { %11447 = vmatpush1.bf16.msra.mxu1 %v22850_v31  ;;  %v22921_v31 = vld [vmem:[%s30039_s11 + $0x5f4] ss:$8 sps:$4 sm:$0xff]  }
 0xbc4   : > { %11448 = vmatprep.subr.bf16.mxu1 %v22855_v6  ;;  %v11833_v6 = vshrl.u32 %v11773_v46, 16 }
 0xbc7   : > { %11449 = vmatpush1.bf16.msra.mxu1 %v22853_v42  ;;  %v11836_v42 = vshll.u32 %v11773_v46, 16 }
 0xbc8   : > { %11450 = vmatprep.subr.bf16.mxu1 %v22858_v50  ;;  %v11827_v50 = vrot.slane %v11825_v29, 1 }
 0xbcb   : > { %11451 = vmatpush1.bf16.msra.mxu1 %v22856_v4  ;;  %v11830_v4 = vrot.slane %v11828_v34, 2  ;;  %v12051_v34 = vld [vmem:[#allocation6 + $0x18] sm:$0xf0] }
 0xbcc   : > { %11452 = vmatprep.subr.bf16.mxu1 %v22861_v19  ;;  %v22919_v19 = vld [vmem:[%s30039_s11 + $0x5f0] ss:$8 sps:$4 sm:$0xff]  }
 0xbcf   : > { %11453 = vmatpush1.bf16.msra.mxu1 %v22859_v45  ;;  %v22924_v45 = vld [vmem:[%s30039_s11 + $0x604] ss:$8 sps:$4 sm:$0xff]  }
 0xbd0   : > { %11454 = vmatprep.subr.bf16.mxu1 %v22864_v14  ;;  %v11835_v14 = vrot.slane %v11833_v6, 1  ;;  %v22967_v6 = vld [vmem:[%s30039_s11 + $0x6f0] ss:$8 sps:$4 sm:$0xff]  }
 0xbd3   : > { %11455 = vmatpush1.bf16.msra.mxu1 %v22862_v7  ;;  %v11838_v7 = vrot.slane %v11836_v42, 2 }
 0xbd4   : > { %11456 = vmatprep.subr.bf16.mxu1 %v22867_v0  ;;  %v11831_v0 = vor.u32 %v11830_v4, %v11827_v50  ;;  %v22972_v4 = vld [vmem:[%s30039_s11 + $0x704] ss:$8 sps:$4 sm:$0xff]  }
 0xbd7   : > { %11457 = vmatpush1.bf16.msra.mxu1 %v22865_v58  ;;  %v22922_v58 = vld [vmem:[%s30039_s11 + $0x600] ss:$8 sps:$4 sm:$0xff]  }
 0xbd8   : > { %11458 = vmatprep.subr.bf16.mxu1 %v22870_v30  ;;  %v11839_v30 = vor.u32 %v11838_v7, %v11835_v14 }
 0xbdb   : > { %11459 = vmatpush1.bf16.msra.mxu1 %v22868_v61  ;;  %v22927_v61 = vld [vmem:[%s30039_s11 + $0x614] ss:$8 sps:$4 sm:$0xff]  }
 0xbdc   : > { %11460 = vmatprep.subr.bf16.mxu1 %v22873_v35  ;;  %v11840_v35 = vsel %vm10110_vm5, %v11831_v0, %v11839_v30  ;;  %v22975_v0 = vld [vmem:[%s30039_s11 + $0x714] ss:$8 sps:$4 sm:$0xff]  }
 0xbdf   : > { %11461 = vmatpush1.bf16.msra.mxu1 %v22871_v16  ;;  %v22925_v16 = vld [vmem:[%s30039_s11 + $0x610] ss:$8 sps:$4 sm:$0xff]  }
 0xbe0   : > { %11715 = vmatprep.subr.bf16.mxu1 %v22876_v33  ;;  %v22930_v33 = vld [vmem:[%s30039_s11 + $0x624] ss:$8 sps:$4 sm:$0xff]  }
 0xbe2   : > { %11463 = vmatmul.mubr.bf16.vlgmr.msra.gmra.mrb[32].mxu1 %v11235_v49  ;;  %v22931_v49 = vld [vmem:[%s30039_s11 + $0x630] ss:$8 sps:$4 sm:$0xff]  }
 0xbe3   : > { %11716 = vmatpush1.bf16.msra.mxu1 %v22874_v26  ;;  %11747 = vmatprep.mubr.bf16.mxu1 %v27219_v43  ;;  %v22883_v43 = vld [vmem:[%s30039_s11 + $0x530] ss:$8 sps:$4 sm:$0xff]   ;;  %v22928_v26 = vld [vmem:[%s30039_s11 + $0x620] ss:$8 sps:$4 sm:$0xff]  }
 0xbe4   : > { %11717 = vmatprep.subr.bf16.mxu1 %v22879_v56  ;;  %v22936_v56 = vld [vmem:[%s30039_s11 + $0x644] ss:$8 sps:$4 sm:$0xff]  }
 0xbe7   : > { %11718 = vmatpush1.bf16.msra.mxu1 %v22877_v51  ;;  %v22934_v51 = vld [vmem:[%s30039_s11 + $0x640] ss:$8 sps:$4 sm:$0xff]  }
 0xbe8   : > { %11719 = vmatprep.subr.bf16.mxu1 %v22882_v11  ;;  %v22939_v11 = vld [vmem:[%s30039_s11 + $0x654] ss:$8 sps:$4 sm:$0xff]  }
 0xbeb   : > { %11720 = vmatpush1.bf16.msra.mxu1 %v22880_v63  ;;  %v22937_v63 = vld [vmem:[%s30039_s11 + $0x650] ss:$8 sps:$4 sm:$0xff]  }
 0xbec   : > { %11721 = vmatprep.subr.bf16.mxu1 %v22885_v32  ;;  %v22942_v32 = vld [vmem:[%s30039_s11 + $0x664] ss:$8 sps:$4 sm:$0xff]  }
 0xbef   : > { %11722 = vmatpush1.bf16.msra.mxu1 %v22883_v43  ;;  %v22940_v43 = vld [vmem:[%s30039_s11 + $0x660] ss:$8 sps:$4 sm:$0xff]  }
 0xbf0   : > { %11723 = vmatprep.subr.bf16.mxu1 %v22888_v22  ;;  %v22945_v22 = vld [vmem:[%s30039_s11 + $0x674] ss:$8 sps:$4 sm:$0xff]  }
 0xbf3   : > { %11724 = vmatpush1.bf16.msra.mxu1 %v22886_v37  ;;  %v22943_v37 = vld [vmem:[%s30039_s11 + $0x670] ss:$8 sps:$4 sm:$0xff]  }
 0xbf4   : > { %11725 = vmatprep.subr.bf16.mxu1 %v22891_v28  ;;  %v22948_v28 = vld [vmem:[%s30039_s11 + $0x684] ss:$8 sps:$4 sm:$0xff]  }
 0xbf7   : > { %11726 = vmatpush1.bf16.msra.mxu1 %v22889_v59  ;;  %v22946_v59 = vld [vmem:[%s30039_s11 + $0x680] ss:$8 sps:$4 sm:$0xff]  }
 0xbf8   : > { %11727 = vmatprep.subr.bf16.mxu1 %v22894_v38  ;;  %v22951_v38 = vld [vmem:[%s30039_s11 + $0x694] ss:$8 sps:$4 sm:$0xff]  }
 0xbfb   : > { %11728 = vmatpush1.bf16.msra.mxu1 %v22892_v5  ;;  %v22949_v5 = vld [vmem:[%s30039_s11 + $0x690] ss:$8 sps:$4 sm:$0xff]  }
 0xbfc   : > { %11729 = vmatprep.subr.bf16.mxu1 %v22897_v10  ;;  %v22954_v10 = vld [vmem:[%s30039_s11 + $0x6a4] ss:$8 sps:$4 sm:$0xff]  }
 0xbff   : > { %11730 = vmatpush1.bf16.msra.mxu1 %v22895_v40  ;;  %v22952_v40 = vld [vmem:[%s30039_s11 + $0x6a0] ss:$8 sps:$4 sm:$0xff]  }
 0xc00   : > { %11731 = vmatprep.subr.bf16.mxu1 %v22900_v13  ;;  %v22957_v13 = vld [vmem:[%s30039_s11 + $0x6b4] ss:$8 sps:$4 sm:$0xff]  }
 0xc03   : > { %11732 = vmatpush1.bf16.msra.mxu1 %v22898_v12  ;;  %v22955_v12 = vld [vmem:[%s30039_s11 + $0x6b0] ss:$8 sps:$4 sm:$0xff]  }
 0xc04   : > { %11733 = vmatprep.subr.bf16.mxu1 %v22903_v54  ;;  %v22960_v54 = vld [vmem:[%s30039_s11 + $0x6c4] ss:$8 sps:$4 sm:$0xff]  }
 0xc07   : > { %11734 = vmatpush1.bf16.msra.mxu1 %v22901_v53  ;;  %v11762_v53 = vld [vmem:[#allocation6 + $0x10] sm:$0xf8] }
 0xc08   : > { %11735 = vmatprep.subr.bf16.mxu1 %v22906_v57  ;;  %v11764_v57 = vld [vmem:[#allocation6 + $0x30] sm:$0x7] }
 0xc0b   : > { %11736 = vmatpush1.bf16.msra.mxu1 %v22904_v8  ;;  %v11766_v8 = vpack.c.bf16 %v27181_v44, %v11762_v53  ;;  %v23086_v53 = vld [vmem:[%s30041_s13 + $0x64] ss:$8 sps:$4 sm:$0xff]  }
 0xc0c   : > { %11737 = vmatprep.subr.bf16.mxu1 %v22909_v18  ;;  %v22958_v18 = vld [vmem:[%s30039_s11 + $0x6c0] ss:$8 sps:$4 sm:$0xff]  }
 0xc0d   : > { %v11770_v2 = vmul.bf16 %v11766_v8, %v27152_v25  ;;  %v23084_v8 = vld [vmem:[%s30041_s13 + $0x60] ss:$8 sps:$4 sm:$0xff]  }
 0xc0f   : > { %11738 = vmatpush1.bf16.msra.mxu1 %v22907_v9  ;;  %v11768_v9 = vpack.c.bf16 %v11764_v57, %v11764_v57  ;;  %v22993_v57 = vld [vmem:[%s30039_s11 + $0x774] ss:$8 sps:$4 sm:$0xff]  }
 0xc10   : > { %11739 = vmatprep.subr.bf16.mxu1 %v22912_v62  ;;  %v22963_v62 = vld [vmem:[%s30039_s11 + $0x6d4] ss:$8 sps:$4 sm:$0xff]  }
 0xc11   : > { %v11772_v44 = vmul.bf16 %v11768_v9, %v27152_v25  ;;  %v22969_v25 = vld [vmem:[%s30039_s11 + $0x6f4] ss:$8 sps:$4 sm:$0xff]  }
 0xc12   : > { %v23089_v9 = vld [vmem:[%s30041_s13 + $0x74] ss:$8 sps:$4 sm:$0xff]  }
 0xc13   : > { %11740 = vmatpush1.bf16.msra.mxu1 %v22910_v27  ;;  %v11808_v27 = vshrl.u32 %v11770_v2, 16  ;;  %v11816_v47 = vshrl.u32 %v11772_v44, 16 }
 0xc14   : > { %11741 = vmatprep.subr.bf16.mxu1 %v22915_v36  ;;  %v11811_v36 = vshll.u32 %v11770_v2, 16  ;;  %v23087_v2 = vld [vmem:[%s30041_s13 + $0x70] ss:$8 sps:$4 sm:$0xff]  }
 0xc15   : > { %v11810_v46 = vrot.slane %v11808_v27, 1  ;;  %v11818_v42 = vrot.slane %v11816_v47, 1  ;;  %v23090_v27 = vld [vmem:[%s30041_s13 + $0x80] ss:$8 sps:$4 sm:$0xff]   ;;  %v23002_v47 = vld [vmem:[%s30039_s11 + $0x7a4] ss:$8 sps:$4 sm:$0xff]  }
 0xc16   : > { %v11813_v29 = vrot.slane %v11811_v36, 2  ;;  %v22997_v36 = vld [vmem:[%s30039_s11 + $0x790] ss:$8 sps:$4 sm:$0xff]  }
 0xc17   : > { %11742 = vmatpush1.bf16.msra.mxu1 %v22913_v24  ;;  %v11819_v24 = vshll.u32 %v11772_v44, 16  ;;  %v23092_v44 = vld [vmem:[%s30041_s13 + $0x84] ss:$8 sps:$4 sm:$0xff]  }
 0xc18   : > { %11743 = vmatprep.subr.bf16.mxu1 %v22918_v21  ;;  %v12053_v21 = vld [vmem:[#allocation6 + $0x38] sm:$0xf] }
 0xc19   : > { %v11821_v50 = vrot.slane %v11819_v24, 2  ;;  %v23093_v24 = vld [vmem:[%s30041_s13 + $0x90] ss:$8 sps:$4 sm:$0xff]  }
 0xc1b   : > { %11744 = vmatpush1.bf16.msra.mxu1 %v22916_v23  ;;  %v12055_v23 = vpack.c.bf16 %v27183_v1, %v12051_v34  ;;  %v11822_v7 = vor.u32 %v11821_v50, %v11818_v42  ;;  %v22970_v1 = vld [vmem:[%s30039_s11 + $0x700] ss:$8 sps:$4 sm:$0xff]   ;;  %v12311_v34 = vld [vmem:[#allocation6 + $0x18] sm:$0xe0]  ;;  %v23011_v50 = vld [vmem:[%s30039_s11 + $0x7d4] ss:$8 sps:$4 sm:$0xff]  }
 0xc1c   : > { %11745 = vmatprep.subr.bf16.mxu1 %v22921_v31  ;;  %v12057_v31 = vpack.c.bf16 %v12053_v21, %v12053_v21  ;;  %v23000_v21 = vld [vmem:[%s30039_s11 + $0x7a0] ss:$8 sps:$4 sm:$0xff]  }
 0xc1d   : > { %v23006_v42 = vld [vmem:[%s30039_s11 + $0x7c0] ss:$8 sps:$4 sm:$0xff]  }
 0xc1e   : > { %v12099_v14 = vrot.slane %v12057_v31, 2  ;;  %v23931_v31 = vld [vmem:[#allocation6 + $0x28] sm:$0xff] }
 0xc1f   : > { %11746 = vmatpush1.bf16.msra.mxu1 %v22919_v19  ;;  %v11814_v19 = vor.u32 %v11813_v29, %v11810_v46  ;;  %v23003_v46 = vld [vmem:[%s30039_s11 + $0x7b0] ss:$8 sps:$4 sm:$0xff]   ;;  %v23008_v29 = vld [vmem:[%s30039_s11 + $0x7c4] ss:$8 sps:$4 sm:$0xff]  }
 0xc20   : > { %12003 = vmatprep.subr.bf16.mxu1 %v22924_v45  ;;  %v12098_v45 = vrot.slane %v12055_v23, 2  ;;  %v12313_v23 = vld [vmem:[#allocation6 + $0x38] sm:$0x1f] }
 0xc22   : > { %11748 = vmatmul.mubr.bf16.vlgmr.msra.gmra.mrb[32].mxu1 %v27222_v17  ;;  %v22933_v17 = vld [vmem:[%s30039_s11 + $0x634] ss:$8 sps:$4 sm:$0xff]   ;;  %v12100_v30 = vsel %vm894_vm1, %v12098_v45, %v12099_v14  ;;  %v23009_v45 = vld [vmem:[%s30039_s11 + $0x7d0] ss:$8 sps:$4 sm:$0xff]   ;;  %v23014_v14 = vld [vmem:[%s30039_s11 + $0x7e4] ss:$8 sps:$4 sm:$0xff]  }
 0xc23   : > { %12004 = vmatpush1.bf16.msra.mxu1 %v22922_v58  ;;  %12035 = vmatprep.mubr.bf16.mxu1 %v11840_v35  ;;  %v11823_v58 = vsel %vm10110_vm5, %v11814_v19, %v11822_v7  ;;  %v12606_v35 = vld [vmem:[%s30047_s19] sm:$0xf] }
 0xc24   : > { %12005 = vmatprep.subr.bf16.mxu1 %v22927_v61  ;;  %v12607_v61 = vld [vmem:[%s30047_s19 + $0x4] sm:$0xf]  ;;  %12632 = vperm.xlu0 %22237, %v12606_v35  }
 0xc25   : > { %12644 = vperm.xlu1 %22238, %v12607_v61  }
 0xc27   : > { %12006 = vmatpush1.bf16.msra.mxu1 %v22925_v16  ;;  %v23066_v16 = vld [vmem:[%s30041_s13] ss:$8 sps:$4 sm:$0xff]  }
 0xc28   : > { %12007 = vmatprep.subr.bf16.mxu1 %v22930_v33  ;;  %v22973_v33 = vld [vmem:[%s30039_s11 + $0x710] ss:$8 sps:$4 sm:$0xff]   ;;  %22240 = vset.pattern.permute.xlu0 %v30164_v48 }
 0xc29   : > { %22239 = vset.pattern.permute.xlu1 %v30164_v48  ;;  %13227 = vperm.xlu0 %22240, %v12607_v61   ;;  %v23017_v61 = vld [vmem:[%s30039_s11 + $0x7f4] ss:$8 sps:$4 sm:$0xff]  }
 0xc2a   : > { %13216 = vperm.xlu1 %22239, %v12606_v35   ;;  %v12050_v35 = vld [vmem:[#allocation6 + $0x10] sm:$0xf0] }
 0xc2b   : > { %12008 = vmatpush1.bf16.msra.mxu1 %v22928_v26  ;;  %v23068_v26 = vld [vmem:[%s30041_s13 + $0x4] ss:$8 sps:$4 sm:$0xff]  }
 0xc2c   : > { %12009 = vmatprep.subr.bf16.mxu1 %v22933_v17  ;;  %v23071_v17 = vld [vmem:[%s30041_s13 + $0x14] ss:$8 sps:$4 sm:$0xff]   ;;  %12900 = vmatprep.subr.bf16.mxu0 %v23068_v26 }
 0xc2d   : > { %12901 = vmatpush1.bf16.msra.mxu0 %v23066_v16  ;;  %v27970_v26 = vld [vmem:[#allocation6 + $0x20] sm:$0xff] }
 0xc2e   : > { %12902 = vmatprep.subr.bf16.mxu0 %v23071_v17  ;;  %22241 = vset.pattern.permute.xlu1 %v30165_v41  ;;  %v22987_v41 = vld [vmem:[%s30039_s11 + $0x754] ss:$8 sps:$4 sm:$0xff]   ;;  %v12054_v17 = vpack.c.bf16 %v27970_v26, %v12050_v35  ;;  %v23063_v35 = vld [vmem:[%s30039_s11 + $0x8f0] ss:$8 sps:$4 sm:$0xff]  }
 0xc2f   : > { %12010 = vmatpush1.bf16.msra.mxu1 %v22931_v49  ;;  %v22978_v49 = vld [vmem:[%s30039_s11 + $0x724] ss:$8 sps:$4 sm:$0xff]  }
 0xc30   : > { %12011 = vmatprep.subr.bf16.mxu1 %v22936_v56  ;;  %v23069_v56 = vld [vmem:[%s30041_s13 + $0x10] ss:$8 sps:$4 sm:$0xff]  }
 0xc31   : > { %12903 = vmatpush1.bf16.msra.mxu0 %v23069_v56 }
 0xc33   : > { %12012 = vmatpush1.bf16.msra.mxu1 %v22934_v51  ;;  %v22976_v51 = vld [vmem:[%s30039_s11 + $0x720] ss:$8 sps:$4 sm:$0xff]  }
 0xc34   : > { %12013 = vmatprep.subr.bf16.mxu1 %v22939_v11  ;;  %v23074_v11 = vld [vmem:[%s30041_s13 + $0x24] ss:$8 sps:$4 sm:$0xff]  }
 0xc35   : > { %12904 = vmatprep.subr.bf16.mxu0 %v23074_v11  ;;  %v23015_v11 = vld [vmem:[%s30039_s11 + $0x7f0] ss:$8 sps:$4 sm:$0xff]  }
 0xc37   : > { %12014 = vmatpush1.bf16.msra.mxu1 %v22937_v63  ;;  %v22981_v63 = vld [vmem:[%s30039_s11 + $0x734] ss:$8 sps:$4 sm:$0xff]  }
 0xc38   : > { %12015 = vmatprep.subr.bf16.mxu1 %v22942_v32  ;;  %v23072_v32 = vld [vmem:[%s30041_s13 + $0x20] ss:$8 sps:$4 sm:$0xff]  }
 0xc39   : > { %12905 = vmatpush1.bf16.msra.mxu0 %v23072_v32 }
 0xc3b   : > { %12016 = vmatpush1.bf16.msra.mxu1 %v22940_v43  ;;  %v22979_v43 = vld [vmem:[%s30039_s11 + $0x730] ss:$8 sps:$4 sm:$0xff]  }
 0xc3c   : > { %12017 = vmatprep.subr.bf16.mxu1 %v22945_v22  ;;  %v23077_v22 = vld [vmem:[%s30041_s13 + $0x34] ss:$8 sps:$4 sm:$0xff]  }
 0xc3d   : > { %12906 = vmatprep.subr.bf16.mxu0 %v23077_v22  ;;  %v12095_v22 = vrot.slane %v12054_v17, 2 }
 0xc3f   : > { %12018 = vmatpush1.bf16.msra.mxu1 %v22943_v37  ;;  %v22984_v37 = vld [vmem:[%s30039_s11 + $0x744] ss:$8 sps:$4 sm:$0xff]  }
 0xc40   : > { %12019 = vmatprep.subr.bf16.mxu1 %v22948_v28  ;;  %v23075_v28 = vld [vmem:[%s30041_s13 + $0x30] ss:$8 sps:$4 sm:$0xff]  }
 0xc41   : > { %12907 = vmatpush1.bf16.msra.mxu0 %v23075_v28 }
 0xc43   : > { %12020 = vmatpush1.bf16.msra.mxu1 %v22946_v59  ;;  %v22982_v59 = vld [vmem:[%s30039_s11 + $0x740] ss:$8 sps:$4 sm:$0xff]  }
 0xc44   : > { %12021 = vmatprep.subr.bf16.mxu1 %v22951_v38  ;;  %v23080_v38 = vld [vmem:[%s30041_s13 + $0x44] ss:$8 sps:$4 sm:$0xff]  }
 0xc45   : > { %12908 = vmatprep.subr.bf16.mxu0 %v23080_v38 }
 0xc47   : > { %12022 = vmatpush1.bf16.msra.mxu1 %v22949_v5  ;;  %v23078_v5 = vld [vmem:[%s30041_s13 + $0x40] ss:$8 sps:$4 sm:$0xff]  }
 0xc48   : > { %12023 = vmatprep.subr.bf16.mxu1 %v22954_v10  ;;  %v22985_v10 = vld [vmem:[%s30039_s11 + $0x750] ss:$8 sps:$4 sm:$0xff]   ;;  %12909 = vmatpush1.bf16.msra.mxu0 %v23078_v5 }
 0xc4b   : > { %12024 = vmatpush1.bf16.msra.mxu1 %v22952_v40  ;;  %v23083_v40 = vld [vmem:[%s30041_s13 + $0x54] ss:$8 sps:$4 sm:$0xff]  }
 0xc4c   : > { %12025 = vmatprep.subr.bf16.mxu1 %v22957_v13  ;;  %v22990_v13 = vld [vmem:[%s30039_s11 + $0x764] ss:$8 sps:$4 sm:$0xff]   ;;  %12910 = vmatprep.subr.bf16.mxu0 %v23083_v40  ;;  %v23021_v40 = vld [vmem:[%s30039_s11 + $0x810] ss:$8 sps:$4 sm:$0xff]  }
 0xc4f   : > { %12026 = vmatpush1.bf16.msra.mxu1 %v22955_v12  ;;  %v23081_v12 = vld [vmem:[%s30041_s13 + $0x50] ss:$8 sps:$4 sm:$0xff]  }
 0xc50   : > { %12027 = vmatprep.subr.bf16.mxu1 %v22960_v54  ;;  %v22988_v54 = vld [vmem:[%s30039_s11 + $0x760] ss:$8 sps:$4 sm:$0xff]   ;;  %12911 = vmatpush1.bf16.msra.mxu0 %v23081_v12 }
 0xc51   : > { %12912 = vmatprep.subr.bf16.mxu0 %v23086_v53  ;;  %v23024_v12 = vld [vmem:[%s30039_s11 + $0x820] ss:$8 sps:$4 sm:$0xff]   ;;  %v23027_v53 = vld [vmem:[%s30039_s11 + $0x830] ss:$8 sps:$4 sm:$0xff]  }
 0xc53   : > { %12028 = vmatpush1.bf16.msra.mxu1 %v22958_v18  ;;  %v22991_v18 = vld [vmem:[%s30039_s11 + $0x770] ss:$8 sps:$4 sm:$0xff]  }
 0xc54   : > { %12029 = vmatprep.subr.bf16.mxu1 %v22963_v62  ;;  %v22996_v62 = vld [vmem:[%s30039_s11 + $0x784] ss:$8 sps:$4 sm:$0xff]   ;;  %12913 = vmatpush1.bf16.msra.mxu0 %v23084_v8  ;;  %v23030_v8 = vld [vmem:[%s30039_s11 + $0x840] ss:$8 sps:$4 sm:$0xff]  }
 0xc55   : > { %12914 = vmatprep.subr.bf16.mxu0 %v23089_v9  ;;  %v23033_v9 = vld [vmem:[%s30039_s11 + $0x850] ss:$8 sps:$4 sm:$0xff]  }
 0xc57   : > { %12030 = vmatpush1.bf16.msra.mxu1 %v22961_v20  ;;  %v22994_v20 = vld [vmem:[%s30039_s11 + $0x780] ss:$8 sps:$4 sm:$0xff]  }
 0xc58   : > { %12031 = vmatprep.subr.bf16.mxu1 %v22966_v60  ;;  %v22999_v60 = vld [vmem:[%s30039_s11 + $0x794] ss:$8 sps:$4 sm:$0xff]   ;;  %12915 = vmatpush1.bf16.msra.mxu0 %v23087_v2  ;;  %v23036_v2 = vld [vmem:[%s30039_s11 + $0x860] ss:$8 sps:$4 sm:$0xff]  }
 0xc59   : > { %12916 = vmatprep.subr.bf16.mxu0 %v23092_v44  ;;  %v23039_v44 = vld [vmem:[%s30039_s11 + $0x870] ss:$8 sps:$4 sm:$0xff]  }
 0xc5b   : > { %12032 = vmatpush1.bf16.msra.mxu1 %v22964_v15  ;;  %v23095_v15 = vld [vmem:[%s30041_s13 + $0x94] ss:$8 sps:$4 sm:$0xff]  }
 0xc5c   : > { %12033 = vmatprep.subr.bf16.mxu1 %v22969_v25  ;;  %12917 = vmatpush1.bf16.msra.mxu0 %v23090_v27  ;;  %v23005_v25 = vld [vmem:[%s30039_s11 + $0x7b4] ss:$8 sps:$4 sm:$0xff]   ;;  %v23042_v27 = vld [vmem:[%s30039_s11 + $0x880] ss:$8 sps:$4 sm:$0xff]  }
 0xc5d   : > { %12918 = vmatprep.subr.bf16.mxu0 %v23095_v15  ;;  %v23045_v15 = vld [vmem:[%s30039_s11 + $0x890] ss:$8 sps:$4 sm:$0xff]  }
 0xc5f   : > { %12034 = vmatpush1.bf16.msra.mxu1 %v22967_v6  ;;  %v12315_v6 = vpack.c.bf16 %v23931_v31, %v12311_v34  ;;  %v12312_v34 = vld [vmem:[#allocation6 + $0x30] sm:$0x1f] }
 0xc60   : > { %12263 = vmatprep.subr.bf16.mxu1 %v22972_v4  ;;  %12919 = vmatpush1.bf16.msra.mxu0 %v23093_v24  ;;  %v12317_v4 = vpack.c.bf16 %v12313_v23, %v12313_v23  ;;  %v23048_v24 = vld [vmem:[%s30039_s11 + $0x8a0] ss:$8 sps:$4 sm:$0xff]  }
 0xc61   : > { %v12319_v19 = vmul.bf16 %v12315_v6, %v27279_v3  ;;  %v23054_v31 = vld [vmem:[%s30039_s11 + $0x8c0] ss:$8 sps:$4 sm:$0xff]   ;;  %v12316_v6 = vpack.c.bf16 %v12312_v34, %v12312_v34 }
 0xc62   : > { %12036 = vmatmul.mubr.bf16.vlgmr.msra.gmra.mrb[32].mxu1 %v11823_v58  ;;  %v12321_v7 = vmul.bf16 %v12317_v4, %v27279_v3  ;;  %v23057_v4 = vld [vmem:[%s30039_s11 + $0x8d0] ss:$8 sps:$4 sm:$0xff]  }
 0xc63   : > { %12264 = vmatpush1.bf16.msra.mxu1 %v22970_v1  ;;  %12295 = vmatprep.mubr.bf16.mxu1 %v12100_v30  ;;  %v12052_v1 = vld [vmem:[#allocation6 + $0x30] sm:$0xf]  ;;  %v12376_v58 = vshll.u32 %v12319_v19, 16 }
 0xc64   : > { %12265 = vmatprep.subr.bf16.mxu1 %v22975_v0  ;;  %v12373_v0 = vshrl.u32 %v12319_v19, 16  ;;  %v23012_v30 = vld [vmem:[%s30039_s11 + $0x7e0] ss:$8 sps:$4 sm:$0xff]   ;;  %v12381_v16 = vshrl.u32 %v12321_v7, 16  ;;  %v12320_v19 = vmul.bf16 %v12316_v6, %v27279_v3 }
 0xc66   : > { %v12375_v56 = vrot.slane %v12373_v0, 2  ;;  %v12383_v32 = vrot.slane %v12381_v16, 2  ;;  %v12364_v0 = vshrl.u32 %v12320_v19, 16 }
 0xc67   : > { %12266 = vmatpush1.bf16.msra.mxu1 %v22973_v33  ;;  %v12384_v33 = vshll.u32 %v12321_v7, 16 }
 0xc68   : > { %12267 = vmatprep.subr.bf16.mxu1 %v22978_v49  ;;  %v12056_v49 = vpack.c.bf16 %v12052_v1, %v12052_v1  ;;  %v23060_v1 = vld [vmem:[%s30039_s11 + $0x8e0] ss:$8 sps:$4 sm:$0xff]   ;;  %v12366_v16 = vrot.slane %v12364_v0, 2  ;;  %v13532_v0 = vld [vmem:[#allocation7 + $0x8] sm:$0x80] }
 0xc6b   : > { %12268 = vmatpush1.bf16.msra.mxu1 %v22976_v51  ;;  %v12378_v51 = vrot.slane %v12376_v58, 3  ;;  %v12367_v58 = vshll.u32 %v12320_v19, 16 }
 0xc6c   : > { %12269 = vmatprep.subr.bf16.mxu1 %v22981_v63  ;;  %v23020_v63 = vld [vmem:[%s30039_s11 + $0x804] ss:$8 sps:$4 sm:$0xff]  }
 0xc6d   : > { %v12379_v28 = vor.u32 %v12378_v51, %v12375_v56 }
 0xc6f   : > { %12270 = vmatpush1.bf16.msra.mxu1 %v22979_v43  ;;  %v12386_v43 = vrot.slane %v12384_v33, 3  ;;  %v12369_v33 = vrot.slane %v12367_v58, 3 }
 0xc70   : > { %12271 = vmatprep.subr.bf16.mxu1 %v22984_v37  ;;  %v12096_v37 = vrot.slane %v12056_v49, 2 }
 0xc71   : > { %v12387_v38 = vor.u32 %v12386_v43, %v12383_v32  ;;  %v12370_v17 = vor.u32 %v12369_v33, %v12366_v16  ;;  %v13531_v16 = vld [vmem:[#allocation7] sm:$0x80] }
 0xc72   : > { %v12097_v5 = vsel %vm894_vm1, %v12095_v22, %v12096_v37 }
 0xc73   : > { %12272 = vmatpush1.bf16.msra.mxu1 %v22982_v59  ;;  %v23018_v59 = vld [vmem:[%s30039_s11 + $0x800] ss:$8 sps:$4 sm:$0xff]  }
 0xc74   : > { %12273 = vmatprep.subr.bf16.mxu1 %v22987_v41  ;;  %v23023_v41 = vld [vmem:[%s30039_s11 + $0x814] ss:$8 sps:$4 sm:$0xff]  }
 0xc77   : > { %12274 = vmatpush1.bf16.msra.mxu1 %v22985_v10  ;;  %v12388_v10 = vsel %vm10696_vm8, %v12379_v28, %v12387_v38  ;;  %v23096_v38 = vld [vmem:[%s30041_s13 + $0xa0] ss:$8 sps:$4 sm:$0xff]  }
 0xc78   : > { %12275 = vmatprep.subr.bf16.mxu1 %v22990_v13  ;;  %v23026_v13 = vld [vmem:[%s30039_s11 + $0x824] ss:$8 sps:$4 sm:$0xff]  }
 0xc7b   : > { %12276 = vmatpush1.bf16.msra.mxu1 %v22988_v54  ;;  %v23029_v54 = vld [vmem:[%s30039_s11 + $0x834] ss:$8 sps:$4 sm:$0xff]  }
 0xc7c   : > { %12277 = vmatprep.subr.bf16.mxu1 %v22993_v57  ;;  %v23032_v57 = vld [vmem:[%s30039_s11 + $0x844] ss:$8 sps:$4 sm:$0xff]  }
 0xc7f   : > { %12278 = vmatpush1.bf16.msra.mxu1 %v22991_v18  ;;  %v23035_v18 = vld [vmem:[%s30039_s11 + $0x854] ss:$8 sps:$4 sm:$0xff]  }
 0xc80   : > { %12279 = vmatprep.subr.bf16.mxu1 %v22996_v62  ;;  %v23038_v62 = vld [vmem:[%s30039_s11 + $0x864] ss:$8 sps:$4 sm:$0xff]  }
 0xc83   : > { %12280 = vmatpush1.bf16.msra.mxu1 %v22994_v20  ;;  %v23041_v20 = vld [vmem:[%s30039_s11 + $0x874] ss:$8 sps:$4 sm:$0xff]  }
 0xc84   : > { %12281 = vmatprep.subr.bf16.mxu1 %v22999_v60  ;;  %v23044_v60 = vld [vmem:[%s30039_s11 + $0x884] ss:$8 sps:$4 sm:$0xff]  }
 0xc87   : > { %12282 = vmatpush1.bf16.msra.mxu1 %v22997_v36  ;;  %v23047_v36 = vld [vmem:[%s30039_s11 + $0x894] ss:$8 sps:$4 sm:$0xff]  }
 0xc88   : > { %12283 = vmatprep.subr.bf16.mxu1 %v23002_v47  ;;  %v23050_v47 = vld [vmem:[%s30039_s11 + $0x8a4] ss:$8 sps:$4 sm:$0xff]  }
 0xc8b   : > { %12284 = vmatpush1.bf16.msra.mxu1 %v23000_v21  ;;  %v23053_v21 = vld [vmem:[%s30039_s11 + $0x8b4] ss:$8 sps:$4 sm:$0xff]  }
 0xc8c   : > { %12285 = vmatprep.subr.bf16.mxu1 %v23005_v25  ;;  %v23051_v25 = vld [vmem:[%s30039_s11 + $0x8b0] ss:$8 sps:$4 sm:$0xff]  }
 0xc8f   : > { %12286 = vmatpush1.bf16.msra.mxu1 %v23003_v46  ;;  %v23056_v46 = vld [vmem:[%s30039_s11 + $0x8c4] ss:$8 sps:$4 sm:$0xff]  }
 0xc90   : > { %12287 = vmatprep.subr.bf16.mxu1 %v23008_v29  ;;  %v12310_v29 = vld [vmem:[#allocation6 + $0x10] sm:$0xe0] }
 0xc91   : > { %v12314_v23 = vpack.c.bf16 %v27970_v26, %v12310_v29 }
 0xc93   : > { %12288 = vmatpush1.bf16.msra.mxu1 %v23006_v42  ;;  %v23059_v42 = vld [vmem:[%s30039_s11 + $0x8d4] ss:$8 sps:$4 sm:$0xff]  }
 0xc94   : > { %12289 = vmatprep.subr.bf16.mxu1 %v23011_v50  ;;  %v12318_v50 = vmul.bf16 %v12314_v23, %v27279_v3 }
 0xc96   : > { %v12359_v7 = vshll.u32 %v12318_v50, 16 }
 0xc97   : > { %12290 = vmatpush1.bf16.msra.mxu1 %v23009_v45  ;;  %v23062_v45 = vld [vmem:[%s30039_s11 + $0x8e4] ss:$8 sps:$4 sm:$0xff]  }
 0xc98   : > { %12291 = vmatprep.subr.bf16.mxu1 %v23014_v14  ;;  %v12356_v14 = vshrl.u32 %v12318_v50, 16 }
 0xc9a   : > { %v12358_v3 = vrot.slane %v12356_v14, 2  ;;  %v12621_v14 = vld [vmem:[#allocation7 + $0x8] sm:$0xf8] }
 0xc9b   : > { %12292 = vmatpush1.bf16.msra.mxu1 %v23012_v30  ;;  %v23065_v30 = vld [vmem:[%s30039_s11 + $0x8f4] ss:$8 sps:$4 sm:$0xff]  }
 0xc9c   : > { %12293 = vmatprep.subr.bf16.mxu1 %v23017_v61  ;;  %v12361_v61 = vrot.slane %v12359_v7, 3 }
 0xc9e   : > { %v12362_v26 = vor.u32 %v12361_v61, %v12358_v3 }
 0xc9f   : > { %12294 = vmatpush1.bf16.msra.mxu1 %v23015_v11 }
 0xca0   : > { %12551 = vmatprep.subr.bf16.mxu1 %v23020_v63  ;;  %v12371_v49 = vsel %vm10696_vm8, %v12362_v26, %v12370_v17 }
 0xca2   : > { %12296 = vmatmul.mubr.bf16.vlgmr.msra.gmra.mrb[32].mxu1 %v12097_v5 }
 0xca3   : > { %12552 = vmatpush1.bf16.msra.mxu1 %v23018_v59  ;;  %12583 = vmatprep.mubr.bf16.mxu1 %v12388_v10  ;;  %v12633_v11 = vpop.permute.xlu0 %12632 }
 0xca4   : > { %12553 = vmatprep.subr.bf16.mxu1 %v23023_v41  ;;  %v12645_v56 = vpop.permute.xlu1 %12644  ;;  %v12641_v63 = vrot.slane %v12633_v11, %v30163_v52  ;;  %v23098_v41 = vld [vmem:[%s30041_s13 + $0xa4] ss:$8 sps:$4 sm:$0xff]  }
 0xca5   : > { %v12653_v51 = vrot.slane %v12645_v56, %v30163_v52  ;;  %12920 = vmatprep.subr.bf16.mxu0 %v23098_v41 }
 0xca6   : > { %12921 = vmatpush1.bf16.msra.mxu0 %v23096_v38 }
 0xca7   : > { %12554 = vmatpush1.bf16.msra.mxu1 %v23021_v40  ;;  %v19344_v32 = vcombine.low %v12641_v63, %v12653_v51 }
 0xca8   : > { %12555 = vmatprep.subr.bf16.mxu1 %v23026_v13  ;;  %v13228_v10 = vpop.permute.xlu0 %13227 }
 0xca9   : > { %v12660_v43 = vshrl.u32 %v19344_v32, 16  ;;  %v12663_v22 = vshll.u32 %v19344_v32, 16  ;;  %v13217_v5 = vpop.permute.xlu1 %13216  ;;  %v13236_v13 = vrot.slane %v13228_v10, %v30163_v52 }
 0xcaa   : > { %v13225_v40 = vrot.slane %v13217_v5, %v30163_v52 }
 0xcab   : > { %12556 = vmatpush1.bf16.msra.mxu1 %v23024_v12  ;;  %v13539_v37 = vrot.slane %v12660_v43, 4  ;;  %v13540_v28 = vrot.slane %v12663_v22, 5  ;;  %v12662_v6 = vrot.slane %v12660_v43, 6 }
 0xcac   : > { %12557 = vmatprep.subr.bf16.mxu1 %v23029_v54  ;;  %v28090_v12 = vcombine.low %v13225_v40, %v13236_v13  ;;  %v14072_v13 = vld [vmem:[#allocation7 + $0x38] sm:$0x1] }
 0xcad   : > { %v28080_v59 = vor.u32 %v13540_v28, %v13539_v37 }
 0xcae   : > { %v13243_v54 = vshrl.u32 %v28090_v12, 16 }
 0xcaf   : > { %12558 = vmatpush1.bf16.msra.mxu1 %v23027_v53  ;;  %v13246_v53 = vshll.u32 %v28090_v12, 16  ;;  %v23155_v12 = vld [vmem:[%s30041_s13 + $0x1d4] ss:$8 sps:$4 sm:$0xff]  }
 0xcb0   : > { %12559 = vmatprep.subr.bf16.mxu1 %v23032_v57  ;;  %v28096_v57 = vrot.slane %v13243_v54, 7 }
 0xcb3   : > { %12560 = vmatpush1.bf16.msra.mxu1 %v23030_v8  ;;  %v23099_v8 = vld [vmem:[%s30041_s13 + $0xb0] ss:$8 sps:$4 sm:$0xff]  }
 0xcb4   : > { %12561 = vmatprep.subr.bf16.mxu1 %v23035_v18  ;;  %v23101_v18 = vld [vmem:[%s30041_s13 + $0xb4] ss:$8 sps:$4 sm:$0xff]  }
 0xcb5   : > { %12922 = vmatprep.subr.bf16.mxu0 %v23101_v18 }
 0xcb6   : > { %12923 = vmatpush1.bf16.msra.mxu0 %v23099_v8 }
 0xcb7   : > { %12562 = vmatpush1.bf16.msra.mxu1 %v23033_v9  ;;  %v28107_v9 = vor.u32 %v28096_v57, %v13246_v53 }
 0xcb8   : > { %12563 = vmatprep.subr.bf16.mxu1 %v23038_v62  ;;  %v23104_v62 = vld [vmem:[%s30041_s13 + $0xc4] ss:$8 sps:$4 sm:$0xff]  }
 0xcb9   : > { %12924 = vmatprep.subr.bf16.mxu0 %v23104_v62 }
 0xcbb   : > { %12564 = vmatpush1.bf16.msra.mxu1 %v23036_v2  ;;  %v23102_v2 = vld [vmem:[%s30041_s13 + $0xc0] ss:$8 sps:$4 sm:$0xff]  }
 0xcbc   : > { %12565 = vmatprep.subr.bf16.mxu1 %v23041_v20  ;;  %v23107_v20 = vld [vmem:[%s30041_s13 + $0xd4] ss:$8 sps:$4 sm:$0xff]   ;;  %12925 = vmatpush1.bf16.msra.mxu0 %v23102_v2 }
 0xcbd   : > { %12926 = vmatprep.subr.bf16.mxu0 %v23107_v20 }
 0xcbf   : > { %12566 = vmatpush1.bf16.msra.mxu1 %v23039_v44  ;;  %v23105_v44 = vld [vmem:[%s30041_s13 + $0xd0] ss:$8 sps:$4 sm:$0xff]  }
 0xcc0   : > { %12567 = vmatprep.subr.bf16.mxu1 %v23044_v60  ;;  %v23110_v60 = vld [vmem:[%s30041_s13 + $0xe4] ss:$8 sps:$4 sm:$0xff]   ;;  %12927 = vmatpush1.bf16.msra.mxu0 %v23105_v44 }
 0xcc1   : > { %12928 = vmatprep.subr.bf16.mxu0 %v23110_v60  ;;  %v12948_v60 = vld [vmem:[#allocation7 + $0x8] sm:$0xf0] }
 0xcc3   : > { %12568 = vmatpush1.bf16.msra.mxu1 %v23042_v27  ;;  %v23108_v27 = vld [vmem:[%s30041_s13 + $0xe0] ss:$8 sps:$4 sm:$0xff]  }
 0xcc4   : > { %12569 = vmatprep.subr.bf16.mxu1 %v23047_v36  ;;  %v23113_v36 = vld [vmem:[%s30041_s13 + $0xf4] ss:$8 sps:$4 sm:$0xff]   ;;  %12929 = vmatpush1.bf16.msra.mxu0 %v23108_v27  ;;  %v14071_v27 = vld [vmem:[#allocation7 + $0x30] sm:$0x1] }
 0xcc5   : > { %12930 = vmatprep.subr.bf16.mxu0 %v23113_v36 }
 0xcc7   : > { %12570 = vmatpush1.bf16.msra.mxu1 %v23045_v15  ;;  %v15195_v15 = vld [vmem:[%s30047_s19] sm:$0xf] }
 0xcc8   : > { %12571 = vmatprep.subr.bf16.mxu1 %v23050_v47  ;;  %15221 = vperm.xlu1 %22241, %v15195_v15   ;;  %v23111_v47 = vld [vmem:[%s30041_s13 + $0xf0] ss:$8 sps:$4 sm:$0xff]  }
 0xcc9   : > { %15805 = vperm.xlu0 %22240, %v15195_v15   ;;  %12931 = vmatpush1.bf16.msra.mxu0 %v23111_v47  ;;  %v14076_v47 = vpack.c.bf16 %v14072_v13, %v14072_v13 }
 0xccb   : > { %12572 = vmatpush1.bf16.msra.mxu1 %v23048_v24  ;;  %v23116_v24 = vld [vmem:[%s30041_s13 + $0x104] ss:$8 sps:$4 sm:$0xff]  }
 0xccc   : > { %12573 = vmatprep.subr.bf16.mxu1 %v23053_v21  ;;  %v15196_v21 = vld [vmem:[%s30047_s19 + $0x4] sm:$0xf]  ;;  %13160 = vmatprep.subr.bf16.mxu0 %v23116_v24 }
 0xccd   : > { %15233 = vperm.xlu1 %22241, %v15196_v21  }
 0xccf   : > { %12574 = vmatpush1.bf16.msra.mxu1 %v23051_v25  ;;  %v10014_v25 = vld [vmem:[%s30040_s12] sm:$0x3] }
 0xcd0   : > { %12575 = vmatprep.subr.bf16.mxu1 %v23056_v46  ;;  %v10019_v46 = vrot.slane %v10014_v25, %v27133_v55  ;;  %v10023_v29 = vrot.slane %v10014_v25, %v27139_v39 }
 0xcd1   : > { %22242 = vset.pattern.permute.xlu1 %v30164_v48 }
 0xcd2   : > { %15816 = vperm.xlu1 %22242, %v15196_v21  }
 0xcd3   : > { %12576 = vmatpush1.bf16.msra.mxu1 %v23054_v31 }
 0xcd4   : > { %12577 = vmatprep.subr.bf16.mxu1 %v23059_v42  ;;  %v12665_v42 = vrot.slane %v12663_v22, 7 }
 0xcd7   : > { %12578 = vmatpush1.bf16.msra.mxu1 %v23057_v4 }
 0xcd8   : > { %12579 = vmatprep.subr.bf16.mxu1 %v23062_v45 }
 0xcdb   : > { %12580 = vmatpush1.bf16.msra.mxu1 %v23060_v1 }
 0xcdc   : > { %12581 = vmatprep.subr.bf16.mxu1 %v23065_v30  ;;  %v28153_v30 = vor.u32 %v12665_v42, %v12662_v6 }
 0xcdf   : > { %12582 = vmatpush1.bf16.msra.mxu1 %v23063_v35  ;;  %v12620_v35 = vld [vmem:[#allocation7] sm:$0xf8] }
 0xce2   : > { %12584 = vmatmul.mubr.bf16.vlgmr.msra.gmra.mrb[32].mxu1 %v12371_v49 }
 0xdb5   : > { %v12585_v34 = vpop.f32.mrb[32].mxu1 }
 0xdb6   : > { %v21715_v23 = vadd.f32 %v12585_v34, %v10019_v46  ;;  %v12587_v31 = vpop.f32.mrb[33].mxu1 }
 0xdb7   : > { %v21716_v50 = vadd.f32 %v12587_v31, %v10023_v29  ;;  %v12589_v4 = vpop.f32.mrb[34].mxu1  ;;  %v14075_v31 = vpack.c.bf16 %v14071_v27, %v14071_v27  ;;  %v23122_v27 = vld [vmem:[%s30041_s13 + $0x124] ss:$8 sps:$4 sm:$0xff]  }
 0xdb8   : > { %v28148_v19 = vmax.f32 %v21715_v23, 0.0  ;;  %v21717_v45 = vadd.f32 %v12589_v4, %v10019_v46  ;;  %v12591_v48 = vpop.f32.mrb[35].mxu1 }
 0xdb9   : > { %v28150_v7 = vmax.f32 %v21716_v50, 0.0  ;;  %v21718_v1 = vadd.f32 %v12591_v48, %v10023_v29 }
 0xdba   : > { %12602 = vst [vmem:[#allocation7 + $0x10] sm:$0xff] %v28148_v19  ;;  %v12600_v58 = vmax.f32 %v21717_v45, 0.0  ;;  %v12626_v26 = vpack.c.bf16 %v28148_v19, %v12620_v35  ;;  %v13535_v49 = vpack.c.bf16 %v28148_v19, %v13531_v16 }
 0xdbb   : > { %12603 = vst [vmem:[#allocation7 + $0x18] sm:$0xff] %v28150_v7  ;;  %v28156_v3 = vmax.f32 %v21718_v1, 0.0  ;;  %v12627_v61 = vpack.c.bf16 %v28150_v7, %v12621_v14  ;;  %v13536_v33 = vpack.c.bf16 %v28150_v7, %v13532_v0  ;;  %v14084_v1 = vmul.bf16 %v28096_v57, %v14076_v47 }
 0xdbc   : > { %12604 = vst [vmem:[#allocation7 + $0x20] sm:$0xff] %v12600_v58  ;;  %v12668_v43 = vmul.bf16 %v28153_v30, %v12626_v26  ;;  %v28169_v22 = vmul.bf16 %v28080_v59, %v13535_v49 }
 0xdbd   : > { %12605 = vst [vmem:[#allocation7 + $0x28] sm:$0xff] %v28156_v3  ;;  %v13544_v17 = vmul.bf16 %v28080_v59, %v13536_v33  ;;  %v13826_v56 = vpack.c.bf16 %v28156_v3, %v28150_v7  ;;  %v12669_v51 = vmul.bf16 %v28153_v30, %v12627_v61 }
 0xdbe   : > { %v12705_v20 = vshrl.u32 %v12668_v43, 16  ;;  %v12708_v44 = vshll.u32 %v12668_v43, 16  ;;  %v14083_v43 = vmul.bf16 %v28096_v57, %v14075_v31  ;;  %v13581_v57 = vshrl.u32 %v28169_v22, 16  ;;  %v23120_v31 = vld [vmem:[%s30041_s13 + $0x120] ss:$8 sps:$4 sm:$0xff]  }
 0xdbf   : > { %v12722_v28 = vshrl.u32 %v12669_v51, 16  ;;  %v12725_v10 = vshll.u32 %v12669_v51, 16  ;;  %v13598_v33 = vshrl.u32 %v13544_v17, 16  ;;  %v13601_v26 = vshll.u32 %v13544_v17, 16  ;;  %v23114_v51 = vld [vmem:[%s30041_s13 + $0x100] ss:$8 sps:$4 sm:$0xff]  }
 0xdc0   : > { %v12707_v6 = vrot.slane %v12705_v20, 1  ;;  %v12710_v42 = vrot.slane %v12708_v44, 2  ;;  %v23117_v20 = vld [vmem:[%s30041_s13 + $0x110] ss:$8 sps:$4 sm:$0xff]  }
 0xdc1   : > { %v14067_v11 = vld [vmem:[#allocation7 + $0x10] sm:$0xfe]  ;;  %v12724_v15 = vrot.slane %v12722_v28, 1  ;;  %v12727_v24 = vrot.slane %v12725_v10, 2  ;;  %v23119_v28 = vld [vmem:[%s30041_s13 + $0x114] ss:$8 sps:$4 sm:$0xff]  }
 0xdc2   : > { %v14068_v63 = vld [vmem:[#allocation7 + $0x18] sm:$0xfe]  ;;  %v14073_v32 = vpack.c.bf16 %v12600_v58, %v14067_v11  ;;  %v12711_v11 = vor.u32 %v12710_v42, %v12707_v6 }
 0xdc3   : > { %v14074_v37 = vpack.c.bf16 %v28156_v3, %v14068_v63  ;;  %v12624_v38 = vld [vmem:[#allocation7 + $0x20] sm:$0x7]  ;;  %v12728_v0 = vor.u32 %v12727_v24, %v12724_v15  ;;  %v13583_v15 = vrot.slane %v13581_v57, 3  ;;  %v14126_v24 = vshll.u32 %v14083_v43, 16 }
 0xdc4   : > { %v28173_v41 = vmul.bf16 %v28107_v9, %v14073_v32  ;;  %v12625_v5 = vld [vmem:[#allocation7 + $0x28] sm:$0x7]  ;;  %v12628_v40 = vpack.c.bf16 %v12624_v38, %v12624_v38  ;;  %v13533_v45 = vld [vmem:[#allocation7 + $0x20] sm:$0x7f]  ;;  %v13600_v38 = vrot.slane %v13598_v33, 3 }
 0xdc5   : > { %v28176_v8 = vmul.bf16 %v28107_v9, %v14074_v37  ;;  %v12629_v18 = vpack.c.bf16 %v12625_v5, %v12625_v5  ;;  %v12950_v62 = vld [vmem:[#allocation7 + $0x28] sm:$0xf]  ;;  %v12952_v9 = vpack.c.bf16 %v28150_v7, %v12948_v60  ;;  %v13537_v49 = vpack.c.bf16 %v13533_v45, %v13533_v45  ;;  %v15222_v60 = vpop.permute.xlu1 %15221 }
 0xdc6   : > { %v12670_v2 = vmul.bf16 %v28153_v30, %v12628_v40  ;;  %v12954_v46 = vpack.c.bf16 %v12950_v62, %v12950_v62  ;;  %v13534_v23 = vld [vmem:[#allocation7 + $0x28] sm:$0x7f]  ;;  %v13603_v5 = vrot.slane %v13601_v26, 4  ;;  %v13584_v62 = vshll.u32 %v28169_v22, 16 }
 0xdc7   : > { %v12671_v36 = vmul.bf16 %v28153_v30, %v12629_v18  ;;  %v13538_v35 = vpack.c.bf16 %v13534_v23, %v13534_v23  ;;  %v12995_v63 = vrot.slane %v12952_v9, 2  ;;  %v13545_v17 = vmul.bf16 %v28080_v59, %v13537_v49  ;;  %v15806_v49 = vpop.permute.xlu0 %15805 }
 0xdc8   : > { %v12713_v21 = vshrl.u32 %v12670_v2, 16  ;;  %v12716_v25 = vshll.u32 %v12670_v2, 16  ;;  %v12996_v61 = vrot.slane %v12954_v46, 2  ;;  %v14138_v2 = vshll.u32 %v14084_v1, 16 }
 0xdc9   : > { %v12730_v29 = vshrl.u32 %v12671_v36, 16  ;;  %v12733_v34 = vshll.u32 %v12671_v36, 16  ;;  %v13546_v32 = vmul.bf16 %v28080_v59, %v13538_v35  ;;  %v13604_v36 = vor.u32 %v13603_v5, %v13600_v38  ;;  %v15234_v42 = vpop.permute.xlu1 %15233 }
 0xdca   : > { %v12715_v50 = vrot.slane %v12713_v21, 1  ;;  %v12718_v4 = vrot.slane %v12716_v25, 2  ;;  %v12997_v18 = vsel %vm894_vm1, %v12995_v63, %v12996_v61  ;;  %v13589_v47 = vshrl.u32 %v13545_v17, 16 }
 0xdcb   : > { %v12732_v48 = vrot.slane %v12730_v29, 1  ;;  %v12735_v14 = vrot.slane %v12733_v34, 2  ;;  %v13606_v40 = vshrl.u32 %v13546_v32, 16  ;;  %v13609_v13 = vshll.u32 %v13546_v32, 16 }
 0xdcc   : > { %v12719_v58 = vor.u32 %v12718_v4, %v12715_v50  ;;  %v13586_v21 = vrot.slane %v13584_v62, 4  ;;  %v13592_v25 = vshll.u32 %v13545_v17, 16  ;;  %v14133_v46 = vshll.u32 %v28176_v8, 16  ;;  %v23129_v62 = vld [vmem:[%s30041_s13 + $0x150] ss:$8 sps:$4 sm:$0xff]  }
 0xdcd   : > { %v12736_v16 = vor.u32 %v12735_v14, %v12732_v48  ;;  %v13608_v59 = vrot.slane %v13606_v40, 3  ;;  %v13611_v44 = vrot.slane %v13609_v13, 4  ;;  %v15230_v29 = vrot.slane %v15222_v60, %v30163_v52  ;;  %v23125_v48 = vld [vmem:[%s30041_s13 + $0x134] ss:$8 sps:$4 sm:$0xff]   ;;  %v15817_v43 = vpop.permute.xlu1 %15816 }
 0xdce   : > { %v12720_v10 = vsel %vm10110_vm5, %v12711_v11, %v12719_v58  ;;  %v13591_v34 = vrot.slane %v13589_v47, 3  ;;  %v14140_v9 = vrot.slane %v14138_v2, 1  ;;  %v14121_v23 = vshll.u32 %v28173_v41, 16  ;;  %v23131_v13 = vld [vmem:[%s30041_s13 + $0x154] ss:$8 sps:$4 sm:$0xff]  }
 0xdcf   : > { %v12737_v37 = vsel %vm10110_vm5, %v12728_v0, %v12736_v16  ;;  %v13612_v22 = vor.u32 %v13611_v44, %v13608_v59  ;;  %v13594_v50 = vrot.slane %v13592_v25, 4  ;;  %v14131_v4 = vshrl.u32 %v28176_v8, 16  ;;  %v23123_v8 = vld [vmem:[%s30041_s13 + $0x130] ss:$8 sps:$4 sm:$0xff]   ;;  %v23132_v44 = vld [vmem:[%s30041_s13 + $0x160] ss:$8 sps:$4 sm:$0xff]  }
 0xdd0   : > { %12932 = vmatprep.mubr.bf16.mxu0 %v12737_v37  ;;  %v14135_v45 = vrot.slane %v14133_v46, 1  ;;  %v15242_v14 = vrot.slane %v15234_v42, %v30163_v52  ;;  %v14119_v1 = vshrl.u32 %v28173_v41, 16  ;;  %v14123_v0 = vrot.slane %v14121_v23, 1  ;;  %v23128_v41 = vld [vmem:[%s30041_s13 + $0x144] ss:$8 sps:$4 sm:$0xff]  }
 0xdd1   : > { %12933 = vmatmul.mubr.bf16.vlgmr.msra.gmra.mrb[104].mxu0 %v12720_v10  ;;  %v28209_v6 = vsel %vm10989_vm6, %v13604_v36, %v13612_v22  ;;  %v14128_v58 = vrot.slane %v14126_v24, 1  ;;  %v13587_v61 = vor.u32 %v13586_v21, %v13583_v15  ;;  %v13595_v35 = vor.u32 %v13594_v50, %v13591_v34  ;;  %v23126_v10 = vld [vmem:[%s30041_s13 + $0x140] ss:$8 sps:$4 sm:$0xff]   ;;  %v23137_v60 = vld [vmem:[%s30041_s13 + $0x174] ss:$8 sps:$4 sm:$0xff]  }
 0xdd2   : > { %13161 = vmatpush1.bf16.msra.mxu0 %v23114_v51  ;;  %13192 = vmatprep.mubr.bf16.mxu0 %v12997_v18  ;;  %v14136_v16 = vor.u32 %v14135_v45, %v14131_v4  ;;  %v28217_v33 = vcombine.low %v15230_v29, %v15242_v14  ;;  %v14124_v26 = vor.u32 %v14123_v0, %v14119_v1  ;;  %v23140_v36 = vld [vmem:[%s30041_s13 + $0x184] ss:$8 sps:$4 sm:$0xff]   ;;  %v23138_v15 = vld [vmem:[%s30041_s13 + $0x180] ss:$8 sps:$4 sm:$0xff]   ;;  %v23143_v47 = vld [vmem:[%s30041_s13 + $0x194] ss:$8 sps:$4 sm:$0xff]  }
 0xdd3   : > { %13162 = vmatprep.subr.bf16.mxu0 %v23119_v28  ;;  %v28223_v51 = vsel %vm10989_vm6, %v13587_v61, %v13595_v35  ;;  %v15814_v37 = vrot.slane %v15806_v49, %v30163_v52  ;;  %v15825_v38 = vrot.slane %v15817_v43, %v30163_v52  ;;  %v23141_v24 = vld [vmem:[%s30041_s13 + $0x190] ss:$8 sps:$4 sm:$0xff]   ;;  %v23146_v22 = vld [vmem:[%s30041_s13 + $0x1a4] ss:$8 sps:$4 sm:$0xff]   ;;  %v23144_v21 = vld [vmem:[%s30041_s13 + $0x1a0] ss:$8 sps:$4 sm:$0xff]  }
 0xdd4   : > { %v28226_v11 = vsel %vm11528_vm7, %v14136_v16, %v14140_v9  ;;  %v15249_v63 = vshrl.u32 %v28217_v33, 16  ;;  %v15252_v32 = vshll.u32 %v28217_v33, 16  ;;  %v28235_v28 = vsel %vm11528_vm7, %v14124_v26, %v14128_v58  ;;  %v23149_v25 = vld [vmem:[%s30041_s13 + $0x1b4] ss:$8 sps:$4 sm:$0xff]   ;;  %v23147_v46 = vld [vmem:[%s30041_s13 + $0x1b0] ss:$8 sps:$4 sm:$0xff]  }
 0xdd5   : > { %v28245_v40 = vcombine.low %v15814_v37, %v15825_v38  ;;  %v13210_v29 = vld [vmem:[#allocation7 + $0x28] sm:$0x1f]  ;;  %v13245_v34 = vrot.slane %v13243_v54, 5  ;;  %v13248_v9 = vrot.slane %v13246_v53, 6  ;;  %v23152_v23 = vld [vmem:[%s30041_s13 + $0x1c4] ss:$8 sps:$4 sm:$0xff]  }
 0xdd6   : > { %13163 = vmatpush1.bf16.msra.mxu0 %v23117_v20  ;;  %v16128_v5 = vrot.slane %v15249_v63, 4  ;;  %v16129_v17 = vrot.slane %v15252_v32, 5  ;;  %v23134_v20 = vld [vmem:[%s30041_s13 + $0x164] ss:$8 sps:$4 sm:$0xff]   ;;  %v13214_v42 = vpack.c.bf16 %v13210_v29, %v13210_v29  ;;  %v23150_v50 = vld [vmem:[%s30041_s13 + $0x1c0] ss:$8 sps:$4 sm:$0xff]  }
 0xdd7   : > { %13164 = vmatprep.subr.bf16.mxu0 %v23122_v27  ;;  %v15832_v52 = vshrl.u32 %v28245_v40, 16  ;;  %v15835_v57 = vshll.u32 %v28245_v40, 16  ;;  %v23135_v27 = vld [vmem:[%s30041_s13 + $0x170] ss:$8 sps:$4 sm:$0xff]   ;;  %v28312_v4 = vor.u32 %v13248_v9, %v13245_v34  ;;  %v23156_v61 = vld [vmem:[%s30041_s13 + $0x1e0] ss:$8 sps:$4 sm:$0xff]  }
 0xdd8   : > { %v28250_v18 = vor.u32 %v16129_v17, %v16128_v5  ;;  %v23153_v45 = vld [vmem:[%s30041_s13 + $0x1d0] ss:$8 sps:$4 sm:$0xff]   ;;  %v23161_v35 = vld [vmem:[%s30041_s13 + $0x1f4] ss:$8 sps:$4 sm:$0xff]   ;;  %v23164_v5 = vld [vmem:[%s30041_s13 + $0x204] ss:$8 sps:$4 sm:$0xff]  }
 0xdd9   : > { %v28259_v2 = vrot.slane %v15832_v52, 7  ;;  %v13254_v53 = vmul.bf16 %v28312_v4, %v13214_v42  ;;  %v12949_v1 = vld [vmem:[#allocation7 + $0x20] sm:$0xf]  ;;  %v12947_v16 = vld [vmem:[#allocation7] sm:$0xf0] }
 0xdda   : > { %13165 = vmatpush1.bf16.msra.mxu0 %v23120_v31  ;;  %v13208_v31 = vld [vmem:[#allocation7 + $0x8] sm:$0xe0]  ;;  %v12953_v49 = vpack.c.bf16 %v12949_v1, %v12949_v1  ;;  %v23159_v37 = vld [vmem:[%s30041_s13 + $0x1f0] ss:$8 sps:$4 sm:$0xff]   ;;  %v12951_v38 = vpack.c.bf16 %v28148_v19, %v12947_v16  ;;  %v23174_v29 = vld [vmem:[%s30041_s13 + $0x240] ss:$8 sps:$4 sm:$0xff]  }
 0xddb   : > { %13166 = vmatprep.subr.bf16.mxu0 %v23125_v48  ;;  %v28267_v59 = vor.u32 %v28259_v2, %v15835_v57  ;;  %v13212_v54 = vpack.c.bf16 %v28150_v7, %v13208_v31  ;;  %v23158_v48 = vld [vmem:[%s30041_s13 + $0x1e4] ss:$8 sps:$4 sm:$0xff]   ;;  %v13314_v0 = vshrl.u32 %v13254_v53, 16  ;;  %v13317_v58 = vshll.u32 %v13254_v53, 16  ;;  %v23179_v34 = vld [vmem:[%s30041_s13 + $0x254] ss:$8 sps:$4 sm:$0xff]  }
 0xddc   : > { %v23177_v9 = vld [vmem:[%s30041_s13 + $0x250] ss:$8 sps:$4 sm:$0xff]   ;;  %v23180_v31 = vld [vmem:[%s30041_s13 + $0x260] ss:$8 sps:$4 sm:$0xff]   ;;  %v23185_v42 = vld [vmem:[%s30041_s13 + $0x274] ss:$8 sps:$4 sm:$0xff]  }
 0xddd   : > { %v13252_v14 = vmul.bf16 %v28312_v4, %v13212_v54  ;;  %v13319_v43 = vrot.slane %v13317_v58, 3  ;;  %v23186_v54 = vld [vmem:[%s30041_s13 + $0x280] ss:$8 sps:$4 sm:$0xff]   ;;  %v23191_v53 = vld [vmem:[%s30041_s13 + $0x294] ss:$8 sps:$4 sm:$0xff]  }
 0xdde   : > { %13167 = vmatpush1.bf16.msra.mxu0 %v23123_v8  ;;  %v23197_v1 = vld [vmem:[%s30041_s13 + $0x2b4] ss:$8 sps:$4 sm:$0xff]   ;;  %v23195_v58 = vld [vmem:[%s30041_s13 + $0x2b0] ss:$8 sps:$4 sm:$0xff]  }
 0xddf   : > { %13168 = vmatprep.subr.bf16.mxu0 %v23128_v41  ;;  %v13306_v26 = vshrl.u32 %v13252_v14, 16  ;;  %v13309_v8 = vshll.u32 %v13252_v14, 16  ;;  %v13316_v41 = vrot.slane %v13314_v0, 2  ;;  %v23192_v14 = vld [vmem:[%s30041_s13 + $0x2a0] ss:$8 sps:$4 sm:$0xff]  }
 0xde0   : > { %v13209_v0 = vld [vmem:[#allocation7 + $0x20] sm:$0x1f] }
 0xde1   : > { %v13308_v17 = vrot.slane %v13306_v26, 2  ;;  %v13213_v16 = vpack.c.bf16 %v13209_v0, %v13209_v0  ;;  %v23198_v26 = vld [vmem:[%s30041_s13 + $0x2c0] ss:$8 sps:$4 sm:$0xff]   ;;  %v23239_v0 = vld [vmem:[%s30041_s13 + $0x394] ss:$8 sps:$4 sm:$0xff]  }
 0xde2   : > { %13169 = vmatpush1.bf16.msra.mxu0 %v23126_v10  ;;  %v13311_v10 = vrot.slane %v13309_v8, 3  ;;  %v23269_v7 = vld [vmem:[%s30041_s13 + $0x434] ss:$8 sps:$4 sm:$0xff]  }
 0xde3   : > { %13170 = vmatprep.subr.bf16.mxu0 %v23131_v13  ;;  %v12993_v13 = vrot.slane %v12953_v49, 2  ;;  %v23203_v49 = vld [vmem:[%s30041_s13 + $0x2d4] ss:$8 sps:$4 sm:$0xff]  }
 0xde4   : > { %v23587_v40 = vld [vmem:[%s30043_s15 + $0x1d4] ss:$8 sps:$4 sm:$0xff]  }
 0xde6   : > { %13171 = vmatpush1.bf16.msra.mxu0 %v23129_v62  ;;  %v13320_v62 = vor.u32 %v13319_v43, %v13316_v41  ;;  %v13253_v41 = vmul.bf16 %v28312_v4, %v13213_v16  ;;  %v23201_v43 = vld [vmem:[%s30041_s13 + $0x2d0] ss:$8 sps:$4 sm:$0xff]   ;;  %v23245_v16 = vld [vmem:[%s30041_s13 + $0x3b4] ss:$8 sps:$4 sm:$0xff]  }
 0xde7   : > { %13172 = vmatprep.subr.bf16.mxu0 %v23134_v20  ;;  %v12992_v20 = vrot.slane %v12951_v38, 2  ;;  %v23206_v38 = vld [vmem:[%s30041_s13 + $0x2e4] ss:$8 sps:$4 sm:$0xff]  }
 0xdea   : > { %13173 = vmatpush1.bf16.msra.mxu0 %v23132_v44  ;;  %v23162_v44 = vld [vmem:[%s30041_s13 + $0x200] ss:$8 sps:$4 sm:$0xff]  }
 0xdeb   : > { %13174 = vmatprep.subr.bf16.mxu0 %v23137_v60  ;;  %v13312_v60 = vor.u32 %v13311_v10, %v13308_v17  ;;  %v13300_v17 = vshll.u32 %v13253_v41, 16  ;;  %v23204_v10 = vld [vmem:[%s30041_s13 + $0x2e0] ss:$8 sps:$4 sm:$0xff]  }
 0xdee   : > { %13175 = vmatpush1.bf16.msra.mxu0 %v23135_v27  ;;  %v23167_v27 = vld [vmem:[%s30041_s13 + $0x214] ss:$8 sps:$4 sm:$0xff]  }
 0xdef   : > { %13176 = vmatprep.subr.bf16.mxu0 %v23140_v36  ;;  %v12994_v36 = vsel %vm894_vm1, %v12992_v20, %v12993_v13  ;;  %v23209_v20 = vld [vmem:[%s30041_s13 + $0x2f4] ss:$8 sps:$4 sm:$0xff]  }
 0xdf2   : > { %13177 = vmatpush1.bf16.msra.mxu0 %v23138_v15  ;;  %v13321_v15 = vsel %vm10696_vm8, %v13312_v60, %v13320_v62  ;;  %v13302_v60 = vrot.slane %v13300_v17, 3  ;;  %v23255_v17 = vld [vmem:[%s30041_s13 + $0x3f0] ss:$8 sps:$4 sm:$0xff]  }
 0xdf3   : > { %13178 = vmatprep.subr.bf16.mxu0 %v23143_v47  ;;  %v23165_v47 = vld [vmem:[%s30041_s13 + $0x210] ss:$8 sps:$4 sm:$0xff]  }
 0xdf6   : > { %13179 = vmatpush1.bf16.msra.mxu0 %v23141_v24  ;;  %v23170_v24 = vld [vmem:[%s30041_s13 + $0x224] ss:$8 sps:$4 sm:$0xff]  }
 0xdf7   : > { %13180 = vmatprep.subr.bf16.mxu0 %v23146_v22  ;;  %v23168_v22 = vld [vmem:[%s30041_s13 + $0x220] ss:$8 sps:$4 sm:$0xff]  }
 0xdfa   : > { %13181 = vmatpush1.bf16.msra.mxu0 %v23144_v21  ;;  %v23173_v21 = vld [vmem:[%s30041_s13 + $0x234] ss:$8 sps:$4 sm:$0xff]  }
 0xdfb   : > { %13182 = vmatprep.subr.bf16.mxu0 %v23149_v25  ;;  %v23171_v25 = vld [vmem:[%s30041_s13 + $0x230] ss:$8 sps:$4 sm:$0xff]  }
 0xdfe   : > { %13183 = vmatpush1.bf16.msra.mxu0 %v23147_v46  ;;  %v23176_v46 = vld [vmem:[%s30041_s13 + $0x244] ss:$8 sps:$4 sm:$0xff]  }
 0xdff   : > { %13184 = vmatprep.subr.bf16.mxu0 %v23152_v23  ;;  %v23182_v23 = vld [vmem:[%s30041_s13 + $0x264] ss:$8 sps:$4 sm:$0xff]  }
 0xe02   : > { %13185 = vmatpush1.bf16.msra.mxu0 %v23150_v50  ;;  %v23183_v50 = vld [vmem:[%s30041_s13 + $0x270] ss:$8 sps:$4 sm:$0xff]  }
 0xe03   : > { %13186 = vmatprep.subr.bf16.mxu0 %v23155_v12  ;;  %v23188_v12 = vld [vmem:[%s30041_s13 + $0x284] ss:$8 sps:$4 sm:$0xff]  }
 0xe06   : > { %13187 = vmatpush1.bf16.msra.mxu0 %v23153_v45  ;;  %v23189_v45 = vld [vmem:[%s30041_s13 + $0x290] ss:$8 sps:$4 sm:$0xff]  }
 0xe07   : > { %13188 = vmatprep.subr.bf16.mxu0 %v23158_v48  ;;  %v23194_v48 = vld [vmem:[%s30041_s13 + $0x2a4] ss:$8 sps:$4 sm:$0xff]  }
 0xe0a   : > { %13189 = vmatpush1.bf16.msra.mxu0 %v23156_v61  ;;  %v23200_v61 = vld [vmem:[%s30041_s13 + $0x2c4] ss:$8 sps:$4 sm:$0xff]  }
 0xe0b   : > { %13190 = vmatprep.subr.bf16.mxu0 %v23161_v35  ;;  %v13207_v35 = vld [vmem:[#allocation7] sm:$0xe0] }
 0xe0c   : > { %v13211_v8 = vpack.c.bf16 %v28148_v19, %v13207_v35  ;;  %v23240_v35 = vld [vmem:[%s30041_s13 + $0x3a0] ss:$8 sps:$4 sm:$0xff]  }
 0xe0e   : > { %13191 = vmatpush1.bf16.msra.mxu0 %v23159_v37  ;;  %v13251_v37 = vmul.bf16 %v28312_v4, %v13211_v8  ;;  %v23248_v8 = vld [vmem:[%s30041_s13 + $0x3c4] ss:$8 sps:$4 sm:$0xff]  }
 0xe0f   : > { %13484 = vmatprep.subr.bf16.mxu0 %v23164_v5  ;;  %v13297_v5 = vshrl.u32 %v13253_v41, 16  ;;  %v23251_v41 = vld [vmem:[%s30041_s13 + $0x3d4] ss:$8 sps:$4 sm:$0xff]  }
 0xe10   : > { %v13289_v13 = vshrl.u32 %v13251_v37, 16  ;;  %v13292_v62 = vshll.u32 %v13251_v37, 16  ;;  %v23254_v37 = vld [vmem:[%s30041_s13 + $0x3e4] ss:$8 sps:$4 sm:$0xff]  }
 0xe11   : > { %13193 = vmatmul.mubr.bf16.vlgmr.msra.gmra.mrb[104].mxu0 %v12994_v36 }
 0xe12   : > { %13485 = vmatpush1.bf16.msra.mxu0 %v23162_v44  ;;  %13516 = vmatprep.mubr.bf16.mxu0 %v13321_v15  ;;  %v13299_v44 = vrot.slane %v13297_v5, 2  ;;  %v13291_v36 = vrot.slane %v13289_v13, 2  ;;  %v13294_v15 = vrot.slane %v13292_v62, 3  ;;  %v23257_v5 = vld [vmem:[%s30041_s13 + $0x3f4] ss:$8 sps:$4 sm:$0xff]  }
 0xe13   : > { %13486 = vmatprep.subr.bf16.mxu0 %v23167_v27  ;;  %v23207_v27 = vld [vmem:[%s30041_s13 + $0x2f0] ss:$8 sps:$4 sm:$0xff]   ;;  %v23258_v13 = vld [vmem:[%s30041_s13 + $0x400] ss:$8 sps:$4 sm:$0xff]   ;;  %v23263_v62 = vld [vmem:[%s30041_s13 + $0x414] ss:$8 sps:$4 sm:$0xff]  }
 0xe16   : > { %13487 = vmatpush1.bf16.msra.mxu0 %v23165_v47  ;;  %v23212_v47 = vld [vmem:[%s30041_s13 + $0x304] ss:$8 sps:$4 sm:$0xff]  }
 0xe17   : > { %13488 = vmatprep.subr.bf16.mxu0 %v23170_v24  ;;  %v13303_v24 = vor.u32 %v13302_v60, %v13299_v44  ;;  %v23266_v44 = vld [vmem:[%s30041_s13 + $0x424] ss:$8 sps:$4 sm:$0xff]   ;;  %v23264_v60 = vld [vmem:[%s30041_s13 + $0x420] ss:$8 sps:$4 sm:$0xff]  }
 0xe1a   : > { %13489 = vmatpush1.bf16.msra.mxu0 %v23168_v22  ;;  %v13295_v22 = vor.u32 %v13294_v15, %v13291_v36  ;;  %v23275_v36 = vld [vmem:[%s30041_s13 + $0x454] ss:$8 sps:$4 sm:$0xff]   ;;  %v23273_v15 = vld [vmem:[%s30041_s13 + $0x450] ss:$8 sps:$4 sm:$0xff]  }
 0xe1b   : > { %13490 = vmatprep.subr.bf16.mxu0 %v23173_v21  ;;  %v23210_v21 = vld [vmem:[%s30041_s13 + $0x300] ss:$8 sps:$4 sm:$0xff]  }
 0xe1e   : > { %13491 = vmatpush1.bf16.msra.mxu0 %v23171_v25  ;;  %v23215_v25 = vld [vmem:[%s30041_s13 + $0x314] ss:$8 sps:$4 sm:$0xff]  }
 0xe1f   : > { %13492 = vmatprep.subr.bf16.mxu0 %v23176_v46  ;;  %v13304_v46 = vsel %vm10696_vm8, %v13295_v22, %v13303_v24  ;;  %v23276_v24 = vld [vmem:[%s30041_s13 + $0x460] ss:$8 sps:$4 sm:$0xff]   ;;  %v23281_v22 = vld [vmem:[%s30041_s13 + $0x474] ss:$8 sps:$4 sm:$0xff]  }
 0xe22   : > { %13493 = vmatpush1.bf16.msra.mxu0 %v23174_v29  ;;  %v23213_v29 = vld [vmem:[%s30041_s13 + $0x310] ss:$8 sps:$4 sm:$0xff]  }
 0xe23   : > { %13494 = vmatprep.subr.bf16.mxu0 %v23179_v34  ;;  %v23218_v34 = vld [vmem:[%s30041_s13 + $0x324] ss:$8 sps:$4 sm:$0xff]  }
 0xe26   : > { %13495 = vmatpush1.bf16.msra.mxu0 %v23177_v9  ;;  %v23216_v9 = vld [vmem:[%s30041_s13 + $0x320] ss:$8 sps:$4 sm:$0xff]  }
 0xe27   : > { %13496 = vmatprep.subr.bf16.mxu0 %v23182_v23  ;;  %v23221_v23 = vld [vmem:[%s30041_s13 + $0x334] ss:$8 sps:$4 sm:$0xff]  }
 0xe2a   : > { %13497 = vmatpush1.bf16.msra.mxu0 %v23180_v31  ;;  %v23224_v31 = vld [vmem:[%s30041_s13 + $0x344] ss:$8 sps:$4 sm:$0xff]  }
 0xe2b   : > { %13498 = vmatprep.subr.bf16.mxu0 %v23185_v42  ;;  %v23222_v42 = vld [vmem:[%s30041_s13 + $0x340] ss:$8 sps:$4 sm:$0xff]  }
 0xe2e   : > { %13499 = vmatpush1.bf16.msra.mxu0 %v23183_v50  ;;  %v23227_v50 = vld [vmem:[%s30041_s13 + $0x354] ss:$8 sps:$4 sm:$0xff]  }
 0xe2f   : > { %13500 = vmatprep.subr.bf16.mxu0 %v23188_v12  ;;  %v23225_v12 = vld [vmem:[%s30041_s13 + $0x350] ss:$8 sps:$4 sm:$0xff]  }
 0xe32   : > { %13501 = vmatpush1.bf16.msra.mxu0 %v23186_v54  ;;  %v23230_v54 = vld [vmem:[%s30041_s13 + $0x364] ss:$8 sps:$4 sm:$0xff]  }
 0xe33   : > { %13502 = vmatprep.subr.bf16.mxu0 %v23191_v53  ;;  %v23228_v53 = vld [vmem:[%s30041_s13 + $0x360] ss:$8 sps:$4 sm:$0xff]  }
 0xe36   : > { %13503 = vmatpush1.bf16.msra.mxu0 %v23189_v45  ;;  %v23233_v45 = vld [vmem:[%s30041_s13 + $0x374] ss:$8 sps:$4 sm:$0xff]  }
 0xe37   : > { %13504 = vmatprep.subr.bf16.mxu0 %v23194_v48  ;;  %v23231_v48 = vld [vmem:[%s30041_s13 + $0x370] ss:$8 sps:$4 sm:$0xff]  }
 0xe3a   : > { %13505 = vmatpush1.bf16.msra.mxu0 %v23192_v14  ;;  %v23236_v14 = vld [vmem:[%s30041_s13 + $0x384] ss:$8 sps:$4 sm:$0xff]  }
 0xe3b   : > { %13506 = vmatprep.subr.bf16.mxu0 %v23197_v1  ;;  %v23234_v1 = vld [vmem:[%s30041_s13 + $0x380] ss:$8 sps:$4 sm:$0xff]  }
 0xe3e   : > { %13507 = vmatpush1.bf16.msra.mxu0 %v23195_v58  ;;  %v23237_v58 = vld [vmem:[%s30041_s13 + $0x390] ss:$8 sps:$4 sm:$0xff]  }
 0xe3f   : > { %13508 = vmatprep.subr.bf16.mxu0 %v23200_v61  ;;  %v23242_v61 = vld [vmem:[%s30041_s13 + $0x3a4] ss:$8 sps:$4 sm:$0xff]  }
 0xe42   : > { %13509 = vmatpush1.bf16.msra.mxu0 %v23198_v26  ;;  %v23243_v26 = vld [vmem:[%s30041_s13 + $0x3b0] ss:$8 sps:$4 sm:$0xff]  }
 0xe43   : > { %13510 = vmatprep.subr.bf16.mxu0 %v23203_v49  ;;  %v23246_v49 = vld [vmem:[%s30041_s13 + $0x3c0] ss:$8 sps:$4 sm:$0xff]  }
 0xe46   : > { %13511 = vmatpush1.bf16.msra.mxu0 %v23201_v43  ;;  %v23249_v43 = vld [vmem:[%s30041_s13 + $0x3d0] ss:$8 sps:$4 sm:$0xff]  }
 0xe47   : > { %13512 = vmatprep.subr.bf16.mxu0 %v23206_v38  ;;  %v23252_v38 = vld [vmem:[%s30041_s13 + $0x3e0] ss:$8 sps:$4 sm:$0xff]  }
 0xe4a   : > { %13513 = vmatpush1.bf16.msra.mxu0 %v23204_v10  ;;  %v23260_v10 = vld [vmem:[%s30041_s13 + $0x404] ss:$8 sps:$4 sm:$0xff]  }
 0xe4b   : > { %13514 = vmatprep.subr.bf16.mxu0 %v23209_v20  ;;  %v23261_v20 = vld [vmem:[%s30041_s13 + $0x410] ss:$8 sps:$4 sm:$0xff]  }
 0xe4e   : > { %13515 = vmatpush1.bf16.msra.mxu0 %v23207_v27  ;;  %v23270_v27 = vld [vmem:[%s30041_s13 + $0x440] ss:$8 sps:$4 sm:$0xff]  }
 0xe4f   : > { %13776 = vmatprep.subr.bf16.mxu0 %v23212_v47  ;;  %v23278_v47 = vld [vmem:[%s30041_s13 + $0x464] ss:$8 sps:$4 sm:$0xff]  }
 0xe51   : > { %13517 = vmatmul.mubr.bf16.vlgmr.msra.gmra.mrb[104].mxu0 %v13304_v46  ;;  %v23282_v46 = vld [vmem:[%s30041_s13 + $0x480] ss:$8 sps:$4 sm:$0xff]  }
 0xe52   : > { %13777 = vmatpush1.bf16.msra.mxu0 %v23210_v21  ;;  %13808 = vmatprep.mubr.bf16.mxu0 %v28209_v6  ;;  %v23219_v6 = vld [vmem:[%s30041_s13 + $0x330] ss:$8 sps:$4 sm:$0xff]  }
 0xe53   : > { %13778 = vmatprep.subr.bf16.mxu0 %v23215_v25  ;;  %v23279_v21 = vld [vmem:[%s30041_s13 + $0x470] ss:$8 sps:$4 sm:$0xff]   ;;  %v23284_v25 = vld [vmem:[%s30041_s13 + $0x484] ss:$8 sps:$4 sm:$0xff]  }
 0xe56   : > { %13779 = vmatpush1.bf16.msra.mxu0 %v23213_v29  ;;  %v23287_v29 = vld [vmem:[%s30041_s13 + $0x494] ss:$8 sps:$4 sm:$0xff]  }
 0xe57   : > { %13780 = vmatprep.subr.bf16.mxu0 %v23218_v34  ;;  %v23285_v34 = vld [vmem:[%s30041_s13 + $0x490] ss:$8 sps:$4 sm:$0xff]  }
 0xe5a   : > { %13781 = vmatpush1.bf16.msra.mxu0 %v23216_v9  ;;  %v23290_v9 = vld [vmem:[%s30041_s13 + $0x4a4] ss:$8 sps:$4 sm:$0xff]  }
 0xe5b   : > { %13782 = vmatprep.subr.bf16.mxu0 %v23221_v23  ;;  %v23288_v23 = vld [vmem:[%s30041_s13 + $0x4a0] ss:$8 sps:$4 sm:$0xff]  }
 0xe5e   : > { %13783 = vmatpush1.bf16.msra.mxu0 %v23219_v6  ;;  %v23293_v6 = vld [vmem:[%s30041_s13 + $0x4b4] ss:$8 sps:$4 sm:$0xff]  }
 0xe5f   : > { %13784 = vmatprep.subr.bf16.mxu0 %v23224_v31  ;;  %v23291_v31 = vld [vmem:[%s30041_s13 + $0x4b0] ss:$8 sps:$4 sm:$0xff]  }
 0xe62   : > { %13785 = vmatpush1.bf16.msra.mxu0 %v23222_v42  ;;  %v23296_v42 = vld [vmem:[%s30041_s13 + $0x4c4] ss:$8 sps:$4 sm:$0xff]  }
 0xe63   : > { %13786 = vmatprep.subr.bf16.mxu0 %v23227_v50  ;;  %v23294_v50 = vld [vmem:[%s30041_s13 + $0x4c0] ss:$8 sps:$4 sm:$0xff]  }
 0xe66   : > { %13787 = vmatpush1.bf16.msra.mxu0 %v23225_v12  ;;  %v23299_v12 = vld [vmem:[%s30041_s13 + $0x4d4] ss:$8 sps:$4 sm:$0xff]  }
 0xe67   : > { %13788 = vmatprep.subr.bf16.mxu0 %v23230_v54  ;;  %v23297_v54 = vld [vmem:[%s30041_s13 + $0x4d0] ss:$8 sps:$4 sm:$0xff]  }
 0xe6a   : > { %13789 = vmatpush1.bf16.msra.mxu0 %v23228_v53  ;;  %v23302_v53 = vld [vmem:[%s30041_s13 + $0x4e4] ss:$8 sps:$4 sm:$0xff]  }
 0xe6b   : > { %13790 = vmatprep.subr.bf16.mxu0 %v23233_v45  ;;  %v23300_v45 = vld [vmem:[%s30041_s13 + $0x4e0] ss:$8 sps:$4 sm:$0xff]  }
 0xe6e   : > { %13791 = vmatpush1.bf16.msra.mxu0 %v23231_v48  ;;  %v23305_v48 = vld [vmem:[%s30041_s13 + $0x4f4] ss:$8 sps:$4 sm:$0xff]  }
 0xe6f   : > { %13792 = vmatprep.subr.bf16.mxu0 %v23236_v14  ;;  %v23303_v14 = vld [vmem:[%s30041_s13 + $0x4f0] ss:$8 sps:$4 sm:$0xff]  }
 0xe72   : > { %13793 = vmatpush1.bf16.msra.mxu0 %v23234_v1  ;;  %v23308_v1 = vld [vmem:[%s30041_s13 + $0x504] ss:$8 sps:$4 sm:$0xff]  }
 0xe73   : > { %13794 = vmatprep.subr.bf16.mxu0 %v23239_v0  ;;  %v13823_v0 = vld [vmem:[#allocation7 + $0x20] sm:$0xff] }
 0xe76   : > { %13795 = vmatpush1.bf16.msra.mxu0 %v23237_v58  ;;  %v23306_v58 = vld [vmem:[%s30041_s13 + $0x500] ss:$8 sps:$4 sm:$0xff]  }
 0xe77   : > { %13796 = vmatprep.subr.bf16.mxu0 %v23242_v61  ;;  %v13825_v61 = vpack.c.bf16 %v13823_v0, %v28148_v19  ;;  %v23312_v19 = vld [vmem:[%s30041_s13 + $0x520] ss:$8 sps:$4 sm:$0xff]  }
 0xe78   : > { %v23354_v0 = vld [vmem:[%s30041_s13 + $0x600] ss:$8 sps:$4 sm:$0xff]  }
 0xe7a   : > { %13797 = vmatpush1.bf16.msra.mxu0 %v23240_v35  ;;  %v23311_v35 = vld [vmem:[%s30041_s13 + $0x514] ss:$8 sps:$4 sm:$0xff]  }
 0xe7b   : > { %13798 = vmatprep.subr.bf16.mxu0 %v23245_v16  ;;  %v23309_v16 = vld [vmem:[%s30041_s13 + $0x510] ss:$8 sps:$4 sm:$0xff]  }
 0xe7e   : > { %13799 = vmatpush1.bf16.msra.mxu0 %v23243_v26  ;;  %v23314_v26 = vld [vmem:[%s30041_s13 + $0x524] ss:$8 sps:$4 sm:$0xff]  }
 0xe7f   : > { %13800 = vmatprep.subr.bf16.mxu0 %v23248_v8  ;;  %v23317_v8 = vld [vmem:[%s30041_s13 + $0x534] ss:$8 sps:$4 sm:$0xff]  }
 0xe82   : > { %13801 = vmatpush1.bf16.msra.mxu0 %v23246_v49  ;;  %v23320_v49 = vld [vmem:[%s30041_s13 + $0x544] ss:$8 sps:$4 sm:$0xff]  }
 0xe83   : > { %13802 = vmatprep.subr.bf16.mxu0 %v23251_v41  ;;  %v23318_v41 = vld [vmem:[%s30041_s13 + $0x540] ss:$8 sps:$4 sm:$0xff]  }
 0xe86   : > { %13803 = vmatpush1.bf16.msra.mxu0 %v23249_v43  ;;  %v23323_v43 = vld [vmem:[%s30041_s13 + $0x554] ss:$8 sps:$4 sm:$0xff]  }
 0xe87   : > { %13804 = vmatprep.subr.bf16.mxu0 %v23254_v37  ;;  %v23321_v37 = vld [vmem:[%s30041_s13 + $0x550] ss:$8 sps:$4 sm:$0xff]  }
 0xe8a   : > { %13805 = vmatpush1.bf16.msra.mxu0 %v23252_v38  ;;  %v23326_v38 = vld [vmem:[%s30041_s13 + $0x564] ss:$8 sps:$4 sm:$0xff]  }
 0xe8b   : > { %13806 = vmatprep.subr.bf16.mxu0 %v23257_v5  ;;  %v23324_v5 = vld [vmem:[%s30041_s13 + $0x560] ss:$8 sps:$4 sm:$0xff]  }
 0xe8e   : > { %13807 = vmatpush1.bf16.msra.mxu0 %v23255_v17  ;;  %v23329_v17 = vld [vmem:[%s30041_s13 + $0x574] ss:$8 sps:$4 sm:$0xff]  }
 0xe8f   : > { %14020 = vmatprep.subr.bf16.mxu0 %v23260_v10  ;;  %v23327_v10 = vld [vmem:[%s30041_s13 + $0x570] ss:$8 sps:$4 sm:$0xff]  }
 0xe91   : > { %13809 = vmatmul.mubr.bf16.vlgmr.msra.gmra.mrb[104].mxu0 %v28223_v51  ;;  %v23272_v51 = vld [vmem:[%s30041_s13 + $0x444] ss:$8 sps:$4 sm:$0xff]  }
 0xe92   : > { %14021 = vmatpush1.bf16.msra.mxu0 %v23258_v13  ;;  %14052 = vmatprep.mubr.bf16.mxu0 %v13826_v56  ;;  %v23267_v56 = vld [vmem:[%s30041_s13 + $0x430] ss:$8 sps:$4 sm:$0xff]   ;;  %v23332_v13 = vld [vmem:[%s30041_s13 + $0x584] ss:$8 sps:$4 sm:$0xff]  }
 0xe93   : > { %14022 = vmatprep.subr.bf16.mxu0 %v23263_v62  ;;  %v23330_v62 = vld [vmem:[%s30041_s13 + $0x580] ss:$8 sps:$4 sm:$0xff]  }
 0xe96   : > { %14023 = vmatpush1.bf16.msra.mxu0 %v23261_v20  ;;  %v23335_v20 = vld [vmem:[%s30041_s13 + $0x594] ss:$8 sps:$4 sm:$0xff]  }
 0xe97   : > { %14024 = vmatprep.subr.bf16.mxu0 %v23266_v44  ;;  %v23333_v44 = vld [vmem:[%s30041_s13 + $0x590] ss:$8 sps:$4 sm:$0xff]  }
 0xe9a   : > { %14025 = vmatpush1.bf16.msra.mxu0 %v23264_v60  ;;  %v23338_v60 = vld [vmem:[%s30041_s13 + $0x5a4] ss:$8 sps:$4 sm:$0xff]  }
 0xe9b   : > { %14026 = vmatprep.subr.bf16.mxu0 %v23269_v7  ;;  %v23336_v7 = vld [vmem:[%s30041_s13 + $0x5a0] ss:$8 sps:$4 sm:$0xff]  }
 0xe9e   : > { %14027 = vmatpush1.bf16.msra.mxu0 %v23267_v56  ;;  %v23341_v56 = vld [vmem:[%s30041_s13 + $0x5b4] ss:$8 sps:$4 sm:$0xff]  }
 0xe9f   : > { %14028 = vmatprep.subr.bf16.mxu0 %v23272_v51  ;;  %v23339_v51 = vld [vmem:[%s30041_s13 + $0x5b0] ss:$8 sps:$4 sm:$0xff]  }
 0xea2   : > { %14029 = vmatpush1.bf16.msra.mxu0 %v23270_v27  ;;  %v14352_v27 = vld [vmem:[#allocation7 + $0x18] sm:$0xf8] }
 0xea3   : > { %14030 = vmatprep.subr.bf16.mxu0 %v23275_v36  ;;  %v14354_v36 = vld [vmem:[#allocation7 + $0x38] sm:$0x7] }
 0xea6   : > { %14031 = vmatpush1.bf16.msra.mxu0 %v23273_v15  ;;  %v23344_v15 = vld [vmem:[%s30041_s13 + $0x5c4] ss:$8 sps:$4 sm:$0xff]  }
 0xea7   : > { %14032 = vmatprep.subr.bf16.mxu0 %v23278_v47  ;;  %v14356_v47 = vpack.c.bf16 %v28156_v3, %v14352_v27  ;;  %v23345_v3 = vld [vmem:[%s30041_s13 + $0x5d0] ss:$8 sps:$4 sm:$0xff]   ;;  %v23392_v27 = vld [vmem:[%s30041_s13 + $0x6c4] ss:$8 sps:$4 sm:$0xff]  }
 0xeaa   : > { %14033 = vmatpush1.bf16.msra.mxu0 %v23276_v24  ;;  %v14358_v24 = vpack.c.bf16 %v14354_v36, %v14354_v36  ;;  %v28813_v36 = vld [vmem:[#allocation7 + $0x20] sm:$0xff] }
 0xeab   : > { %14034 = vmatprep.subr.bf16.mxu0 %v23281_v22  ;;  %v23342_v22 = vld [vmem:[%s30041_s13 + $0x5c0] ss:$8 sps:$4 sm:$0xff]  }
 0xeae   : > { %14035 = vmatpush1.bf16.msra.mxu0 %v23279_v21  ;;  %v23347_v21 = vld [vmem:[%s30041_s13 + $0x5d4] ss:$8 sps:$4 sm:$0xff]  }
 0xeaf   : > { %14036 = vmatprep.subr.bf16.mxu0 %v23284_v25  ;;  %v14360_v25 = vmul.bf16 %v14356_v47, %v28153_v30 }
 0xeb2   : > { %14037 = vmatpush1.bf16.msra.mxu0 %v23282_v46  ;;  %v14362_v46 = vmul.bf16 %v14358_v24, %v28153_v30  ;;  %v23390_v24 = vld [vmem:[%s30041_s13 + $0x6c0] ss:$8 sps:$4 sm:$0xff]  }
 0xeb3   : > { %14038 = vmatprep.subr.bf16.mxu0 %v23287_v29  ;;  %v23350_v29 = vld [vmem:[%s30041_s13 + $0x5e4] ss:$8 sps:$4 sm:$0xff]  }
 0xeb6   : > { %14039 = vmatpush1.bf16.msra.mxu0 %v23285_v34  ;;  %v14414_v34 = vshrl.u32 %v14360_v25, 16 }
 0xeb7   : > { %14040 = vmatprep.subr.bf16.mxu0 %v23290_v9  ;;  %v14417_v9 = vshll.u32 %v14360_v25, 16 }
 0xeba   : > { %14041 = vmatpush1.bf16.msra.mxu0 %v23288_v23  ;;  %v14422_v23 = vshrl.u32 %v14362_v46, 16 }
 0xebb   : > { %14042 = vmatprep.subr.bf16.mxu0 %v23293_v6  ;;  %v14425_v6 = vshll.u32 %v14362_v46, 16  ;;  %v23393_v46 = vld [vmem:[%s30041_s13 + $0x6d0] ss:$8 sps:$4 sm:$0xff]  }
 0xebe   : > { %14043 = vmatpush1.bf16.msra.mxu0 %v23291_v31  ;;  %v23348_v31 = vld [vmem:[%s30041_s13 + $0x5e0] ss:$8 sps:$4 sm:$0xff]  }
 0xebf   : > { %14044 = vmatprep.subr.bf16.mxu0 %v23296_v42  ;;  %v23353_v42 = vld [vmem:[%s30041_s13 + $0x5f4] ss:$8 sps:$4 sm:$0xff]  }
 0xec2   : > { %14045 = vmatpush1.bf16.msra.mxu0 %v23294_v50  ;;  %v14416_v50 = vrot.slane %v14414_v34, 1 }
 0xec3   : > { %14046 = vmatprep.subr.bf16.mxu0 %v23299_v12  ;;  %v14419_v12 = vrot.slane %v14417_v9, 2 }
 0xec6   : > { %14047 = vmatpush1.bf16.msra.mxu0 %v23297_v54  ;;  %v14424_v54 = vrot.slane %v14422_v23, 1 }
 0xec7   : > { %14048 = vmatprep.subr.bf16.mxu0 %v23302_v53  ;;  %v14427_v53 = vrot.slane %v14425_v6, 2  ;;  %v23396_v6 = vld [vmem:[%s30041_s13 + $0x6e0] ss:$8 sps:$4 sm:$0xff]  }
 0xeca   : > { %14049 = vmatpush1.bf16.msra.mxu0 %v23300_v45  ;;  %v23351_v45 = vld [vmem:[%s30041_s13 + $0x5f0] ss:$8 sps:$4 sm:$0xff]  }
 0xecb   : > { %14050 = vmatprep.subr.bf16.mxu0 %v23305_v48  ;;  %v23356_v48 = vld [vmem:[%s30041_s13 + $0x604] ss:$8 sps:$4 sm:$0xff]  }
 0xece   : > { %14051 = vmatpush1.bf16.msra.mxu0 %v23303_v14  ;;  %v14420_v14 = vor.u32 %v14419_v12, %v14416_v50 }
 0xecf   : > { %14304 = vmatprep.subr.bf16.mxu0 %v23308_v1  ;;  %v14428_v1 = vor.u32 %v14427_v53, %v14424_v54 }
 0xed1   : > { %14053 = vmatmul.mubr.bf16.vlgmr.msra.gmra.mrb[104].mxu0 %v13825_v61  ;;  %v14429_v61 = vsel %vm10110_vm5, %v14420_v14, %v14428_v1  ;;  %v23399_v1 = vld [vmem:[%s30041_s13 + $0x6f0] ss:$8 sps:$4 sm:$0xff]  }
 0xed2   : > { %14305 = vmatpush1.bf16.msra.mxu0 %v23306_v58  ;;  %14336 = vmatprep.mubr.bf16.mxu0 %v28226_v11  ;;  %v23315_v11 = vld [vmem:[%s30041_s13 + $0x530] ss:$8 sps:$4 sm:$0xff]   ;;  %v23359_v58 = vld [vmem:[%s30041_s13 + $0x614] ss:$8 sps:$4 sm:$0xff]  }
 0xed3   : > { %14306 = vmatprep.subr.bf16.mxu0 %v23311_v35  ;;  %v23357_v35 = vld [vmem:[%s30041_s13 + $0x610] ss:$8 sps:$4 sm:$0xff]  }
 0xed6   : > { %14307 = vmatpush1.bf16.msra.mxu0 %v23309_v16  ;;  %v23362_v16 = vld [vmem:[%s30041_s13 + $0x624] ss:$8 sps:$4 sm:$0xff]  }
 0xed7   : > { %14308 = vmatprep.subr.bf16.mxu0 %v23314_v26  ;;  %v23360_v26 = vld [vmem:[%s30041_s13 + $0x620] ss:$8 sps:$4 sm:$0xff]  }
 0xeda   : > { %14309 = vmatpush1.bf16.msra.mxu0 %v23312_v19  ;;  %v23363_v19 = vld [vmem:[%s30041_s13 + $0x630] ss:$8 sps:$4 sm:$0xff]  }
 0xedb   : > { %14310 = vmatprep.subr.bf16.mxu0 %v23317_v8  ;;  %v23368_v8 = vld [vmem:[%s30041_s13 + $0x644] ss:$8 sps:$4 sm:$0xff]  }
 0xede   : > { %14311 = vmatpush1.bf16.msra.mxu0 %v23315_v11  ;;  %v23366_v11 = vld [vmem:[%s30041_s13 + $0x640] ss:$8 sps:$4 sm:$0xff]  }
 0xedf   : > { %14312 = vmatprep.subr.bf16.mxu0 %v23320_v49  ;;  %v23371_v49 = vld [vmem:[%s30041_s13 + $0x654] ss:$8 sps:$4 sm:$0xff]  }
 0xee2   : > { %14313 = vmatpush1.bf16.msra.mxu0 %v23318_v41  ;;  %v23369_v41 = vld [vmem:[%s30041_s13 + $0x650] ss:$8 sps:$4 sm:$0xff]  }
 0xee3   : > { %14314 = vmatprep.subr.bf16.mxu0 %v23323_v43  ;;  %v23374_v43 = vld [vmem:[%s30041_s13 + $0x664] ss:$8 sps:$4 sm:$0xff]  }
 0xee6   : > { %14315 = vmatpush1.bf16.msra.mxu0 %v23321_v37  ;;  %v23372_v37 = vld [vmem:[%s30041_s13 + $0x660] ss:$8 sps:$4 sm:$0xff]  }
 0xee7   : > { %14316 = vmatprep.subr.bf16.mxu0 %v23326_v38  ;;  %v23377_v38 = vld [vmem:[%s30041_s13 + $0x674] ss:$8 sps:$4 sm:$0xff]  }
 0xeea   : > { %14317 = vmatpush1.bf16.msra.mxu0 %v23324_v5  ;;  %v23375_v5 = vld [vmem:[%s30041_s13 + $0x670] ss:$8 sps:$4 sm:$0xff]  }
 0xeeb   : > { %14318 = vmatprep.subr.bf16.mxu0 %v23329_v17  ;;  %v23380_v17 = vld [vmem:[%s30041_s13 + $0x684] ss:$8 sps:$4 sm:$0xff]  }
 0xeee   : > { %14319 = vmatpush1.bf16.msra.mxu0 %v23327_v10  ;;  %v23378_v10 = vld [vmem:[%s30041_s13 + $0x680] ss:$8 sps:$4 sm:$0xff]  }
 0xeef   : > { %14320 = vmatprep.subr.bf16.mxu0 %v23332_v13  ;;  %v23383_v13 = vld [vmem:[%s30041_s13 + $0x694] ss:$8 sps:$4 sm:$0xff]  }
 0xef2   : > { %14321 = vmatpush1.bf16.msra.mxu0 %v23330_v62  ;;  %v23381_v62 = vld [vmem:[%s30041_s13 + $0x690] ss:$8 sps:$4 sm:$0xff]  }
 0xef3   : > { %14322 = vmatprep.subr.bf16.mxu0 %v23335_v20  ;;  %v23386_v20 = vld [vmem:[%s30041_s13 + $0x6a4] ss:$8 sps:$4 sm:$0xff]  }
 0xef6   : > { %14323 = vmatpush1.bf16.msra.mxu0 %v23333_v44  ;;  %v23384_v44 = vld [vmem:[%s30041_s13 + $0x6a0] ss:$8 sps:$4 sm:$0xff]  }
 0xef7   : > { %14324 = vmatprep.subr.bf16.mxu0 %v23338_v60  ;;  %v23389_v60 = vld [vmem:[%s30041_s13 + $0x6b4] ss:$8 sps:$4 sm:$0xff]  }
 0xefa   : > { %14325 = vmatpush1.bf16.msra.mxu0 %v23336_v7  ;;  %v14351_v7 = vld [vmem:[#allocation7 + $0x10] sm:$0xf8] }
 0xefb   : > { %14326 = vmatprep.subr.bf16.mxu0 %v23341_v56  ;;  %v14353_v56 = vld [vmem:[#allocation7 + $0x30] sm:$0x7] }
 0xefc   : > { %v14357_v47 = vpack.c.bf16 %v14353_v56, %v14353_v56  ;;  %v23414_v56 = vld [vmem:[%s30041_s13 + $0x740] ss:$8 sps:$4 sm:$0xff]  }
 0xefe   : > { %14327 = vmatpush1.bf16.msra.mxu0 %v23339_v51  ;;  %v23387_v51 = vld [vmem:[%s30041_s13 + $0x6b0] ss:$8 sps:$4 sm:$0xff]   ;;  %v14361_v25 = vmul.bf16 %v14357_v47, %v28153_v30 }
 0xeff   : > { %14328 = vmatprep.subr.bf16.mxu0 %v23344_v15  ;;  %v14355_v15 = vpack.c.bf16 %v28813_v36, %v14351_v7  ;;  %v23512_v7 = vld [vmem:[%s30043_s15 + $0x44] ss:$8 sps:$4 sm:$0xff]   ;;  %v23417_v47 = vld [vmem:[%s30041_s13 + $0x750] ss:$8 sps:$4 sm:$0xff]  }
 0xf00   : > { %v14405_v9 = vshrl.u32 %v14361_v25, 16  ;;  %v14408_v23 = vshll.u32 %v14361_v25, 16  ;;  %v23420_v25 = vld [vmem:[%s30041_s13 + $0x760] ss:$8 sps:$4 sm:$0xff]  }
 0xf02   : > { %14329 = vmatpush1.bf16.msra.mxu0 %v23342_v22  ;;  %v23395_v22 = vld [vmem:[%s30041_s13 + $0x6d4] ss:$8 sps:$4 sm:$0xff]   ;;  %v14407_v54 = vrot.slane %v14405_v9, 1  ;;  %v14410_v53 = vrot.slane %v14408_v23, 2  ;;  %v23428_v9 = vld [vmem:[%s30041_s13 + $0x784] ss:$8 sps:$4 sm:$0xff]  }
 0xf03   : > { %14330 = vmatprep.subr.bf16.mxu0 %v23347_v21  ;;  %v14359_v21 = vmul.bf16 %v14355_v15, %v28153_v30  ;;  %v14640_v30 = vld [vmem:[#allocation7 + $0x18] sm:$0xf0]  ;;  %v23515_v15 = vld [vmem:[%s30043_s15 + $0x54] ss:$8 sps:$4 sm:$0xff]   ;;  %v23519_v23 = vld [vmem:[%s30043_s15 + $0x70] ss:$8 sps:$4 sm:$0xff]  }
 0xf05   : > { %v14400_v34 = vshll.u32 %v14359_v21, 16 }
 0xf06   : > { %14331 = vmatpush1.bf16.msra.mxu0 %v23345_v3  ;;  %v23398_v3 = vld [vmem:[%s30041_s13 + $0x6e4] ss:$8 sps:$4 sm:$0xff]  }
 0xf07   : > { %14332 = vmatprep.subr.bf16.mxu0 %v23350_v29  ;;  %v14397_v29 = vshrl.u32 %v14359_v21, 16  ;;  %v14402_v12 = vrot.slane %v14400_v34, 2  ;;  %v23518_v21 = vld [vmem:[%s30043_s15 + $0x64] ss:$8 sps:$4 sm:$0xff]   ;;  %v23423_v34 = vld [vmem:[%s30041_s13 + $0x770] ss:$8 sps:$4 sm:$0xff]  }
 0xf09   : > { %v14399_v50 = vrot.slane %v14397_v29, 1  ;;  %v23521_v29 = vld [vmem:[%s30043_s15 + $0x74] ss:$8 sps:$4 sm:$0xff]  }
 0xf0a   : > { %14333 = vmatpush1.bf16.msra.mxu0 %v23348_v31  ;;  %v14642_v31 = vld [vmem:[#allocation7 + $0x38] sm:$0xf] }
 0xf0b   : > { %14334 = vmatprep.subr.bf16.mxu0 %v23353_v42  ;;  %v23401_v42 = vld [vmem:[%s30041_s13 + $0x6f4] ss:$8 sps:$4 sm:$0xff]   ;;  %v14646_v14 = vpack.c.bf16 %v14642_v31, %v14642_v31 }
 0xf0c   : > { %v23431_v31 = vld [vmem:[%s30041_s13 + $0x794] ss:$8 sps:$4 sm:$0xff]  }
 0xf0e   : > { %14335 = vmatpush1.bf16.msra.mxu0 %v23351_v45  ;;  %v28836_v45 = vld [vmem:[#allocation7 + $0x28] sm:$0xff] }
 0xf0f   : > { %14592 = vmatprep.subr.bf16.mxu0 %v23356_v48  ;;  %v14644_v48 = vpack.c.bf16 %v28836_v45, %v14640_v30  ;;  %v23426_v30 = vld [vmem:[%s30041_s13 + $0x780] ss:$8 sps:$4 sm:$0xff]  }
 0xf11   : > { %14337 = vmatmul.mubr.bf16.vlgmr.msra.gmra.mrb[104].mxu0 %v28235_v28  ;;  %v23365_v28 = vld [vmem:[%s30041_s13 + $0x634] ss:$8 sps:$4 sm:$0xff]  }
 0xf12   : > { %14593 = vmatpush1.bf16.msra.mxu0 %v23354_v0  ;;  %14624 = vmatprep.mubr.bf16.mxu0 %v14429_v61  ;;  %v23404_v0 = vld [vmem:[%s30041_s13 + $0x704] ss:$8 sps:$4 sm:$0xff]   ;;  %v14411_v61 = vor.u32 %v14410_v53, %v14407_v54  ;;  %v23525_v53 = vld [vmem:[%s30043_s15 + $0x90] ss:$8 sps:$4 sm:$0xff]  }
 0xf13   : > { %14594 = vmatprep.subr.bf16.mxu0 %v23359_v58  ;;  %v14403_v58 = vor.u32 %v14402_v12, %v14399_v50  ;;  %v23527_v50 = vld [vmem:[%s30043_s15 + $0x94] ss:$8 sps:$4 sm:$0xff]   ;;  %v23429_v12 = vld [vmem:[%s30041_s13 + $0x790] ss:$8 sps:$4 sm:$0xff]   ;;  %v23434_v54 = vld [vmem:[%s30041_s13 + $0x7a4] ss:$8 sps:$4 sm:$0xff]  }
 0xf16   : > { %14595 = vmatpush1.bf16.msra.mxu0 %v23357_v35  ;;  %v14687_v35 = vrot.slane %v14644_v48, 2  ;;  %v23432_v48 = vld [vmem:[%s30041_s13 + $0x7a0] ss:$8 sps:$4 sm:$0xff]  }
 0xf17   : > { %14596 = vmatprep.subr.bf16.mxu0 %v23362_v16  ;;  %v14688_v16 = vrot.slane %v14646_v14, 2  ;;  %v23437_v14 = vld [vmem:[%s30041_s13 + $0x7b4] ss:$8 sps:$4 sm:$0xff]  }
 0xf1a   : > { %14597 = vmatpush1.bf16.msra.mxu0 %v23360_v26  ;;  %v23402_v26 = vld [vmem:[%s30041_s13 + $0x700] ss:$8 sps:$4 sm:$0xff]  }
 0xf1b   : > { %14598 = vmatprep.subr.bf16.mxu0 %v23365_v28  ;;  %v23407_v28 = vld [vmem:[%s30041_s13 + $0x714] ss:$8 sps:$4 sm:$0xff]  }
 0xf1e   : > { %14599 = vmatpush1.bf16.msra.mxu0 %v23363_v19  ;;  %v14412_v19 = vsel %vm10110_vm5, %v14403_v58, %v14411_v61  ;;  %v14902_v58 = vld [vmem:[#allocation7 + $0x38] sm:$0x1f] }
 0xf1f   : > { %14600 = vmatprep.subr.bf16.mxu0 %v23368_v8  ;;  %v14689_v8 = vsel %vm894_vm1, %v14687_v35, %v14688_v16  ;;  %v23440_v61 = vld [vmem:[%s30041_s13 + $0x7c4] ss:$8 sps:$4 sm:$0xff]   ;;  %v14906_v16 = vpack.c.bf16 %v14902_v58, %v14902_v58 }
 0xf20   : > { %v23482_v58 = vld [vmem:[%s30041_s13 + $0x8a4] ss:$8 sps:$4 sm:$0xff]  }
 0xf22   : > { %14601 = vmatpush1.bf16.msra.mxu0 %v23366_v11  ;;  %v23498_v11 = vld [vmem:[%s30043_s15] ss:$8 sps:$4 sm:$0xff]  }
 0xf23   : > { %14602 = vmatprep.subr.bf16.mxu0 %v23371_v49  ;;  %v23500_v49 = vld [vmem:[%s30043_s15 + $0x4] ss:$8 sps:$4 sm:$0xff]  }
 0xf24   : > { %15489 = vmatprep.subr.bf16.mxu1 %v23500_v49  ;;  %v14641_v49 = vld [vmem:[#allocation7 + $0x30] sm:$0xf] }
 0xf25   : > { %15490 = vmatpush1.bf16.msra.mxu1 %v23498_v11  ;;  %v23446_v11 = vld [vmem:[%s30041_s13 + $0x7e4] ss:$8 sps:$4 sm:$0xff]  }
 0xf26   : > { %14603 = vmatpush1.bf16.msra.mxu0 %v23369_v41  ;;  %v23405_v41 = vld [vmem:[%s30041_s13 + $0x710] ss:$8 sps:$4 sm:$0xff]  }
 0xf27   : > { %14604 = vmatprep.subr.bf16.mxu0 %v23374_v43  ;;  %v23503_v43 = vld [vmem:[%s30043_s15 + $0x14] ss:$8 sps:$4 sm:$0xff]  }
 0xf28   : > { %15491 = vmatprep.subr.bf16.mxu1 %v23503_v43 }
 0xf2a   : > { %14605 = vmatpush1.bf16.msra.mxu0 %v23372_v37  ;;  %v23410_v37 = vld [vmem:[%s30041_s13 + $0x724] ss:$8 sps:$4 sm:$0xff]  }
 0xf2b   : > { %14606 = vmatprep.subr.bf16.mxu0 %v23377_v38  ;;  %v23501_v38 = vld [vmem:[%s30043_s15 + $0x10] ss:$8 sps:$4 sm:$0xff]  }
 0xf2c   : > { %15492 = vmatpush1.bf16.msra.mxu1 %v23501_v38 }
 0xf2e   : > { %14607 = vmatpush1.bf16.msra.mxu0 %v23375_v5  ;;  %v23506_v5 = vld [vmem:[%s30043_s15 + $0x24] ss:$8 sps:$4 sm:$0xff]  }
 0xf2f   : > { %14608 = vmatprep.subr.bf16.mxu0 %v23380_v17  ;;  %v23408_v17 = vld [vmem:[%s30041_s13 + $0x720] ss:$8 sps:$4 sm:$0xff]   ;;  %15493 = vmatprep.subr.bf16.mxu1 %v23506_v5 }
 0xf32   : > { %14609 = vmatpush1.bf16.msra.mxu0 %v23378_v10  ;;  %v23413_v10 = vld [vmem:[%s30041_s13 + $0x734] ss:$8 sps:$4 sm:$0xff]  }
 0xf33   : > { %14610 = vmatprep.subr.bf16.mxu0 %v23383_v13  ;;  %v23504_v13 = vld [vmem:[%s30043_s15 + $0x20] ss:$8 sps:$4 sm:$0xff]  }
 0xf34   : > { %15494 = vmatpush1.bf16.msra.mxu1 %v23504_v13 }
 0xf36   : > { %14611 = vmatpush1.bf16.msra.mxu0 %v23381_v62  ;;  %v23509_v62 = vld [vmem:[%s30043_s15 + $0x34] ss:$8 sps:$4 sm:$0xff]  }
 0xf37   : > { %14612 = vmatprep.subr.bf16.mxu0 %v23386_v20  ;;  %v23411_v20 = vld [vmem:[%s30041_s13 + $0x730] ss:$8 sps:$4 sm:$0xff]   ;;  %15495 = vmatprep.subr.bf16.mxu1 %v23509_v62  ;;  %v14645_v62 = vpack.c.bf16 %v14641_v49, %v14641_v49  ;;  %v23491_v49 = vld [vmem:[%s30041_s13 + $0x8d4] ss:$8 sps:$4 sm:$0xff]  }
 0xf3a   : > { %14613 = vmatpush1.bf16.msra.mxu0 %v23384_v44  ;;  %v23416_v44 = vld [vmem:[%s30041_s13 + $0x744] ss:$8 sps:$4 sm:$0xff]  }
 0xf3b   : > { %14614 = vmatprep.subr.bf16.mxu0 %v23389_v60  ;;  %v23507_v60 = vld [vmem:[%s30043_s15 + $0x30] ss:$8 sps:$4 sm:$0xff]  }
 0xf3c   : > { %15496 = vmatpush1.bf16.msra.mxu1 %v23507_v60 }
 0xf3d   : > { %15497 = vmatprep.subr.bf16.mxu1 %v23512_v7 }
 0xf3e   : > { %14615 = vmatpush1.bf16.msra.mxu0 %v23387_v51  ;;  %v23419_v51 = vld [vmem:[%s30041_s13 + $0x754] ss:$8 sps:$4 sm:$0xff]  }
 0xf3f   : > { %14616 = vmatprep.subr.bf16.mxu0 %v23392_v27  ;;  %v23510_v27 = vld [vmem:[%s30043_s15 + $0x40] ss:$8 sps:$4 sm:$0xff]  }
 0xf40   : > { %15498 = vmatpush1.bf16.msra.mxu1 %v23510_v27 }
 0xf41   : > { %15499 = vmatprep.subr.bf16.mxu1 %v23515_v15  ;;  %v14685_v15 = vrot.slane %v14645_v62, 2 }
 0xf42   : > { %14617 = vmatpush1.bf16.msra.mxu0 %v23390_v24  ;;  %v23422_v24 = vld [vmem:[%s30041_s13 + $0x764] ss:$8 sps:$4 sm:$0xff]  }
 0xf43   : > { %14618 = vmatprep.subr.bf16.mxu0 %v23395_v22  ;;  %v23513_v22 = vld [vmem:[%s30043_s15 + $0x50] ss:$8 sps:$4 sm:$0xff]  }
 0xf44   : > { %15500 = vmatpush1.bf16.msra.mxu1 %v23513_v22  ;;  %v23450_v22 = vld [vmem:[%s30041_s13 + $0x800] ss:$8 sps:$4 sm:$0xff]  }
 0xf45   : > { %15501 = vmatprep.subr.bf16.mxu1 %v23518_v21  ;;  %v23455_v21 = vld [vmem:[%s30041_s13 + $0x814] ss:$8 sps:$4 sm:$0xff]  }
 0xf46   : > { %14619 = vmatpush1.bf16.msra.mxu0 %v23393_v46  ;;  %v23425_v46 = vld [vmem:[%s30041_s13 + $0x774] ss:$8 sps:$4 sm:$0xff]  }
 0xf47   : > { %14620 = vmatprep.subr.bf16.mxu0 %v23398_v3  ;;  %v23516_v3 = vld [vmem:[%s30043_s15 + $0x60] ss:$8 sps:$4 sm:$0xff]  }
 0xf48   : > { %15502 = vmatpush1.bf16.msra.mxu1 %v23516_v3  ;;  %v23453_v3 = vld [vmem:[%s30041_s13 + $0x810] ss:$8 sps:$4 sm:$0xff]  }
 0xf49   : > { %15503 = vmatprep.subr.bf16.mxu1 %v23521_v29  ;;  %v23458_v29 = vld [vmem:[%s30041_s13 + $0x824] ss:$8 sps:$4 sm:$0xff]  }
 0xf4a   : > { %14621 = vmatpush1.bf16.msra.mxu0 %v23396_v6  ;;  %v23524_v6 = vld [vmem:[%s30043_s15 + $0x84] ss:$8 sps:$4 sm:$0xff]  }
 0xf4b   : > { %14622 = vmatprep.subr.bf16.mxu0 %v23401_v42  ;;  %v23522_v42 = vld [vmem:[%s30043_s15 + $0x80] ss:$8 sps:$4 sm:$0xff]  }
 0xf4c   : > { %15504 = vmatpush1.bf16.msra.mxu1 %v23519_v23  ;;  %v23459_v23 = vld [vmem:[%s30041_s13 + $0x830] ss:$8 sps:$4 sm:$0xff]  }
 0xf4d   : > { %15505 = vmatprep.subr.bf16.mxu1 %v23524_v6  ;;  %v23464_v6 = vld [vmem:[%s30041_s13 + $0x844] ss:$8 sps:$4 sm:$0xff]  }
 0xf4e   : > { %14623 = vmatpush1.bf16.msra.mxu0 %v23399_v1  ;;  %v23435_v1 = vld [vmem:[%s30041_s13 + $0x7b0] ss:$8 sps:$4 sm:$0xff]  }
 0xf4f   : > { %14852 = vmatprep.subr.bf16.mxu0 %v23404_v0  ;;  %v14900_v0 = vld [vmem:[#allocation7 + $0x18] sm:$0xe0] }
 0xf50   : > { %15506 = vmatpush1.bf16.msra.mxu1 %v23522_v42  ;;  %v14904_v35 = vpack.c.bf16 %v28836_v45, %v14900_v0  ;;  %v23441_v45 = vld [vmem:[%s30041_s13 + $0x7d0] ss:$8 sps:$4 sm:$0xff]  }
 0xf51   : > { %14625 = vmatmul.mubr.bf16.vlgmr.msra.gmra.mrb[104].mxu0 %v14412_v19  ;;  %15507 = vmatprep.subr.bf16.mxu1 %v23527_v50  ;;  %v23465_v42 = vld [vmem:[%s30041_s13 + $0x850] ss:$8 sps:$4 sm:$0xff]   ;;  %v23470_v50 = vld [vmem:[%s30041_s13 + $0x864] ss:$8 sps:$4 sm:$0xff]  }
 0xf52   : > { %14853 = vmatpush1.bf16.msra.mxu0 %v23402_v26  ;;  %14884 = vmatprep.mubr.bf16.mxu0 %v14689_v8  ;;  %v23438_v26 = vld [vmem:[%s30041_s13 + $0x7c0] ss:$8 sps:$4 sm:$0xff]   ;;  %v14908_v19 = vmul.bf16 %v14904_v35, %v28312_v4  ;;  %v14910_v8 = vmul.bf16 %v14906_v16, %v28312_v4  ;;  %v23477_v0 = vld [vmem:[%s30041_s13 + $0x890] ss:$8 sps:$4 sm:$0xff]   ;;  %v23485_v35 = vld [vmem:[%s30041_s13 + $0x8b4] ss:$8 sps:$4 sm:$0xff]  }
 0xf53   : > { %14854 = vmatprep.subr.bf16.mxu0 %v23407_v28  ;;  %v23443_v28 = vld [vmem:[%s30041_s13 + $0x7d4] ss:$8 sps:$4 sm:$0xff]   ;;  %v14899_v16 = vld [vmem:[#allocation7 + $0x10] sm:$0xe0] }
 0xf54   : > { %15508 = vmatpush1.bf16.msra.mxu1 %v23525_v53  ;;  %v14962_v43 = vshrl.u32 %v14908_v19, 16  ;;  %v14970_v38 = vshrl.u32 %v14910_v8, 16  ;;  %v14973_v5 = vshll.u32 %v14910_v8, 16  ;;  %v23471_v53 = vld [vmem:[%s30041_s13 + $0x870] ss:$8 sps:$4 sm:$0xff]   ;;  %v14903_v8 = vpack.c.bf16 %v28813_v36, %v14899_v16 }
 0xf56   : > { %14855 = vmatpush1.bf16.msra.mxu0 %v23405_v41  ;;  %v14639_v41 = vld [vmem:[#allocation7 + $0x10] sm:$0xf0]  ;;  %v14972_v60 = vrot.slane %v14970_v38, 2  ;;  %v14975_v7 = vrot.slane %v14973_v5, 3 }
 0xf57   : > { %14856 = vmatprep.subr.bf16.mxu0 %v23410_v37  ;;  %v14965_v37 = vshll.u32 %v14908_v19, 16  ;;  %v14643_v13 = vpack.c.bf16 %v28813_v36, %v14639_v41  ;;  %v23488_v19 = vld [vmem:[%s30041_s13 + $0x8c4] ss:$8 sps:$4 sm:$0xff]   ;;  %v14907_v41 = vmul.bf16 %v14903_v8, %v28312_v4  ;;  %v23489_v36 = vld [vmem:[%s30041_s13 + $0x8d0] ss:$8 sps:$4 sm:$0xff]  }
 0xf58   : > { %v15209_v8 = vld [vmem:[#allocation6] sm:$0xf8] }
 0xf59   : > { %v14684_v27 = vrot.slane %v14643_v13, 2  ;;  %v14945_v38 = vshrl.u32 %v14907_v41, 16  ;;  %v14948_v5 = vshll.u32 %v14907_v41, 16  ;;  %v23492_v13 = vld [vmem:[%s30041_s13 + $0x8e0] ss:$8 sps:$4 sm:$0xff]  }
 0xf5a   : > { %14857 = vmatpush1.bf16.msra.mxu0 %v23408_v17  ;;  %v23444_v17 = vld [vmem:[%s30041_s13 + $0x7e0] ss:$8 sps:$4 sm:$0xff]  }
 0xf5b   : > { %14858 = vmatprep.subr.bf16.mxu0 %v23413_v10  ;;  %v23449_v10 = vld [vmem:[%s30041_s13 + $0x7f4] ss:$8 sps:$4 sm:$0xff]   ;;  %v14947_v62 = vrot.slane %v14945_v38, 2 }
 0xf5e   : > { %14859 = vmatpush1.bf16.msra.mxu0 %v23411_v20  ;;  %v14964_v20 = vrot.slane %v14962_v43, 2 }
 0xf5f   : > { %14860 = vmatprep.subr.bf16.mxu0 %v23416_v44  ;;  %v14967_v44 = vrot.slane %v14965_v37, 3  ;;  %v23494_v37 = vld [vmem:[%s30041_s13 + $0x8e4] ss:$8 sps:$4 sm:$0xff]  }
 0xf62   : > { %14861 = vmatpush1.bf16.msra.mxu0 %v23414_v56  ;;  %v23447_v56 = vld [vmem:[%s30041_s13 + $0x7f0] ss:$8 sps:$4 sm:$0xff]  }
 0xf63   : > { %14862 = vmatprep.subr.bf16.mxu0 %v23419_v51  ;;  %v23452_v51 = vld [vmem:[%s30041_s13 + $0x804] ss:$8 sps:$4 sm:$0xff]  }
 0xf66   : > { %14863 = vmatpush1.bf16.msra.mxu0 %v23417_v47  ;;  %v14968_v47 = vor.u32 %v14967_v44, %v14964_v20  ;;  %v14950_v20 = vrot.slane %v14948_v5, 3 }
 0xf67   : > { %14864 = vmatprep.subr.bf16.mxu0 %v23422_v24  ;;  %v14976_v24 = vor.u32 %v14975_v7, %v14972_v60  ;;  %v23495_v7 = vld [vmem:[%s30041_s13 + $0x8f0] ss:$8 sps:$4 sm:$0xff]  }
 0xf6a   : > { %14865 = vmatpush1.bf16.msra.mxu0 %v23420_v25  ;;  %v14686_v25 = vsel %vm894_vm1, %v14684_v27, %v14685_v15  ;;  %v23528_v15 = vld [vmem:[%s30043_s15 + $0xa0] ss:$8 sps:$4 sm:$0xff]  }
 0xf6b   : > { %14866 = vmatprep.subr.bf16.mxu0 %v23425_v46  ;;  %v14977_v46 = vsel %vm10696_vm8, %v14968_v47, %v14976_v24  ;;  %v23530_v47 = vld [vmem:[%s30043_s15 + $0xa4] ss:$8 sps:$4 sm:$0xff]   ;;  %v23533_v24 = vld [vmem:[%s30043_s15 + $0xb4] ss:$8 sps:$4 sm:$0xff]  }
 0xf6c   : > { %15509 = vmatprep.subr.bf16.mxu1 %v23530_v47 }
 0xf6d   : > { %15510 = vmatpush1.bf16.msra.mxu1 %v23528_v15 }
 0xf6e   : > { %14867 = vmatpush1.bf16.msra.mxu0 %v23423_v34  ;;  %v23456_v34 = vld [vmem:[%s30041_s13 + $0x820] ss:$8 sps:$4 sm:$0xff]   ;;  %15511 = vmatprep.subr.bf16.mxu1 %v23533_v24 }
 0xf6f   : > { %14868 = vmatprep.subr.bf16.mxu0 %v23428_v9  ;;  %v23461_v9 = vld [vmem:[%s30041_s13 + $0x834] ss:$8 sps:$4 sm:$0xff]  }
 0xf72   : > { %14869 = vmatpush1.bf16.msra.mxu0 %v23426_v30  ;;  %v23462_v30 = vld [vmem:[%s30041_s13 + $0x840] ss:$8 sps:$4 sm:$0xff]  }
 0xf73   : > { %14870 = vmatprep.subr.bf16.mxu0 %v23431_v31  ;;  %v23467_v31 = vld [vmem:[%s30041_s13 + $0x854] ss:$8 sps:$4 sm:$0xff]  }
 0xf76   : > { %14871 = vmatpush1.bf16.msra.mxu0 %v23429_v12  ;;  %v23468_v12 = vld [vmem:[%s30041_s13 + $0x860] ss:$8 sps:$4 sm:$0xff]  }
 0xf77   : > { %14872 = vmatprep.subr.bf16.mxu0 %v23434_v54  ;;  %v23473_v54 = vld [vmem:[%s30041_s13 + $0x874] ss:$8 sps:$4 sm:$0xff]  }
 0xf7a   : > { %14873 = vmatpush1.bf16.msra.mxu0 %v23432_v48  ;;  %v23476_v48 = vld [vmem:[%s30041_s13 + $0x884] ss:$8 sps:$4 sm:$0xff]  }
 0xf7b   : > { %14874 = vmatprep.subr.bf16.mxu0 %v23437_v14  ;;  %v23474_v14 = vld [vmem:[%s30041_s13 + $0x880] ss:$8 sps:$4 sm:$0xff]  }
 0xf7e   : > { %14875 = vmatpush1.bf16.msra.mxu0 %v23435_v1  ;;  %v23479_v1 = vld [vmem:[%s30041_s13 + $0x894] ss:$8 sps:$4 sm:$0xff]  }
 0xf7f   : > { %14876 = vmatprep.subr.bf16.mxu0 %v23440_v61  ;;  %v23480_v61 = vld [vmem:[%s30041_s13 + $0x8a0] ss:$8 sps:$4 sm:$0xff]  }
 0xf82   : > { %14877 = vmatpush1.bf16.msra.mxu0 %v23438_v26  ;;  %v14901_v26 = vld [vmem:[#allocation7 + $0x30] sm:$0x1f] }
 0xf83   : > { %14878 = vmatprep.subr.bf16.mxu0 %v23443_v28  ;;  %v23483_v28 = vld [vmem:[%s30041_s13 + $0x8b0] ss:$8 sps:$4 sm:$0xff]  }
 0xf86   : > { %14879 = vmatpush1.bf16.msra.mxu0 %v23441_v45  ;;  %v14905_v45 = vpack.c.bf16 %v14901_v26, %v14901_v26 }
 0xf87   : > { %14880 = vmatprep.subr.bf16.mxu0 %v23446_v11  ;;  %v23486_v11 = vld [vmem:[%s30041_s13 + $0x8c0] ss:$8 sps:$4 sm:$0xff]  }
 0xf88   : > { %v14909_v43 = vmul.bf16 %v14905_v45, %v28312_v4  ;;  %v23497_v4 = vld [vmem:[%s30041_s13 + $0x8f4] ss:$8 sps:$4 sm:$0xff]  }
 0xf8a   : > { %14881 = vmatpush1.bf16.msra.mxu0 %v23444_v17  ;;  %v14953_v17 = vshrl.u32 %v14909_v43, 16 }
 0xf8b   : > { %14882 = vmatprep.subr.bf16.mxu0 %v23449_v10  ;;  %v14956_v10 = vshll.u32 %v14909_v43, 16 }
 0xf8c   : > { %v14955_v44 = vrot.slane %v14953_v17, 2 }
 0xf8d   : > { %v14958_v60 = vrot.slane %v14956_v10, 3 }
 0xf8e   : > { %14883 = vmatpush1.bf16.msra.mxu0 %v23447_v56  ;;  %v14951_v56 = vor.u32 %v14950_v20, %v14947_v62  ;;  %v15537_v20 = vld [vmem:[#allocation6 + $0x8] sm:$0xf0] }
 0xf8f   : > { %15140 = vmatprep.subr.bf16.mxu0 %v23452_v51  ;;  %v14959_v51 = vor.u32 %v14958_v60, %v14955_v44 }
 0xf91   : > { %14885 = vmatmul.mubr.bf16.vlgmr.msra.gmra.mrb[104].mxu0 %v14686_v25  ;;  %v14960_v27 = vsel %vm10696_vm8, %v14951_v56, %v14959_v51  ;;  %v23534_v25 = vld [vmem:[%s30043_s15 + $0xc0] ss:$8 sps:$4 sm:$0xff]  }
 0xf92   : > { %15141 = vmatpush1.bf16.msra.mxu0 %v23450_v22  ;;  %15172 = vmatprep.mubr.bf16.mxu0 %v14977_v46  ;;  %v23531_v22 = vld [vmem:[%s30043_s15 + $0xb0] ss:$8 sps:$4 sm:$0xff]   ;;  %v23539_v46 = vld [vmem:[%s30043_s15 + $0xd4] ss:$8 sps:$4 sm:$0xff]  }
 0xf93   : > { %15142 = vmatprep.subr.bf16.mxu0 %v23455_v21  ;;  %v23536_v21 = vld [vmem:[%s30043_s15 + $0xc4] ss:$8 sps:$4 sm:$0xff]   ;;  %15512 = vmatpush1.bf16.msra.mxu1 %v23531_v22  ;;  %v16661_v22 = vld [vmem:[#allocation6 + $0x38] sm:$0x1] }
 0xf94   : > { %15513 = vmatprep.subr.bf16.mxu1 %v23536_v21 }
 0xf96   : > { %15143 = vmatpush1.bf16.msra.mxu0 %v23453_v3  ;;  %v23537_v3 = vld [vmem:[%s30043_s15 + $0xd0] ss:$8 sps:$4 sm:$0xff]  }
 0xf97   : > { %15144 = vmatprep.subr.bf16.mxu0 %v23458_v29  ;;  %15514 = vmatpush1.bf16.msra.mxu1 %v23534_v25  ;;  %v23542_v29 = vld [vmem:[%s30043_s15 + $0xe4] ss:$8 sps:$4 sm:$0xff]  }
 0xf98   : > { %15515 = vmatprep.subr.bf16.mxu1 %v23539_v46 }
 0xf9a   : > { %15145 = vmatpush1.bf16.msra.mxu0 %v23456_v34  ;;  %v23540_v34 = vld [vmem:[%s30043_s15 + $0xe0] ss:$8 sps:$4 sm:$0xff]  }
 0xf9b   : > { %15146 = vmatprep.subr.bf16.mxu0 %v23461_v9  ;;  %15516 = vmatpush1.bf16.msra.mxu1 %v23537_v3  ;;  %v23545_v9 = vld [vmem:[%s30043_s15 + $0xf4] ss:$8 sps:$4 sm:$0xff]  }
 0xf9c   : > { %15517 = vmatprep.subr.bf16.mxu1 %v23542_v29  ;;  %v16660_v29 = vld [vmem:[#allocation6 + $0x30] sm:$0x1] }
 0xf9e   : > { %15147 = vmatpush1.bf16.msra.mxu0 %v23459_v23  ;;  %v23543_v23 = vld [vmem:[%s30043_s15 + $0xf0] ss:$8 sps:$4 sm:$0xff]  }
 0xf9f   : > { %15148 = vmatprep.subr.bf16.mxu0 %v23464_v6  ;;  %15518 = vmatpush1.bf16.msra.mxu1 %v23540_v34  ;;  %v23548_v6 = vld [vmem:[%s30043_s15 + $0x104] ss:$8 sps:$4 sm:$0xff]  }
 0xfa0   : > { %15519 = vmatprep.subr.bf16.mxu1 %v23545_v9 }
 0xfa2   : > { %15149 = vmatpush1.bf16.msra.mxu0 %v23462_v30  ;;  %v12608_v30 = vld [vmem:[%s30042_s14] sm:$0x3] }
 0xfa3   : > { %15150 = vmatprep.subr.bf16.mxu0 %v23467_v31  ;;  %15520 = vmatpush1.bf16.msra.mxu1 %v23543_v23  ;;  %v12613_v31 = vrot.slane %v12608_v30, %v27133_v55 }
 0xfa4   : > { %15749 = vmatprep.subr.bf16.mxu1 %v23548_v6 }
 0xfa6   : > { %15151 = vmatpush1.bf16.msra.mxu0 %v23465_v42  ;;  %v12617_v42 = vrot.slane %v12608_v30, %v27139_v39 }
 0xfa7   : > { %15152 = vmatprep.subr.bf16.mxu0 %v23470_v50 }
 0xfaa   : > { %15153 = vmatpush1.bf16.msra.mxu0 %v23468_v12 }
 0xfab   : > { %15154 = vmatprep.subr.bf16.mxu0 %v23473_v54 }
 0xfae   : > { %15155 = vmatpush1.bf16.msra.mxu0 %v23471_v53  ;;  %v15251_v53 = vrot.slane %v15249_v63, 6 }
 0xfaf   : > { %15156 = vmatprep.subr.bf16.mxu0 %v23476_v48  ;;  %v15254_v48 = vrot.slane %v15252_v32, 7  ;;  %v16120_v32 = vld [vmem:[#allocation6] sm:$0x80] }
 0xfb1   : > { %v29159_v45 = vor.u32 %v15254_v48, %v15251_v53  ;;  %v16665_v48 = vpack.c.bf16 %v16661_v22, %v16661_v22 }
 0xfb2   : > { %15157 = vmatpush1.bf16.msra.mxu0 %v23474_v14 }
 0xfb3   : > { %15158 = vmatprep.subr.bf16.mxu0 %v23479_v1 }
 0xfb6   : > { %15159 = vmatpush1.bf16.msra.mxu0 %v23477_v0 }
 0xfb7   : > { %15160 = vmatprep.subr.bf16.mxu0 %v23482_v58 }
 0xfba   : > { %15161 = vmatpush1.bf16.msra.mxu0 %v23480_v61 }
 0xfbb   : > { %15162 = vmatprep.subr.bf16.mxu0 %v23485_v35  ;;  %v15210_v35 = vld [vmem:[#allocation6 + $0x8] sm:$0xf8] }
 0xfbe   : > { %15163 = vmatpush1.bf16.msra.mxu0 %v23483_v28  ;;  %v16121_v28 = vld [vmem:[#allocation6 + $0x8] sm:$0x80] }
 0xfbf   : > { %15164 = vmatprep.subr.bf16.mxu0 %v23488_v19 }
 0xfc2   : > { %15165 = vmatpush1.bf16.msra.mxu0 %v23486_v11 }
 0xfc3   : > { %15166 = vmatprep.subr.bf16.mxu0 %v23491_v49 }
 0xfc6   : > { %15167 = vmatpush1.bf16.msra.mxu0 %v23489_v36 }
 0xfc7   : > { %15168 = vmatprep.subr.bf16.mxu0 %v23494_v37 }
 0xfca   : > { %15169 = vmatpush1.bf16.msra.mxu0 %v23492_v13 }
 0xfcb   : > { %15170 = vmatprep.subr.bf16.mxu0 %v23497_v4 }
 0xfce   : > { %15171 = vmatpush1.bf16.msra.mxu0 %v23495_v7 }
 0xfd1   : > { %15173 = vmatmul.mubr.bf16.vlgmr.msra.gmra.mrb[104].mxu0 %v14960_v27 }
0x10a4   : > { %v15174_v50 = vpop.f32.mrb[104].mxu0 }
0x10a5   : > { %v21719_v12 = vadd.f32 %v15174_v50, %v12613_v31  ;;  %v15176_v54 = vpop.f32.mrb[105].mxu0 }
0x10a6   : > { %v21720_v14 = vadd.f32 %v15176_v54, %v12617_v42  ;;  %v15178_v1 = vpop.f32.mrb[106].mxu0 }
0x10a7   : > { %v29154_v0 = vmax.f32 %v21719_v12, 0.0  ;;  %v21721_v58 = vadd.f32 %v15178_v1, %v12613_v31  ;;  %v15180_v61 = vpop.f32.mrb[107].mxu0 }
0x10a8   : > { %v29156_v16 = vmax.f32 %v21720_v14, 0.0  ;;  %v21722_v26 = vadd.f32 %v15180_v61, %v12617_v42  ;;  %v16664_v14 = vpack.c.bf16 %v16660_v29, %v16660_v29 }
0x10a9   : > { %15191 = vst [vmem:[#allocation6 + $0x10] sm:$0xff] %v29154_v0  ;;  %v15189_v19 = vmax.f32 %v21721_v58, 0.0  ;;  %v15215_v49 = vpack.c.bf16 %v29154_v0, %v15209_v8  ;;  %v16124_v43 = vpack.c.bf16 %v29154_v0, %v16120_v32 }
0x10aa   : > { %15192 = vst [vmem:[#allocation6 + $0x18] sm:$0xff] %v29156_v16  ;;  %v15190_v33 = vmax.f32 %v21722_v26, 0.0  ;;  %v15216_v63 = vpack.c.bf16 %v29156_v16, %v15210_v35  ;;  %v16125_v11 = vpack.c.bf16 %v29156_v16, %v16121_v28  ;;  %v15541_v24 = vpack.c.bf16 %v29156_v16, %v15537_v20 }
0x10ab   : > { %15193 = vst [vmem:[#allocation6 + $0x20] sm:$0xff] %v15189_v19  ;;  %v15257_v38 = vmul.bf16 %v29159_v45, %v15215_v49  ;;  %v29173_v5 = vmul.bf16 %v28250_v18, %v16124_v43  ;;  %v16673_v20 = vmul.bf16 %v28259_v2, %v16665_v48 }
0x10ac   : > { %15194 = vst [vmem:[#allocation6 + $0x28] sm:$0xff] %v15190_v33  ;;  %v16133_v41 = vmul.bf16 %v28250_v18, %v16125_v11  ;;  %v29168_v36 = vpack.c.bf16 %v15190_v33, %v29156_v16  ;;  %v15258_v37 = vmul.bf16 %v29159_v45, %v15216_v63  ;;  %v23546_v33 = vld [vmem:[%s30043_s15 + $0x100] ss:$8 sps:$4 sm:$0xff]   ;;  %v15584_v32 = vrot.slane %v15541_v24, 2 }
0x10ad   : > { %v15294_v60 = vshrl.u32 %v15257_v38, 16  ;;  %v15297_v51 = vshll.u32 %v15257_v38, 16  ;;  %v16170_v8 = vshrl.u32 %v29173_v5, 16 }
0x10ae   : > { %v15311_v17 = vshrl.u32 %v15258_v37, 16  ;;  %v15314_v4 = vshll.u32 %v15258_v37, 16  ;;  %v16187_v50 = vshrl.u32 %v16133_v41, 16  ;;  %v16190_v35 = vshll.u32 %v16133_v41, 16  ;;  %v23551_v37 = vld [vmem:[%s30043_s15 + $0x114] ss:$8 sps:$4 sm:$0xff]  }
0x10af   : > { %v15296_v23 = vrot.slane %v15294_v60, 1  ;;  %v15299_v30 = vrot.slane %v15297_v51, 2  ;;  %v16173_v51 = vshll.u32 %v29173_v5, 16 }
0x10b0   : > { %v15313_v47 = vrot.slane %v15311_v17, 1  ;;  %v15316_v21 = vrot.slane %v15314_v4, 2  ;;  %v16189_v11 = vrot.slane %v16187_v50, 3  ;;  %v16192_v41 = vrot.slane %v16190_v35, 4 }
0x10b1   : > { %v15300_v63 = vor.u32 %v15299_v30, %v15296_v23  ;;  %v23552_v30 = vld [vmem:[%s30043_s15 + $0x120] ss:$8 sps:$4 sm:$0xff]  }
0x10b2   : > { %v15213_v10 = vld [vmem:[#allocation6 + $0x20] sm:$0x7]  ;;  %v15317_v1 = vor.u32 %v15316_v21, %v15313_v47  ;;  %v23554_v21 = vld [vmem:[%s30043_s15 + $0x124] ss:$8 sps:$4 sm:$0xff]  }
0x10b3   : > { %v15214_v13 = vld [vmem:[#allocation6 + $0x28] sm:$0x7]  ;;  %v15217_v62 = vpack.c.bf16 %v15213_v10, %v15213_v10  ;;  %v16122_v12 = vld [vmem:[#allocation6 + $0x20] sm:$0x7f] }
0x10b4   : > { %v15218_v44 = vpack.c.bf16 %v15214_v13, %v15214_v13  ;;  %v16123_v7 = vld [vmem:[#allocation6 + $0x28] sm:$0x7f]  ;;  %v16126_v19 = vpack.c.bf16 %v16122_v12, %v16122_v12  ;;  %v29188_v10 = vld [vmem:[#allocation6 + $0x20] sm:$0xff]  ;;  %v16727_v12 = vshll.u32 %v16673_v20, 16 }
0x10b5   : > { %v15259_v56 = vmul.bf16 %v29159_v45, %v15217_v62  ;;  %v15539_v27 = vld [vmem:[#allocation6 + $0x28] sm:$0xf]  ;;  %v16127_v3 = vpack.c.bf16 %v16123_v7, %v16123_v7 }
0x10b6   : > { %v15260_v15 = vmul.bf16 %v29159_v45, %v15218_v44  ;;  %v15543_v6 = vpack.c.bf16 %v15539_v27, %v15539_v27  ;;  %v16134_v17 = vmul.bf16 %v28250_v18, %v16126_v19  ;;  %v29190_v13 = vld [vmem:[#allocation6 + $0x28] sm:$0xff]  ;;  %v16656_v44 = vld [vmem:[#allocation6 + $0x10] sm:$0xfe]  ;;  %v16657_v27 = vld [vmem:[#allocation6 + $0x18] sm:$0xfe] }
0x10b7   : > { %v15302_v25 = vshrl.u32 %v15259_v56, 16  ;;  %v15305_v46 = vshll.u32 %v15259_v56, 16  ;;  %v16135_v61 = vmul.bf16 %v28250_v18, %v16127_v3  ;;  %v16172_v56 = vrot.slane %v16170_v8, 3  ;;  %v23549_v18 = vld [vmem:[%s30043_s15 + $0x110] ss:$8 sps:$4 sm:$0xff]  }
0x10b8   : > { %v15319_v34 = vshrl.u32 %v15260_v15, 16  ;;  %v15322_v9 = vshll.u32 %v15260_v15, 16  ;;  %v15585_v28 = vrot.slane %v15543_v6, 2  ;;  %v16178_v15 = vshrl.u32 %v16134_v17, 16  ;;  %v23573_v20 = vld [vmem:[%s30043_s15 + $0x190] ss:$8 sps:$4 sm:$0xff]  }
0x10b9   : > { %v15304_v31 = vrot.slane %v15302_v25, 1  ;;  %v15307_v42 = vrot.slane %v15305_v46, 2  ;;  %v16195_v49 = vshrl.u32 %v16135_v61, 16  ;;  %v16198_v38 = vshll.u32 %v16135_v61, 16  ;;  %v23555_v61 = vld [vmem:[%s30043_s15 + $0x130] ss:$8 sps:$4 sm:$0xff]  }
0x10ba   : > { %v15321_v54 = vrot.slane %v15319_v34, 1  ;;  %v15324_v53 = vrot.slane %v15322_v9, 2  ;;  %v15586_v60 = vsel %vm894_vm1, %v15584_v32, %v15585_v28  ;;  %v16181_v47 = vshll.u32 %v16134_v17, 16  ;;  %v23560_v28 = vld [vmem:[%s30043_s15 + $0x144] ss:$8 sps:$4 sm:$0xff]  }
0x10bb   : > { %v15308_v58 = vor.u32 %v15307_v42, %v15304_v31  ;;  %v16197_v62 = vrot.slane %v16195_v49, 3  ;;  %v16200_v7 = vrot.slane %v16198_v38, 4  ;;  %v16663_v24 = vpack.c.bf16 %v29190_v13, %v16657_v27  ;;  %v23558_v32 = vld [vmem:[%s30043_s15 + $0x140] ss:$8 sps:$4 sm:$0xff]   ;;  %v23561_v49 = vld [vmem:[%s30043_s15 + $0x150] ss:$8 sps:$4 sm:$0xff]  }
0x10bc   : > { %v15325_v26 = vor.u32 %v15324_v53, %v15321_v54  ;;  %v16662_v22 = vpack.c.bf16 %v29188_v10, %v16656_v44  ;;  %v16193_v25 = vor.u32 %v16192_v41, %v16189_v11  ;;  %v16175_v46 = vrot.slane %v16173_v51, 4  ;;  %v23563_v11 = vld [vmem:[%s30043_s15 + $0x154] ss:$8 sps:$4 sm:$0xff]   ;;  %v23567_v38 = vld [vmem:[%s30043_s15 + $0x170] ss:$8 sps:$4 sm:$0xff]  }
0x10bd   : > { %v15309_v4 = vsel %vm10110_vm5, %v15300_v63, %v15308_v58  ;;  %v16201_v5 = vor.u32 %v16200_v7, %v16197_v62  ;;  %v16672_v3 = vmul.bf16 %v28259_v2, %v16664_v14  ;;  %v16180_v29 = vrot.slane %v16178_v15, 3  ;;  %v23557_v2 = vld [vmem:[%s30043_s15 + $0x134] ss:$8 sps:$4 sm:$0xff]   ;;  %v23572_v17 = vld [vmem:[%s30043_s15 + $0x184] ss:$8 sps:$4 sm:$0xff]  }
0x10be   : > { %v15326_v43 = vsel %vm10110_vm5, %v15317_v1, %v15325_v26  ;;  %v16183_v34 = vrot.slane %v16181_v47, 4  ;;  %v16671_v9 = vmul.bf16 %v28267_v59, %v16663_v24  ;;  %v16670_v23 = vmul.bf16 %v28267_v59, %v16662_v22  ;;  %v23569_v41 = vld [vmem:[%s30043_s15 + $0x174] ss:$8 sps:$4 sm:$0xff]   ;;  %v23578_v44 = vld [vmem:[%s30043_s15 + $0x1a4] ss:$8 sps:$4 sm:$0xff]  }
0x10bf   : > { %15521 = vmatprep.mubr.bf16.mxu1 %v15326_v43  ;;  %v29208_v6 = vsel %vm10989_vm6, %v16193_v25, %v16201_v5  ;;  %v16176_v31 = vor.u32 %v16175_v46, %v16172_v56  ;;  %v16715_v53 = vshll.u32 %v16672_v3, 16  ;;  %v16729_v26 = vrot.slane %v16727_v12, 1  ;;  %v23566_v43 = vld [vmem:[%s30043_s15 + $0x164] ss:$8 sps:$4 sm:$0xff]   ;;  %v23575_v62 = vld [vmem:[%s30043_s15 + $0x194] ss:$8 sps:$4 sm:$0xff]  }
0x10c0   : > { %15522 = vmatmul.mubr.bf16.vlgmr.msra.gmra.mrb[36].mxu1 %v15309_v4  ;;  %v16184_v42 = vor.u32 %v16183_v34, %v16180_v29  ;;  %v16722_v50 = vshll.u32 %v16671_v9, 16  ;;  %v16710_v54 = vshll.u32 %v16670_v23, 16  ;;  %v16720_v48 = vshrl.u32 %v16671_v9, 16  ;;  %v23570_v4 = vld [vmem:[%s30043_s15 + $0x180] ss:$8 sps:$4 sm:$0xff]  }
0x10c1   : > { %15750 = vmatpush1.bf16.msra.mxu1 %v23546_v33  ;;  %15781 = vmatprep.mubr.bf16.mxu1 %v15586_v60  ;;  %v16708_v1 = vshrl.u32 %v16670_v23, 16  ;;  %v16717_v8 = vrot.slane %v16715_v53, 1  ;;  %v23576_v60 = vld [vmem:[%s30043_s15 + $0x1a0] ss:$8 sps:$4 sm:$0xff]   ;;  %v23581_v7 = vld [vmem:[%s30043_s15 + $0x1b4] ss:$8 sps:$4 sm:$0xff]  }
0x10c2   : > { %15751 = vmatprep.subr.bf16.mxu1 %v23551_v37  ;;  %v29217_v59 = vsel %vm10989_vm6, %v16176_v31, %v16184_v42  ;;  %v16724_v14 = vrot.slane %v16722_v50, 1  ;;  %v16712_v58 = vrot.slane %v16710_v54, 1  ;;  %v23564_v37 = vld [vmem:[%s30043_s15 + $0x160] ss:$8 sps:$4 sm:$0xff]   ;;  %v23579_v56 = vld [vmem:[%s30043_s15 + $0x1b0] ss:$8 sps:$4 sm:$0xff]  }
0x10c3   : > { %v15799_v51 = vld [vmem:[#allocation6 + $0x28] sm:$0x1f]  ;;  %v15834_v27 = vrot.slane %v15832_v52, 5  ;;  %v23584_v15 = vld [vmem:[%s30043_s15 + $0x1c4] ss:$8 sps:$4 sm:$0xff]  }
0x10c4   : > { %v16725_v35 = vor.u32 %v16724_v14, %v16720_v48  ;;  %v16713_v19 = vor.u32 %v16712_v58, %v16708_v1  ;;  %v15797_v47 = vld [vmem:[#allocation6 + $0x8] sm:$0xe0]  ;;  %v15803_v24 = vpack.c.bf16 %v15799_v51, %v15799_v51  ;;  %v23582_v22 = vld [vmem:[%s30043_s15 + $0x1c0] ss:$8 sps:$4 sm:$0xff]   ;;  %v23585_v25 = vld [vmem:[%s30043_s15 + $0x1d0] ss:$8 sps:$4 sm:$0xff]  }
0x10c5   : > { %15752 = vmatpush1.bf16.msra.mxu1 %v23549_v18  ;;  %v15837_v18 = vrot.slane %v15835_v57, 6  ;;  %v15801_v52 = vpack.c.bf16 %v29156_v16, %v15797_v47  ;;  %v23590_v5 = vld [vmem:[%s30043_s15 + $0x1e4] ss:$8 sps:$4 sm:$0xff]   ;;  %v15538_v3 = vld [vmem:[#allocation6 + $0x20] sm:$0xf] }
0x10c6   : > { %15753 = vmatprep.subr.bf16.mxu1 %v23554_v21  ;;  %v29226_v33 = vsel %vm11528_vm7, %v16725_v35, %v16729_v26  ;;  %v29229_v63 = vsel %vm11528_vm7, %v16713_v19, %v16717_v8  ;;  %v23588_v16 = vld [vmem:[%s30043_s15 + $0x1e0] ss:$8 sps:$4 sm:$0xff]   ;;  %v23593_v9 = vld [vmem:[%s30043_s15 + $0x1f4] ss:$8 sps:$4 sm:$0xff]   ;;  %v15542_v42 = vpack.c.bf16 %v15538_v3, %v15538_v3  ;;  %v23596_v53 = vld [vmem:[%s30043_s15 + $0x204] ss:$8 sps:$4 sm:$0xff]  }
0x10c7   : > { %v29286_v21 = vor.u32 %v15837_v18, %v15834_v27  ;;  %v15536_v23 = vld [vmem:[#allocation6] sm:$0xf0]  ;;  %v23594_v35 = vld [vmem:[%s30043_s15 + $0x200] ss:$8 sps:$4 sm:$0xff]   ;;  %v23621_v27 = vld [vmem:[%s30043_s15 + $0x290] ss:$8 sps:$4 sm:$0xff]  }
0x10c8   : > { %v15540_v54 = vpack.c.bf16 %v29154_v0, %v15536_v23  ;;  %v15582_v1 = vrot.slane %v15542_v42, 2  ;;  %v23623_v51 = vld [vmem:[%s30043_s15 + $0x294] ss:$8 sps:$4 sm:$0xff]   ;;  %v23626_v18 = vld [vmem:[%s30043_s15 + $0x2a4] ss:$8 sps:$4 sm:$0xff]  }
0x10c9   : > { %15754 = vmatpush1.bf16.msra.mxu1 %v23552_v30  ;;  %v15843_v57 = vmul.bf16 %v29286_v21, %v15803_v24  ;;  %v15841_v46 = vmul.bf16 %v29286_v21, %v15801_v52  ;;  %v23629_v47 = vld [vmem:[%s30043_s15 + $0x2b4] ss:$8 sps:$4 sm:$0xff]  }
0x10ca   : > { %15755 = vmatprep.subr.bf16.mxu1 %v23557_v2  ;;  %v23591_v2 = vld [vmem:[%s30043_s15 + $0x1f0] ss:$8 sps:$4 sm:$0xff]   ;;  %v15796_v52 = vld [vmem:[#allocation6] sm:$0xe0] }
0x10cb   : > { %v15903_v29 = vshrl.u32 %v15843_v57, 16  ;;  %v15906_v34 = vshll.u32 %v15843_v57, 16  ;;  %v15895_v30 = vshrl.u32 %v15841_v46, 16  ;;  %v15898_v31 = vshll.u32 %v15841_v46, 16  ;;  %v15798_v24 = vld [vmem:[#allocation6 + $0x20] sm:$0x1f] }
0x10cc   : > { %v15802_v57 = vpack.c.bf16 %v15798_v24, %v15798_v24  ;;  %v23635_v46 = vld [vmem:[%s30043_s15 + $0x2d4] ss:$8 sps:$4 sm:$0xff]   ;;  %v23681_v24 = vld [vmem:[%s30043_s15 + $0x3d0] ss:$8 sps:$4 sm:$0xff]  }
0x10cd   : > { %15756 = vmatpush1.bf16.msra.mxu1 %v23555_v61  ;;  %v15905_v50 = vrot.slane %v15903_v29, 2  ;;  %v15908_v12 = vrot.slane %v15906_v34, 3  ;;  %v15897_v48 = vrot.slane %v15895_v30, 2  ;;  %v15900_v14 = vrot.slane %v15898_v31, 3  ;;  %v23633_v29 = vld [vmem:[%s30043_s15 + $0x2d0] ss:$8 sps:$4 sm:$0xff]  }
0x10ce   : > { %15757 = vmatprep.subr.bf16.mxu1 %v23560_v28  ;;  %v15581_v61 = vrot.slane %v15540_v54, 2  ;;  %v23599_v28 = vld [vmem:[%s30043_s15 + $0x214] ss:$8 sps:$4 sm:$0xff]   ;;  %v15842_v3 = vmul.bf16 %v29286_v21, %v15802_v57  ;;  %v23636_v30 = vld [vmem:[%s30043_s15 + $0x2e0] ss:$8 sps:$4 sm:$0xff]  }
0x10cf   : > { %v15909_v58 = vor.u32 %v15908_v12, %v15905_v50  ;;  %v15901_v26 = vor.u32 %v15900_v14, %v15897_v48  ;;  %v23641_v50 = vld [vmem:[%s30043_s15 + $0x2f4] ss:$8 sps:$4 sm:$0xff]   ;;  %v23639_v54 = vld [vmem:[%s30043_s15 + $0x2f0] ss:$8 sps:$4 sm:$0xff]   ;;  %v23644_v14 = vld [vmem:[%s30043_s15 + $0x304] ss:$8 sps:$4 sm:$0xff]  }
0x10d0   : > { %v15583_v19 = vsel %vm894_vm1, %v15581_v61, %v15582_v1  ;;  %v15889_v23 = vshll.u32 %v15842_v3, 16  ;;  %v23642_v61 = vld [vmem:[%s30043_s15 + $0x300] ss:$8 sps:$4 sm:$0xff]   ;;  %v23687_v57 = vld [vmem:[%s30043_s15 + $0x3f0] ss:$8 sps:$4 sm:$0xff]  }
0x10d1   : > { %15758 = vmatpush1.bf16.msra.mxu1 %v23558_v32  ;;  %v15910_v8 = vsel %vm10696_vm8, %v15901_v26, %v15909_v58  ;;  %v23597_v32 = vld [vmem:[%s30043_s15 + $0x210] ss:$8 sps:$4 sm:$0xff]  }
0x10d2   : > { %15759 = vmatprep.subr.bf16.mxu1 %v23563_v11  ;;  %v23602_v11 = vld [vmem:[%s30043_s15 + $0x224] ss:$8 sps:$4 sm:$0xff]  }
0x10d5   : > { %15760 = vmatpush1.bf16.msra.mxu1 %v23561_v49  ;;  %v23600_v49 = vld [vmem:[%s30043_s15 + $0x220] ss:$8 sps:$4 sm:$0xff]  }
0x10d6   : > { %15761 = vmatprep.subr.bf16.mxu1 %v23566_v43  ;;  %v23605_v43 = vld [vmem:[%s30043_s15 + $0x234] ss:$8 sps:$4 sm:$0xff]  }
0x10d9   : > { %15762 = vmatpush1.bf16.msra.mxu1 %v23564_v37  ;;  %v23603_v37 = vld [vmem:[%s30043_s15 + $0x230] ss:$8 sps:$4 sm:$0xff]  }
0x10da   : > { %15763 = vmatprep.subr.bf16.mxu1 %v23569_v41  ;;  %v23608_v41 = vld [vmem:[%s30043_s15 + $0x244] ss:$8 sps:$4 sm:$0xff]  }
0x10dd   : > { %15764 = vmatpush1.bf16.msra.mxu1 %v23567_v38  ;;  %v23606_v38 = vld [vmem:[%s30043_s15 + $0x240] ss:$8 sps:$4 sm:$0xff]  }
0x10de   : > { %15765 = vmatprep.subr.bf16.mxu1 %v23572_v17  ;;  %v23611_v17 = vld [vmem:[%s30043_s15 + $0x254] ss:$8 sps:$4 sm:$0xff]  }
0x10e1   : > { %15766 = vmatpush1.bf16.msra.mxu1 %v23570_v4  ;;  %v23609_v4 = vld [vmem:[%s30043_s15 + $0x250] ss:$8 sps:$4 sm:$0xff]  }
0x10e2   : > { %15767 = vmatprep.subr.bf16.mxu1 %v23575_v62  ;;  %v23614_v62 = vld [vmem:[%s30043_s15 + $0x264] ss:$8 sps:$4 sm:$0xff]  }
0x10e5   : > { %15768 = vmatpush1.bf16.msra.mxu1 %v23573_v20  ;;  %v23612_v20 = vld [vmem:[%s30043_s15 + $0x260] ss:$8 sps:$4 sm:$0xff]  }
0x10e6   : > { %15769 = vmatprep.subr.bf16.mxu1 %v23578_v44  ;;  %v23617_v44 = vld [vmem:[%s30043_s15 + $0x274] ss:$8 sps:$4 sm:$0xff]  }
0x10e9   : > { %15770 = vmatpush1.bf16.msra.mxu1 %v23576_v60  ;;  %v23615_v60 = vld [vmem:[%s30043_s15 + $0x270] ss:$8 sps:$4 sm:$0xff]  }
0x10ea   : > { %15771 = vmatprep.subr.bf16.mxu1 %v23581_v7  ;;  %v23620_v7 = vld [vmem:[%s30043_s15 + $0x284] ss:$8 sps:$4 sm:$0xff]  }
0x10ed   : > { %15772 = vmatpush1.bf16.msra.mxu1 %v23579_v56  ;;  %v23618_v56 = vld [vmem:[%s30043_s15 + $0x280] ss:$8 sps:$4 sm:$0xff]  }
0x10ee   : > { %15773 = vmatprep.subr.bf16.mxu1 %v23584_v15  ;;  %v23624_v15 = vld [vmem:[%s30043_s15 + $0x2a0] ss:$8 sps:$4 sm:$0xff]  }
0x10f1   : > { %15774 = vmatpush1.bf16.msra.mxu1 %v23582_v22  ;;  %v23627_v22 = vld [vmem:[%s30043_s15 + $0x2b0] ss:$8 sps:$4 sm:$0xff]  }
0x10f2   : > { %15775 = vmatprep.subr.bf16.mxu1 %v23587_v40  ;;  %v23632_v40 = vld [vmem:[%s30043_s15 + $0x2c4] ss:$8 sps:$4 sm:$0xff]  }
0x10f5   : > { %15776 = vmatpush1.bf16.msra.mxu1 %v23585_v25  ;;  %v23630_v25 = vld [vmem:[%s30043_s15 + $0x2c0] ss:$8 sps:$4 sm:$0xff]  }
0x10f6   : > { %15777 = vmatprep.subr.bf16.mxu1 %v23590_v5  ;;  %v15800_v5 = vpack.c.bf16 %v29154_v0, %v15796_v52  ;;  %v23689_v52 = vld [vmem:[%s30043_s15 + $0x3f4] ss:$8 sps:$4 sm:$0xff]  }
0x10f8   : > { %v15840_v34 = vmul.bf16 %v29286_v21, %v15800_v5  ;;  %v23690_v5 = vld [vmem:[%s30043_s15 + $0x400] ss:$8 sps:$4 sm:$0xff]  }
0x10f9   : > { %15778 = vmatpush1.bf16.msra.mxu1 %v23588_v16  ;;  %v23638_v16 = vld [vmem:[%s30043_s15 + $0x2e4] ss:$8 sps:$4 sm:$0xff]  }
0x10fa   : > { %15779 = vmatprep.subr.bf16.mxu1 %v23593_v9  ;;  %v15886_v9 = vshrl.u32 %v15842_v3, 16  ;;  %v15878_v31 = vshrl.u32 %v15840_v34, 16  ;;  %v15881_v42 = vshll.u32 %v15840_v34, 16  ;;  %v23693_v3 = vld [vmem:[%s30043_s15 + $0x410] ss:$8 sps:$4 sm:$0xff]  }
0x10fb   : > { %v23696_v34 = vld [vmem:[%s30043_s15 + $0x420] ss:$8 sps:$4 sm:$0xff]  }
0x10fc   : > { %v15888_v12 = vrot.slane %v15886_v9, 2  ;;  %v15883_v48 = vrot.slane %v15881_v42, 3  ;;  %v23702_v9 = vld [vmem:[%s30043_s15 + $0x440] ss:$8 sps:$4 sm:$0xff]  }
0x10fd   : > { %15780 = vmatpush1.bf16.msra.mxu1 %v23591_v2  ;;  %v15891_v2 = vrot.slane %v15889_v23, 3  ;;  %v23707_v23 = vld [vmem:[%s30043_s15 + $0x454] ss:$8 sps:$4 sm:$0xff]   ;;  %v23708_v42 = vld [vmem:[%s30043_s15 + $0x460] ss:$8 sps:$4 sm:$0xff]  }
0x10fe   : > { %16073 = vmatprep.subr.bf16.mxu1 %v23596_v53  ;;  %v15880_v53 = vrot.slane %v15878_v31, 2  ;;  %v23710_v31 = vld [vmem:[%s30043_s15 + $0x464] ss:$8 sps:$4 sm:$0xff]  }
0x10ff   : > { %v15892_v1 = vor.u32 %v15891_v2, %v15888_v12  ;;  %v23711_v12 = vld [vmem:[%s30043_s15 + $0x470] ss:$8 sps:$4 sm:$0xff]   ;;  %v23716_v2 = vld [vmem:[%s30043_s15 + $0x484] ss:$8 sps:$4 sm:$0xff]  }
0x1100   : > { %15782 = vmatmul.mubr.bf16.vlgmr.msra.gmra.mrb[36].mxu1 %v15583_v19  ;;  %v15884_v58 = vor.u32 %v15883_v48, %v15880_v53  ;;  %v23650_v19 = vld [vmem:[%s30043_s15 + $0x324] ss:$8 sps:$4 sm:$0xff]   ;;  %v23719_v53 = vld [vmem:[%s30043_s15 + $0x494] ss:$8 sps:$4 sm:$0xff]   ;;  %v23717_v48 = vld [vmem:[%s30043_s15 + $0x490] ss:$8 sps:$4 sm:$0xff]  }
0x1101   : > { %16074 = vmatpush1.bf16.msra.mxu1 %v23594_v35  ;;  %16105 = vmatprep.mubr.bf16.mxu1 %v15910_v8  ;;  %v23647_v35 = vld [vmem:[%s30043_s15 + $0x314] ss:$8 sps:$4 sm:$0xff]   ;;  %v23648_v8 = vld [vmem:[%s30043_s15 + $0x320] ss:$8 sps:$4 sm:$0xff]  }
0x1102   : > { %16075 = vmatprep.subr.bf16.mxu1 %v23599_v28  ;;  %v15893_v26 = vsel %vm10696_vm8, %v15884_v58, %v15892_v1  ;;  %v23645_v28 = vld [vmem:[%s30043_s15 + $0x310] ss:$8 sps:$4 sm:$0xff]   ;;  %v23720_v1 = vld [vmem:[%s30043_s15 + $0x4a0] ss:$8 sps:$4 sm:$0xff]   ;;  %v23725_v58 = vld [vmem:[%s30043_s15 + $0x4b4] ss:$8 sps:$4 sm:$0xff]  }
0x1105   : > { %16076 = vmatpush1.bf16.msra.mxu1 %v23597_v32  ;;  %v23653_v32 = vld [vmem:[%s30043_s15 + $0x334] ss:$8 sps:$4 sm:$0xff]  }
0x1106   : > { %16077 = vmatprep.subr.bf16.mxu1 %v23602_v11  ;;  %v23656_v11 = vld [vmem:[%s30043_s15 + $0x344] ss:$8 sps:$4 sm:$0xff]  }
0x1109   : > { %16078 = vmatpush1.bf16.msra.mxu1 %v23600_v49  ;;  %v23654_v49 = vld [vmem:[%s30043_s15 + $0x340] ss:$8 sps:$4 sm:$0xff]  }
0x110a   : > { %16079 = vmatprep.subr.bf16.mxu1 %v23605_v43  ;;  %v23659_v43 = vld [vmem:[%s30043_s15 + $0x354] ss:$8 sps:$4 sm:$0xff]  }
0x110d   : > { %16080 = vmatpush1.bf16.msra.mxu1 %v23603_v37  ;;  %v23657_v37 = vld [vmem:[%s30043_s15 + $0x350] ss:$8 sps:$4 sm:$0xff]  }
0x110e   : > { %16081 = vmatprep.subr.bf16.mxu1 %v23608_v41  ;;  %v23662_v41 = vld [vmem:[%s30043_s15 + $0x364] ss:$8 sps:$4 sm:$0xff]  }
0x1111   : > { %16082 = vmatpush1.bf16.msra.mxu1 %v23606_v38  ;;  %v23660_v38 = vld [vmem:[%s30043_s15 + $0x360] ss:$8 sps:$4 sm:$0xff]  }
0x1112   : > { %16083 = vmatprep.subr.bf16.mxu1 %v23611_v17  ;;  %v23665_v17 = vld [vmem:[%s30043_s15 + $0x374] ss:$8 sps:$4 sm:$0xff]  }
0x1115   : > { %16084 = vmatpush1.bf16.msra.mxu1 %v23609_v4  ;;  %v23663_v4 = vld [vmem:[%s30043_s15 + $0x370] ss:$8 sps:$4 sm:$0xff]  }
0x1116   : > { %16085 = vmatprep.subr.bf16.mxu1 %v23614_v62  ;;  %v23668_v62 = vld [vmem:[%s30043_s15 + $0x384] ss:$8 sps:$4 sm:$0xff]  }
0x1119   : > { %16086 = vmatpush1.bf16.msra.mxu1 %v23612_v20  ;;  %v23666_v20 = vld [vmem:[%s30043_s15 + $0x380] ss:$8 sps:$4 sm:$0xff]  }
0x111a   : > { %16087 = vmatprep.subr.bf16.mxu1 %v23617_v44  ;;  %v23671_v44 = vld [vmem:[%s30043_s15 + $0x394] ss:$8 sps:$4 sm:$0xff]  }
0x111d   : > { %16088 = vmatpush1.bf16.msra.mxu1 %v23615_v60  ;;  %v23669_v60 = vld [vmem:[%s30043_s15 + $0x390] ss:$8 sps:$4 sm:$0xff]  }
0x111e   : > { %16089 = vmatprep.subr.bf16.mxu1 %v23620_v7  ;;  %v23674_v7 = vld [vmem:[%s30043_s15 + $0x3a4] ss:$8 sps:$4 sm:$0xff]  }
0x1121   : > { %16090 = vmatpush1.bf16.msra.mxu1 %v23618_v56  ;;  %v23672_v56 = vld [vmem:[%s30043_s15 + $0x3a0] ss:$8 sps:$4 sm:$0xff]  }
0x1122   : > { %16091 = vmatprep.subr.bf16.mxu1 %v23623_v51  ;;  %v23677_v51 = vld [vmem:[%s30043_s15 + $0x3b4] ss:$8 sps:$4 sm:$0xff]  }
0x1125   : > { %16092 = vmatpush1.bf16.msra.mxu1 %v23621_v27  ;;  %v23675_v27 = vld [vmem:[%s30043_s15 + $0x3b0] ss:$8 sps:$4 sm:$0xff]  }
0x1126   : > { %16093 = vmatprep.subr.bf16.mxu1 %v23626_v18  ;;  %v23680_v18 = vld [vmem:[%s30043_s15 + $0x3c4] ss:$8 sps:$4 sm:$0xff]  }
0x1129   : > { %16094 = vmatpush1.bf16.msra.mxu1 %v23624_v15  ;;  %v23678_v15 = vld [vmem:[%s30043_s15 + $0x3c0] ss:$8 sps:$4 sm:$0xff]  }
0x112a   : > { %16095 = vmatprep.subr.bf16.mxu1 %v23629_v47  ;;  %v23683_v47 = vld [vmem:[%s30043_s15 + $0x3d4] ss:$8 sps:$4 sm:$0xff]  }
0x112d   : > { %16096 = vmatpush1.bf16.msra.mxu1 %v23627_v22  ;;  %v23686_v22 = vld [vmem:[%s30043_s15 + $0x3e4] ss:$8 sps:$4 sm:$0xff]  }
0x112e   : > { %16097 = vmatprep.subr.bf16.mxu1 %v23632_v40  ;;  %v23684_v40 = vld [vmem:[%s30043_s15 + $0x3e0] ss:$8 sps:$4 sm:$0xff]  }
0x1131   : > { %16098 = vmatpush1.bf16.msra.mxu1 %v23630_v25  ;;  %v23692_v25 = vld [vmem:[%s30043_s15 + $0x404] ss:$8 sps:$4 sm:$0xff]  }
0x1132   : > { %16099 = vmatprep.subr.bf16.mxu1 %v23635_v46  ;;  %v23695_v46 = vld [vmem:[%s30043_s15 + $0x414] ss:$8 sps:$4 sm:$0xff]  }
0x1135   : > { %16100 = vmatpush1.bf16.msra.mxu1 %v23633_v29  ;;  %v23698_v29 = vld [vmem:[%s30043_s15 + $0x424] ss:$8 sps:$4 sm:$0xff]  }
0x1136   : > { %16101 = vmatprep.subr.bf16.mxu1 %v23638_v16  ;;  %v23704_v16 = vld [vmem:[%s30043_s15 + $0x444] ss:$8 sps:$4 sm:$0xff]  }
0x1139   : > { %16102 = vmatpush1.bf16.msra.mxu1 %v23636_v30  ;;  %v23705_v30 = vld [vmem:[%s30043_s15 + $0x450] ss:$8 sps:$4 sm:$0xff]  }
0x113a   : > { %16103 = vmatprep.subr.bf16.mxu1 %v23641_v50  ;;  %v23713_v50 = vld [vmem:[%s30043_s15 + $0x474] ss:$8 sps:$4 sm:$0xff]  }
0x113d   : > { %16104 = vmatpush1.bf16.msra.mxu1 %v23639_v54  ;;  %v23714_v54 = vld [vmem:[%s30043_s15 + $0x480] ss:$8 sps:$4 sm:$0xff]  }
0x113e   : > { %16365 = vmatprep.subr.bf16.mxu1 %v23644_v14  ;;  %v23722_v14 = vld [vmem:[%s30043_s15 + $0x4a4] ss:$8 sps:$4 sm:$0xff]  }
0x1140   : > { %16106 = vmatmul.mubr.bf16.vlgmr.msra.gmra.mrb[36].mxu1 %v15893_v26  ;;  %v23726_v26 = vld [vmem:[%s30043_s15 + $0x4c0] ss:$8 sps:$4 sm:$0xff]  }
0x1141   : > { %16366 = vmatpush1.bf16.msra.mxu1 %v23642_v61  ;;  %16397 = vmatprep.mubr.bf16.mxu1 %v29208_v6  ;;  %v23651_v6 = vld [vmem:[%s30043_s15 + $0x330] ss:$8 sps:$4 sm:$0xff]  }
0x1142   : > { %16367 = vmatprep.subr.bf16.mxu1 %v23647_v35  ;;  %v23723_v61 = vld [vmem:[%s30043_s15 + $0x4b0] ss:$8 sps:$4 sm:$0xff]   ;;  %v23728_v35 = vld [vmem:[%s30043_s15 + $0x4c4] ss:$8 sps:$4 sm:$0xff]  }
0x1145   : > { %16368 = vmatpush1.bf16.msra.mxu1 %v23645_v28  ;;  %v23731_v28 = vld [vmem:[%s30043_s15 + $0x4d4] ss:$8 sps:$4 sm:$0xff]  }
0x1146   : > { %16369 = vmatprep.subr.bf16.mxu1 %v23650_v19  ;;  %v23729_v19 = vld [vmem:[%s30043_s15 + $0x4d0] ss:$8 sps:$4 sm:$0xff]  }
0x1149   : > { %16370 = vmatpush1.bf16.msra.mxu1 %v23648_v8  ;;  %v23734_v8 = vld [vmem:[%s30043_s15 + $0x4e4] ss:$8 sps:$4 sm:$0xff]  }
0x114a   : > { %16371 = vmatprep.subr.bf16.mxu1 %v23653_v32  ;;  %v23732_v32 = vld [vmem:[%s30043_s15 + $0x4e0] ss:$8 sps:$4 sm:$0xff]  }
0x114d   : > { %16372 = vmatpush1.bf16.msra.mxu1 %v23651_v6  ;;  %v23737_v6 = vld [vmem:[%s30043_s15 + $0x4f4] ss:$8 sps:$4 sm:$0xff]  }
0x114e   : > { %16373 = vmatprep.subr.bf16.mxu1 %v23656_v11  ;;  %v23735_v11 = vld [vmem:[%s30043_s15 + $0x4f0] ss:$8 sps:$4 sm:$0xff]  }
0x1151   : > { %16374 = vmatpush1.bf16.msra.mxu1 %v23654_v49  ;;  %v23740_v49 = vld [vmem:[%s30043_s15 + $0x504] ss:$8 sps:$4 sm:$0xff]  }
0x1152   : > { %16375 = vmatprep.subr.bf16.mxu1 %v23659_v43  ;;  %v23738_v43 = vld [vmem:[%s30043_s15 + $0x500] ss:$8 sps:$4 sm:$0xff]  }
0x1155   : > { %16376 = vmatpush1.bf16.msra.mxu1 %v23657_v37  ;;  %v16414_v37 = vpack.c.bf16 %v29188_v10, %v29154_v0  ;;  %v23744_v0 = vld [vmem:[%s30043_s15 + $0x520] ss:$8 sps:$4 sm:$0xff]  }
0x1156   : > { %16377 = vmatprep.subr.bf16.mxu1 %v23662_v41  ;;  %v23743_v41 = vld [vmem:[%s30043_s15 + $0x514] ss:$8 sps:$4 sm:$0xff]  }
0x1159   : > { %16378 = vmatpush1.bf16.msra.mxu1 %v23660_v38  ;;  %v23741_v38 = vld [vmem:[%s30043_s15 + $0x510] ss:$8 sps:$4 sm:$0xff]  }
0x115a   : > { %16379 = vmatprep.subr.bf16.mxu1 %v23665_v17  ;;  %v23746_v17 = vld [vmem:[%s30043_s15 + $0x524] ss:$8 sps:$4 sm:$0xff]  }
0x115d   : > { %16380 = vmatpush1.bf16.msra.mxu1 %v23663_v4  ;;  %v23749_v4 = vld [vmem:[%s30043_s15 + $0x534] ss:$8 sps:$4 sm:$0xff]  }
0x115e   : > { %16381 = vmatprep.subr.bf16.mxu1 %v23668_v62  ;;  %v23752_v62 = vld [vmem:[%s30043_s15 + $0x544] ss:$8 sps:$4 sm:$0xff]  }
0x1161   : > { %16382 = vmatpush1.bf16.msra.mxu1 %v23666_v20  ;;  %v23750_v20 = vld [vmem:[%s30043_s15 + $0x540] ss:$8 sps:$4 sm:$0xff]  }
0x1162   : > { %16383 = vmatprep.subr.bf16.mxu1 %v23671_v44  ;;  %v23755_v44 = vld [vmem:[%s30043_s15 + $0x554] ss:$8 sps:$4 sm:$0xff]  }
0x1165   : > { %16384 = vmatpush1.bf16.msra.mxu1 %v23669_v60  ;;  %v23753_v60 = vld [vmem:[%s30043_s15 + $0x550] ss:$8 sps:$4 sm:$0xff]  }
0x1166   : > { %16385 = vmatprep.subr.bf16.mxu1 %v23674_v7  ;;  %v23758_v7 = vld [vmem:[%s30043_s15 + $0x564] ss:$8 sps:$4 sm:$0xff]  }
0x1169   : > { %16386 = vmatpush1.bf16.msra.mxu1 %v23672_v56  ;;  %v23756_v56 = vld [vmem:[%s30043_s15 + $0x560] ss:$8 sps:$4 sm:$0xff]  }
0x116a   : > { %16387 = vmatprep.subr.bf16.mxu1 %v23677_v51  ;;  %v23761_v51 = vld [vmem:[%s30043_s15 + $0x574] ss:$8 sps:$4 sm:$0xff]  }
0x116d   : > { %16388 = vmatpush1.bf16.msra.mxu1 %v23675_v27  ;;  %v23759_v27 = vld [vmem:[%s30043_s15 + $0x570] ss:$8 sps:$4 sm:$0xff]  }
0x116e   : > { %16389 = vmatprep.subr.bf16.mxu1 %v23680_v18  ;;  %v23764_v18 = vld [vmem:[%s30043_s15 + $0x584] ss:$8 sps:$4 sm:$0xff]  }
0x1171   : > { %16390 = vmatpush1.bf16.msra.mxu1 %v23678_v15  ;;  %v23762_v15 = vld [vmem:[%s30043_s15 + $0x580] ss:$8 sps:$4 sm:$0xff]  }
0x1172   : > { %16391 = vmatprep.subr.bf16.mxu1 %v23683_v47  ;;  %v23767_v47 = vld [vmem:[%s30043_s15 + $0x594] ss:$8 sps:$4 sm:$0xff]  }
0x1175   : > { %16392 = vmatpush1.bf16.msra.mxu1 %v23681_v24  ;;  %v23765_v24 = vld [vmem:[%s30043_s15 + $0x590] ss:$8 sps:$4 sm:$0xff]  }
0x1176   : > { %16393 = vmatprep.subr.bf16.mxu1 %v23686_v22  ;;  %v23770_v22 = vld [vmem:[%s30043_s15 + $0x5a4] ss:$8 sps:$4 sm:$0xff]  }
0x1179   : > { %16394 = vmatpush1.bf16.msra.mxu1 %v23684_v40  ;;  %v23768_v40 = vld [vmem:[%s30043_s15 + $0x5a0] ss:$8 sps:$4 sm:$0xff]  }
0x117a   : > { %16395 = vmatprep.subr.bf16.mxu1 %v23689_v52  ;;  %v23773_v52 = vld [vmem:[%s30043_s15 + $0x5b4] ss:$8 sps:$4 sm:$0xff]  }
0x117d   : > { %16396 = vmatpush1.bf16.msra.mxu1 %v23687_v57  ;;  %v23771_v57 = vld [vmem:[%s30043_s15 + $0x5b0] ss:$8 sps:$4 sm:$0xff]  }
0x117e   : > { %16609 = vmatprep.subr.bf16.mxu1 %v23692_v25  ;;  %v23776_v25 = vld [vmem:[%s30043_s15 + $0x5c4] ss:$8 sps:$4 sm:$0xff]  }
0x1180   : > { %16398 = vmatmul.mubr.bf16.vlgmr.msra.gmra.mrb[36].mxu1 %v29217_v59  ;;  %v23701_v59 = vld [vmem:[%s30043_s15 + $0x434] ss:$8 sps:$4 sm:$0xff]  }
0x1181   : > { %16610 = vmatpush1.bf16.msra.mxu1 %v23690_v5  ;;  %16641 = vmatprep.mubr.bf16.mxu1 %v29168_v36  ;;  %v23699_v36 = vld [vmem:[%s30043_s15 + $0x430] ss:$8 sps:$4 sm:$0xff]   ;;  %v16941_v5 = vld [vmem:[#allocation6 + $0x18] sm:$0xf8] }
0x1182   : > { %16611 = vmatprep.subr.bf16.mxu1 %v23695_v46  ;;  %v16943_v46 = vld [vmem:[#allocation6 + $0x38] sm:$0x7] }
0x1185   : > { %16612 = vmatpush1.bf16.msra.mxu1 %v23693_v3  ;;  %v16945_v3 = vpack.c.bf16 %v29190_v13, %v16941_v5 }
0x1186   : > { %16613 = vmatprep.subr.bf16.mxu1 %v23698_v29  ;;  %v23774_v29 = vld [vmem:[%s30043_s15 + $0x5c0] ss:$8 sps:$4 sm:$0xff]  }
0x1189   : > { %16614 = vmatpush1.bf16.msra.mxu1 %v23696_v34  ;;  %v23779_v34 = vld [vmem:[%s30043_s15 + $0x5d4] ss:$8 sps:$4 sm:$0xff]  }
0x118a   : > { %16615 = vmatprep.subr.bf16.mxu1 %v23701_v59  ;;  %v16947_v59 = vpack.c.bf16 %v16943_v46, %v16943_v46 }
0x118d   : > { %16616 = vmatpush1.bf16.msra.mxu1 %v23699_v36  ;;  %v16949_v36 = vmul.bf16 %v16945_v3, %v29159_v45  ;;  %v23828_v3 = vld [vmem:[%s30043_s15 + $0x6e0] ss:$8 sps:$4 sm:$0xff]  }
0x118e   : > { %16617 = vmatprep.subr.bf16.mxu1 %v23704_v16  ;;  %v23777_v16 = vld [vmem:[%s30043_s15 + $0x5d0] ss:$8 sps:$4 sm:$0xff]  }
0x1191   : > { %16618 = vmatpush1.bf16.msra.mxu1 %v23702_v9  ;;  %v23782_v9 = vld [vmem:[%s30043_s15 + $0x5e4] ss:$8 sps:$4 sm:$0xff]  }
0x1192   : > { %16619 = vmatprep.subr.bf16.mxu1 %v23707_v23  ;;  %v16951_v23 = vmul.bf16 %v16947_v59, %v29159_v45  ;;  %v17231_v59 = vld [vmem:[#allocation6 + $0x38] sm:$0xf] }
0x1195   : > { %16620 = vmatpush1.bf16.msra.mxu1 %v23705_v30  ;;  %v17003_v30 = vshrl.u32 %v16949_v36, 16 }
0x1196   : > { %16621 = vmatprep.subr.bf16.mxu1 %v23710_v31  ;;  %v17006_v31 = vshll.u32 %v16949_v36, 16 }
0x1199   : > { %16622 = vmatpush1.bf16.msra.mxu1 %v23708_v42  ;;  %v23780_v42 = vld [vmem:[%s30043_s15 + $0x5e0] ss:$8 sps:$4 sm:$0xff]  }
0x119a   : > { %16623 = vmatprep.subr.bf16.mxu1 %v23713_v50  ;;  %v23785_v50 = vld [vmem:[%s30043_s15 + $0x5f4] ss:$8 sps:$4 sm:$0xff]  }
0x119d   : > { %16624 = vmatpush1.bf16.msra.mxu1 %v23711_v12  ;;  %v17011_v12 = vshrl.u32 %v16951_v23, 16 }
0x119e   : > { %16625 = vmatprep.subr.bf16.mxu1 %v23716_v2  ;;  %v17014_v2 = vshll.u32 %v16951_v23, 16 }
0x11a1   : > { %16626 = vmatpush1.bf16.msra.mxu1 %v23714_v54  ;;  %v17005_v54 = vrot.slane %v17003_v30, 1  ;;  %v17235_v30 = vpack.c.bf16 %v17231_v59, %v17231_v59 }
0x11a2   : > { %16627 = vmatprep.subr.bf16.mxu1 %v23719_v53  ;;  %v17008_v53 = vrot.slane %v17006_v31, 2  ;;  %v23831_v31 = vld [vmem:[%s30043_s15 + $0x6f0] ss:$8 sps:$4 sm:$0xff]  }
0x11a5   : > { %16628 = vmatpush1.bf16.msra.mxu1 %v23717_v48  ;;  %v23783_v48 = vld [vmem:[%s30043_s15 + $0x5f0] ss:$8 sps:$4 sm:$0xff]  }
0x11a6   : > { %16629 = vmatprep.subr.bf16.mxu1 %v23722_v14  ;;  %v23788_v14 = vld [vmem:[%s30043_s15 + $0x604] ss:$8 sps:$4 sm:$0xff]  }
0x11a9   : > { %16630 = vmatpush1.bf16.msra.mxu1 %v23720_v1  ;;  %v17013_v1 = vrot.slane %v17011_v12, 1  ;;  %v23836_v12 = vld [vmem:[%s30043_s15 + $0x704] ss:$8 sps:$4 sm:$0xff]  }
0x11aa   : > { %16631 = vmatprep.subr.bf16.mxu1 %v23725_v58  ;;  %v17016_v58 = vrot.slane %v17014_v2, 2 }
0x11ad   : > { %16632 = vmatpush1.bf16.msra.mxu1 %v23723_v61  ;;  %v17009_v61 = vor.u32 %v17008_v53, %v17005_v54  ;;  %v17277_v53 = vrot.slane %v17235_v30, 2 }
0x11ae   : > { %16633 = vmatprep.subr.bf16.mxu1 %v23728_v35  ;;  %v23786_v35 = vld [vmem:[%s30043_s15 + $0x600] ss:$8 sps:$4 sm:$0xff]  }
0x11b1   : > { %16634 = vmatpush1.bf16.msra.mxu1 %v23726_v26  ;;  %v17017_v26 = vor.u32 %v17016_v58, %v17013_v1 }
0x11b2   : > { %16635 = vmatprep.subr.bf16.mxu1 %v23731_v28  ;;  %v23791_v28 = vld [vmem:[%s30043_s15 + $0x614] ss:$8 sps:$4 sm:$0xff]  }
0x11b5   : > { %16636 = vmatpush1.bf16.msra.mxu1 %v23729_v19  ;;  %v17018_v19 = vsel %vm10110_vm5, %v17009_v61, %v17017_v26  ;;  %v23837_v61 = vld [vmem:[%s30043_s15 + $0x710] ss:$8 sps:$4 sm:$0xff]   ;;  %v23840_v26 = vld [vmem:[%s30043_s15 + $0x720] ss:$8 sps:$4 sm:$0xff]  }
0x11b6   : > { %16637 = vmatprep.subr.bf16.mxu1 %v23734_v8  ;;  %v23789_v8 = vld [vmem:[%s30043_s15 + $0x610] ss:$8 sps:$4 sm:$0xff]  }
0x11b9   : > { %16638 = vmatpush1.bf16.msra.mxu1 %v23732_v32  ;;  %v23794_v32 = vld [vmem:[%s30043_s15 + $0x624] ss:$8 sps:$4 sm:$0xff]  }
0x11ba   : > { %16639 = vmatprep.subr.bf16.mxu1 %v23737_v6  ;;  %v23792_v6 = vld [vmem:[%s30043_s15 + $0x620] ss:$8 sps:$4 sm:$0xff]  }
0x11bd   : > { %16640 = vmatpush1.bf16.msra.mxu1 %v23735_v11  ;;  %v23795_v11 = vld [vmem:[%s30043_s15 + $0x630] ss:$8 sps:$4 sm:$0xff]  }
0x11be   : > { %16893 = vmatprep.subr.bf16.mxu1 %v23740_v49  ;;  %v23800_v49 = vld [vmem:[%s30043_s15 + $0x644] ss:$8 sps:$4 sm:$0xff]  }
0x11c0   : > { %16642 = vmatmul.mubr.bf16.vlgmr.msra.gmra.mrb[36].mxu1 %v16414_v37  ;;  %v23803_v37 = vld [vmem:[%s30043_s15 + $0x654] ss:$8 sps:$4 sm:$0xff]  }
0x11c1   : > { %16894 = vmatpush1.bf16.msra.mxu1 %v23738_v43  ;;  %16925 = vmatprep.mubr.bf16.mxu1 %v29226_v33  ;;  %v23747_v33 = vld [vmem:[%s30043_s15 + $0x530] ss:$8 sps:$4 sm:$0xff]   ;;  %v23798_v43 = vld [vmem:[%s30043_s15 + $0x640] ss:$8 sps:$4 sm:$0xff]  }
0x11c2   : > { %16895 = vmatprep.subr.bf16.mxu1 %v23743_v41  ;;  %v23801_v41 = vld [vmem:[%s30043_s15 + $0x650] ss:$8 sps:$4 sm:$0xff]  }
0x11c5   : > { %16896 = vmatpush1.bf16.msra.mxu1 %v23741_v38  ;;  %v23806_v38 = vld [vmem:[%s30043_s15 + $0x664] ss:$8 sps:$4 sm:$0xff]  }
0x11c6   : > { %16897 = vmatprep.subr.bf16.mxu1 %v23746_v17  ;;  %v23804_v17 = vld [vmem:[%s30043_s15 + $0x660] ss:$8 sps:$4 sm:$0xff]  }
0x11c9   : > { %16898 = vmatpush1.bf16.msra.mxu1 %v23744_v0  ;;  %v23809_v0 = vld [vmem:[%s30043_s15 + $0x674] ss:$8 sps:$4 sm:$0xff]  }
0x11ca   : > { %16899 = vmatprep.subr.bf16.mxu1 %v23749_v4  ;;  %v23807_v4 = vld [vmem:[%s30043_s15 + $0x670] ss:$8 sps:$4 sm:$0xff]  }
0x11cd   : > { %16900 = vmatpush1.bf16.msra.mxu1 %v23747_v33  ;;  %v23812_v33 = vld [vmem:[%s30043_s15 + $0x684] ss:$8 sps:$4 sm:$0xff]  }
0x11ce   : > { %16901 = vmatprep.subr.bf16.mxu1 %v23752_v62  ;;  %v23810_v62 = vld [vmem:[%s30043_s15 + $0x680] ss:$8 sps:$4 sm:$0xff]  }
0x11d1   : > { %16902 = vmatpush1.bf16.msra.mxu1 %v23750_v20  ;;  %v23815_v20 = vld [vmem:[%s30043_s15 + $0x694] ss:$8 sps:$4 sm:$0xff]  }
0x11d2   : > { %16903 = vmatprep.subr.bf16.mxu1 %v23755_v44  ;;  %v23813_v44 = vld [vmem:[%s30043_s15 + $0x690] ss:$8 sps:$4 sm:$0xff]  }
0x11d5   : > { %16904 = vmatpush1.bf16.msra.mxu1 %v23753_v60  ;;  %v23818_v60 = vld [vmem:[%s30043_s15 + $0x6a4] ss:$8 sps:$4 sm:$0xff]  }
0x11d6   : > { %16905 = vmatprep.subr.bf16.mxu1 %v23758_v7  ;;  %v23816_v7 = vld [vmem:[%s30043_s15 + $0x6a0] ss:$8 sps:$4 sm:$0xff]  }
0x11d9   : > { %16906 = vmatpush1.bf16.msra.mxu1 %v23756_v56  ;;  %v23821_v56 = vld [vmem:[%s30043_s15 + $0x6b4] ss:$8 sps:$4 sm:$0xff]  }
0x11da   : > { %16907 = vmatprep.subr.bf16.mxu1 %v23761_v51  ;;  %v23819_v51 = vld [vmem:[%s30043_s15 + $0x6b0] ss:$8 sps:$4 sm:$0xff]  }
0x11dd   : > { %16908 = vmatpush1.bf16.msra.mxu1 %v23759_v27  ;;  %v23824_v27 = vld [vmem:[%s30043_s15 + $0x6c4] ss:$8 sps:$4 sm:$0xff]  }
0x11de   : > { %16909 = vmatprep.subr.bf16.mxu1 %v23764_v18  ;;  %v16940_v18 = vld [vmem:[#allocation6 + $0x10] sm:$0xf8] }
0x11e1   : > { %16910 = vmatpush1.bf16.msra.mxu1 %v23762_v15  ;;  %v16942_v15 = vld [vmem:[#allocation6 + $0x30] sm:$0x7] }
0x11e2   : > { %16911 = vmatprep.subr.bf16.mxu1 %v23767_v47  ;;  %v16944_v47 = vpack.c.bf16 %v29188_v10, %v16940_v18  ;;  %v23875_v18 = vld [vmem:[%s30043_s15 + $0x7d4] ss:$8 sps:$4 sm:$0xff]  }
0x11e5   : > { %16912 = vmatpush1.bf16.msra.mxu1 %v23765_v24  ;;  %v23822_v24 = vld [vmem:[%s30043_s15 + $0x6c0] ss:$8 sps:$4 sm:$0xff]  }
0x11e6   : > { %16913 = vmatprep.subr.bf16.mxu1 %v23770_v22  ;;  %v16946_v22 = vpack.c.bf16 %v16942_v15, %v16942_v15 }
0x11e8   : > { %v16950_v10 = vmul.bf16 %v16946_v22, %v29159_v45  ;;  %v23878_v22 = vld [vmem:[%s30043_s15 + $0x7e4] ss:$8 sps:$4 sm:$0xff]  }
0x11e9   : > { %16914 = vmatpush1.bf16.msra.mxu1 %v23768_v40  ;;  %v23827_v40 = vld [vmem:[%s30043_s15 + $0x6d4] ss:$8 sps:$4 sm:$0xff]  }
0x11ea   : > { %16915 = vmatprep.subr.bf16.mxu1 %v23773_v52  ;;  %v16948_v52 = vmul.bf16 %v16944_v47, %v29159_v45  ;;  %v23833_v45 = vld [vmem:[%s30043_s15 + $0x6f4] ss:$8 sps:$4 sm:$0xff]  }
0x11ec   : > { %v16986_v5 = vshrl.u32 %v16948_v52, 16  ;;  %v16989_v46 = vshll.u32 %v16948_v52, 16  ;;  %v17230_v52 = vld [vmem:[#allocation6 + $0x30] sm:$0xf] }
0x11ed   : > { %16916 = vmatpush1.bf16.msra.mxu1 %v23771_v57  ;;  %v23825_v57 = vld [vmem:[%s30043_s15 + $0x6d0] ss:$8 sps:$4 sm:$0xff]  }
0x11ee   : > { %16917 = vmatprep.subr.bf16.mxu1 %v23776_v25  ;;  %v23830_v25 = vld [vmem:[%s30043_s15 + $0x6e4] ss:$8 sps:$4 sm:$0xff]   ;;  %v16988_v36 = vrot.slane %v16986_v5, 1  ;;  %v23881_v5 = vld [vmem:[%s30043_s15 + $0x7f4] ss:$8 sps:$4 sm:$0xff]  }
0x11f1   : > { %16918 = vmatpush1.bf16.msra.mxu1 %v23774_v29  ;;  %v16994_v29 = vshrl.u32 %v16950_v10, 16 }
0x11f2   : > { %16919 = vmatprep.subr.bf16.mxu1 %v23779_v34  ;;  %v16997_v34 = vshll.u32 %v16950_v10, 16 }
0x11f5   : > { %16920 = vmatpush1.bf16.msra.mxu1 %v23777_v16  ;;  %v16991_v16 = vrot.slane %v16989_v46, 2  ;;  %v17228_v46 = vld [vmem:[#allocation6 + $0x10] sm:$0xf0] }
0x11f6   : > { %16921 = vmatprep.subr.bf16.mxu1 %v23782_v9  ;;  %v17229_v9 = vld [vmem:[#allocation6 + $0x18] sm:$0xf0] }
0x11f7   : > { %v17233_v23 = vpack.c.bf16 %v29190_v13, %v17229_v9  ;;  %v16992_v2 = vor.u32 %v16991_v16, %v16988_v36  ;;  %v23834_v13 = vld [vmem:[%s30043_s15 + $0x700] ss:$8 sps:$4 sm:$0xff]   ;;  %v23879_v9 = vld [vmem:[%s30043_s15 + $0x7f0] ss:$8 sps:$4 sm:$0xff]  }
0x11f9   : > { %16922 = vmatpush1.bf16.msra.mxu1 %v23780_v42  ;;  %v16996_v42 = vrot.slane %v16994_v29, 1  ;;  %v17276_v54 = vrot.slane %v17233_v23, 2  ;;  %v23884_v23 = vld [vmem:[%s30043_s15 + $0x804] ss:$8 sps:$4 sm:$0xff]  }
0x11fa   : > { %16923 = vmatprep.subr.bf16.mxu1 %v23785_v50  ;;  %v16999_v50 = vrot.slane %v16997_v34, 2  ;;  %v29908_v34 = vld [vmem:[#allocation6 + $0x20] sm:$0xff] }
0x11fb   : > { %v17278_v58 = vsel %vm894_vm1, %v17276_v54, %v17277_v53  ;;  %v17232_v59 = vpack.c.bf16 %v29908_v34, %v17228_v46  ;;  %v23887_v53 = vld [vmem:[%s30043_s15 + $0x814] ss:$8 sps:$4 sm:$0xff]  }
0x11fd   : > { %16924 = vmatpush1.bf16.msra.mxu1 %v23783_v48  ;;  %v17000_v48 = vor.u32 %v16999_v50, %v16996_v42  ;;  %v17273_v42 = vrot.slane %v17232_v59, 2  ;;  %v15197_v59 = vld [vmem:[%s30044_s16] sm:$0x3] }
0x11fe   : > { %17181 = vmatprep.subr.bf16.mxu1 %v23788_v14  ;;  %v23839_v14 = vld [vmem:[%s30043_s15 + $0x714] ss:$8 sps:$4 sm:$0xff]  }
0x11ff   : > { %v17001_v1 = vsel %vm10110_vm5, %v16992_v2, %v17000_v48  ;;  %v23882_v2 = vld [vmem:[%s30043_s15 + $0x800] ss:$8 sps:$4 sm:$0xff]  }
0x1200   : > { %16926 = vmatmul.mubr.bf16.vlgmr.msra.gmra.mrb[36].mxu1 %v29229_v63  ;;  %v23797_v63 = vld [vmem:[%s30043_s15 + $0x634] ss:$8 sps:$4 sm:$0xff]  }
0x1201   : > { %17182 = vmatpush1.bf16.msra.mxu1 %v23786_v35  ;;  %17213 = vmatprep.mubr.bf16.mxu1 %v17018_v19  ;;  %v23842_v35 = vld [vmem:[%s30043_s15 + $0x724] ss:$8 sps:$4 sm:$0xff]   ;;  %v23843_v19 = vld [vmem:[%s30043_s15 + $0x730] ss:$8 sps:$4 sm:$0xff]  }
0x1202   : > { %17183 = vmatprep.subr.bf16.mxu1 %v23791_v28  ;;  %v23845_v28 = vld [vmem:[%s30043_s15 + $0x734] ss:$8 sps:$4 sm:$0xff]  }
0x1205   : > { %17184 = vmatpush1.bf16.msra.mxu1 %v23789_v8  ;;  %v23848_v8 = vld [vmem:[%s30043_s15 + $0x744] ss:$8 sps:$4 sm:$0xff]  }
0x1206   : > { %17185 = vmatprep.subr.bf16.mxu1 %v23794_v32  ;;  %v23846_v32 = vld [vmem:[%s30043_s15 + $0x740] ss:$8 sps:$4 sm:$0xff]  }
0x1209   : > { %17186 = vmatpush1.bf16.msra.mxu1 %v23792_v6  ;;  %v23851_v6 = vld [vmem:[%s30043_s15 + $0x754] ss:$8 sps:$4 sm:$0xff]  }
0x120a   : > { %17187 = vmatprep.subr.bf16.mxu1 %v23797_v63  ;;  %v23849_v63 = vld [vmem:[%s30043_s15 + $0x750] ss:$8 sps:$4 sm:$0xff]  }
0x120d   : > { %17188 = vmatpush1.bf16.msra.mxu1 %v23795_v11  ;;  %v23854_v11 = vld [vmem:[%s30043_s15 + $0x764] ss:$8 sps:$4 sm:$0xff]  }
0x120e   : > { %17189 = vmatprep.subr.bf16.mxu1 %v23800_v49  ;;  %v23852_v49 = vld [vmem:[%s30043_s15 + $0x760] ss:$8 sps:$4 sm:$0xff]  }
0x1211   : > { %17190 = vmatpush1.bf16.msra.mxu1 %v23798_v43  ;;  %v23857_v43 = vld [vmem:[%s30043_s15 + $0x774] ss:$8 sps:$4 sm:$0xff]  }
0x1212   : > { %17191 = vmatprep.subr.bf16.mxu1 %v23803_v37  ;;  %v23855_v37 = vld [vmem:[%s30043_s15 + $0x770] ss:$8 sps:$4 sm:$0xff]  }
0x1215   : > { %17192 = vmatpush1.bf16.msra.mxu1 %v23801_v41  ;;  %v23860_v41 = vld [vmem:[%s30043_s15 + $0x784] ss:$8 sps:$4 sm:$0xff]  }
0x1216   : > { %17193 = vmatprep.subr.bf16.mxu1 %v23806_v38  ;;  %v23858_v38 = vld [vmem:[%s30043_s15 + $0x780] ss:$8 sps:$4 sm:$0xff]  }
0x1219   : > { %17194 = vmatpush1.bf16.msra.mxu1 %v23804_v17  ;;  %v23863_v17 = vld [vmem:[%s30043_s15 + $0x794] ss:$8 sps:$4 sm:$0xff]  }
0x121a   : > { %17195 = vmatprep.subr.bf16.mxu1 %v23809_v0  ;;  %v23861_v0 = vld [vmem:[%s30043_s15 + $0x790] ss:$8 sps:$4 sm:$0xff]  }
0x121d   : > { %17196 = vmatpush1.bf16.msra.mxu1 %v23807_v4  ;;  %v23866_v4 = vld [vmem:[%s30043_s15 + $0x7a4] ss:$8 sps:$4 sm:$0xff]  }
0x121e   : > { %17197 = vmatprep.subr.bf16.mxu1 %v23812_v33  ;;  %v23864_v33 = vld [vmem:[%s30043_s15 + $0x7a0] ss:$8 sps:$4 sm:$0xff]  }
0x1221   : > { %17198 = vmatpush1.bf16.msra.mxu1 %v23810_v62  ;;  %v23869_v62 = vld [vmem:[%s30043_s15 + $0x7b4] ss:$8 sps:$4 sm:$0xff]  }
0x1222   : > { %17199 = vmatprep.subr.bf16.mxu1 %v23815_v20  ;;  %v23867_v20 = vld [vmem:[%s30043_s15 + $0x7b0] ss:$8 sps:$4 sm:$0xff]  }
0x1225   : > { %17200 = vmatpush1.bf16.msra.mxu1 %v23813_v44  ;;  %v23872_v44 = vld [vmem:[%s30043_s15 + $0x7c4] ss:$8 sps:$4 sm:$0xff]  }
0x1226   : > { %17201 = vmatprep.subr.bf16.mxu1 %v23818_v60  ;;  %v17489_v60 = vld [vmem:[#allocation6 + $0x18] sm:$0xe0] }
0x1229   : > { %17202 = vmatpush1.bf16.msra.mxu1 %v23816_v7  ;;  %v17491_v7 = vld [vmem:[#allocation6 + $0x38] sm:$0x1f] }
0x122a   : > { %17203 = vmatprep.subr.bf16.mxu1 %v23821_v56  ;;  %v23935_v56 = vld [vmem:[#allocation6 + $0x28] sm:$0xff]  ;;  %v17495_v15 = vpack.c.bf16 %v17491_v7, %v17491_v7 }
0x122d   : > { %17204 = vmatpush1.bf16.msra.mxu1 %v23819_v51  ;;  %v17493_v51 = vpack.c.bf16 %v23935_v56, %v17489_v60  ;;  %v23918_v60 = vld [vmem:[%s30043_s15 + $0x8c0] ss:$8 sps:$4 sm:$0xff]   ;;  %v23923_v56 = vld [vmem:[%s30043_s15 + $0x8d4] ss:$8 sps:$4 sm:$0xff]  }
0x122e   : > { %17205 = vmatprep.subr.bf16.mxu1 %v23824_v27  ;;  %v23870_v27 = vld [vmem:[%s30043_s15 + $0x7c0] ss:$8 sps:$4 sm:$0xff]  }
0x122f   : > { %v17497_v47 = vmul.bf16 %v17493_v51, %v29286_v21 }
0x1231   : > { %17206 = vmatpush1.bf16.msra.mxu1 %v23822_v24  ;;  %v23873_v24 = vld [vmem:[%s30043_s15 + $0x7d0] ss:$8 sps:$4 sm:$0xff]   ;;  %v17554_v10 = vshll.u32 %v17497_v47, 16 }
0x1232   : > { %17207 = vmatprep.subr.bf16.mxu1 %v23827_v40  ;;  %v17499_v40 = vmul.bf16 %v17495_v15, %v29286_v21  ;;  %v23926_v15 = vld [vmem:[%s30043_s15 + $0x8e4] ss:$8 sps:$4 sm:$0xff]  }
0x1233   : > { %v17556_v16 = vrot.slane %v17554_v10, 3 }
0x1234   : > { %v17562_v29 = vshll.u32 %v17499_v40, 16 }
0x1235   : > { %17208 = vmatpush1.bf16.msra.mxu1 %v23825_v57  ;;  %v17551_v57 = vshrl.u32 %v17497_v47, 16 }
0x1236   : > { %17209 = vmatprep.subr.bf16.mxu1 %v23830_v25  ;;  %v23876_v25 = vld [vmem:[%s30043_s15 + $0x7e0] ss:$8 sps:$4 sm:$0xff]  }
0x1237   : > { %v17553_v36 = vrot.slane %v17551_v57, 2  ;;  %v23929_v57 = vld [vmem:[%s30043_s15 + $0x8f4] ss:$8 sps:$4 sm:$0xff]  }
0x1239   : > { %17210 = vmatpush1.bf16.msra.mxu1 %v23828_v3  ;;  %v17559_v3 = vshrl.u32 %v17499_v40, 16 }
0x123a   : > { %17211 = vmatprep.subr.bf16.mxu1 %v23833_v45  ;;  %v17234_v45 = vpack.c.bf16 %v17230_v52, %v17230_v52 }
0x123b   : > { %v17561_v30 = vrot.slane %v17559_v3, 2 }
0x123c   : > { %v17274_v50 = vrot.slane %v17234_v45, 2  ;;  %v15202_v45 = vrot.slane %v15197_v59, %v27133_v55 }
0x123d   : > { %17212 = vmatpush1.bf16.msra.mxu1 %v23831_v31  ;;  %v17564_v31 = vrot.slane %v17562_v29, 3 }
0x123e   : > { %17441 = vmatprep.subr.bf16.mxu1 %v23836_v12  ;;  %v17557_v12 = vor.u32 %v17556_v16, %v17553_v36  ;;  %v17275_v48 = vsel %vm894_vm1, %v17273_v42, %v17274_v50  ;;  %v15206_v36 = vrot.slane %v15197_v59, %v27139_v39 }
0x123f   : > { %v17565_v54 = vor.u32 %v17564_v31, %v17561_v30 }
0x1240   : > { %17214 = vmatmul.mubr.bf16.vlgmr.msra.gmra.mrb[36].mxu1 %v17001_v1  ;;  %v23890_v1 = vld [vmem:[%s30043_s15 + $0x824] ss:$8 sps:$4 sm:$0xff]  }
0x1241   : > { %17442 = vmatpush1.bf16.msra.mxu1 %v23834_v13  ;;  %17473 = vmatprep.mubr.bf16.mxu1 %v17278_v58  ;;  %v17566_v13 = vsel %vm10696_vm8, %v17557_v12, %v17565_v54  ;;  %v23888_v58 = vld [vmem:[%s30043_s15 + $0x820] ss:$8 sps:$4 sm:$0xff]  }
0x1242   : > { %17443 = vmatprep.subr.bf16.mxu1 %v23839_v14  ;;  %v23885_v14 = vld [vmem:[%s30043_s15 + $0x810] ss:$8 sps:$4 sm:$0xff]  }
0x1245   : > { %17444 = vmatpush1.bf16.msra.mxu1 %v23837_v61  ;;  %v23893_v61 = vld [vmem:[%s30043_s15 + $0x834] ss:$8 sps:$4 sm:$0xff]  }
0x1246   : > { %17445 = vmatprep.subr.bf16.mxu1 %v23842_v35  ;;  %v23891_v35 = vld [vmem:[%s30043_s15 + $0x830] ss:$8 sps:$4 sm:$0xff]  }
0x1249   : > { %17446 = vmatpush1.bf16.msra.mxu1 %v23840_v26  ;;  %v23896_v26 = vld [vmem:[%s30043_s15 + $0x844] ss:$8 sps:$4 sm:$0xff]  }
0x124a   : > { %17447 = vmatprep.subr.bf16.mxu1 %v23845_v28  ;;  %v23894_v28 = vld [vmem:[%s30043_s15 + $0x840] ss:$8 sps:$4 sm:$0xff]  }
0x124d   : > { %17448 = vmatpush1.bf16.msra.mxu1 %v23843_v19  ;;  %v23899_v19 = vld [vmem:[%s30043_s15 + $0x854] ss:$8 sps:$4 sm:$0xff]  }
0x124e   : > { %17449 = vmatprep.subr.bf16.mxu1 %v23848_v8  ;;  %v23897_v8 = vld [vmem:[%s30043_s15 + $0x850] ss:$8 sps:$4 sm:$0xff]  }
0x1251   : > { %17450 = vmatpush1.bf16.msra.mxu1 %v23846_v32  ;;  %v23902_v32 = vld [vmem:[%s30043_s15 + $0x864] ss:$8 sps:$4 sm:$0xff]  }
0x1252   : > { %17451 = vmatprep.subr.bf16.mxu1 %v23851_v6  ;;  %v23900_v6 = vld [vmem:[%s30043_s15 + $0x860] ss:$8 sps:$4 sm:$0xff]  }
0x1255   : > { %17452 = vmatpush1.bf16.msra.mxu1 %v23849_v63  ;;  %v23905_v63 = vld [vmem:[%s30043_s15 + $0x874] ss:$8 sps:$4 sm:$0xff]  }
0x1256   : > { %17453 = vmatprep.subr.bf16.mxu1 %v23854_v11  ;;  %v23903_v11 = vld [vmem:[%s30043_s15 + $0x870] ss:$8 sps:$4 sm:$0xff]  }
0x1259   : > { %17454 = vmatpush1.bf16.msra.mxu1 %v23852_v49  ;;  %v23908_v49 = vld [vmem:[%s30043_s15 + $0x884] ss:$8 sps:$4 sm:$0xff]  }
0x125a   : > { %17455 = vmatprep.subr.bf16.mxu1 %v23857_v43  ;;  %v23906_v43 = vld [vmem:[%s30043_s15 + $0x880] ss:$8 sps:$4 sm:$0xff]  }
0x125d   : > { %17456 = vmatpush1.bf16.msra.mxu1 %v23855_v37  ;;  %v23911_v37 = vld [vmem:[%s30043_s15 + $0x894] ss:$8 sps:$4 sm:$0xff]  }
0x125e   : > { %17457 = vmatprep.subr.bf16.mxu1 %v23860_v41  ;;  %v23909_v41 = vld [vmem:[%s30043_s15 + $0x890] ss:$8 sps:$4 sm:$0xff]  }
0x1261   : > { %17458 = vmatpush1.bf16.msra.mxu1 %v23858_v38  ;;  %v23914_v38 = vld [vmem:[%s30043_s15 + $0x8a4] ss:$8 sps:$4 sm:$0xff]  }
0x1262   : > { %17459 = vmatprep.subr.bf16.mxu1 %v23863_v17  ;;  %v23912_v17 = vld [vmem:[%s30043_s15 + $0x8a0] ss:$8 sps:$4 sm:$0xff]  }
0x1265   : > { %17460 = vmatpush1.bf16.msra.mxu1 %v23861_v0  ;;  %v23917_v0 = vld [vmem:[%s30043_s15 + $0x8b4] ss:$8 sps:$4 sm:$0xff]  }
0x1266   : > { %17461 = vmatprep.subr.bf16.mxu1 %v23866_v4  ;;  %v23915_v4 = vld [vmem:[%s30043_s15 + $0x8b0] ss:$8 sps:$4 sm:$0xff]  }
0x1269   : > { %17462 = vmatpush1.bf16.msra.mxu1 %v23864_v33  ;;  %v23920_v33 = vld [vmem:[%s30043_s15 + $0x8c4] ss:$8 sps:$4 sm:$0xff]  }
0x126a   : > { %17463 = vmatprep.subr.bf16.mxu1 %v23869_v62  ;;  %v17488_v62 = vld [vmem:[#allocation6 + $0x10] sm:$0xe0] }
0x126d   : > { %17464 = vmatpush1.bf16.msra.mxu1 %v23867_v20  ;;  %v17490_v20 = vld [vmem:[#allocation6 + $0x30] sm:$0x1f] }
0x126e   : > { %17465 = vmatprep.subr.bf16.mxu1 %v23872_v44  ;;  %v17492_v44 = vpack.c.bf16 %v29908_v34, %v17488_v62  ;;  %v17494_v7 = vpack.c.bf16 %v17490_v20, %v17490_v20 }
0x1270   : > { %v17496_v51 = vmul.bf16 %v17492_v44, %v29286_v21 }
0x1271   : > { %17466 = vmatpush1.bf16.msra.mxu1 %v23870_v27  ;;  %v23921_v27 = vld [vmem:[%s30043_s15 + $0x8d0] ss:$8 sps:$4 sm:$0xff]  }
0x1272   : > { %17467 = vmatprep.subr.bf16.mxu1 %v23875_v18  ;;  %v17498_v18 = vmul.bf16 %v17494_v7, %v29286_v21  ;;  %v17534_v47 = vshrl.u32 %v17496_v51, 16 }
0x1274   : > { %v17542_v40 = vshrl.u32 %v17498_v18, 16  ;;  %v17545_v52 = vshll.u32 %v17498_v18, 16  ;;  %v17536_v21 = vrot.slane %v17534_v47, 2 }
0x1275   : > { %17468 = vmatpush1.bf16.msra.mxu1 %v23873_v24  ;;  %v17537_v24 = vshll.u32 %v17496_v51, 16 }
0x1276   : > { %17469 = vmatprep.subr.bf16.mxu1 %v23878_v22  ;;  %v23924_v22 = vld [vmem:[%s30043_s15 + $0x8e0] ss:$8 sps:$4 sm:$0xff]   ;;  %v17547_v46 = vrot.slane %v17545_v52, 3 }
0x1277   : > { %v17539_v10 = vrot.slane %v17537_v24, 3 }
0x1279   : > { %17470 = vmatpush1.bf16.msra.mxu1 %v23876_v25  ;;  %v23927_v25 = vld [vmem:[%s30043_s15 + $0x8f0] ss:$8 sps:$4 sm:$0xff]   ;;  %v17540_v3 = vor.u32 %v17539_v10, %v17536_v21 }
0x127a   : > { %17471 = vmatprep.subr.bf16.mxu1 %v23881_v5  ;;  %v17544_v5 = vrot.slane %v17542_v40, 2 }
0x127c   : > { %v17548_v29 = vor.u32 %v17547_v46, %v17544_v5 }
0x127d   : > { %17472 = vmatpush1.bf16.msra.mxu1 %v23879_v9 }
0x127e   : > { %17729 = vmatprep.subr.bf16.mxu1 %v23884_v23  ;;  %v17549_v34 = vsel %vm10696_vm8, %v17540_v3, %v17548_v29 }
0x1280   : > { %17474 = vmatmul.mubr.bf16.vlgmr.msra.gmra.mrb[36].mxu1 %v17275_v48 }
0x1281   : > { %17730 = vmatpush1.bf16.msra.mxu1 %v23882_v2  ;;  %17761 = vmatprep.mubr.bf16.mxu1 %v17566_v13 }
0x1282   : > { %17731 = vmatprep.subr.bf16.mxu1 %v23887_v53 }
0x1285   : > { %17732 = vmatpush1.bf16.msra.mxu1 %v23885_v14 }
0x1286   : > { %17733 = vmatprep.subr.bf16.mxu1 %v23890_v1 }
0x1289   : > { %17734 = vmatpush1.bf16.msra.mxu1 %v23888_v58 }
0x128a   : > { %17735 = vmatprep.subr.bf16.mxu1 %v23893_v61 }
0x128d   : > { %17736 = vmatpush1.bf16.msra.mxu1 %v23891_v35 }
0x128e   : > { %17737 = vmatprep.subr.bf16.mxu1 %v23896_v26 }
0x1291   : > { %17738 = vmatpush1.bf16.msra.mxu1 %v23894_v28 }
0x1292   : > { %17739 = vmatprep.subr.bf16.mxu1 %v23899_v19 }
0x1295   : > { %17740 = vmatpush1.bf16.msra.mxu1 %v23897_v8 }
0x1296   : > { %17741 = vmatprep.subr.bf16.mxu1 %v23902_v32 }
0x1299   : > { %17742 = vmatpush1.bf16.msra.mxu1 %v23900_v6 }
0x129a   : > { %17743 = vmatprep.subr.bf16.mxu1 %v23905_v63 }
0x129d   : > { %17744 = vmatpush1.bf16.msra.mxu1 %v23903_v11 }
0x129e   : > { %17745 = vmatprep.subr.bf16.mxu1 %v23908_v49 }
0x12a1   : > { %17746 = vmatpush1.bf16.msra.mxu1 %v23906_v43 }
0x12a2   : > { %17747 = vmatprep.subr.bf16.mxu1 %v23911_v37 }
0x12a5   : > { %17748 = vmatpush1.bf16.msra.mxu1 %v23909_v41 }
0x12a6   : > { %17749 = vmatprep.subr.bf16.mxu1 %v23914_v38 }
0x12a9   : > { %17750 = vmatpush1.bf16.msra.mxu1 %v23912_v17 }
0x12aa   : > { %17751 = vmatprep.subr.bf16.mxu1 %v23917_v0 }
0x12ad   : > { %17752 = vmatpush1.bf16.msra.mxu1 %v23915_v4 }
0x12ae   : > { %17753 = vmatprep.subr.bf16.mxu1 %v23920_v33 }
0x12b1   : > { %17754 = vmatpush1.bf16.msra.mxu1 %v23918_v60 }
0x12b2   : > { %17755 = vmatprep.subr.bf16.mxu1 %v23923_v56 }
0x12b5   : > { %17756 = vmatpush1.bf16.msra.mxu1 %v23921_v27 }
0x12b6   : > { %17757 = vmatprep.subr.bf16.mxu1 %v23926_v15 }
0x12b9   : > { %17758 = vmatpush1.bf16.msra.mxu1 %v23924_v22 }
0x12ba   : > { %17759 = vmatprep.subr.bf16.mxu1 %v23929_v57 }
0x12bd   : > { %17760 = vmatpush1.bf16.msra.mxu1 %v23927_v25 }
0x12c0   : > { %17762 = vmatmul.mubr.bf16.vlgmr.msra.gmra.mrb[36].mxu1 %v17549_v34 }
0x1393   : > { %v17763_v16 = vpop.f32.mrb[36].mxu1 }
0x1394   : > { %v21723_v9 = vadd.f32 %v17763_v16, %v15202_v45  ;;  %v17765_v23 = vpop.f32.mrb[37].mxu1 }
0x1395   : > { %v21724_v30 = vadd.f32 %v17765_v23, %v15206_v36  ;;  %v17767_v31 = vpop.f32.mrb[38].mxu1 }
0x1396   : > { %v17776_v42 = vmax.f32 %v21723_v9, 0.0  ;;  %v21725_v50 = vadd.f32 %v17767_v31, %v15202_v45  ;;  %v17769_v12 = vpop.f32.mrb[39].mxu1 }
0x1397   : > { %v17777_v2 = vmax.f32 %v21724_v30, 0.0  ;;  %v21726_v54 = vadd.f32 %v17769_v12, %v15206_v36 }
0x1398   : > { %17780 = vst [vmem:[%s683_s26] sm:$0xff] %v17776_v42  ;;  %v17778_v53 = vmax.f32 %v21725_v50, 0.0 }
0x1399   : > { %17781 = vst [vmem:[%s683_s26 + $0x8] sm:$0xff] %v17777_v2  ;;  %v17779_v55 = vmax.f32 %v21726_v54, 0.0 }
0x139a   : > { %17782 = vst [vmem:[%s683_s26 + $0x10] sm:$0xff] %v17778_v53 }
0x139b   : > { %17783 = vst [vmem:[%s683_s26 + $0x18] sm:$0xff] %v17779_v55 }
0x139c PF: > { %s32_s3 = sadd.s32 1, %s23943_s3  }
0x139d   : > { %p29_p4 = scmp.ge.s32.totalorder %s32_s3, 4  }
0x139f   :  { %31 = sbr.rel (!%p29_p4) target bundleno = 8 (0x8), region = 194 }

</bundles_post_ra>
